<compile_context>
chip_gen: v6e
topology: v6e:2x2x1
jax: 0.10.0
libtpu: 0.0.40
codegen_flags: <defaults>
</compile_context>

<pallas_src>
import functools

import numpy as np
import jax
import jax.numpy as jnp
from jax.experimental import pallas as pl
from jax.experimental.pallas import tpu as pltpu


def _taf_kernel(ref_ref, nbr_ref, w1r_ref, w1n_ref, b1_ref, w2_ref, b2_ref,
                wf_ref, bf_ref, out_ref, refc1_scr, acc_scr, *, H, W, C):
    """One (batch, frame) pair: attention conv + modulation + fused 1x1 conv."""
    i = pl.program_id(1)
    HW = H * W

    def pad1(x3):
        # zero-pad [H, W, C] -> [H+2, W+2, C] (concat-based; lowers cleanly)
        zr = jnp.zeros((1, W, C), x3.dtype)
        xp = jnp.concatenate([zr, x3, zr], axis=0)
        zc = jnp.zeros((H + 2, 1, C), x3.dtype)
        return jnp.concatenate([zc, xp, zc], axis=1)

    def im2col3x3(x3):
        # [H, W, C] -> [H*W, 9*C]   (tap-major, channel-minor, matches weights)
        xp = pad1(x3)
        cols = []
        for kh in range(3):
            for kw in range(3):
                cols.append(xp[kh:kh + H, kw:kw + W, :].reshape(HW, C))
        return jnp.concatenate(cols, axis=-1)

    mxu_dt = w1n_ref.dtype

    # Reference-frame contribution to tAtt_1 and accumulator init: once per b.
    @pl.when(i == 0)
    def _():
        ref_patches = im2col3x3(ref_ref[0, 0]).astype(mxu_dt)
        refc1_scr[...] = jnp.dot(ref_patches, w1r_ref[...],
                                 preferred_element_type=jnp.float32)
        acc_scr[...] = jnp.broadcast_to(bf_ref[...], (HW, C)).astype(jnp.float32)

    nbr3 = nbr_ref[0, 0]                          # [H, W, C]
    nbr = nbr3.reshape(HW, C)                     # [HW, C]

    # att = lrelu(tAtt_1(cat[ref, nbr]))
    nbr_patches = im2col3x3(nbr3).astype(mxu_dt)  # [HW, 9C]
    a1 = (refc1_scr[...]
          + jnp.dot(nbr_patches, w1n_ref[...], preferred_element_type=jnp.float32)
          + b1_ref[...])
    a1 = jnp.maximum(a1, 0.1 * a1)                # LeakyReLU(0.1)

    # att = sigmoid(tAtt_2(att))
    a1_patches = im2col3x3(a1.reshape(H, W, C)).astype(mxu_dt)
    att = jax.nn.sigmoid(
        jnp.dot(a1_patches, w2_ref[...], preferred_element_type=jnp.float32)
        + b2_ref[...])

    # frame's slice of the 1x1 fusion conv, accumulated across frames
    weighted = (nbr * att).astype(mxu_dt)         # [HW, C]
    acc_scr[...] = acc_scr[...] + jnp.dot(weighted, wf_ref[0],
                                          preferred_element_type=jnp.float32)

    @pl.when(i == pl.num_programs(1) - 1)
    def _():
        fea = acc_scr[...]
        out_ref[0] = jnp.maximum(fea, 0.1 * fea).astype(out_ref.dtype)


def taf_forward(aligned_fea, params, *, center=2, mxu_dtype=jnp.float32):
    """aligned_fea: [B, N, C, H, W] float32.  Returns fea: [B, C, H, W]."""
    w1, b1, w2, b2, wf, bf = params
    B, N, C, H, W = aligned_fea.shape
    nf = w1.shape[0]
    assert C == nf and w1.shape[1] == 2 * nf
    HW = H * W
    KK = 9

    # channels-last
    x = jnp.transpose(aligned_fea, (0, 1, 3, 4, 2))          # [B, N, H, W, C]

    # tAtt_1 weight split by linearity of the concat input (ref || nbr).
    w1_ref_r = jnp.transpose(w1[:, :C], (2, 3, 1, 0)).reshape(KK * C, C).astype(mxu_dtype)
    w1_nbr_r = jnp.transpose(w1[:, C:], (2, 3, 1, 0)).reshape(KK * C, C).astype(mxu_dtype)
    w2_r = jnp.transpose(w2, (2, 3, 1, 0)).reshape(KK * C, C).astype(mxu_dtype)
    # fea_fusion (1x1 conv over N*C channels) as per-frame [C, C] slabs.
    wf_r = jnp.transpose(wf[:, :, 0, 0].reshape(C, N, C), (1, 2, 0)).astype(mxu_dtype)
    b1_r = b1.reshape(1, C).astype(jnp.float32)
    b2_r = b2.reshape(1, C).astype(jnp.float32)
    bf_r = bf.reshape(1, C).astype(jnp.float32)

    kernel = functools.partial(_taf_kernel, H=H, W=W, C=C)

    y_flat = pl.pallas_call(
        kernel,
        grid=(B, N),
        in_specs=[
            # reference frame (constant block index across i -> fetched once / b)
            pl.BlockSpec((1, 1, H, W, C), lambda b, i: (b, center, 0, 0, 0)),
            # neighbour frame i
            pl.BlockSpec((1, 1, H, W, C), lambda b, i: (b, i, 0, 0, 0)),
            pl.BlockSpec((KK * C, C), lambda b, i: (0, 0)),   # w1 (ref half)
            pl.BlockSpec((KK * C, C), lambda b, i: (0, 0)),   # w1 (nbr half)
            pl.BlockSpec((1, C), lambda b, i: (0, 0)),        # b1
            pl.BlockSpec((KK * C, C), lambda b, i: (0, 0)),   # w2
            pl.BlockSpec((1, C), lambda b, i: (0, 0)),        # b2
            pl.BlockSpec((1, C, C), lambda b, i: (i, 0, 0)),  # fusion weight, frame i
            pl.BlockSpec((1, C), lambda b, i: (0, 0)),        # fusion bias
        ],
        out_specs=pl.BlockSpec((1, HW, C), lambda b, i: (b, 0, 0)),
        out_shape=jax.ShapeDtypeStruct((B, HW, C), jnp.float32),
        scratch_shapes=[pltpu.VMEM((HW, C), jnp.float32),     # ref conv1 cache
                        pltpu.VMEM((HW, C), jnp.float32)],    # fused-output acc
        compiler_params=pltpu.CompilerParams(
            dimension_semantics=("parallel", "arbitrary"),
            vmem_limit_bytes=48 * 1024 * 1024),
    )(x, x, w1_ref_r, w1_nbr_r, b1_r, w2_r, b2_r, wf_r, bf_r)

    return jnp.transpose(y_flat.reshape(B, H, W, C), (0, 3, 1, 2))


def _taf_reference(x, params, center):
    """Pure-JAX reference mirroring the PyTorch forward (NCHW)."""
    w1, b1, w2, b2, wf, bf = params
    B, N, C, H, W = x.shape
    dn = ("NCHW", "OIHW", "NCHW")
    ref = x[:, center]
    outs = []
    for i in range(N):
        att_in = jnp.concatenate([ref, x[:, i]], axis=1)
        a = jax.lax.conv_general_dilated(att_in, w1, (1, 1), ((1, 1), (1, 1)),
                                         dimension_numbers=dn) + b1[None, :, None, None]
        a = jnp.where(a >= 0, a, 0.1 * a)
        a = jax.lax.conv_general_dilated(a, w2, (1, 1), ((1, 1), (1, 1)),
                                         dimension_numbers=dn) + b2[None, :, None, None]
        a = jax.nn.sigmoid(a)
        outs.append(x[:, i] * a)
    fuse_in = jnp.concatenate(outs, axis=1)                   # [B, N*C, H, W]
    f = jax.lax.conv_general_dilated(fuse_in, wf, (1, 1), ((0, 0), (0, 0)),
                                     dimension_numbers=dn) + bf[None, :, None, None]
    return jnp.where(f >= 0, f, 0.1 * f)


if __name__ == "__main__":
    B, nframes, nf, H, W = 2, 5, 8, 16, 16
    center = 2

    key = jax.random.PRNGKey(0)
    kx, k1, kb1, k2, kb2, kf, kbf = jax.random.split(key, 7)
    aligned_fea = jax.random.normal(kx, (B, nframes, nf, H, W), jnp.float32)

    w1 = 0.1 * jax.random.normal(k1, (nf, 2 * nf, 3, 3), jnp.float32)
    b1 = 0.1 * jax.random.normal(kb1, (nf,), jnp.float32)
    w2 = 0.1 * jax.random.normal(k2, (nf, nf, 3, 3), jnp.float32)
    b2 = 0.1 * jax.random.normal(kb2, (nf,), jnp.float32)
    wf = 0.1 * jax.random.normal(kf, (nf, nframes * nf, 1, 1), jnp.float32)
    bf = 0.1 * jax.random.normal(kbf, (nf,), jnp.float32)
    params = (w1, b1, w2, b2, wf, bf)

    fea = taf_forward(aligned_fea, params, center=center)
    fea = jax.block_until_ready(fea)
    assert fea.shape == (B, nf, H, W)

    ref = _taf_reference(aligned_fea, params, center)
    err = float(np.max(np.abs(np.asarray(fea) - np.asarray(ref))))
    assert np.allclose(np.asarray(fea), np.asarray(ref), atol=2e-4), err

    print("KERNEL_OK")
</pallas_src>

<mosaic_0001>
module attributes {stable_mosaic.version = 11 : i64} {
  func.func @_taf_kernel(%arg0: i32, %arg1: i32, %arg2: memref<1x1x16x16x8xf32, #tpu.memory_space<vmem>>, %arg3: memref<1x1x16x16x8xf32, #tpu.memory_space<vmem>>, %arg4: memref<72x8xf32, #tpu.memory_space<vmem>>, %arg5: memref<72x8xf32, #tpu.memory_space<vmem>>, %arg6: memref<1x8xf32, #tpu.memory_space<vmem>>, %arg7: memref<72x8xf32, #tpu.memory_space<vmem>>, %arg8: memref<1x8xf32, #tpu.memory_space<vmem>>, %arg9: memref<1x8x8xf32, #tpu.memory_space<vmem>>, %arg10: memref<1x8xf32, #tpu.memory_space<vmem>>, %arg11: memref<1x256x8xf32, #tpu.memory_space<vmem>>, %arg12: memref<256x8xf32, #tpu.memory_space<vmem>>, %arg13: memref<256x8xf32, #tpu.memory_space<vmem>>) attributes {dimension_semantics = [#tpu.dimension_semantics<parallel>, #tpu.dimension_semantics<arbitrary>], iteration_bounds = array<i64: 2, 5>, scalar_prefetch = 0 : i64, scratch_operands = 2 : i64, tpu.core_type = #tpu.core_type<tc>, window_params = [{transform_indices = @transform_0, window_bounds = array<i64: 1, 1, 16, 16, 8>}, {transform_indices = @transform_1, window_bounds = array<i64: 1, 1, 16, 16, 8>}, {pipeline_mode = #tpu.pipeline_mode<synchronous>, transform_indices = @transform_2, window_bounds = array<i64: 72, 8>}, {pipeline_mode = #tpu.pipeline_mode<synchronous>, transform_indices = @transform_3, window_bounds = array<i64: 72, 8>}, {pipeline_mode = #tpu.pipeline_mode<synchronous>, transform_indices = @transform_4, window_bounds = array<i64: 1, 8>}, {pipeline_mode = #tpu.pipeline_mode<synchronous>, transform_indices = @transform_5, window_bounds = array<i64: 72, 8>}, {pipeline_mode = #tpu.pipeline_mode<synchronous>, transform_indices = @transform_6, window_bounds = array<i64: 1, 8>}, {transform_indices = @transform_7, window_bounds = array<i64: 1, 8, 8>}, {pipeline_mode = #tpu.pipeline_mode<synchronous>, transform_indices = @transform_8, window_bounds = array<i64: 1, 8>}, {transform_indices = @transform_9, window_bounds = array<i64: 1, 256, 8>}]} {
    %c0_i32 = arith.constant 0 : i32
    %0 = arith.cmpi eq, %arg1, %c0_i32 : i32
    %1 = arith.extui %0 : i1 to i32
    %c0_i32_0 = arith.constant 0 : i32
    %2 = arith.cmpi ne, %1, %c0_i32_0 : i32
    scf.if %2 {
      %c0_31 = arith.constant 0 : index
      %c0_32 = arith.constant 0 : index
      %c0_33 = arith.constant 0 : index
      %c0_34 = arith.constant 0 : index
      %c0_35 = arith.constant 0 : index
      %83 = vector.load %arg2[%c0_31, %c0_32, %c0_33, %c0_34, %c0_35] : memref<1x1x16x16x8xf32, #tpu.memory_space<vmem>>, vector<1x1x16x16x8xf32>
      %84 = vector.shape_cast %83 : vector<1x1x16x16x8xf32> to vector<16x16x8xf32>
      %cst_36 = arith.constant 0.000000e+00 : f32
      %85 = vector.broadcast %cst_36 : f32 to vector<1x16x8xf32>
      %86 = tpu.concatenate %85, %84, %85 in 0 : vector<1x16x8xf32>, vector<16x16x8xf32>, vector<1x16x8xf32> -> vector<18x16x8xf32>
      %cst_37 = arith.constant 0.000000e+00 : f32
      %87 = vector.broadcast %cst_37 : f32 to vector<18x1x8xf32>
      %88 = tpu.concatenate %87, %86, %87 in 1 : vector<18x1x8xf32>, vector<18x16x8xf32>, vector<18x1x8xf32> -> vector<18x18x8xf32>
      %89 = vector.extract_strided_slice %88 {offsets = [0, 0, 0], sizes = [16, 16, 8], strides = [1, 1, 1]} : vector<18x18x8xf32> to vector<16x16x8xf32>
      %90 = vector.shape_cast %89 : vector<16x16x8xf32> to vector<256x8xf32>
      %91 = vector.extract_strided_slice %88 {offsets = [0, 1, 0], sizes = [16, 16, 8], strides = [1, 1, 1]} : vector<18x18x8xf32> to vector<16x16x8xf32>
      %92 = vector.shape_cast %91 : vector<16x16x8xf32> to vector<256x8xf32>
      %93 = vector.extract_strided_slice %88 {offsets = [0, 2, 0], sizes = [16, 16, 8], strides = [1, 1, 1]} : vector<18x18x8xf32> to vector<16x16x8xf32>
      %94 = vector.shape_cast %93 : vector<16x16x8xf32> to vector<256x8xf32>
      %95 = vector.extract_strided_slice %88 {offsets = [1, 0, 0], sizes = [16, 16, 8], strides = [1, 1, 1]} : vector<18x18x8xf32> to vector<16x16x8xf32>
      %96 = vector.shape_cast %95 : vector<16x16x8xf32> to vector<256x8xf32>
      %97 = vector.extract_strided_slice %88 {offsets = [1, 1, 0], sizes = [16, 16, 8], strides = [1, 1, 1]} : vector<18x18x8xf32> to vector<16x16x8xf32>
      %98 = vector.shape_cast %97 : vector<16x16x8xf32> to vector<256x8xf32>
      %99 = vector.extract_strided_slice %88 {offsets = [1, 2, 0], sizes = [16, 16, 8], strides = [1, 1, 1]} : vector<18x18x8xf32> to vector<16x16x8xf32>
      %100 = vector.shape_cast %99 : vector<16x16x8xf32> to vector<256x8xf32>
      %101 = vector.extract_strided_slice %88 {offsets = [2, 0, 0], sizes = [16, 16, 8], strides = [1, 1, 1]} : vector<18x18x8xf32> to vector<16x16x8xf32>
      %102 = vector.shape_cast %101 : vector<16x16x8xf32> to vector<256x8xf32>
      %103 = vector.extract_strided_slice %88 {offsets = [2, 1, 0], sizes = [16, 16, 8], strides = [1, 1, 1]} : vector<18x18x8xf32> to vector<16x16x8xf32>
      %104 = vector.shape_cast %103 : vector<16x16x8xf32> to vector<256x8xf32>
      %105 = vector.extract_strided_slice %88 {offsets = [2, 2, 0], sizes = [16, 16, 8], strides = [1, 1, 1]} : vector<18x18x8xf32> to vector<16x16x8xf32>
      %106 = vector.shape_cast %105 : vector<16x16x8xf32> to vector<256x8xf32>
      %107 = tpu.concatenate %90, %92, %94, %96, %98, %100, %102, %104, %106 in 1 : vector<256x8xf32>, vector<256x8xf32>, vector<256x8xf32>, vector<256x8xf32>, vector<256x8xf32>, vector<256x8xf32>, vector<256x8xf32>, vector<256x8xf32>, vector<256x8xf32> -> vector<256x72xf32>
      %c0_38 = arith.constant 0 : index
      %c0_39 = arith.constant 0 : index
      %108 = vector.load %arg4[%c0_38, %c0_39] : memref<72x8xf32, #tpu.memory_space<vmem>>, vector<72x8xf32>
      %cst_40 = arith.constant dense<0.000000e+00> : vector<256x8xf32>
      %109 = tpu.matmul %107, %108, %cst_40 {dimension_numbers = #tpu.dot_dimension_numbers<[1], [0], [0], [1], [0, 0, 1, 1], [], []>} : vector<256x72xf32>, vector<72x8xf32>, vector<256x8xf32> -> vector<256x8xf32>
      %c0_41 = arith.constant 0 : index
      %c0_42 = arith.constant 0 : index
      %110 = vector.load %arg12[%c0_41, %c0_42] : memref<256x8xf32, #tpu.memory_space<vmem>>, vector<256x8xf32>
      tpu.vector_store %arg12[%c0_41, %c0_42], %109 {strides = array<i32>} : memref<256x8xf32, #tpu.memory_space<vmem>>, vector<256x8xf32>,
      %c0_43 = arith.constant 0 : index
      %c0_44 = arith.constant 0 : index
      %111 = vector.load %arg10[%c0_43, %c0_44] : memref<1x8xf32, #tpu.memory_space<vmem>>, vector<1x8xf32>
      %112 = vector.shape_cast %111 : vector<1x8xf32> to vector<1x8xf32>
      %113 = vector.broadcast %112 : vector<1x8xf32> to vector<256x8xf32>
      %c0_45 = arith.constant 0 : index
      %c0_46 = arith.constant 0 : index
      %114 = vector.load %arg13[%c0_45, %c0_46] : memref<256x8xf32, #tpu.memory_space<vmem>>, vector<256x8xf32>
      tpu.vector_store %arg13[%c0_45, %c0_46], %113 {strides = array<i32>} : memref<256x8xf32, #tpu.memory_space<vmem>>, vector<256x8xf32>,
    } else {
    }
    %c0 = arith.constant 0 : index
    %c0_1 = arith.constant 0 : index
    %c0_2 = arith.constant 0 : index
    %c0_3 = arith.constant 0 : index
    %c0_4 = arith.constant 0 : index
    %3 = vector.load %arg3[%c0, %c0_1, %c0_2, %c0_3, %c0_4] : memref<1x1x16x16x8xf32, #tpu.memory_space<vmem>>, vector<1x1x16x16x8xf32>
    %4 = vector.shape_cast %3 : vector<1x1x16x16x8xf32> to vector<16x16x8xf32>
    %5 = vector.shape_cast %4 : vector<16x16x8xf32> to vector<256x8xf32>
    %cst = arith.constant 0.000000e+00 : f32
    %6 = vector.broadcast %cst : f32 to vector<1x16x8xf32>
    %7 = tpu.concatenate %6, %4, %6 in 0 : vector<1x16x8xf32>, vector<16x16x8xf32>, vector<1x16x8xf32> -> vector<18x16x8xf32>
    %cst_5 = arith.constant 0.000000e+00 : f32
    %8 = vector.broadcast %cst_5 : f32 to vector<18x1x8xf32>
    %9 = tpu.concatenate %8, %7, %8 in 1 : vector<18x1x8xf32>, vector<18x16x8xf32>, vector<18x1x8xf32> -> vector<18x18x8xf32>
    %10 = vector.extract_strided_slice %9 {offsets = [0, 0, 0], sizes = [16, 16, 8], strides = [1, 1, 1]} : vector<18x18x8xf32> to vector<16x16x8xf32>
    %11 = vector.shape_cast %10 : vector<16x16x8xf32> to vector<256x8xf32>
    %12 = vector.extract_strided_slice %9 {offsets = [0, 1, 0], sizes = [16, 16, 8], strides = [1, 1, 1]} : vector<18x18x8xf32> to vector<16x16x8xf32>
    %13 = vector.shape_cast %12 : vector<16x16x8xf32> to vector<256x8xf32>
    %14 = vector.extract_strided_slice %9 {offsets = [0, 2, 0], sizes = [16, 16, 8], strides = [1, 1, 1]} : vector<18x18x8xf32> to vector<16x16x8xf32>
    %15 = vector.shape_cast %14 : vector<16x16x8xf32> to vector<256x8xf32>
    %16 = vector.extract_strided_slice %9 {offsets = [1, 0, 0], sizes = [16, 16, 8], strides = [1, 1, 1]} : vector<18x18x8xf32> to vector<16x16x8xf32>
    %17 = vector.shape_cast %16 : vector<16x16x8xf32> to vector<256x8xf32>
    %18 = vector.extract_strided_slice %9 {offsets = [1, 1, 0], sizes = [16, 16, 8], strides = [1, 1, 1]} : vector<18x18x8xf32> to vector<16x16x8xf32>
    %19 = vector.shape_cast %18 : vector<16x16x8xf32> to vector<256x8xf32>
    %20 = vector.extract_strided_slice %9 {offsets = [1, 2, 0], sizes = [16, 16, 8], strides = [1, 1, 1]} : vector<18x18x8xf32> to vector<16x16x8xf32>
    %21 = vector.shape_cast %20 : vector<16x16x8xf32> to vector<256x8xf32>
    %22 = vector.extract_strided_slice %9 {offsets = [2, 0, 0], sizes = [16, 16, 8], strides = [1, 1, 1]} : vector<18x18x8xf32> to vector<16x16x8xf32>
    %23 = vector.shape_cast %22 : vector<16x16x8xf32> to vector<256x8xf32>
    %24 = vector.extract_strided_slice %9 {offsets = [2, 1, 0], sizes = [16, 16, 8], strides = [1, 1, 1]} : vector<18x18x8xf32> to vector<16x16x8xf32>
    %25 = vector.shape_cast %24 : vector<16x16x8xf32> to vector<256x8xf32>
    %26 = vector.extract_strided_slice %9 {offsets = [2, 2, 0], sizes = [16, 16, 8], strides = [1, 1, 1]} : vector<18x18x8xf32> to vector<16x16x8xf32>
    %27 = vector.shape_cast %26 : vector<16x16x8xf32> to vector<256x8xf32>
    %28 = tpu.concatenate %11, %13, %15, %17, %19, %21, %23, %25, %27 in 1 : vector<256x8xf32>, vector<256x8xf32>, vector<256x8xf32>, vector<256x8xf32>, vector<256x8xf32>, vector<256x8xf32>, vector<256x8xf32>, vector<256x8xf32>, vector<256x8xf32> -> vector<256x72xf32>
    %c0_6 = arith.constant 0 : index
    %c0_7 = arith.constant 0 : index
    %29 = vector.load %arg12[%c0_6, %c0_7] : memref<256x8xf32, #tpu.memory_space<vmem>>, vector<256x8xf32>
    %c0_8 = arith.constant 0 : index
    %c0_9 = arith.constant 0 : index
    %30 = vector.load %arg5[%c0_8, %c0_9] : memref<72x8xf32, #tpu.memory_space<vmem>>, vector<72x8xf32>
    %cst_10 = arith.constant dense<0.000000e+00> : vector<256x8xf32>
    %31 = tpu.matmul %28, %30, %cst_10 {dimension_numbers = #tpu.dot_dimension_numbers<[1], [0], [0], [1], [0, 0, 1, 1], [], []>} : vector<256x72xf32>, vector<72x8xf32>, vector<256x8xf32> -> vector<256x8xf32>
    %32 = arith.addf %29, %31 : vector<256x8xf32>
    %c0_11 = arith.constant 0 : index
    %c0_12 = arith.constant 0 : index
    %33 = vector.load %arg6[%c0_11, %c0_12] : memref<1x8xf32, #tpu.memory_space<vmem>>, vector<1x8xf32>
    %34 = vector.broadcast %33 : vector<1x8xf32> to vector<256x8xf32>
    %35 = arith.addf %32, %34 : vector<256x8xf32>
    %cst_13 = arith.constant 1.000000e-01 : f32
    %36 = vector.broadcast %cst_13 : f32 to vector<256x8xf32>
    %37 = arith.mulf %36, %35 : vector<256x8xf32>
    %38 = arith.maximumf %35, %37 : vector<256x8xf32>
    %39 = vector.shape_cast %38 : vector<256x8xf32> to vector<16x16x8xf32>
    %cst_14 = arith.constant 0.000000e+00 : f32
    %40 = vector.broadcast %cst_14 : f32 to vector<1x16x8xf32>
    %41 = tpu.concatenate %40, %39, %40 in 0 : vector<1x16x8xf32>, vector<16x16x8xf32>, vector<1x16x8xf32> -> vector<18x16x8xf32>
    %cst_15 = arith.constant 0.000000e+00 : f32
    %42 = vector.broadcast %cst_15 : f32 to vector<18x1x8xf32>
    %43 = tpu.concatenate %42, %41, %42 in 1 : vector<18x1x8xf32>, vector<18x16x8xf32>, vector<18x1x8xf32> -> vector<18x18x8xf32>
    %44 = vector.extract_strided_slice %43 {offsets = [0, 0, 0], sizes = [16, 16, 8], strides = [1, 1, 1]} : vector<18x18x8xf32> to vector<16x16x8xf32>
    %45 = vector.shape_cast %44 : vector<16x16x8xf32> to vector<256x8xf32>
    %46 = vector.extract_strided_slice %43 {offsets = [0, 1, 0], sizes = [16, 16, 8], strides = [1, 1, 1]} : vector<18x18x8xf32> to vector<16x16x8xf32>
    %47 = vector.shape_cast %46 : vector<16x16x8xf32> to vector<256x8xf32>
    %48 = vector.extract_strided_slice %43 {offsets = [0, 2, 0], sizes = [16, 16, 8], strides = [1, 1, 1]} : vector<18x18x8xf32> to vector<16x16x8xf32>
    %49 = vector.shape_cast %48 : vector<16x16x8xf32> to vector<256x8xf32>
    %50 = vector.extract_strided_slice %43 {offsets = [1, 0, 0], sizes = [16, 16, 8], strides = [1, 1, 1]} : vector<18x18x8xf32> to vector<16x16x8xf32>
    %51 = vector.shape_cast %50 : vector<16x16x8xf32> to vector<256x8xf32>
    %52 = vector.extract_strided_slice %43 {offsets = [1, 1, 0], sizes = [16, 16, 8], strides = [1, 1, 1]} : vector<18x18x8xf32> to vector<16x16x8xf32>
    %53 = vector.shape_cast %52 : vector<16x16x8xf32> to vector<256x8xf32>
    %54 = vector.extract_strided_slice %43 {offsets = [1, 2, 0], sizes = [16, 16, 8], strides = [1, 1, 1]} : vector<18x18x8xf32> to vector<16x16x8xf32>
    %55 = vector.shape_cast %54 : vector<16x16x8xf32> to vector<256x8xf32>
    %56 = vector.extract_strided_slice %43 {offsets = [2, 0, 0], sizes = [16, 16, 8], strides = [1, 1, 1]} : vector<18x18x8xf32> to vector<16x16x8xf32>
    %57 = vector.shape_cast %56 : vector<16x16x8xf32> to vector<256x8xf32>
    %58 = vector.extract_strided_slice %43 {offsets = [2, 1, 0], sizes = [16, 16, 8], strides = [1, 1, 1]} : vector<18x18x8xf32> to vector<16x16x8xf32>
    %59 = vector.shape_cast %58 : vector<16x16x8xf32> to vector<256x8xf32>
    %60 = vector.extract_strided_slice %43 {offsets = [2, 2, 0], sizes = [16, 16, 8], strides = [1, 1, 1]} : vector<18x18x8xf32> to vector<16x16x8xf32>
    %61 = vector.shape_cast %60 : vector<16x16x8xf32> to vector<256x8xf32>
    %62 = tpu.concatenate %45, %47, %49, %51, %53, %55, %57, %59, %61 in 1 : vector<256x8xf32>, vector<256x8xf32>, vector<256x8xf32>, vector<256x8xf32>, vector<256x8xf32>, vector<256x8xf32>, vector<256x8xf32>, vector<256x8xf32>, vector<256x8xf32> -> vector<256x72xf32>
    %c0_16 = arith.constant 0 : index
    %c0_17 = arith.constant 0 : index
    %63 = vector.load %arg7[%c0_16, %c0_17] : memref<72x8xf32, #tpu.memory_space<vmem>>, vector<72x8xf32>
    %cst_18 = arith.constant dense<0.000000e+00> : vector<256x8xf32>
    %64 = tpu.matmul %62, %63, %cst_18 {dimension_numbers = #tpu.dot_dimension_numbers<[1], [0], [0], [1], [0, 0, 1, 1], [], []>} : vector<256x72xf32>, vector<72x8xf32>, vector<256x8xf32> -> vector<256x8xf32>
    %c0_19 = arith.constant 0 : index
    %c0_20 = arith.constant 0 : index
    %65 = vector.load %arg8[%c0_19, %c0_20] : memref<1x8xf32, #tpu.memory_space<vmem>>, vector<1x8xf32>
    %66 = vector.broadcast %65 : vector<1x8xf32> to vector<256x8xf32>
    %67 = arith.addf %64, %66 : vector<256x8xf32>
    %68 = arith.negf %67 : vector<256x8xf32>
    %69 = math.exp %68 : vector<256x8xf32>
    %cst_21 = arith.constant 1.000000e+00 : f32
    %70 = vector.broadcast %cst_21 : f32 to vector<256x8xf32>
    %71 = arith.addf %70, %69 : vector<256x8xf32>
    %72 = arith.divf %70, %71 : vector<256x8xf32>
    %73 = arith.mulf %5, %72 : vector<256x8xf32>
    %c0_22 = arith.constant 0 : index
    %c0_23 = arith.constant 0 : index
    %74 = vector.load %arg13[%c0_22, %c0_23] : memref<256x8xf32, #tpu.memory_space<vmem>>, vector<256x8xf32>
    %c0_24 = arith.constant 0 : index
    %c0_25 = arith.constant 0 : index
    %c0_26 = arith.constant 0 : index
    %75 = vector.load %arg9[%c0_24, %c0_25, %c0_26] : memref<1x8x8xf32, #tpu.memory_space<vmem>>, vector<1x8x8xf32>
    %76 = vector.shape_cast %75 : vector<1x8x8xf32> to vector<8x8xf32>
    %cst_27 = arith.constant dense<0.000000e+00> : vector<256x8xf32>
    %77 = tpu.matmul %73, %76, %cst_27 {dimension_numbers = #tpu.dot_dimension_numbers<[1], [0], [0], [1], [0, 0, 1, 1], [], []>} : vector<256x8xf32>, vector<8x8xf32>, vector<256x8xf32> -> vector<256x8xf32>
    %78 = arith.addf %74, %77 : vector<256x8xf32>
    %c0_28 = arith.constant 0 : index
    %c0_29 = arith.constant 0 : index
    %79 = vector.load %arg13[%c0_28, %c0_29] : memref<256x8xf32, #tpu.memory_space<vmem>>, vector<256x8xf32>
    tpu.vector_store %arg13[%c0_28, %c0_29], %78 {strides = array<i32>} : memref<256x8xf32, #tpu.memory_space<vmem>>, vector<256x8xf32>,
    %c4_i32 = arith.constant 4 : i32
    %80 = arith.cmpi eq, %arg1, %c4_i32 : i32
    %81 = arith.extui %80 : i1 to i32
    %c0_i32_30 = arith.constant 0 : i32
    %82 = arith.cmpi ne, %81, %c0_i32_30 : i32
    scf.if %82 {
      %c0_31 = arith.constant 0 : index
      %c0_32 = arith.constant 0 : index
      %83 = vector.load %arg13[%c0_31, %c0_32] : memref<256x8xf32, #tpu.memory_space<vmem>>, vector<256x8xf32>
      %cst_33 = arith.constant 1.000000e-01 : f32
      %84 = vector.broadcast %cst_33 : f32 to vector<256x8xf32>
      %85 = arith.mulf %84, %83 : vector<256x8xf32>
      %86 = arith.maximumf %83, %85 : vector<256x8xf32>
      %c0_34 = arith.constant 0 : index
      %c0_35 = arith.constant 0 : index
      %c0_36 = arith.constant 0 : index
      %87 = vector.load %arg11[%c0_34, %c0_35, %c0_36] : memref<1x256x8xf32, #tpu.memory_space<vmem>>, vector<1x256x8xf32>
      %88 = vector.shape_cast %87 : vector<1x256x8xf32> to vector<256x8xf32>
      %89 = vector.shape_cast %86 : vector<256x8xf32> to vector<1x256x8xf32>
      tpu.vector_store %arg11[%c0_34, %c0_35, %c0_36], %89 {strides = array<i32>} : memref<1x256x8xf32, #tpu.memory_space<vmem>>, vector<1x256x8xf32>,
    } else {
    }
    return
  }
  func.func @transform_0(%arg0: i32, %arg1: i32) -> (i32, i32, i32, i32, i32) {
    %c2_i32 = arith.constant 2 : i32
    %c0_i32 = arith.constant 0 : i32
    %c0_i32_0 = arith.constant 0 : i32
    %c0_i32_1 = arith.constant 0 : i32
    %c0_i32_2 = arith.constant 0 : i32
    return %arg0, %c2_i32, %c0_i32, %c0_i32_0, %c0_i32_1 : i32, i32, i32, i32, i32
  }
  func.func @transform_1(%arg0: i32, %arg1: i32) -> (i32, i32, i32, i32, i32) {
    %c0_i32 = arith.constant 0 : i32
    %c0_i32_0 = arith.constant 0 : i32
    %c0_i32_1 = arith.constant 0 : i32
    %c0_i32_2 = arith.constant 0 : i32
    return %arg0, %arg1, %c0_i32, %c0_i32_0, %c0_i32_1 : i32, i32, i32, i32, i32
  }
  func.func @transform_2(%arg0: i32, %arg1: i32) -> (i32, i32) {
    %c0_i32 = arith.constant 0 : i32
    %c0_i32_0 = arith.constant 0 : i32
    %c0_i32_1 = arith.constant 0 : i32
    return %c0_i32, %c0_i32_0 : i32, i32
  }
  func.func @transform_3(%arg0: i32, %arg1: i32) -> (i32, i32) {
    %c0_i32 = arith.constant 0 : i32
    %c0_i32_0 = arith.constant 0 : i32
    %c0_i32_1 = arith.constant 0 : i32
    return %c0_i32, %c0_i32_0 : i32, i32
  }
  func.func @transform_4(%arg0: i32, %arg1: i32) -> (i32, i32) {
    %c0_i32 = arith.constant 0 : i32
    %c0_i32_0 = arith.constant 0 : i32
    %c0_i32_1 = arith.constant 0 : i32
    return %c0_i32, %c0_i32_0 : i32, i32
  }
  func.func @transform_5(%arg0: i32, %arg1: i32) -> (i32, i32) {
    %c0_i32 = arith.constant 0 : i32
    %c0_i32_0 = arith.constant 0 : i32
    %c0_i32_1 = arith.constant 0 : i32
    return %c0_i32, %c0_i32_0 : i32, i32
  }
  func.func @transform_6(%arg0: i32, %arg1: i32) -> (i32, i32) {
    %c0_i32 = arith.constant 0 : i32
    %c0_i32_0 = arith.constant 0 : i32
    %c0_i32_1 = arith.constant 0 : i32
    return %c0_i32, %c0_i32_0 : i32, i32
  }
  func.func @transform_7(%arg0: i32, %arg1: i32) -> (i32, i32, i32) {
    %c0_i32 = arith.constant 0 : i32
    %c0_i32_0 = arith.constant 0 : i32
    %c0_i32_1 = arith.constant 0 : i32
    return %arg1, %c0_i32, %c0_i32_0 : i32, i32, i32
  }
  func.func @transform_8(%arg0: i32, %arg1: i32) -> (i32, i32) {
    %c0_i32 = arith.constant 0 : i32
    %c0_i32_0 = arith.constant 0 : i32
    %c0_i32_1 = arith.constant 0 : i32
    return %c0_i32, %c0_i32_0 : i32, i32
  }
  func.func @transform_9(%arg0: i32, %arg1: i32) -> (i32, i32, i32) {
    %c0_i32 = arith.constant 0 : i32
    %c0_i32_0 = arith.constant 0 : i32
    %c0_i32_1 = arith.constant 0 : i32
    return %arg0, %c0_i32, %c0_i32_0 : i32, i32, i32
  }
}

</mosaic_0001>

<bundles_post_ra>
// kernel: tpu_custom_call.1
= control target key start
LH: loop header
LB: loop body
LE: loop exit
PB: predicated region body
PF: predicated region fallthrough
CT: control target
= control target key end

     0   :  { %s7765_s30 = smov 0   ;;  %s7767_s10 = smov 0   ;;  %s12818_s0 = inlined_call_operand.vmem [shape: f32[2,5,16,16,8], index: 0, kind: input, shape index: {}]   ;;  %s12819_s1 = inlined_call_operand.vmem [shape: f32[2,5,16,16,8], index: 1, kind: input, shape index: {}]   ;;  %s12820_s2 = inlined_call_operand.vmem [shape: f32[72,8], index: 2, kind: input, shape index: {}]   ;;  %s12821_s3 = inlined_call_operand.vmem [shape: f32[72,8], index: 3, kind: input, shape index: {}]   ;;  %s12822_s4 = inlined_call_operand.vmem [shape: f32[1,8], index: 4, kind: input, shape index: {}]   ;;  %s12823_s5 = inlined_call_operand.vmem [shape: f32[72,8], index: 5, kind: input, shape index: {}]   ;;  %s12824_s6 = inlined_call_operand.vmem [shape: f32[1,8], index: 6, kind: input, shape index: {}]   ;;  %s12825_s7 = inlined_call_operand.vmem [shape: f32[5,8,8], index: 7, kind: input, shape index: {}]   ;;  %s12826_s8 = inlined_call_operand.vmem [shape: f32[1,8], index: 8, kind: input, shape index: {}]   ;;  %s12827_s9 = inlined_call_operand.vmem [shape: f32[2,256,8], index: 9, kind: output, shape index: {}]  }
   0x1   :  { %s7769_s11 = smov 0   ;;  %s7771_s12 = smov 0  }
   0x2   :  { %s7773_s13 = smov 0  }
   0x3 LB: > { %13075 = sst [smem:[#allocation4_spill]] %s7687_s11  ;;  %s28_s14 = sadd.s32 1, %s7687_s11  ;;  %s7695_s13 = sphi %s7773_s13, %s19_s13   ;;  %s7691_s12 = sphi %s7771_s12, %s13578_s12   ;;  %s7687_s11 = sphi %s7769_s11, %s13577_s11   ;;  %s7683_s10 = sphi %s7767_s10, %s13576_s10   ;;  %s7679_s30 = sphi %s7765_s30, %s13575_s30  }
   0x4   : > { %13076 = sst [smem:[#allocation5_spill]] %s7691_s12  ;;  %s31_s15 = sadd.s32 1, %s7691_s12 }
   0x5   : > { %13077 = sst [smem:[#allocation6_spill]] %s7695_s13  ;;  %p29_p0 = scmp.ge.s32.totalorder %s28_s14, 5 }
   0x6   : > { %p6738_p1 = scmp.ge.s32.totalorder %s7695_s13, 1  ;;  %p325_p2 = scmp.lt.s32.totalorder %s7695_s13, 11 }
   0x7   : > { %s13580_s14 = smov (%p29_p0, %s28_s14), 0  ;;  %s13582_s15 = smov (!%p29_p0, %s31_s15), %s7691_s12 }
   0x8   : > { %13078 = sst [smem:[#allocation7_spill]] %s13580_s14  ;;  %p326_p3 = pnand %p6738_p1, %p325_p2 }
   0x9   : > { %p33_p4 = scmp.ge.s32.totalorder %s13582_s15, 2 }
   0xa   : > { %329 = sbr.rel (%p326_p3) target bundleno = 2445 (0x98d), region = 56 }
   0xb   : > { %s13584_s15 = smov (%p33_p4, %s13582_s15), 0 }
   0xc   : > { %13079 = sst [smem:[#allocation8_spill]] %s13584_s15 }
   0xf   : > { %p375_p5 = scmp.lt.s32.totalorder %s7683_s10, 1  ;;  %p383_p6 = scmp.lt.s32.totalorder %s7679_s30, 4 }
  0x10   : > { %p6745_p7 = scmp.ne.s32.totalorder %s7679_s30, 0 }
  0x11   : > { %s13586_s10 = smov (!%p375_p5, %s7683_s10), 1 }
  0x12   : > { %s384_s16 = scalar_select %p383_p6, %s7679_s30, 4 }
  0x13   : > { %s6739_s17 = smul.u32 1280, %s13586_s10  ;;  %s6944_s18 = sshll.u32 %s13586_s10, 8 }
  0x14   : > { %s6740_s19 = sshll.u32 %s384_s16, 5  ;;  %s7385_s20 = smul.u32 160, %s13586_s10 }
  0x15   : > { %s7802_s23 = scalar_lea.vmem %s12818_s0, %s6739_s17  ;;  %s6742_s24 = sshll.u32 %s384_s16, 3 }
  0x16   : > { %s387_s25 = sadd.s32 %s7385_s20, %s6740_s19  ;;  %s7807_s28 = scalar_lea.vmem %s12825_s7, %s6742_s24 }
  0x17   : > { %s6741_s29 = sshll.u32 %s387_s25, 3  ;;  %s7812_s12 = scalar_lea.vmem %s12827_s9, %s6944_s18 }
  0x18   : > { %s7817_s13 = scalar_lea.vmem %s12819_s1, %s6741_s29  ;;  %402 = sbr.rel (%p6745_p7) target bundleno = 851 (0x353), region = 60 }
  0x1d   : > { %v6746_v0 = vld [vmem:[%s7802_s23 + $0x200] sm:$0xff]  ;;  %v6747_v1 = vld [vmem:[%s7802_s23 + $0x208] sm:$0xff]  ;;  %vm468_vm0 = vcmask 1040384   ;;  %v7697_v4 = vmov 0.0   ;;  %v6748_v6 = vld [vmem:[%s7802_s23 + $0x210] sm:$0xff]  ;;  %vm634_vm1 = vcmask 1046528  }
  0x1e   : > { %v471_v2 = vrot.slane %v6746_v0, 7  ;;  %v472_v3 = vrot.slane %v6747_v1, 7  ;;  %v7822_v5 = vrot.slane %v7697_v4, 7  ;;  %v6749_v7 = vld [vmem:[%s7802_s23 + $0x218] sm:$0xff]  ;;  %v6750_v8 = vld [vmem:[%s7802_s23 + $0x220] sm:$0xff]  ;;  %v474_v9 = vrot.slane %v6748_v6, 7 }
  0x1f   : > { %v475_v10 = vrot.slane %v6749_v7, 7  ;;  %v477_v11 = vrot.slane %v6750_v8, 7  ;;  %v6751_v20 = vld [vmem:[%s7802_s23 + $0x228] sm:$0xff]  ;;  %v6752_v28 = vld [vmem:[%s7802_s23 + $0x230] sm:$0xff]  ;;  %s7698_s11 = smov 8   ;;  %v6753_v33 = vld [vmem:[%s7802_s23 + $0x238] sm:$0xff] }
  0x20   : > { %13080 = vst [vmem:[#allocation9_spill] sm:$0xff] %v7822_v5  ;;  %v7828_v12 = vsel %vm468_vm0, %v471_v2, %v472_v3  ;;  %v7831_v13 = vsel %vm468_vm0, %v472_v3, 0.0  ;;  %v7835_v14 = vsel %vm468_vm0, 0.0, %v7822_v5  ;;  %v7839_v15 = vsel %vm468_vm0, %v7822_v5, 0.0  ;;  %v6754_v37 = vld [vmem:[%s7802_s23 + $0x240] sm:$0xff]  ;;  %v6755_v38 = vld [vmem:[%s7802_s23 + $0x248] sm:$0xff] }
  0x21   : > { %13081 = vst [vmem:[#allocation10_spill] sm:$0xff] %v7828_v12  ;;  %13082 = vst [vmem:[#allocation11_spill] sm:$0xff] %v7835_v14  ;;  %v641_v16 = vrot.slane %v7828_v12, 1  ;;  %v643_v17 = vrot.slane %v7831_v13, 1  ;;  %v635_v18 = vrot.slane %v7835_v14, 1  ;;  %v636_v19 = vrot.slane %v7822_v5, 1 }
  0x22   : > { %v638_v21 = vrot.slane %v7839_v15, 1  ;;  %v7848_v22 = vsel %vm468_vm0, %v474_v9, %v475_v10  ;;  %v7851_v23 = vsel %vm468_vm0, 0.0, %v474_v9  ;;  %v7864_v30 = vsel %vm468_vm0, 0.0, %v471_v2  ;;  %v6756_v50 = vld [vmem:[%s7802_s23 + $0x250] sm:$0xff]  ;;  %v6757_v55 = vld [vmem:[%s7802_s23 + $0x258] sm:$0xff]  ;;  %v6758_v60 = vld [vmem:[%s7802_s23 + $0x260] sm:$0xff] }
  0x23   : > { %v7854_v24 = vsel %vm634_vm1, %v641_v16, %v643_v17  ;;  %v637_v25 = vsel %vm634_vm1, %v635_v18, %v636_v19  ;;  %v645_v26 = vrot.slane %v7851_v23, 1  ;;  %v646_v27 = vrot.slane %v7848_v22, 1  ;;  %13083 = vst [vmem:[#allocation12_spill] sm:$0xff] %v7864_v30  ;;  %v6759_v0 = vld [vmem:[%s7802_s23 + $0x268] sm:$0xff]  ;;  %s7699_s14 = smov 16   ;;  %s7700_s15 = smov 24  }
  0x24   : > { %814 = vrot.lane.b32.xlu1 %v7854_v24, %s7698_s11  ;;  %v639_v29 = vsel %vm634_vm1, %v636_v19, %v638_v21  ;;  %v478_v31 = vrot.slane %v6751_v20, 7  ;;  %v7867_v32 = vsel %vm468_vm0, 0.0, %v477_v11  ;;  %v640_v36 = vrot.slane %v7864_v30, 1  ;;  %s7701_s16 = smov 32   ;;  %s7702_s17 = smov 40  }
  0x25   : > { %v7870_v34 = vpack.i.bf16 %v639_v29, %v637_v25  ;;  %v7873_v35 = vsel %vm634_vm1, %v645_v26, %v646_v27  ;;  %v650_v40 = vrot.slane %v7867_v32, 1  ;;  %v7883_v41 = vsel %vm468_vm0, %v475_v10, 0.0  ;;  %v6760_v10 = vld [vmem:[%s7802_s23 + $0x270] sm:$0xff]  ;;  %v6762_v29 = vld [vmem:[%s7802_s23 + $0x280] sm:$0xff]  ;;  %s7703_s22 = smov 48   ;;  %s7704_s10 = smov 56  }
  0x26   : > { %v7879_v39 = vsel %vm468_vm0, %v477_v11, %v478_v31  ;;  %v480_v42 = vrot.slane %v6752_v28, 7  ;;  %v7888_v43 = vsel %vm634_vm1, %v640_v36, %v641_v16  ;;  %v481_v45 = vrot.slane %v6753_v33, 7  ;;  %v6761_v11 = vld [vmem:[%s7802_s23 + $0x278] sm:$0xff]  ;;  %s7705_s21 = smov 64  }
  0x27   : > { %13084 = vst [vmem:[#allocation13_spill] sm:$0xff] %v7870_v34  ;;  %7445 = vrot.lane.b32.xlu0 %v7870_v34, %s7698_s11  ;;  %v651_v44 = vrot.slane %v7879_v39, 1  ;;  %v648_v46 = vrot.slane %v7883_v41, 1  ;;  %v483_v48 = vrot.slane %v6754_v37, 7  ;;  %v484_v49 = vrot.slane %v6755_v38, 7 }
  0x28   : > { %816 = vrot.lane.b32.xlu1 %v7873_v35, %s7698_s11  ;;  %v7895_v47 = vsel %vm468_vm0, 0.0, %v480_v42  ;;  %v7902_v52 = vsel %vm468_vm0, %v480_v42, %v481_v45  ;;  %v7906_v54 = vsel %vm468_vm0, %v478_v31, 0.0  ;;  %v486_v59 = vrot.slane %v6756_v50, 7  ;;  %v6763_v31 = vld [vmem:[%s7802_s23 + $0x288] sm:$0xff]  ;;  %v6765_v50 = vld [vmem:[%s7802_s23 + $0x298] sm:$0xff] }
  0x29   : > { %v7899_v51 = vsel %vm634_vm1, %v650_v40, %v651_v44  ;;  %v655_v53 = vrot.slane %v7895_v47, 1  ;;  %v656_v56 = vrot.slane %v7902_v52, 1  ;;  %v7911_v57 = vsel %vm468_vm0, %v483_v48, %v484_v49 }
  0x2a   : > { %13085 = vst [vmem:[#allocation14_spill] sm:$0xff] %v7899_v51  ;;  %v7914_v58 = vsel %vm468_vm0, 0.0, %v483_v48  ;;  %v7922_v61 = vsel %vm634_vm1, %v646_v27, %v648_v46  ;;  %v653_v62 = vrot.slane %v7906_v54, 1  ;;  %v487_v63 = vrot.slane %v6757_v55, 7 }
  0x2b   : > { %812 = vrot.lane.b32.xlu0 %v7888_v43, %s7698_s11  ;;  %v7927_v1 = vsel %vm634_vm1, %v655_v53, %v656_v56  ;;  %v660_v2 = vrot.slane %v7914_v58, 1  ;;  %v661_v3 = vrot.slane %v7911_v57, 1  ;;  %v7932_v4 = vsel %vm468_vm0, %v481_v45, 0.0 }
  0x2c   : > { %820 = vrot.lane.b32.xlu1 %v7899_v51, %s7698_s11  ;;  %13086 = vst [vmem:[#allocation15_spill] sm:$0xff] %v7927_v1  ;;  %v7935_v6 = vsel %vm468_vm0, %v486_v59, %v487_v63  ;;  %v7938_v7 = vsel %vm468_vm0, 0.0, %v486_v59  ;;  %v489_v8 = vrot.slane %v6758_v60, 7  ;;  %v490_v9 = vrot.slane %v6759_v0, 7 }
  0x2d   : > { %v7947_v16 = vsel %vm634_vm1, %v651_v44, %v653_v62  ;;  %v658_v17 = vrot.slane %v7932_v4, 1  ;;  %v7951_v18 = vsel %vm634_vm1, %v660_v2, %v661_v3  ;;  %v665_v19 = vrot.slane %v7938_v7, 1 }
  0x2e   : > { %13087 = vst [vmem:[#allocation16_spill] sm:$0xff] %v7951_v18  ;;  %v666_v20 = vrot.slane %v7935_v6, 1  ;;  %v7956_v21 = vsel %vm468_vm0, %v484_v49, 0.0  ;;  %v7959_v25 = vsel %vm468_vm0, %v489_v8, %v490_v9  ;;  %v7962_v26 = vsel %vm468_vm0, 0.0, %v489_v8  ;;  %v6764_v49 = vld [vmem:[%s7802_s23 + $0x290] sm:$0xff]  ;;  %v6766_v8 = vld [vmem:[%s7802_s23 + $0x2a0] sm:$0xff] }
  0x2f   : > { %818 = vrot.lane.b32.xlu0 %v7922_v61, %s7698_s11  ;;  %v492_v27 = vrot.slane %v6760_v10, 7  ;;  %v493_v28 = vrot.slane %v6761_v11, 7  ;;  %v7971_v33 = vsel %vm634_vm1, %v656_v56, %v658_v17  ;;  %v663_v36 = vrot.slane %v7956_v21, 1  ;;  %v6767_v10 = vld [vmem:[%s7802_s23 + $0x2a8] sm:$0xff] }
  0x30   : > { %824 = vrot.lane.b32.xlu1 %v7927_v1, %s7698_s11  ;;  %13088 = vst [vmem:[#allocation17_spill] sm:$0xff] %v7971_v33  ;;  %v7975_v37 = vsel %vm634_vm1, %v665_v19, %v666_v20  ;;  %v670_v38 = vrot.slane %v7962_v26, 1  ;;  %v671_v40 = vrot.slane %v7959_v25, 1  ;;  %v7980_v42 = vsel %vm468_vm0, %v487_v63, 0.0 }
  0x31   : > { %13089 = vst [vmem:[#allocation18_spill] sm:$0xff] %v7975_v37  ;;  %v7983_v44 = vsel %vm468_vm0, %v492_v27, %v493_v28  ;;  %v7986_v45 = vsel %vm468_vm0, 0.0, %v492_v27  ;;  %v495_v46 = vrot.slane %v6762_v29, 7  ;;  %v496_v48 = vrot.slane %v6763_v31, 7 }
  0x32   : > { %13090 = vst [vmem:[#allocation19_spill] sm:$0xff] %v7983_v44  ;;  %13091 = vst [vmem:[#allocation20_spill] sm:$0xff] %v7986_v45  ;;  %v7995_v53 = vsel %vm634_vm1, %v661_v3, %v663_v36  ;;  %v668_v55 = vrot.slane %v7980_v42, 1  ;;  %v7999_v56 = vsel %vm634_vm1, %v670_v38, %v671_v40  ;;  %v675_v59 = vrot.slane %v7986_v45, 1 }
  0x33   : > { %822 = vrot.lane.b32.xlu0 %v7947_v16, %s7698_s11  ;;  %13092 = vst [vmem:[#allocation21_spill] sm:$0xff] %v7995_v53  ;;  %13093 = vst [vmem:[#allocation22_spill] sm:$0xff] %v7999_v56  ;;  %v676_v60 = vrot.slane %v7983_v44, 1  ;;  %v8004_v62 = vsel %vm468_vm0, %v490_v9, 0.0  ;;  %v8007_v63 = vsel %vm468_vm0, %v495_v46, %v496_v48  ;;  %v8010_v0 = vsel %vm468_vm0, 0.0, %v495_v46  ;;  %v6768_v46 = vld [vmem:[%s7802_s23 + $0x2b0] sm:$0xff] }
  0x34   : > { %828 = vrot.lane.b32.xlu1 %v7951_v18, %s7698_s11  ;;  %13094 = vst [vmem:[#allocation23_spill] sm:$0xff] %v8007_v63  ;;  %13095 = vst [vmem:[#allocation24_spill] sm:$0xff] %v8010_v0  ;;  %v498_v2 = vrot.slane %v6764_v49, 7  ;;  %v499_v3 = vrot.slane %v6765_v50, 7  ;;  %v8019_v9 = vsel %vm634_vm1, %v666_v20, %v668_v55  ;;  %v673_v11 = vrot.slane %v8004_v62, 1  ;;  %v6769_v49 = vld [vmem:[%s7802_s23 + $0x2b8] sm:$0xff] }
  0x35   : > { %13096 = vst [vmem:[#allocation25_spill] sm:$0xff] %v8019_v9  ;;  %v8023_v17 = vsel %vm468_vm0, %v493_v28, 0.0  ;;  %v8026_v19 = vsel %vm634_vm1, %v675_v59, %v676_v60  ;;  %v680_v27 = vrot.slane %v8010_v0, 1  ;;  %v681_v29 = vrot.slane %v8007_v63, 1 }
  0x36   : > { %13097 = vst [vmem:[#allocation26_spill] sm:$0xff] %v8026_v19  ;;  %v501_v31 = vrot.slane %v6766_v8, 7  ;;  %v8031_v36 = vsel %vm468_vm0, %v498_v2, %v499_v3  ;;  %v8034_v38 = vsel %vm468_vm0, 0.0, %v498_v2  ;;  %v502_v20 = vrot.slane %v6767_v10, 7 }
  0x37   : > { %826 = vrot.lane.b32.xlu0 %v7971_v33, %s7698_s11  ;;  %v678_v28 = vrot.slane %v8023_v17, 1  ;;  %v8044_v50 = vsel %vm634_vm1, %v671_v40, %v673_v11  ;;  %v8047_v55 = vsel %vm468_vm0, %v496_v48, 0.0  ;;  %v8050_v59 = vsel %vm634_vm1, %v680_v27, %v681_v29  ;;  %v6770_v11 = vld [vmem:[%s7802_s23 + $0x2c0] sm:$0xff]  ;;  %v6771_v27 = vld [vmem:[%s7802_s23 + $0x2c8] sm:$0xff] }
  0x38   : > { %832 = vrot.lane.b32.xlu1 %v7975_v37, %s7698_s11  ;;  %13098 = vst [vmem:[#allocation27_spill] sm:$0xff] %v8044_v50  ;;  %13099 = vst [vmem:[#allocation28_spill] sm:$0xff] %v8050_v59  ;;  %v685_v2 = vrot.slane %v8034_v38, 1  ;;  %v686_v8 = vrot.slane %v8031_v36, 1  ;;  %v8055_v10 = vsel %vm468_vm0, 0.0, %v501_v31  ;;  %v8058_v34 = vsel %vm468_vm0, %v501_v31, %v502_v20 }
  0x39   : > { %v719_v40 = vrot.slane %v7839_v15, 2  ;;  %v8064_v48 = vsel %vm634_vm1, %v676_v60, %v678_v28  ;;  %v683_v31 = vrot.slane %v8047_v55, 1  ;;  %vm715_vm2 = vcmask 1045504  }
  0x3a   : > { %13100 = vst [vmem:[#allocation29_spill] sm:$0xff] %v8064_v48  ;;  %v8076_v15 = vsel %vm634_vm1, %v685_v2, %v686_v8  ;;  %v691_v60 = vrot.slane %v8058_v34, 1  ;;  %v716_v28 = vrot.slane %v7835_v14, 2  ;;  %v508_v18 = vrot.slane %v6771_v27, 7  ;;  %v6773_v2 = vld [vmem:[%s7802_s23 + $0x2d8] sm:$0xff] }
  0x3b   : > { %830 = vrot.lane.b32.xlu0 %v7995_v53, %s7698_s11  ;;  %13101 = vst [vmem:[#allocation30_spill] sm:$0xff] %v8076_v15  ;;  %v8107_v1 = vsel %vm468_vm0, %v502_v20, 0.0  ;;  %vm1576_vm3 = vcmask 64512   ;;  %vm1609_vm4 = vcmask 130048   ;;  %vm1642_vm5 = vcmask 195584  }
  0x3c   : > { %836 = vrot.lane.b32.xlu1 %v7999_v56, %s7698_s11  ;;  %v505_v56 = vrot.slane %v6769_v49, 7  ;;  %v8073_v49 = vsel %vm468_vm0, %v499_v3, 0.0  ;;  %v6772_v3 = vld [vmem:[%s7802_s23 + $0x2d0] sm:$0xff]  ;;  %v693_v20 = vrot.slane %v8107_v1, 1  ;;  %vm1675_vm6 = vcmask 261120  }
  0x3d   : > { %vm1708_vm7 = vcmask 326656   ;;  %vm1741_vm8 = vcmask 392192   ;;  %vm1807_vm9 = vcmask 523264   ;;  %vm1774_vm10 = vcmask 457728  }
  0x3e   : > { %vm1849_vm11 = vcmask 588800  }
  0x3f   : > { %834 = vrot.lane.b32.xlu0 %v8019_v9, %s7698_s11  ;;  %v507_v9 = vrot.slane %v6770_v11, 7 }
  0x40   : > { %840 = vrot.lane.b32.xlu1 %v8026_v19, %s7698_s11  ;;  %v504_v19 = vrot.slane %v6768_v46, 7  ;;  %v690_v46 = vrot.slane %v8055_v10, 1 }
  0x42   : > { %v8082_v37 = vsel %vm468_vm0, %v504_v19, %v505_v56  ;;  %v8102_v27 = vsel %vm634_vm1, %v690_v46, %v691_v60 }
  0x43   : > { %838 = vrot.lane.b32.xlu0 %v8044_v50, %s7698_s11  ;;  %v717_v50 = vrot.slane %v7822_v5, 2  ;;  %13102 = vst [vmem:[#allocation31_spill] sm:$0xff] %v8082_v37  ;;  %v8096_v5 = vsel %vm634_vm1, %v681_v29, %v683_v31  ;;  %13106 = vst [vmem:[#allocation35_spill] sm:$0xff] %v8102_v27  ;;  %v8113_v29 = vsel %vm468_vm0, 0.0, %v507_v9  ;;  %v511_v31 = vrot.slane %v6773_v2, 7 }
  0x44   : > { %844 = vrot.lane.b32.xlu1 %v8050_v59, %s7698_s11  ;;  %v8085_v59 = vsel %vm468_vm0, 0.0, %v504_v19  ;;  %13104 = vst [vmem:[#allocation33_spill] sm:$0xff] %v8096_v5  ;;  %v688_v19 = vrot.slane %v8073_v49, 1  ;;  %13108 = vst [vmem:[#allocation37_spill] sm:$0xff] %v8113_v29  ;;  %v8131_v2 = vsel %vm468_vm0, %v505_v56, 0.0 }
  0x45   : > { %13103 = vst [vmem:[#allocation32_spill] sm:$0xff] %v8085_v59  ;;  %v718_v53 = vsel %vm715_vm2, %v716_v28, %v717_v50  ;;  %v720_v14 = vsel %vm715_vm2, %v717_v50, %v719_v40  ;;  %v696_v28 = vrot.slane %v8082_v37, 1  ;;  %v8110_v50 = vsel %vm468_vm0, %v507_v9, %v508_v18 }
  0x46   : > { %v8099_v11 = vpack.i.bf16 %v720_v14, %v718_v53  ;;  %13107 = vst [vmem:[#allocation36_spill] sm:$0xff] %v8110_v50  ;;  %v510_v40 = vrot.slane %v6772_v3, 7  ;;  %v6774_v14 = vld [vmem:[%s7802_s23 + $0x2e0] sm:$0xff]  ;;  %v6775_v53 = vld [vmem:[%s7802_s23 + $0x2e8] sm:$0xff]  ;;  %v8122_v46 = vsel %vm634_vm1, %v686_v8, %v688_v19  ;;  %v700_v9 = vrot.slane %v8113_v29, 1 }
  0x47   : > { %842 = vrot.lane.b32.xlu0 %v8064_v48, %s7698_s11  ;;  %v695_v48 = vrot.slane %v8085_v59, 1  ;;  %13109 = vst [vmem:[#allocation38_spill] sm:$0xff] %v8122_v46  ;;  %v701_v3 = vrot.slane %v8110_v50, 1  ;;  %v513_v8 = vrot.slane %v6774_v14, 7  ;;  %v514_v19 = vrot.slane %v6775_v53, 7 }
  0x48   : > { %848 = vrot.lane.b32.xlu1 %v8076_v15, %s7698_s11  ;;  %13105 = vst [vmem:[#allocation34_spill] sm:$0xff] %v8099_v11  ;;  %v698_v56 = vrot.slane %v8131_v2, 1  ;;  %v8153_v14 = vsel %vm468_vm0, %v508_v18, 0.0 }
  0x49   : > { %v8126_v15 = vsel %vm634_vm1, %v695_v48, %v696_v28  ;;  %v8144_v48 = vsel %vm634_vm1, %v691_v60, %v693_v20  ;;  %v8148_v33 = vsel %vm634_vm1, %v700_v9, %v701_v3  ;;  %v8156_v53 = vsel %vm468_vm0, %v513_v8, %v514_v19 }
  0x4a   : > { %13110 = vst [vmem:[#allocation39_spill] sm:$0xff] %v8126_v15  ;;  %13113 = vst [vmem:[#allocation42_spill] sm:$0xff] %v8144_v48  ;;  %v8166_v60 = vsel %vm634_vm1, %v696_v28, %v698_v56  ;;  %v703_v20 = vrot.slane %v8153_v14, 1 }
  0x4b   : > { %846 = vrot.lane.b32.xlu0 %v8096_v5, %s7698_s11  ;;  %v8134_v5 = vsel %vm468_vm0, %v510_v40, %v511_v31  ;;  %13114 = vst [vmem:[#allocation43_spill] sm:$0xff] %v8148_v33  ;;  %13115 = vst [vmem:[#allocation44_spill] sm:$0xff] %v8156_v53 }
  0x4c   : > { %852 = vrot.lane.b32.xlu1 %v8102_v27, %s7698_s11  ;;  %13111 = vst [vmem:[#allocation40_spill] sm:$0xff] %v8134_v5  ;;  %v8137_v27 = vsel %vm468_vm0, 0.0, %v510_v40  ;;  %v706_v40 = vrot.slane %v8134_v5, 1  ;;  %13117 = vst [vmem:[#allocation46_spill] sm:$0xff] %v8166_v60  ;;  %v8182_v28 = vsel %vm634_vm1, %v701_v3, %v703_v20  ;;  %v722_v20 = vrot.slane %v7828_v12, 2 }
  0x4d   : > { %13112 = vst [vmem:[#allocation41_spill] sm:$0xff] %v8137_v27  ;;  %v705_v51 = vrot.slane %v8137_v27, 1  ;;  %13119 = vst [vmem:[#allocation48_spill] sm:$0xff] %v8182_v28 }
  0x4f   : > { %850 = vrot.lane.b32.xlu0 %v8122_v46, %s7698_s11  ;;  %v8170_v18 = vsel %vm634_vm1, %v705_v51, %v706_v40  ;;  %v711_v46 = vrot.slane %v8156_v53, 1 }
  0x50   : > { %856 = vrot.lane.b32.xlu1 %v8126_v15, %s7698_s11  ;;  %v8159_v15 = vsel %vm468_vm0, 0.0, %v513_v8  ;;  %13118 = vst [vmem:[#allocation47_spill] sm:$0xff] %v8170_v18  ;;  %v8175_v8 = vsel %vm468_vm0, %v511_v31, 0.0 }
  0x51   : > { %13116 = vst [vmem:[#allocation45_spill] sm:$0xff] %v8159_v15  ;;  %v710_v9 = vrot.slane %v8159_v15, 1  ;;  %v708_v56 = vrot.slane %v8175_v8, 1 }
  0x53   : > { %854 = vrot.lane.b32.xlu0 %v8144_v48, %s7698_s11  ;;  %v8186_v51 = vsel %vm634_vm1, %v710_v9, %v711_v46  ;;  %v8196_v31 = vsel %vm634_vm1, %v706_v40, %v708_v56  ;;  %v721_v9 = vrot.slane %v7864_v30, 2  ;;  %v727_v56 = vrot.slane %v7848_v22, 2  ;;  %v13175_v48 = vld [vmem:[#allocation16_spill] sm:$0xff] }
  0x54   : > { %860 = vrot.lane.b32.xlu1 %v8148_v33, %s7698_s11  ;;  %13120 = vst [vmem:[#allocation49_spill] sm:$0xff] %v8186_v51  ;;  %v8189_v33 = vsel %vm468_vm0, %v514_v19, 0.0  ;;  %13121 = vst [vmem:[#allocation50_spill] sm:$0xff] %v8196_v31 }
  0x55   : > { %v713_v3 = vrot.slane %v8189_v33, 1 }
  0x57   : > { %858 = vrot.lane.b32.xlu0 %v8166_v60, %s7698_s11  ;;  %v8206_v19 = vsel %vm634_vm1, %v711_v46, %v713_v3  ;;  %v726_v46 = vrot.slane %v7851_v23, 2 }
  0x58   : > { %864 = vrot.lane.b32.xlu1 %v8170_v18, %s7698_s11  ;;  %v724_v18 = vrot.slane %v7831_v13, 2  ;;  %13122 = vst [vmem:[#allocation51_spill] sm:$0xff] %v8206_v19  ;;  %v8219_v13 = vsel %vm715_vm2, %v721_v9, %v722_v20 }
  0x5a   : > { %v8210_v40 = vsel %vm715_vm2, %v722_v20, %v724_v18  ;;  %v732_v18 = vrot.slane %v7879_v39, 2  ;;  %v731_v20 = vrot.slane %v7867_v32, 2 }
  0x5b   : > { %862 = vrot.lane.b32.xlu0 %v8182_v28, %s7698_s11  ;;  %v749_v28 = vrot.slane %v7980_v42, 2 }
  0x5c   : > { %868 = vrot.lane.b32.xlu1 %v8186_v51, %s7698_s11  ;;  %v729_v51 = vrot.slane %v7883_v41, 2  ;;  %v8232_v41 = vsel %vm715_vm2, %v726_v46, %v727_v56 }
  0x5e   : > { %v8223_v3 = vsel %vm715_vm2, %v727_v56, %v729_v51  ;;  %v737_v51 = vrot.slane %v7902_v52, 2  ;;  %v736_v56 = vrot.slane %v7895_v47, 2 }
  0x5f   : > { %866 = vrot.lane.b32.xlu0 %v8196_v31, %s7698_s11  ;;  %v744_v31 = vrot.slane %v7956_v21, 2 }
  0x60   : > { %7450 = vrot.lane.b32.xlu1 %v8099_v11, %s7699_s14  ;;  %v734_v11 = vrot.slane %v7906_v54, 2  ;;  %v8245_v54 = vsel %vm715_vm2, %v731_v20, %v732_v18 }
  0x61   : > { %13124 = vst [vmem:[#allocation53_spill] sm:$0xff] %v8245_v54 }
  0x62   : > { %v8236_v9 = vsel %vm715_vm2, %v732_v18, %v734_v11  ;;  %v742_v11 = vrot.slane %v7911_v57, 2  ;;  %v741_v18 = vrot.slane %v7914_v58, 2 }
  0x63   : > { %870 = vrot.lane.b32.xlu0 %v8206_v19, %s7698_s11  ;;  %13123 = vst [vmem:[#allocation52_spill] sm:$0xff] %v8236_v9  ;;  %v739_v19 = vrot.slane %v7932_v4, 2  ;;  %v8258_v4 = vsel %vm715_vm2, %v736_v56, %v737_v51 }
  0x64   : > { %910 = vrot.lane.b32.xlu1 %v8210_v40, %s7699_s14  ;;  %13126 = vst [vmem:[#allocation55_spill] sm:$0xff] %v8258_v4  ;;  %v8262_v20 = vsel %vm715_vm2, %v742_v11, %v744_v31  ;;  %v8271_v21 = vsel %vm715_vm2, %v741_v18, %v742_v11  ;;  %v752_v31 = vrot.slane %v7959_v25, 2  ;;  %v751_v11 = vrot.slane %v7962_v26, 2 }
  0x65   : > { %v8249_v46 = vsel %vm715_vm2, %v737_v51, %v739_v19  ;;  %13127 = vst [vmem:[#allocation56_spill] sm:$0xff] %v8262_v20  ;;  %v747_v19 = vrot.slane %v7935_v6, 2  ;;  %13128 = vst [vmem:[#allocation57_spill] sm:$0xff] %v8271_v21  ;;  %v746_v51 = vrot.slane %v7938_v7, 2 }
  0x66   : > { %13125 = vst [vmem:[#allocation54_spill] sm:$0xff] %v8249_v46 }
  0x67   : > { %908 = vrot.lane.b32.xlu0 %v8219_v13, %s7699_s14  ;;  %v8275_v56 = vsel %vm715_vm2, %v747_v19, %v749_v28  ;;  %v8284_v42 = vsel %vm715_vm2, %v746_v51, %v747_v19  ;;  %v757_v28 = vrot.slane %v7983_v44, 2  ;;  %v756_v19 = vrot.slane %v7986_v45, 2 }
  0x68   : > { %914 = vrot.lane.b32.xlu1 %v8223_v3, %s7699_s14  ;;  %13129 = vst [vmem:[#allocation58_spill] sm:$0xff] %v8275_v56  ;;  %13130 = vst [vmem:[#allocation59_spill] sm:$0xff] %v8284_v42 }
  0x6b   : > { %912 = vrot.lane.b32.xlu0 %v8232_v41, %s7699_s14 }
  0x6c   : > { %918 = vrot.lane.b32.xlu1 %v8236_v9, %s7699_s14 }
  0x6f   : > { %916 = vrot.lane.b32.xlu0 %v8245_v54, %s7699_s14  ;;  %v13179_v54 = vld [vmem:[#allocation18_spill] sm:$0xff] }
  0x70   : > { %922 = vrot.lane.b32.xlu1 %v8249_v46, %s7699_s14  ;;  %v754_v46 = vrot.slane %v8004_v62, 2  ;;  %v8297_v62 = vsel %vm715_vm2, %v751_v11, %v752_v31 }
  0x71   : > { %13132 = vst [vmem:[#allocation61_spill] sm:$0xff] %v8297_v62 }
  0x72   : > { %v8288_v18 = vsel %vm715_vm2, %v752_v31, %v754_v46  ;;  %v762_v46 = vrot.slane %v8007_v63, 2  ;;  %v761_v31 = vrot.slane %v8010_v0, 2 }
  0x73   : > { %920 = vrot.lane.b32.xlu0 %v8258_v4, %s7699_s14  ;;  %13131 = vst [vmem:[#allocation60_spill] sm:$0xff] %v8288_v18 }
  0x74   : > { %926 = vrot.lane.b32.xlu1 %v8262_v20, %s7699_s14  ;;  %v759_v20 = vrot.slane %v8023_v17, 2  ;;  %v8310_v17 = vsel %vm715_vm2, %v756_v19, %v757_v28 }
  0x75   : > { %13134 = vst [vmem:[#allocation63_spill] sm:$0xff] %v8310_v17 }
  0x76   : > { %v8301_v51 = vsel %vm715_vm2, %v757_v28, %v759_v20  ;;  %v767_v20 = vrot.slane %v8031_v36, 2  ;;  %v766_v28 = vrot.slane %v8034_v38, 2 }
  0x77   : > { %924 = vrot.lane.b32.xlu0 %v8271_v21, %s7699_s14  ;;  %13133 = vst [vmem:[#allocation62_spill] sm:$0xff] %v8301_v51  ;;  %v794_v21 = vrot.slane %v8189_v33, 2 }
  0x78   : > { %930 = vrot.lane.b32.xlu1 %v8275_v56, %s7699_s14  ;;  %v764_v56 = vrot.slane %v8047_v55, 2  ;;  %v8323_v55 = vsel %vm715_vm2, %v761_v31, %v762_v46 }
  0x79   : > { %13136 = vst [vmem:[#allocation65_spill] sm:$0xff] %v8323_v55 }
  0x7a   : > { %v8314_v11 = vsel %vm715_vm2, %v762_v46, %v764_v56  ;;  %v772_v56 = vrot.slane %v8058_v34, 2  ;;  %v771_v46 = vrot.slane %v8055_v10, 2 }
  0x7b   : > { %928 = vrot.lane.b32.xlu0 %v8284_v42, %s7699_s14  ;;  %13135 = vst [vmem:[#allocation64_spill] sm:$0xff] %v8314_v11  ;;  %v789_v42 = vrot.slane %v8175_v8, 2 }
  0x7c   : > { %934 = vrot.lane.b32.xlu1 %v8288_v18, %s7699_s14  ;;  %v769_v18 = vrot.slane %v8073_v49, 2  ;;  %v8336_v49 = vsel %vm715_vm2, %v766_v28, %v767_v20 }
  0x7e   : > { %v8327_v19 = vsel %vm715_vm2, %v767_v20, %v769_v18  ;;  %v777_v18 = vrot.slane %v8082_v37, 2  ;;  %v776_v20 = vrot.slane %v8085_v59, 2 }
  0x7f   : > { %932 = vrot.lane.b32.xlu0 %v8297_v62, %s7699_s14  ;;  %v784_v62 = vrot.slane %v8153_v14, 2 }
  0x80   : > { %938 = vrot.lane.b32.xlu1 %v8301_v51, %s7699_s14  ;;  %v774_v51 = vrot.slane %v8107_v1, 2  ;;  %v8349_v1 = vsel %vm715_vm2, %v771_v46, %v772_v56 }
  0x81   : > { %13138 = vst [vmem:[#allocation67_spill] sm:$0xff] %v8349_v1 }
  0x82   : > { %v8340_v31 = vsel %vm715_vm2, %v772_v56, %v774_v51  ;;  %v782_v51 = vrot.slane %v8110_v50, 2  ;;  %v781_v56 = vrot.slane %v8113_v29, 2 }
  0x83   : > { %936 = vrot.lane.b32.xlu0 %v8310_v17, %s7699_s14  ;;  %13137 = vst [vmem:[#allocation66_spill] sm:$0xff] %v8340_v31  ;;  %v779_v17 = vrot.slane %v8131_v2, 2  ;;  %v8362_v2 = vsel %vm715_vm2, %v776_v20, %v777_v18 }
  0x84   : > { %942 = vrot.lane.b32.xlu1 %v8314_v11, %s7699_s14  ;;  %13140 = vst [vmem:[#allocation69_spill] sm:$0xff] %v8362_v2  ;;  %v8366_v46 = vsel %vm715_vm2, %v782_v51, %v784_v62  ;;  %v8375_v14 = vsel %vm715_vm2, %v781_v56, %v782_v51  ;;  %v792_v62 = vrot.slane %v8156_v53, 2  ;;  %v791_v51 = vrot.slane %v8159_v15, 2 }
  0x85   : > { %v8353_v28 = vsel %vm715_vm2, %v777_v18, %v779_v17  ;;  %13141 = vst [vmem:[#allocation70_spill] sm:$0xff] %v8366_v46  ;;  %v787_v17 = vrot.slane %v8134_v5, 2  ;;  %13142 = vst [vmem:[#allocation71_spill] sm:$0xff] %v8375_v14  ;;  %v786_v18 = vrot.slane %v8137_v27, 2 }
  0x86   : > { %13139 = vst [vmem:[#allocation68_spill] sm:$0xff] %v8353_v28  ;;  %v8405_v33 = vsel %vm715_vm2, %v791_v51, %v792_v62 }
  0x87   : > { %940 = vrot.lane.b32.xlu0 %v8323_v55, %s7699_s14  ;;  %v8379_v20 = vsel %vm715_vm2, %v787_v17, %v789_v42  ;;  %v8390_v8 = vsel %vm715_vm2, %v786_v18, %v787_v17  ;;  %v8396_v42 = vsel %vm715_vm2, %v792_v62, %v794_v21  ;;  %13148 = vst [vmem:[#allocation77_spill] sm:$0xff] %v8405_v33 }
  0x88   : > { %946 = vrot.lane.b32.xlu1 %v8327_v19, %s7699_s14  ;;  %13143 = vst [vmem:[#allocation72_spill] sm:$0xff] %v8379_v20  ;;  %13145 = vst [vmem:[#allocation74_spill] sm:$0xff] %v8390_v8 }
  0x89   : > { %13147 = vst [vmem:[#allocation76_spill] sm:$0xff] %v8396_v42 }
  0x8b   : > { %944 = vrot.lane.b32.xlu0 %v8336_v49, %s7699_s14 }
  0x8c   : > { %950 = vrot.lane.b32.xlu1 %v8340_v31, %s7699_s14 }
  0x8f   : > { %948 = vrot.lane.b32.xlu0 %v8349_v1, %s7699_s14 }
  0x90   : > { %954 = vrot.lane.b32.xlu1 %v8353_v28, %s7699_s14 }
  0x93   : > { %952 = vrot.lane.b32.xlu0 %v8362_v2, %s7699_s14 }
  0x94   : > { %958 = vrot.lane.b32.xlu1 %v8366_v46, %s7699_s14 }
  0x96   : > { %v8383_v28 = vpop.permute.xlu1 %814 }
  0x97   : > { %13144 = vst [vmem:[#allocation73_spill] sm:$0xff] %v8383_v28  ;;  %956 = vrot.lane.b32.xlu0 %v8375_v14, %s7699_s14 }
  0x98   : > { %962 = vrot.lane.b32.xlu1 %v8379_v20, %s7699_s14 }
  0x99   : > { %v8393_v56 = vpop.permute.xlu0 %7445 }
  0x9a   : > { %13146 = vst [vmem:[#allocation75_spill] sm:$0xff] %v8393_v56  ;;  %v8398_v46 = vpop.permute.xlu1 %816 }
  0x9b   : > { %960 = vrot.lane.b32.xlu0 %v8390_v8, %s7699_s14 }
  0x9c   : > { %966 = vrot.lane.b32.xlu1 %v8396_v42, %s7699_s14 }
  0x9d   : > { %v8407_v17 = vpop.permute.xlu0 %812 }
  0x9e   : > { %13149 = vst [vmem:[#allocation78_spill] sm:$0xff] %v8407_v17  ;;  %v8409_v18 = vpop.permute.xlu1 %820 }
  0x9f   : > { %964 = vrot.lane.b32.xlu0 %v8405_v33, %s7699_s14 }
  0xa0   : > { %1002 = vrot.lane.b32.xlu1 %v7828_v12, %s7700_s15 }
  0xa1   : > { %v8415_v21 = vpop.permute.xlu0 %818 }
  0xa2   : > { %v8417_v28 = vpop.permute.xlu1 %824 }
  0xa3   : > { %1000 = vrot.lane.b32.xlu0 %v7864_v30, %s7700_s15 }
  0xa4   : > { %1006 = vrot.lane.b32.xlu1 %v7848_v22, %s7700_s15 }
  0xa5   : > { %v8423_v62 = vpop.permute.xlu0 %822 }
  0xa6   : > { %v8425_v51 = vpop.permute.xlu1 %828 }
  0xa7   : > { %1004 = vrot.lane.b32.xlu0 %v7851_v23, %s7700_s15 }
  0xa8   : > { %1010 = vrot.lane.b32.xlu1 %v7879_v39, %s7700_s15 }
  0xa9   : > { %v8431_v42 = vpop.permute.xlu0 %826 }
  0xaa   : > { %v8433_v33 = vpop.permute.xlu1 %832 }
  0xab   : > { %1008 = vrot.lane.b32.xlu0 %v7867_v32, %s7700_s15 }
  0xac   : > { %1014 = vrot.lane.b32.xlu1 %v7902_v52, %s7700_s15 }
  0xad   : > { %v8439_v12 = vpop.permute.xlu0 %830 }
  0xae   : > { %v8441_v20 = vpop.permute.xlu1 %836 }
  0xaf   : > { %1012 = vrot.lane.b32.xlu0 %v7895_v47, %s7700_s15 }
  0xb0   : > { %1018 = vrot.lane.b32.xlu1 %v7911_v57, %s7700_s15 }
  0xb1   : > { %v8447_v8 = vpop.permute.xlu0 %834 }
  0xb2   : > { %v8449_v30 = vpop.permute.xlu1 %840 }
  0xb3   : > { %13150 = vst [vmem:[#allocation79_spill] sm:$0xff] %v8449_v30  ;;  %1016 = vrot.lane.b32.xlu0 %v7914_v58, %s7700_s15 }
  0xb4   : > { %1022 = vrot.lane.b32.xlu1 %v7935_v6, %s7700_s15 }
  0xb5   : > { %v8455_v17 = vpop.permute.xlu0 %838 }
  0xb6   : > { %v8457_v14 = vpop.permute.xlu1 %844 }
  0xb7   : > { %13151 = vst [vmem:[#allocation80_spill] sm:$0xff] %v8457_v14  ;;  %1020 = vrot.lane.b32.xlu0 %v7938_v7, %s7700_s15 }
  0xb8   : > { %1026 = vrot.lane.b32.xlu1 %v7959_v25, %s7700_s15 }
  0xb9   : > { %v8463_v56 = vpop.permute.xlu0 %842 }
  0xba   : > { %13152 = vst [vmem:[#allocation81_spill] sm:$0xff] %v8463_v56  ;;  %v8465_v2 = vpop.permute.xlu1 %848 }
  0xbb   : > { %1024 = vrot.lane.b32.xlu0 %v7962_v26, %s7700_s15 }
  0xbc   : > { %1030 = vrot.lane.b32.xlu1 %v7983_v44, %s7700_s15 }
  0xbd   : > { %v8471_v30 = vpop.permute.xlu0 %846 }
  0xbe   : > { %13153 = vst [vmem:[#allocation82_spill] sm:$0xff] %v8471_v30  ;;  %v8473_v60 = vpop.permute.xlu1 %852 }
  0xbf   : > { %13154 = vst [vmem:[#allocation83_spill] sm:$0xff] %v8473_v60  ;;  %1028 = vrot.lane.b32.xlu0 %v7986_v45, %s7700_s15 }
  0xc0   : > { %1034 = vrot.lane.b32.xlu1 %v8007_v63, %s7700_s15 }
  0xc1   : > { %v8479_v14 = vpop.permute.xlu0 %850 }
  0xc2   : > { %v8481_v56 = vpop.permute.xlu1 %856 }
  0xc3   : > { %13155 = vst [vmem:[#allocation84_spill] sm:$0xff] %v8481_v56  ;;  %1032 = vrot.lane.b32.xlu0 %v8010_v0, %s7700_s15 }
  0xc4   : > { %1038 = vrot.lane.b32.xlu1 %v8031_v36, %s7700_s15 }
  0xc5   : > { %v8487_v30 = vpop.permute.xlu0 %854 }
  0xc6   : > { %13156 = vst [vmem:[#allocation85_spill] sm:$0xff] %v8487_v30  ;;  %v8489_v44 = vpop.permute.xlu1 %860  ;;  %v13186_v30 = vld [vmem:[#allocation28_spill] sm:$0xff] }
  0xc7   : > { %13157 = vst [vmem:[#allocation86_spill] sm:$0xff] %v8489_v44  ;;  %1036 = vrot.lane.b32.xlu0 %v8034_v38, %s7700_s15  ;;  %v8517_v44 = vld [vmem:[%s7802_s23 + $0x2f8] sm:$0xff] }
  0xc8   : > { %1042 = vrot.lane.b32.xlu1 %v8058_v34, %s7700_s15  ;;  %13164 = vst [vmem:[#allocation93_spill] sm:$0xff] %v8517_v44 }
  0xc9   : > { %v8495_v63 = vpop.permute.xlu0 %858 }
  0xca   : > { %13158 = vst [vmem:[#allocation87_spill] sm:$0xff] %v8495_v63  ;;  %v8497_v45 = vpop.permute.xlu1 %864 }
  0xcb   : > { %13159 = vst [vmem:[#allocation88_spill] sm:$0xff] %v8497_v45  ;;  %1040 = vrot.lane.b32.xlu0 %v8055_v10, %s7700_s15  ;;  %v6776_v45 = vld [vmem:[%s7802_s23 + $0x2f0] sm:$0xff] }
  0xcc   : > { %1046 = vrot.lane.b32.xlu1 %v8082_v37, %s7700_s15  ;;  %v516_v1 = vrot.slane %v6776_v45, 7  ;;  %v13176_v37 = vld [vmem:[#allocation25_spill] sm:$0xff] }
  0xcd   : > { %v8503_v0 = vpop.permute.xlu0 %862 }
  0xce   : > { %13160 = vst [vmem:[#allocation89_spill] sm:$0xff] %v8503_v0  ;;  %v8505_v4 = vpop.permute.xlu1 %868  ;;  %v12945_v0 = vrot.slane %v8517_v44, 7  ;;  %v8546_v45 = vsel %vm468_vm0, 0.0, %v516_v1 }
  0xcf   : > { %13161 = vst [vmem:[#allocation90_spill] sm:$0xff] %v8505_v4  ;;  %1044 = vrot.lane.b32.xlu0 %v8085_v59, %s7700_s15  ;;  %13169 = vst [vmem:[#allocation98_spill] sm:$0xff] %v8546_v45 }
  0xd0   : > { %1050 = vrot.lane.b32.xlu1 %v8110_v50, %s7700_s15 }
  0xd1   : > { %v8511_v9 = vpop.permute.xlu0 %866 }
  0xd2   : > { %13162 = vst [vmem:[#allocation91_spill] sm:$0xff] %v8511_v9  ;;  %v8513_v31 = vpop.permute.xlu1 %7450  ;;  %v8537_v9 = vsel %vm468_vm0, %v516_v1, %v12945_v0 }
  0xd3   : > { %13163 = vst [vmem:[#allocation92_spill] sm:$0xff] %v8513_v31  ;;  %1048 = vrot.lane.b32.xlu0 %v8113_v29, %s7700_s15  ;;  %13168 = vst [vmem:[#allocation97_spill] sm:$0xff] %v8537_v9  ;;  %v13173_v29 = vld [vmem:[#allocation21_spill] sm:$0xff] }
  0xd4   : > { %1054 = vrot.lane.b32.xlu1 %v8134_v5, %s7700_s15 }
  0xd5   : > { %v8523_v4 = vpop.permute.xlu0 %870 }
  0xd6   : > { %13165 = vst [vmem:[#allocation94_spill] sm:$0xff] %v8523_v4  ;;  %v8526_v59 = vpop.permute.xlu1 %910 }
  0xd7   : > { %13166 = vst [vmem:[#allocation95_spill] sm:$0xff] %v8526_v59  ;;  %1052 = vrot.lane.b32.xlu0 %v8137_v27, %s7700_s15  ;;  %v13172_v27 = vld [vmem:[#allocation15_spill] sm:$0xff] }
  0xd8   : > { %1058 = vrot.lane.b32.xlu1 %v8156_v53, %s7700_s15 }
  0xd9   : > { %v8532_v31 = vpop.permute.xlu0 %908 }
  0xda   : > { %13167 = vst [vmem:[#allocation96_spill] sm:$0xff] %v8532_v31  ;;  %v8539_v5 = vpop.permute.xlu1 %914  ;;  %v13170_v31 = vld [vmem:[#allocation14_spill] sm:$0xff] }
  0xdb   : > { %1056 = vrot.lane.b32.xlu0 %v8159_v15, %s7700_s15 }
  0xdc   : > { %1062 = vrot.lane.b32.xlu1 %v8537_v9, %s7700_s15 }
  0xdd   : > { %v8548_v59 = vpop.permute.xlu0 %912 }
  0xde   : > { %v8550_v53 = vpop.permute.xlu1 %918 }
  0xdf   : > { %1060 = vrot.lane.b32.xlu0 %v8546_v45, %s7700_s15 }
  0xe0   : > { %1098 = vrot.lane.b32.xlu1 %v7854_v24, %s7701_s16 }
  0xe1   : > { %v8556_v0 = vpop.permute.xlu0 %916 }
  0xe2   : > { %v8558_v44 = vpop.permute.xlu1 %922 }
  0xe3   : > { %1096 = vrot.lane.b32.xlu0 %v7888_v43, %s7701_s16  ;;  %v13171_v43 = vld [vmem:[#allocation17_spill] sm:$0xff] }
  0xe4   : > { %1102 = vrot.lane.b32.xlu1 %v7922_v61, %s7701_s16 }
  0xe5   : > { %v8564_v1 = vpop.permute.xlu0 %920 }
  0xe6   : > { %v8566_v9 = vpop.permute.xlu1 %926 }
  0xe7   : > { %1100 = vrot.lane.b32.xlu0 %v7873_v35, %s7701_s16 }
  0xe8   : > { %1106 = vrot.lane.b32.xlu1 %v7947_v16, %s7701_s16 }
  0xe9   : > { %v8572_v24 = vpop.permute.xlu0 %924 }
  0xea   : > { %v8574_v45 = vpop.permute.xlu1 %930 }
  0xeb   : > { %1104 = vrot.lane.b32.xlu0 %v13170_v31, %s7701_s16 }
  0xec   : > { %1110 = vrot.lane.b32.xlu1 %v13171_v43, %s7701_s16 }
  0xed   : > { %v8580_v15 = vpop.permute.xlu0 %928 }
  0xee   : > { %v8582_v4 = vpop.permute.xlu1 %934 }
  0xef   : > { %1108 = vrot.lane.b32.xlu0 %v13172_v27, %s7701_s16  ;;  %v13180_v27 = vld [vmem:[#allocation27_spill] sm:$0xff] }
  0xf0   : > { %1114 = vrot.lane.b32.xlu1 %v13173_v29, %s7701_s16 }
  0xf1   : > { %v8588_v50 = vpop.permute.xlu0 %932 }
  0xf2   : > { %v8590_v56 = vpop.permute.xlu1 %938 }
  0xf3   : > { %13174 = vst [vmem:[#allocation14_spill] sm:$0xff] %v8590_v56  ;;  %1112 = vrot.lane.b32.xlu0 %v13175_v48, %s7701_s16  ;;  %v13182_v56 = vld [vmem:[#allocation22_spill] sm:$0xff]  ;;  %v13183_v48 = vld [vmem:[#allocation29_spill] sm:$0xff] }
  0xf4   : > { %1118 = vrot.lane.b32.xlu1 %v13176_v37, %s7701_s16 }
  0xf5   : > { %v8596_v43 = vpop.permute.xlu0 %936 }
  0xf6   : > { %13177 = vst [vmem:[#allocation99_spill] sm:$0xff] %v8596_v43  ;;  %v8598_v63 = vpop.permute.xlu1 %942 }
  0xf7   : > { %13178 = vst [vmem:[#allocation100_spill] sm:$0xff] %v8598_v63  ;;  %1116 = vrot.lane.b32.xlu0 %v13179_v54, %s7701_s16  ;;  %v13184_v63 = vld [vmem:[#allocation26_spill] sm:$0xff]  ;;  %v13185_v54 = vld [vmem:[#allocation33_spill] sm:$0xff] }
  0xf8   : > { %1122 = vrot.lane.b32.xlu1 %v13180_v27, %s7701_s16 }
  0xf9   : > { %v8604_v29 = vpop.permute.xlu0 %940 }
  0xfa   : > { %13181 = vst [vmem:[#allocation101_spill] sm:$0xff] %v8604_v29  ;;  %v8606_v60 = vpop.permute.xlu1 %946 }
  0xfb   : > { %1120 = vrot.lane.b32.xlu0 %v13182_v56, %s7701_s16 }
  0xfc   : > { %1126 = vrot.lane.b32.xlu1 %v13183_v48, %s7701_s16 }
  0xfd   : > { %v8612_v37 = vpop.permute.xlu0 %944 }
  0xfe   : > { %v8614_v43 = vpop.permute.xlu1 %950 }
  0xff   : > { %1124 = vrot.lane.b32.xlu0 %v13184_v63, %s7701_s16 }
 0x100   : > { %1130 = vrot.lane.b32.xlu1 %v13185_v54, %s7701_s16 }
 0x101   : > { %v8620_v27 = vpop.permute.xlu0 %948 }
 0x102   : > { %v8622_v29 = vpop.permute.xlu1 %954 }
 0x103   : > { %1128 = vrot.lane.b32.xlu0 %v13186_v30, %s7701_s16  ;;  %v1848_v30 = vld [vmem:[%s12820_s2 + $0x40] sm:$0xff] }
 0x104   : > { %1224 = vrot.lane.b32.xlu1 %v8323_v55, %s7702_s17  ;;  %7349 = vmatprep.subr.mxu1 %v1848_v30  ;;  %v1847_v55 = vld [vmem:[%s12820_s2 + $0x38] sm:$0xff] }
 0x105   : > { %v8628_v48 = vpop.permute.xlu0 %952  ;;  %7358 = vmatpush3.msra.mxu1 %v1848_v30  ;;  %7101 = vmatprep.subr.mxu0 %v1848_v30 }
 0x106   : > { %v8630_v56 = vpop.permute.xlu1 %958  ;;  %7350 = vmatprep.subr.mxu1 %v1847_v55  ;;  %7102 = vmatpush3.msra.mxu0 %v1848_v30 }
 0x107   : > { %13187 = vst [vmem:[#allocation102_spill] sm:$0xff] %v8630_v56  ;;  %1192 = vrot.lane.b32.xlu0 %v8219_v13, %s7702_s17  ;;  %7359 = vmatpush3.msra.mxu1 %v1847_v55 }
 0x108   : > { %1226 = vrot.lane.b32.xlu1 %v8314_v11, %s7702_s17  ;;  %7103 = vmatprep.subr.mxu0 %v1847_v55 }
 0x109   : > { %v8636_v54 = vpop.permute.xlu0 %956  ;;  %7104 = vmatpush3.msra.mxu0 %v1847_v55  ;;  %v1843_v55 = vld [vmem:[%s12820_s2 + $0x18] sm:$0xff] }
 0x10a   : > { %13188 = vst [vmem:[#allocation103_spill] sm:$0xff] %v8636_v54  ;;  %v8638_v63 = vpop.permute.xlu1 %962  ;;  %v13194_v54 = vld [vmem:[#allocation30_spill] sm:$0xff] }
 0x10b   : > { %13189 = vst [vmem:[#allocation104_spill] sm:$0xff] %v8638_v63  ;;  %1194 = vrot.lane.b32.xlu0 %v8210_v40, %s7702_s17  ;;  %v1846_v40 = vld [vmem:[%s12820_s2 + $0x30] sm:$0xff]  ;;  %v1845_v63 = vld [vmem:[%s12820_s2 + $0x28] sm:$0xff] }
 0x10c   : > { %1320 = vrot.lane.b32.xlu1 %v8034_v38, %s7703_s22  ;;  %7351 = vmatprep.subr.mxu1 %v1846_v40 }
 0x10d   : > { %v8650_v13 = vpop.permute.xlu0 %960  ;;  %7360 = vmatpush3.msra.mxu1 %v1846_v40  ;;  %7105 = vmatprep.subr.mxu0 %v1846_v40 }
 0x10e   : > { %13190 = vst [vmem:[#allocation105_spill] sm:$0xff] %v8650_v13  ;;  %v8652_v11 = vpop.permute.xlu1 %966  ;;  %7352 = vmatprep.subr.mxu1 %v1845_v63  ;;  %7106 = vmatpush3.msra.mxu0 %v1846_v40  ;;  %v1842_v40 = vld [vmem:[%s12820_s2 + $0x10] sm:$0xff] }
 0x10f   : > { %13191 = vst [vmem:[#allocation106_spill] sm:$0xff] %v8652_v11  ;;  %1288 = vrot.lane.b32.xlu0 %v7851_v23, %s7703_s22  ;;  %v1844_v11 = vld [vmem:[%s12820_s2 + $0x20] sm:$0xff]  ;;  %7361 = vmatpush3.msra.mxu1 %v1845_v63 }
 0x110   : > { %1322 = vrot.lane.b32.xlu1 %v8031_v36, %s7703_s22  ;;  %7107 = vmatprep.subr.mxu0 %v1845_v63 }
 0x111   : > { %v8664_v13 = vpop.permute.xlu0 %964  ;;  %7353 = vmatprep.subr.mxu1 %v1844_v11  ;;  %7108 = vmatpush3.msra.mxu0 %v1845_v63 }
 0x112   : > { %13192 = vst [vmem:[#allocation107_spill] sm:$0xff] %v8664_v13  ;;  %v8666_v30 = vpop.permute.xlu1 %1002  ;;  %7362 = vmatpush3.msra.mxu1 %v1844_v11  ;;  %7109 = vmatprep.subr.mxu0 %v1844_v11 }
 0x113   : > { %13193 = vst [vmem:[#allocation108_spill] sm:$0xff] %v8666_v30  ;;  %1290 = vrot.lane.b32.xlu0 %v7848_v22, %s7703_s22  ;;  %7354 = vmatprep.subr.mxu1 %v1843_v55 }
 0x114   : > { %1416 = vrot.lane.b32.xlu1 %v13194_v54, %s7704_s10  ;;  %7110 = vmatpush3.msra.mxu0 %v1844_v11 }
 0x115   : > { %v8675_v13 = vpop.permute.xlu0 %1000  ;;  %7363 = vmatpush3.msra.mxu1 %v1843_v55  ;;  %7111 = vmatprep.subr.mxu0 %v1843_v55 }
 0x116   : > { %13195 = vst [vmem:[#allocation30_spill] sm:$0xff] %v8675_v13  ;;  %v8680_v30 = vpop.permute.xlu1 %1006  ;;  %v1582_v13 = vsel %vm1576_vm3, %v7848_v22, %v8415_v21  ;;  %7355 = vmatprep.subr.mxu1 %v1842_v40  ;;  %7112 = vmatpush3.msra.mxu0 %v1843_v55  ;;  %v1581_v22 = vsel %vm1576_vm3, %v7851_v23, %v8398_v46 }
 0x117   : > { %13196 = vst [vmem:[#allocation109_spill] sm:$0xff] %v8680_v30  ;;  %1384 = vrot.lane.b32.xlu0 %v7873_v35, %s7704_s10  ;;  %v1615_v35 = vsel %vm1609_vm4, %v1582_v13, %v8539_v5  ;;  %7364 = vmatpush3.msra.mxu1 %v1842_v40  ;;  %v1584_v5 = vsel %vm1576_vm3, %v7879_v39, %v8423_v62 }
 0x118   : > { %1386 = vrot.lane.b32.xlu1 %v7922_v61, %s7704_s10  ;;  %v1841_v61 = vld [vmem:[%s12820_s2 + $0x8] sm:$0xff]  ;;  %v1614_v11 = vsel %vm1609_vm4, %v1581_v22, %v8548_v59  ;;  %7113 = vmatprep.subr.mxu0 %v1842_v40  ;;  %v1617_v23 = vsel %vm1609_vm4, %v1584_v5, %v8550_v53  ;;  %v1586_v53 = vsel %vm1576_vm3, %v7902_v52, %v8431_v42 }
 0x119   : > { %v8692_v63 = vpop.permute.xlu0 %1004  ;;  %7356 = vmatprep.subr.mxu1 %v1841_v61  ;;  %7114 = vmatpush3.msra.mxu0 %v1842_v40  ;;  %v13197_v59 = vld [vmem:[#allocation38_spill] sm:$0xff] }
 0x11a   : > { %v1011_v30 = vpop.permute.xlu1 %1010  ;;  %7365 = vmatpush3.msra.mxu1 %v1841_v61  ;;  %7115 = vmatprep.subr.mxu0 %v1841_v61 }
 0x11b   : > { %v8700_v56 = vsel %vm1642_vm5, %v1615_v35, %v1011_v30  ;;  %1132 = vrot.lane.b32.xlu0 %v13194_v54, %s7701_s16  ;;  %v1840_v54 = vld [vmem:[%s12820_s2] sm:$0xff]  ;;  %v1583_v30 = vsel %vm1576_vm3, %v7867_v32, %v8409_v18  ;;  %7116 = vmatpush3.msra.mxu0 %v1841_v61  ;;  %v1619_v35 = vsel %vm1609_vm4, %v1586_v53, %v8558_v44 }
 0x11c   : > { %1480 = vrot.lane.b32.xlu1 %v8232_v41, %s7705_s21  ;;  %7357 = vmatprep.subr.mxu1 %v1840_v54  ;;  %v1616_v55 = vsel %vm1609_vm4, %v1583_v30, %v8556_v0  ;;  %v1585_v0 = vsel %vm1576_vm3, %v7895_v47, %v8417_v28  ;;  %v1588_v44 = vsel %vm1576_vm3, %v7911_v57, %v8439_v12 }
 0x11d   : > { %v1009_v21 = vpop.permute.xlu0 %1008  ;;  %7366 = vmatpush3.msra.mxu1 %v1840_v54  ;;  %7117 = vmatprep.subr.mxu0 %v1840_v54  ;;  %v1618_v42 = vsel %vm1609_vm4, %v1585_v0, %v8564_v1  ;;  %v1587_v12 = vsel %vm1576_vm3, %v7914_v58, %v8425_v51 }
 0x11e   : > { %v8720_v46 = vsel %vm1642_vm5, %v1614_v11, %v1009_v21  ;;  %v1015_v13 = vpop.permute.xlu1 %1014  ;;  %7118 = vmatpush3.msra.mxu0 %v1840_v54  ;;  %v1621_v11 = vsel %vm1609_vm4, %v1588_v44, %v8566_v9  ;;  %v1590_v9 = vsel %vm1576_vm3, %v7935_v6, %v8447_v8  ;;  %v1589_v8 = vsel %vm1576_vm3, %v7938_v7, %v8433_v33 }
 0x11f   : > { %v8723_v62 = vsel %vm1642_vm5, %v1617_v23, %v1015_v13  ;;  %1418 = vrot.lane.b32.xlu0 %v13197_v59, %s7704_s10  ;;  %v1623_v23 = vsel %vm1609_vm4, %v1590_v9, %v8574_v45  ;;  %v1592_v45 = vsel %vm1576_vm3, %v7959_v25, %v8455_v17 }
 0x120   : > { %1134 = vrot.lane.b32.xlu1 %v13197_v59, %s7701_s16  ;;  %v1625_v30 = vsel %vm1609_vm4, %v1592_v45, %v8582_v4  ;;  %v13211_v45 = vld [vmem:[#allocation32_spill] sm:$0xff] }
 0x121   : > { %v1013_v40 = vpop.permute.xlu0 %1012 }
 0x122   : > { %v8740_v22 = vsel %vm1642_vm5, %v1616_v55, %v1013_v40  ;;  %v1019_v18 = vpop.permute.xlu1 %1018 }
 0x123   : > { %v8743_v5 = vsel %vm1642_vm5, %v1619_v35, %v1019_v18  ;;  %1512 = vrot.lane.b32.xlu0 %v8336_v49, %s7705_s21  ;;  %v1598_v35 = vsel %vm1576_vm3, %v8031_v36, %v8479_v14  ;;  %v13204_v36 = vld [vmem:[#allocation85_spill] sm:$0xff] }
 0x124   : > { %1228 = vrot.lane.b32.xlu1 %v8336_v49, %s7702_s17  ;;  %v1620_v49 = vsel %vm1609_vm4, %v1587_v12, %v8572_v24  ;;  %v1622_v24 = vsel %vm1609_vm4, %v1589_v8, %v8580_v15  ;;  %v1600_v14 = vsel %vm1576_vm3, %v8058_v34, %v13204_v36  ;;  %v13210_v8 = vld [vmem:[#allocation84_spill] sm:$0xff] }
 0x125   : > { %v1017_v61 = vpop.permute.xlu0 %1016 }
 0x126   : > { %v8760_v21 = vsel %vm1642_vm5, %v1618_v42, %v1017_v61  ;;  %v1023_v54 = vpop.permute.xlu1 %1022  ;;  %v1633_v61 = vsel %vm1609_vm4, %v1600_v14, %v8614_v43  ;;  %v13220_v14 = vld [vmem:[#allocation40_spill] sm:$0xff] }
 0x127   : > { %v8763_v28 = vsel %vm1642_vm5, %v1621_v11, %v1023_v54  ;;  %1196 = vrot.lane.b32.xlu0 %v8232_v41, %s7702_s17  ;;  %v13208_v54 = vld [vmem:[#allocation31_spill] sm:$0xff] }
 0x128   : > { %13198 = vst [vmem:[#allocation38_spill] sm:$0xff] %v8763_v28  ;;  %1514 = vrot.lane.b32.xlu1 %v8327_v19, %s7705_s21 }
 0x129   : > { %v1021_v1 = vpop.permute.xlu0 %1020 }
 0x12a   : > { %v8780_v41 = vsel %vm1642_vm5, %v1620_v49, %v1021_v1  ;;  %v1027_v13 = vpop.permute.xlu1 %1026 }
 0x12b   : > { %v8783_v51 = vsel %vm1642_vm5, %v1623_v23, %v1027_v13  ;;  %1482 = vrot.lane.b32.xlu0 %v8223_v3, %s7705_s21  ;;  %v13209_v13 = vld [vmem:[#allocation42_spill] sm:$0xff] }
 0x12c   : > { %13199 = vst [vmem:[#allocation110_spill] sm:$0xff] %v8783_v51  ;;  %1230 = vrot.lane.b32.xlu1 %v8327_v19, %s7702_s17  ;;  %v1591_v19 = vsel %vm1576_vm3, %v7962_v26, %v8441_v20 }
 0x12d   : > { %v1025_v59 = vpop.permute.xlu0 %1024  ;;  %v1624_v15 = vsel %vm1609_vm4, %v1591_v19, %v8588_v50  ;;  %v13203_v50 = vld [vmem:[#allocation35_spill] sm:$0xff]  ;;  %v13214_v19 = vld [vmem:[#allocation102_spill] sm:$0xff] }
 0x12e   : > { %v8800_v53 = vsel %vm1642_vm5, %v1622_v24, %v1025_v59  ;;  %v1031_v55 = vpop.permute.xlu1 %1030  ;;  %v1601_v24 = vsel %vm1576_vm3, %v13211_v45, %v13210_v8  ;;  %v13213_v59 = vld [vmem:[#allocation36_spill] sm:$0xff]  ;;  %v13228_v8 = vld [vmem:[#allocation94_spill] sm:$0xff] }
 0x12f   : > { %13200 = vst [vmem:[#allocation111_spill] sm:$0xff] %v8800_v53  ;;  %v8803_v33 = vsel %vm1642_vm5, %v1625_v30, %v1031_v55  ;;  %1198 = vrot.lane.b32.xlu0 %v8223_v3, %s7702_s17  ;;  %v1634_v30 = vsel %vm1609_vm4, %v1601_v24, %v8628_v48  ;;  %v13219_v48 = vld [vmem:[#allocation91_spill] sm:$0xff]  ;;  %v13229_v24 = vld [vmem:[#allocation44_spill] sm:$0xff] }
 0x130   : > { %13201 = vst [vmem:[#allocation112_spill] sm:$0xff] %v8803_v33  ;;  %1324 = vrot.lane.b32.xlu1 %v8055_v10, %s7703_s22 }
 0x131   : > { %v1029_v4 = vpop.permute.xlu0 %1028 }
 0x132   : > { %v8815_v17 = vsel %vm1642_vm5, %v1624_v15, %v1029_v4  ;;  %v8817_v40 = vpop.permute.xlu1 %1034 }
 0x133   : > { %13202 = vst [vmem:[#allocation113_spill] sm:$0xff] %v8815_v17  ;;  %1292 = vrot.lane.b32.xlu0 %v7867_v32, %s7703_s22  ;;  %v1631_v32 = vsel %vm1609_vm4, %v1598_v35, %v8606_v60 }
 0x134   : > { %1326 = vrot.lane.b32.xlu1 %v8058_v34, %s7703_s22 }
 0x135   : > { %v8823_v3 = vpop.permute.xlu0 %1032 }
 0x136   : > { %v8825_v20 = vpop.permute.xlu1 %1038 }
 0x137   : > { %1294 = vrot.lane.b32.xlu0 %v7879_v39, %s7703_s22  ;;  %v1597_v39 = vsel %vm1576_vm3, %v8034_v38, %v8465_v2  ;;  %v13207_v2 = vld [vmem:[#allocation87_spill] sm:$0xff] }
 0x138   : > { %1420 = vrot.lane.b32.xlu1 %v13203_v50, %s7704_s10  ;;  %v1630_v60 = vsel %vm1609_vm4, %v1597_v39, %v8612_v37  ;;  %v13206_v37 = vld [vmem:[#allocation53_spill] sm:$0xff]  ;;  %v1602_v43 = vsel %vm1576_vm3, %v13208_v54, %v13207_v2 }
 0x139   : > { %v8834_v18 = vpop.permute.xlu0 %1036  ;;  %v1635_v49 = vsel %vm1609_vm4, %v1602_v43, %v8622_v29  ;;  %v13218_v39 = vld [vmem:[#allocation37_spill] sm:$0xff] }
 0x13a   : > { %v1043_v0 = vpop.permute.xlu1 %1042 }
 0x13b   : > { %v8839_v44 = vsel %vm1642_vm5, %v1631_v32, %v1043_v0  ;;  %1388 = vrot.lane.b32.xlu0 %v13170_v31, %s7704_s10  ;;  %v13216_v32 = vld [vmem:[#allocation67_spill] sm:$0xff]  ;;  %v13217_v0 = vld [vmem:[#allocation86_spill] sm:$0xff] }
 0x13c   : > { %1390 = vrot.lane.b32.xlu1 %v7947_v16, %s7704_s10  ;;  %v13205_v16 = vld [vmem:[#allocation83_spill] sm:$0xff]  ;;  %v1603_v36 = vsel %vm1576_vm3, %v13218_v39, %v13217_v0  ;;  %v13234_v0 = vld [vmem:[#allocation52_spill] sm:$0xff] }
 0x13d   : > { %v1041_v42 = vpop.permute.xlu0 %1040  ;;  %v1599_v34 = vsel %vm1576_vm3, %v8055_v10, %v13205_v16  ;;  %v13222_v16 = vld [vmem:[#allocation104_spill] sm:$0xff] }
 0x13e   : > { %v8856_v31 = vsel %vm1642_vm5, %v1630_v60, %v1041_v42  ;;  %v1047_v11 = vpop.permute.xlu1 %1046  ;;  %v1632_v12 = vsel %vm1609_vm4, %v1599_v34, %v8620_v27  ;;  %v13212_v27 = vld [vmem:[#allocation89_spill] sm:$0xff]  ;;  %v1606_v60 = vsel %vm1576_vm3, %v13220_v14, %v13219_v48  ;;  %v13221_v42 = vld [vmem:[#allocation103_spill] sm:$0xff] }
 0x13f   : > { %v8859_v38 = vsel %vm1642_vm5, %v1633_v61, %v1047_v11  ;;  %1136 = vrot.lane.b32.xlu0 %v13203_v50, %s7701_s16  ;;  %v1604_v29 = vsel %vm1576_vm3, %v13213_v59, %v13212_v27  ;;  %v1636_v61 = vsel %vm1609_vm4, %v1603_v36, %v13221_v42  ;;  %v1639_v34 = vsel %vm1609_vm4, %v1606_v60, %v13222_v16  ;;  %v13235_v36 = vld [vmem:[#allocation90_spill] sm:$0xff]  ;;  %v13236_v48 = vld [vmem:[#allocation45_spill] sm:$0xff]  ;;  %v13237_v42 = vld [vmem:[#allocation107_spill] sm:$0xff] }
 0x140   : > { %1484 = vrot.lane.b32.xlu1 %v13206_v37, %s7705_s21  ;;  %v1637_v15 = vsel %vm1609_vm4, %v1604_v29, %v13214_v19  ;;  %v1608_v27 = vsel %vm1576_vm3, %v13229_v24, %v13228_v8  ;;  %v13230_v29 = vld [vmem:[#allocation105_spill] sm:$0xff]  ;;  %v13231_v19 = vld [vmem:[#allocation106_spill] sm:$0xff]  ;;  %v1607_v60 = vsel %vm1576_vm3, %v13236_v48, %v13235_v36  ;;  %v13239_v8 = vld [vmem:[#allocation39_spill] sm:$0xff] }
 0x141   : > { %v1045_v9 = vpop.permute.xlu0 %1044  ;;  %v13246_v36 = vld [vmem:[#allocation69_spill] sm:$0xff] }
 0x142   : > { %v8876_v1 = vsel %vm1642_vm5, %v1632_v12, %v1045_v9  ;;  %v1051_v23 = vpop.permute.xlu1 %1050  ;;  %v13225_v9 = vld [vmem:[#allocation88_spill] sm:$0xff] }
 0x143   : > { %v8879_v10 = vsel %vm1642_vm5, %v1635_v49, %v1051_v23  ;;  %1422 = vrot.lane.b32.xlu0 %v13209_v13, %s7704_s10  ;;  %v13226_v49 = vld [vmem:[#allocation41_spill] sm:$0xff] }
 0x144   : > { %1138 = vrot.lane.b32.xlu1 %v13209_v13, %s7701_s16  ;;  %v1605_v23 = vsel %vm1576_vm3, %v13226_v49, %v13225_v9  ;;  %v13227_v13 = vld [vmem:[#allocation66_spill] sm:$0xff] }
 0x145   : > { %v1049_v55 = vpop.permute.xlu0 %1048 }
 0x146   : > { %v8896_v4 = vsel %vm1642_vm5, %v1634_v30, %v1049_v55  ;;  %v1055_v50 = vpop.permute.xlu1 %1054  ;;  %v1638_v30 = vsel %vm1609_vm4, %v1605_v23, %v13230_v29  ;;  %v13240_v29 = vld [vmem:[#allocation15_spill] sm:$0xff] }
 0x147   : > { %v8899_v35 = vsel %vm1642_vm5, %v1637_v15, %v1055_v50  ;;  %1516 = vrot.lane.b32.xlu0 %v13216_v32, %s7705_s21  ;;  %v1641_v15 = vsel %vm1609_vm4, %v1608_v27, %v13231_v19 }
 0x148   : > { %13215 = vst [vmem:[#allocation35_spill] sm:$0xff] %v8899_v35  ;;  %1232 = vrot.lane.b32.xlu1 %v13216_v32, %s7702_s17  ;;  %v13260_v35 = vld [vmem:[#allocation48_spill] sm:$0xff] }
 0x149   : > { %v1053_v11 = vpop.permute.xlu0 %1052 }
 0x14a   : > { %v8916_v2 = vsel %vm1642_vm5, %v1636_v61, %v1053_v11  ;;  %v1059_v43 = vpop.permute.xlu1 %1058  ;;  %v1640_v61 = vsel %vm1609_vm4, %v1607_v60, %v13237_v42 }
 0x14b   : > { %13223 = vst [vmem:[#allocation85_spill] sm:$0xff] %v8916_v2  ;;  %v8919_v12 = vsel %vm1642_vm5, %v1639_v34, %v1059_v43  ;;  %1200 = vrot.lane.b32.xlu0 %v13206_v37, %s7702_s17  ;;  %v13264_v2 = vld [vmem:[#allocation71_spill] sm:$0xff] }
 0x14c   : > { %13224 = vst [vmem:[#allocation83_spill] sm:$0xff] %v8919_v12  ;;  %1518 = vrot.lane.b32.xlu1 %v13227_v13, %s7705_s21 }
 0x14d   : > { %v1057_v55 = vpop.permute.xlu0 %1056 }
 0x14e   : > { %v8936_v37 = vsel %vm1642_vm5, %v1638_v30, %v1057_v55  ;;  %v1063_v50 = vpop.permute.xlu1 %1062 }
 0x14f   : > { %13232 = vst [vmem:[#allocation53_spill] sm:$0xff] %v8936_v37  ;;  %v8939_v32 = vsel %vm1642_vm5, %v1641_v15, %v1063_v50  ;;  %1486 = vrot.lane.b32.xlu0 %v13234_v0, %s7705_s21  ;;  %v13244_v15 = vld [vmem:[#allocation46_spill] sm:$0xff]  ;;  %v13258_v37 = vld [vmem:[#allocation57_spill] sm:$0xff] }
 0x150   : > { %13233 = vst [vmem:[#allocation87_spill] sm:$0xff] %v8939_v32  ;;  %1234 = vrot.lane.b32.xlu1 %v13227_v13, %s7702_s17  ;;  %v13253_v32 = vld [vmem:[#allocation16_spill] sm:$0xff] }
 0x151   : > { %v1061_v11 = vpop.permute.xlu0 %1060 }
 0x152   : > { %v8951_v16 = vsel %vm1642_vm5, %v1640_v61, %v1061_v11  ;;  %v8953_v34 = vpop.permute.xlu1 %1098  ;;  %v13249_v61 = vld [vmem:[#allocation68_spill] sm:$0xff] }
 0x153   : > { %13238 = vst [vmem:[#allocation31_spill] sm:$0xff] %v8951_v16  ;;  %1202 = vrot.lane.b32.xlu0 %v13234_v0, %s7702_s17  ;;  %v13254_v16 = vld [vmem:[#allocation75_spill] sm:$0xff] }
 0x154   : > { %1328 = vrot.lane.b32.xlu1 %v13211_v45, %s7703_s22  ;;  %v7447_v17 = vunpack.i.l.bf16 %v13254_v16 }
 0x155   : > { %v1097_v43 = vpop.permute.xlu0 %1096 }
 0x156   : > { %v8959_v9 = vpop.permute.xlu1 %1102 }
 0x157   : > { %1296 = vrot.lane.b32.xlu0 %v7895_v47, %s7703_s22  ;;  %v13241_v47 = vld [vmem:[#allocation17_spill] sm:$0xff] }
 0x158   : > { %1330 = vrot.lane.b32.xlu1 %v13208_v54, %s7703_s22 }
 0x159   : > { %v8965_v23 = vpop.permute.xlu0 %1100 }
 0x15a   : > { %v8967_v13 = vpop.permute.xlu1 %1106 }
 0x15b   : > { %1298 = vrot.lane.b32.xlu0 %v7902_v52, %s7703_s22  ;;  %v13242_v52 = vld [vmem:[#allocation55_spill] sm:$0xff] }
 0x15c   : > { %1424 = vrot.lane.b32.xlu1 %v13239_v8, %s7704_s10 }
 0x15d   : > { %v8973_v45 = vpop.permute.xlu0 %1104 }
 0x15e   : > { %v8975_v27 = vpop.permute.xlu1 %1110 }
 0x15f   : > { %1392 = vrot.lane.b32.xlu0 %v13240_v29, %s7704_s10  ;;  %v13251_v29 = vld [vmem:[#allocation54_spill] sm:$0xff] }
 0x160   : > { %1394 = vrot.lane.b32.xlu1 %v13241_v47, %s7704_s10 }
 0x161   : > { %v8981_v54 = vpop.permute.xlu0 %1108 }
 0x162   : > { %v8983_v30 = vpop.permute.xlu1 %1114 }
 0x163   : > { %1140 = vrot.lane.b32.xlu0 %v13239_v8, %s7701_s16 }
 0x164   : > { %1488 = vrot.lane.b32.xlu1 %v13242_v52, %s7705_s21 }
 0x165   : > { %v8989_v55 = vpop.permute.xlu0 %1112 }
 0x166   : > { %v8991_v19 = vpop.permute.xlu1 %1118 }
 0x167   : > { %13243 = vst [vmem:[#allocation42_spill] sm:$0xff] %v8991_v19  ;;  %1426 = vrot.lane.b32.xlu0 %v13244_v15, %s7704_s10 }
 0x168   : > { %1142 = vrot.lane.b32.xlu1 %v13244_v15, %s7701_s16 }
 0x169   : > { %v8997_v50 = vpop.permute.xlu0 %1116 }
 0x16a   : > { %v8999_v0 = vpop.permute.xlu1 %1122 }
 0x16b   : > { %13245 = vst [vmem:[#allocation84_spill] sm:$0xff] %v8999_v0  ;;  %1520 = vrot.lane.b32.xlu0 %v13246_v36, %s7705_s21 }
 0x16c   : > { %1236 = vrot.lane.b32.xlu1 %v13246_v36, %s7702_s17 }
 0x16d   : > { %v9005_v60 = vpop.permute.xlu0 %1120 }
 0x16e   : > { %13247 = vst [vmem:[#allocation32_spill] sm:$0xff] %v9005_v60  ;;  %v9007_v42 = vpop.permute.xlu1 %1126  ;;  %v13259_v60 = vld [vmem:[#allocation30_spill] sm:$0xff] }
 0x16f   : > { %13248 = vst [vmem:[#allocation89_spill] sm:$0xff] %v9007_v42  ;;  %1204 = vrot.lane.b32.xlu0 %v13242_v52, %s7702_s17 }
 0x170   : > { %1522 = vrot.lane.b32.xlu1 %v13249_v61, %s7705_s21 }
 0x171   : > { %v9013_v11 = vpop.permute.xlu0 %1124 }
 0x172   : > { %13250 = vst [vmem:[#allocation36_spill] sm:$0xff] %v9013_v11  ;;  %v9015_v8 = vpop.permute.xlu1 %1130 }
 0x173   : > { %1490 = vrot.lane.b32.xlu0 %v13251_v29, %s7705_s21 }
 0x174   : > { %1238 = vrot.lane.b32.xlu1 %v13249_v61, %s7702_s17 }
 0x175   : > { %v1129_v47 = vpop.permute.xlu0 %1128 }
 0x176   : > { %v1225_v15 = vpop.permute.xlu1 %1224 }
 0x177   : > { %1206 = vrot.lane.b32.xlu0 %v13251_v29, %s7702_s17  ;;  %v13252_v29 = vld [vmem:[#allocation43_spill] sm:$0xff] }
 0x178   : > { %1332 = vrot.lane.b32.xlu1 %v13218_v39, %s7703_s22 }
 0x179   : > { %v1193_v52 = vpop.permute.xlu0 %1192 }
 0x17a   : > { %v9025_v36 = vpop.permute.xlu1 %1226 }
 0x17b   : > { %1300 = vrot.lane.b32.xlu0 %v7914_v58, %s7703_s22  ;;  %v13255_v58 = vld [vmem:[#allocation21_spill] sm:$0xff] }
 0x17c   : > { %1334 = vrot.lane.b32.xlu1 %v13213_v59, %s7703_s22  ;;  %v13256_v59 = vld [vmem:[#allocation92_spill] sm:$0xff] }
 0x17d   : > { %v9031_v33 = vpop.permute.xlu0 %1194  ;;  %v7452_v11 = vunpack.i.l.bf16 %v13256_v59 }
 0x17e   : > { %v1321_v61 = vpop.permute.xlu1 %1320 }
 0x17f   : > { %1302 = vrot.lane.b32.xlu0 %v7911_v57, %s7703_s22  ;;  %v13257_v57 = vld [vmem:[#allocation11_spill] sm:$0xff] }
 0x180   : > { %1428 = vrot.lane.b32.xlu1 %v13252_v29, %s7704_s10  ;;  %v1577_v12 = vsel %vm1576_vm3, %v13257_v57, %v7447_v17  ;;  %v13261_v17 = vld [vmem:[#allocation79_spill] sm:$0xff] }
 0x181   : > { %v1289_v42 = vpop.permute.xlu0 %1288 }
 0x182   : > { %v1323_v39 = vpop.permute.xlu1 %1322 }
 0x183   : > { %1396 = vrot.lane.b32.xlu0 %v13253_v32, %s7704_s10  ;;  %v1610_v32 = vsel %vm1609_vm4, %v1577_v12, %v7452_v11  ;;  %v13262_v12 = vld [vmem:[#allocation20_spill] sm:$0xff] }
 0x184   : > { %1398 = vrot.lane.b32.xlu1 %v13255_v58, %s7704_s10  ;;  %v1643_v58 = vsel %vm1642_vm5, %v1610_v32, %v13259_v60  ;;  %v1593_v11 = vsel %vm1576_vm3, %v13262_v12, %v13261_v17 }
 0x185   : > { %v9043_v51 = vpop.permute.xlu0 %1290  ;;  %v1676_v19 = vsel %vm1675_vm6, %v1643_v58, %v1097_v43  ;;  %v13263_v43 = vld [vmem:[#allocation99_spill] sm:$0xff] }
 0x186   : > { %v1417_v0 = vpop.permute.xlu1 %1416  ;;  %v1626_v58 = vsel %vm1609_vm4, %v1593_v11, %v13263_v43  ;;  %v13266_v43 = vld [vmem:[#allocation19_spill] sm:$0xff] }
 0x187   : > { %1144 = vrot.lane.b32.xlu0 %v13252_v29, %s7701_s16  ;;  %v1709_v29 = vsel %vm1708_vm7, %v1676_v19, %v1193_v52 }
 0x188   : > { %1492 = vrot.lane.b32.xlu1 %v13258_v37, %s7705_s21  ;;  %v1742_v60 = vsel %vm1741_vm8, %v1709_v29, %v1289_v42 }
 0x189   : > { %v1385_v53 = vpop.permute.xlu0 %1384 }
 0x18a   : > { %v1387_v28 = vpop.permute.xlu1 %1386  ;;  %v1775_v19 = vsel %vm1774_vm10, %v1742_v60, %v1385_v53  ;;  %v7448_v53 = vunpack.i.h.bf16 %v13254_v16 }
 0x18b   : > { %1430 = vrot.lane.b32.xlu0 %v13260_v35, %s7704_s10 }
 0x18c   : > { %1146 = vrot.lane.b32.xlu1 %v13260_v35, %s7701_s16  ;;  %v1659_v35 = vsel %vm1642_vm5, %v1626_v58, %v8823_v3  ;;  %v13265_v3 = vld [vmem:[#allocation81_spill] sm:$0xff] }
 0x18d   : > { %v9064_v32 = vpop.permute.xlu0 %1132  ;;  %v1692_v42 = vsel %vm1675_vm6, %v1659_v35, %v1129_v47  ;;  %v1594_v58 = vsel %vm1576_vm3, %v13266_v43, %v13265_v3  ;;  %v7453_v47 = vunpack.i.h.bf16 %v13256_v59  ;;  %v13269_v3 = vld [vmem:[#allocation9_spill] sm:$0xff] }
 0x18e   : > { %v1481_v52 = vpop.permute.xlu1 %1480  ;;  %v1725_v60 = vsel %vm1708_vm7, %v1692_v42, %v1225_v15  ;;  %v1578_v59 = vsel %vm1576_vm3, %v13269_v3, %v7448_v53 }
 0x18f   : > { %1524 = vrot.lane.b32.xlu0 %v13264_v2, %s7705_s21  ;;  %v1808_v17 = vsel %vm1807_vm9, %v1775_v19, %v1481_v52  ;;  %v13267_v19 = vld [vmem:[#allocation70_spill] sm:$0xff] }
 0x190   : > { %1240 = vrot.lane.b32.xlu1 %v13264_v2, %s7702_s17  ;;  %7119 = vmatprep.mubr.msk.f32.mxu0 %vm1849_vm11, %v1808_v17  ;;  %v1758_v2 = vsel %vm1741_vm8, %v1725_v60, %v1321_v61  ;;  %v13268_v52 = vld [vmem:[#allocation14_spill] sm:$0xff]  ;;  %v13270_v60 = vld [vmem:[#allocation56_spill] sm:$0xff] }
 0x191   : > { %v1419_v29 = vpop.permute.xlu0 %1418  ;;  %v1627_v35 = vsel %vm1609_vm4, %v1594_v58, %v13268_v52  ;;  %v1791_v16 = vsel %vm1774_vm10, %v1758_v2, %v1417_v0  ;;  %v1611_v0 = vsel %vm1609_vm4, %v1578_v59, %v7453_v47  ;;  %v13271_v58 = vld [vmem:[#allocation108_spill] sm:$0xff] }
 0x192   : > { %v9078_v11 = vpop.permute.xlu1 %1134  ;;  %v1644_v2 = vsel %vm1642_vm5, %v1611_v0, %v13271_v58  ;;  %v13277_v0 = vld [vmem:[#allocation59_spill] sm:$0xff] }
 0x193   : > { %1208 = vrot.lane.b32.xlu0 %v13258_v37, %s7702_s17  ;;  %v1660_v37 = vsel %vm1642_vm5, %v1627_v35, %v8817_v40 }
 0x194   : > { %1526 = vrot.lane.b32.xlu1 %v13267_v19, %s7705_s21  ;;  %v1693_v61 = vsel %vm1675_vm6, %v1660_v37, %v9015_v8  ;;  %v1677_v8 = vsel %vm1675_vm6, %v1644_v2, %v8953_v34 }
 0x195   : > { %v1513_v15 = vpop.permute.xlu0 %1512  ;;  %v1726_v40 = vsel %vm1708_vm7, %v1693_v61, %v9025_v36  ;;  %v1710_v47 = vsel %vm1708_vm7, %v1677_v8, %v9031_v33 }
 0x196   : > { %v9096_v17 = vpop.permute.xlu1 %1228  ;;  %v1824_v42 = vsel %vm1807_vm9, %v1791_v16, %v1513_v15  ;;  %v1759_v53 = vsel %vm1741_vm8, %v1726_v40, %v1323_v39  ;;  %v13278_v40 = vld [vmem:[#allocation96_spill] sm:$0xff] }
 0x197   : > { %1494 = vrot.lane.b32.xlu0 %v13270_v60, %s7705_s21  ;;  %7143 = vmatprep.mubr.msk.f32.mxu1 %vm1849_vm11, %v1824_v42  ;;  %v1792_v35 = vsel %vm1774_vm10, %v1759_v53, %v1419_v29  ;;  %v13273_v42 = vld [vmem:[#allocation18_spill] sm:$0xff] }
 0x198   : > { %1242 = vrot.lane.b32.xlu1 %v13267_v19, %s7702_s17  ;;  %v1743_v19 = vsel %vm1741_vm8, %v1710_v47, %v9043_v51 }
 0x199   : > { %v1197_v52 = vpop.permute.xlu0 %1196  ;;  %v1776_v34 = vsel %vm1774_vm10, %v1743_v19, %v1387_v28 }
 0x19a   : > { %v1515_v16 = vpop.permute.xlu1 %1514 }
 0x19b   : > { %v1825_v36 = vsel %vm1807_vm9, %v1792_v35, %v1515_v16  ;;  %1210 = vrot.lane.b32.xlu0 %v13270_v60, %s7702_s17  ;;  %v13276_v60 = vld [vmem:[#allocation12_spill] sm:$0xff]  ;;  %v13279_v16 = vld [vmem:[#allocation50_spill] sm:$0xff] }
 0x19c   : > { %1336 = vrot.lane.b32.xlu1 %v13226_v49, %s7703_s22  ;;  %7144 = vmatmul.mubr.msk.f32.vlgmr.msra.gmra.mxu1 %vm1849_vm11, %v1825_v36  ;;  %v13272_v49 = vld [vmem:[#allocation47_spill] sm:$0xff] }
 0x19d   : > { %v1483_v39 = vpop.permute.xlu0 %1482 }
 0x19e   : > { %v1809_v29 = vsel %vm1807_vm9, %v1776_v34, %v1483_v39  ;;  %v1231_v15 = vpop.permute.xlu1 %1230 }
 0x19f   : > { %1304 = vrot.lane.b32.xlu0 %v7938_v7, %s7703_s22  ;;  %7120 = vmatmul.mubr.msk.f32.vlgmr.msra.gmra.mxu0 %vm1849_vm11, %v1809_v29  ;;  %v13274_v7 = vld [vmem:[#allocation25_spill] sm:$0xff]  ;;  %v13281_v29 = vld [vmem:[#allocation24_spill] sm:$0xff] }
 0x1a0   : > { %1338 = vrot.lane.b32.xlu1 %v13220_v14, %s7703_s22  ;;  %v13275_v14 = vld [vmem:[#allocation78_spill] sm:$0xff] }
 0x1a1   : > { %v1199_v51 = vpop.permute.xlu0 %1198 }
 0x1a2   : > { %v1325_v33 = vpop.permute.xlu1 %1324 }
 0x1a3   : > { %1306 = vrot.lane.b32.xlu0 %v7935_v6, %s7703_s22  ;;  %v1579_v6 = vsel %vm1576_vm3, %v13276_v60, %v13275_v14 }
 0x1a4   : > { %1432 = vrot.lane.b32.xlu1 %v13272_v49, %s7704_s10  ;;  %v1612_v58 = vsel %vm1609_vm4, %v1579_v6, %v13278_v40 }
 0x1a5   : > { %v1293_v28 = vpop.permute.xlu0 %1292  ;;  %v1645_v53 = vsel %vm1642_vm5, %v1612_v58, %v8692_v63  ;;  %v13280_v63 = vld [vmem:[#allocation80_spill] sm:$0xff]  ;;  %v13284_v58 = vld [vmem:[#allocation82_spill] sm:$0xff] }
 0x1a6   : > { %v1327_v37 = vpop.permute.xlu1 %1326  ;;  %v1678_v35 = vsel %vm1675_vm6, %v1645_v53, %v8965_v23 }
 0x1a7   : > { %1400 = vrot.lane.b32.xlu0 %v13273_v42, %s7704_s10  ;;  %v1711_v47 = vsel %vm1708_vm7, %v1678_v35, %v1197_v52  ;;  %v13282_v42 = vld [vmem:[#allocation74_spill] sm:$0xff]  ;;  %v13283_v52 = vld [vmem:[#allocation101_spill] sm:$0xff] }
 0x1a8   : > { %1402 = vrot.lane.b32.xlu1 %v13274_v7, %s7704_s10  ;;  %v1744_v36 = vsel %vm1741_vm8, %v1711_v47, %v1293_v28 }
 0x1a9   : > { %v1295_v59 = vpop.permute.xlu0 %1294 }
 0x1aa   : > { %v1421_v61 = vpop.permute.xlu1 %1420 }
 0x1ab   : > { %1148 = vrot.lane.b32.xlu0 %v13272_v49, %s7701_s16  ;;  %v1595_v49 = vsel %vm1576_vm3, %v13281_v29, %v13280_v63  ;;  %v13289_v63 = vld [vmem:[#allocation10_spill] sm:$0xff] }
 0x1ac   : > { %1496 = vrot.lane.b32.xlu1 %v13277_v0, %s7705_s21  ;;  %v1628_v7 = vsel %vm1609_vm4, %v1595_v49, %v13283_v52  ;;  %v13292_v52 = vld [vmem:[#allocation109_spill] sm:$0xff] }
 0x1ad   : > { %v1389_v2 = vpop.permute.xlu0 %1388  ;;  %v1661_v28 = vsel %vm1642_vm5, %v1628_v7, %v8834_v18  ;;  %v13286_v18 = vld [vmem:[#allocation72_spill] sm:$0xff] }
 0x1ae   : > { %v1391_v8 = vpop.permute.xlu1 %1390  ;;  %v1777_v34 = vsel %vm1774_vm10, %v1744_v36, %v1389_v2  ;;  %v1694_v60 = vsel %vm1675_vm6, %v1661_v28, %v9064_v32  ;;  %v13285_v2 = vld [vmem:[#allocation23_spill] sm:$0xff] }
 0x1af   : > { %1434 = vrot.lane.b32.xlu0 %v13279_v16, %s7704_s10  ;;  %v1727_v40 = vsel %vm1708_vm7, %v1694_v60, %v9096_v17  ;;  %v1596_v53 = vsel %vm1576_vm3, %v13285_v2, %v13284_v58 }
 0x1b0   : > { %1150 = vrot.lane.b32.xlu1 %v13279_v16, %s7701_s16  ;;  %v1760_v35 = vsel %vm1741_vm8, %v1727_v40, %v1325_v33  ;;  %v13287_v16 = vld [vmem:[#allocation100_spill] sm:$0xff] }
 0x1b1   : > { %v9161_v19 = vpop.permute.xlu0 %1136  ;;  %v1629_v32 = vsel %vm1609_vm4, %v1596_v53, %v13287_v16  ;;  %v1793_v47 = vsel %vm1774_vm10, %v1760_v35, %v1421_v61  ;;  %v13291_v61 = vld [vmem:[#allocation95_spill] sm:$0xff] }
 0x1b2   : > { %v1485_v39 = vpop.permute.xlu1 %1484  ;;  %v1662_v17 = vsel %vm1642_vm5, %v1629_v32, %v8825_v20  ;;  %v13294_v32 = vld [vmem:[#allocation22_spill] sm:$0xff] }
 0x1b3   : > { %v1810_v23 = vsel %vm1807_vm9, %v1777_v34, %v1485_v39  ;;  %1528 = vrot.lane.b32.xlu0 %v13282_v42, %s7705_s21  ;;  %v13288_v39 = vld [vmem:[#allocation73_spill] sm:$0xff]  ;;  %v1695_v33 = vsel %vm1675_vm6, %v1662_v17, %v9078_v11 }
 0x1b4   : > { %1244 = vrot.lane.b32.xlu1 %v13282_v42, %s7702_s17  ;;  %7122 = vmatprep.mubr.msk.f32.mxu0 %vm1849_vm11, %v1810_v23  ;;  %v1580_v49 = vsel %vm1576_vm3, %v13289_v63, %v13288_v39  ;;  %v13290_v23 = vld [vmem:[#allocation58_spill] sm:$0xff]  ;;  %v1728_v20 = vsel %vm1708_vm7, %v1695_v33, %v1231_v15  ;;  %v13297_v39 = vld [vmem:[#allocation51_spill] sm:$0xff] }
 0x1b5   : > { %v1423_v14 = vpop.permute.xlu0 %1422  ;;  %v1613_v42 = vsel %vm1609_vm4, %v1580_v49, %v13291_v61  ;;  %v1761_v28 = vsel %vm1741_vm8, %v1728_v20, %v1327_v37  ;;  %v13298_v20 = vld [vmem:[#allocation77_spill] sm:$0xff] }
 0x1b6   : > { %v9179_v6 = vpop.permute.xlu1 %1138  ;;  %v1646_v7 = vsel %vm1642_vm5, %v1613_v42, %v13292_v52  ;;  %v1794_v40 = vsel %vm1774_vm10, %v1761_v28, %v1423_v14 }
 0x1b7   : > { %1212 = vrot.lane.b32.xlu0 %v13277_v0, %s7702_s17  ;;  %v1679_v11 = vsel %vm1675_vm6, %v1646_v7, %v8959_v9 }
 0x1b8   : > { %1530 = vrot.lane.b32.xlu1 %v13286_v18, %s7705_s21  ;;  %v1712_v53 = vsel %vm1708_vm7, %v1679_v11, %v1199_v51 }
 0x1b9   : > { %v1517_v36 = vpop.permute.xlu0 %1516  ;;  %v1745_v15 = vsel %vm1741_vm8, %v1712_v53, %v1295_v59 }
 0x1ba   : > { %v1826_v0 = vsel %vm1807_vm9, %v1793_v47, %v1517_v36  ;;  %v1233_v34 = vpop.permute.xlu1 %1232  ;;  %v1778_v37 = vsel %vm1774_vm10, %v1745_v15, %v1391_v8 }
 0x1bb   : > { %1498 = vrot.lane.b32.xlu0 %v13290_v23, %s7705_s21  ;;  %7146 = vmatprep.mubr.msk.f32.mxu1 %vm1849_vm11, %v1826_v0  ;;  %v1680_v0 = vsel %vm1675_vm6, %v8720_v46, %v8973_v45  ;;  %v1696_v45 = vsel %vm1675_vm6, %v8856_v31, %v9161_v19  ;;  %v1697_v31 = vsel %vm1675_vm6, %v8839_v44, %v9179_v6  ;;  %v13300_v19 = vld [vmem:[#allocation60_spill] sm:$0xff] }
 0x1bc   : > { %1246 = vrot.lane.b32.xlu1 %v13286_v18, %s7702_s17  ;;  %v1729_v7 = vsel %vm1708_vm7, %v1696_v45, %v1233_v34 }
 0x1bd   : > { %v1201_v60 = vpop.permute.xlu0 %1200 }
 0x1be   : > { %v1519_v58 = vpop.permute.xlu1 %1518  ;;  %v1713_v63 = vsel %vm1708_vm7, %v1680_v0, %v1201_v60  ;;  %v13299_v60 = vld [vmem:[#allocation76_spill] sm:$0xff] }
 0x1bf   : > { %v1827_v35 = vsel %vm1807_vm9, %v1794_v40, %v1519_v58  ;;  %1214 = vrot.lane.b32.xlu0 %v13290_v23, %s7702_s17 }
 0x1c0   : > { %1340 = vrot.lane.b32.xlu1 %v13236_v48, %s7703_s22  ;;  %7147 = vmatmul.mubr.msk.f32.gmra.mxu1 %vm1849_vm11, %v1827_v35  ;;  %v13293_v48 = vld [vmem:[#allocation49_spill] sm:$0xff] }
 0x1c1   : > { %v1487_v9 = vpop.permute.xlu0 %1486 }
 0x1c2   : > { %v1811_v14 = vsel %vm1807_vm9, %v1778_v37, %v1487_v9  ;;  %v1235_v18 = vpop.permute.xlu1 %1234  ;;  %v1681_v37 = vsel %vm1675_vm6, %v8700_v56, %v8967_v13 }
 0x1c3   : > { %1308 = vrot.lane.b32.xlu0 %v7962_v26, %s7703_s22  ;;  %7123 = vmatmul.mubr.msk.f32.gmra.mxu0 %vm1849_vm11, %v1811_v14  ;;  %v13295_v26 = vld [vmem:[#allocation27_spill] sm:$0xff]  ;;  %v1730_v34 = vsel %vm1708_vm7, %v1697_v31, %v1235_v18 }
 0x1c4   : > { %1342 = vrot.lane.b32.xlu1 %v13229_v24, %s7703_s22  ;;  %v13296_v24 = vld [vmem:[#allocation61_spill] sm:$0xff] }
 0x1c5   : > { %v1203_v51 = vpop.permute.xlu0 %1202 }
 0x1c6   : > { %v1329_v59 = vpop.permute.xlu1 %1328  ;;  %v1714_v6 = vsel %vm1708_vm7, %v1681_v37, %v1203_v51 }
 0x1c7   : > { %1310 = vrot.lane.b32.xlu0 %v7959_v25, %s7703_s22  ;;  %v1762_v28 = vsel %vm1741_vm8, %v1729_v7, %v1329_v59  ;;  %v13301_v59 = vld [vmem:[#allocation98_spill] sm:$0xff] }
 0x1c8   : > { %1436 = vrot.lane.b32.xlu1 %v13293_v48, %s7704_s10  ;;  %v798_v56 = vrot.slane %v13301_v59, 1 }
 0x1c9   : > { %v1297_v8 = vpop.permute.xlu0 %1296 }
 0x1ca   : > { %v1331_v16 = vpop.permute.xlu1 %1330  ;;  %v1746_v49 = vsel %vm1741_vm8, %v1713_v63, %v1297_v8  ;;  %v13306_v63 = vld [vmem:[#allocation29_spill] sm:$0xff] }
 0x1cb   : > { %1404 = vrot.lane.b32.xlu0 %v13294_v32, %s7704_s10  ;;  %v1763_v35 = vsel %vm1741_vm8, %v1730_v34, %v1331_v16 }
 0x1cc   : > { %1406 = vrot.lane.b32.xlu1 %v13295_v26, %s7704_s10 }
 0x1cd   : > { %v1299_v47 = vpop.permute.xlu0 %1298 }
 0x1ce   : > { %v1425_v36 = vpop.permute.xlu1 %1424  ;;  %v1747_v18 = vsel %vm1741_vm8, %v1714_v6, %v1299_v47 }
 0x1cf   : > { %1152 = vrot.lane.b32.xlu0 %v13293_v48, %s7701_s16  ;;  %v1795_v11 = vsel %vm1774_vm10, %v1762_v28, %v1425_v36  ;;  %v13302_v48 = vld [vmem:[#allocation97_spill] sm:$0xff]  ;;  %v1682_v28 = vsel %vm1675_vm6, %v8740_v22, %v8981_v54 }
 0x1d0   : > { %1500 = vrot.lane.b32.xlu1 %v13296_v24, %s7705_s21  ;;  %v799_v8 = vrot.slane %v13302_v48, 1 }
 0x1d1   : > { %v1393_v25 = vpop.permute.xlu0 %1392 }
 0x1d2   : > { %v1395_v17 = vpop.permute.xlu1 %1394  ;;  %v1779_v23 = vsel %vm1774_vm10, %v1746_v49, %v1393_v25  ;;  %v800_v47 = vsel %vm634_vm1, %v798_v56, %v799_v8  ;;  %v13303_v25 = vld [vmem:[#allocation93_spill] sm:$0xff] }
 0x1d3   : > { %1438 = vrot.lane.b32.xlu0 %v13297_v39, %s7704_s10  ;;  %v1780_v13 = vsel %vm1774_vm10, %v1747_v18, %v1395_v17  ;;  %v13304_v17 = vrot.slane %v13303_v25, 7 }
 0x1d4   : > { %1154 = vrot.lane.b32.xlu1 %v13297_v39, %s7701_s16  ;;  %v13305_v39 = vld [vmem:[#allocation26_spill] sm:$0xff] }
 0x1d5   : > { %v9252_v33 = vpop.permute.xlu0 %1140  ;;  %v601_v0 = vsel %vm468_vm0, %v13304_v17, 0.0 }
 0x1d6   : > { %v1489_v61 = vpop.permute.xlu1 %1488  ;;  %v801_v49 = vrot.slane %v601_v0, 1  ;;  %v806_v31 = vrot.slane %v601_v0, 2  ;;  %v13311_v0 = vld [vmem:[#allocation13_spill] sm:$0xff] }
 0x1d7   : > { %v1812_v42 = vsel %vm1807_vm9, %v1779_v23, %v1489_v61  ;;  %1532 = vrot.lane.b32.xlu0 %v13298_v20, %s7705_s21 }
 0x1d8   : > { %1248 = vrot.lane.b32.xlu1 %v13298_v20, %s7702_s17  ;;  %7125 = vmatprep.mubr.msk.f32.mxu0 %vm1849_vm11, %v1812_v42  ;;  %v803_v42 = vrot.slane %v13301_v59, 2  ;;  %v13307_v20 = vld [vmem:[#allocation63_spill] sm:$0xff] }
 0x1d9   : > { %v1427_v46 = vpop.permute.xlu0 %1426 }
 0x1da   : > { %v9264_v52 = vpop.permute.xlu1 %1142  ;;  %v1796_v9 = vsel %vm1774_vm10, %v1763_v35, %v1427_v46  ;;  %v802_v46 = vsel %vm634_vm1, %v799_v8, %v801_v49 }
 0x1db   : > { %1216 = vrot.lane.b32.xlu0 %v13296_v24, %s7702_s17 }
 0x1dc   : > { %1534 = vrot.lane.b32.xlu1 %v13299_v60, %s7705_s21 }
 0x1dd   : > { %v1521_v40 = vpop.permute.xlu0 %1520 }
 0x1de   : > { %v1828_v58 = vsel %vm1807_vm9, %v1795_v11, %v1521_v40  ;;  %v9274_v53 = vpop.permute.xlu1 %1236 }
 0x1df   : > { %1502 = vrot.lane.b32.xlu0 %v13300_v19, %s7705_s21  ;;  %7149 = vmatprep.mubr.msk.f32.mxu1 %vm1849_vm11, %v1828_v58 }
 0x1e0   : > { %1250 = vrot.lane.b32.xlu1 %v13299_v60, %s7702_s17 }
 0x1e1   : > { %v1205_v15 = vpop.permute.xlu0 %1204 }
 0x1e2   : > { %v1523_v44 = vpop.permute.xlu1 %1522  ;;  %v1715_v60 = vsel %vm1708_vm7, %v1682_v28, %v1205_v15  ;;  %v1698_v15 = vsel %vm1675_vm6, %v8876_v1, %v9252_v33  ;;  %v1699_v1 = vsel %vm1675_vm6, %v8859_v38, %v9264_v52  ;;  %v13308_v33 = vld [vmem:[#allocation62_spill] sm:$0xff] }
 0x1e3   : > { %v1829_v14 = vsel %vm1807_vm9, %v1796_v9, %v1523_v44  ;;  %1218 = vrot.lane.b32.xlu0 %v13300_v19, %s7702_s17  ;;  %v1731_v9 = vsel %vm1708_vm7, %v1698_v15, %v9274_v53 }
 0x1e4   : > { %1344 = vrot.lane.b32.xlu1 %v13301_v59, %s7703_s22  ;;  %7150 = vmatmul.mubr.msk.f32.gmra.mxu1 %vm1849_vm11, %v1829_v14 }
 0x1e5   : > { %v1491_v16 = vpop.permute.xlu0 %1490 }
 0x1e6   : > { %v1813_v51 = vsel %vm1807_vm9, %v1780_v13, %v1491_v16  ;;  %v1239_v32 = vpop.permute.xlu1 %1238  ;;  %v1683_v13 = vsel %vm1675_vm6, %v8723_v62, %v8975_v27 }
 0x1e7   : > { %1312 = vrot.lane.b32.xlu0 %v13262_v12, %s7703_s22  ;;  %7126 = vmatmul.mubr.msk.f32.gmra.mxu0 %vm1849_vm11, %v1813_v51  ;;  %v1732_v53 = vsel %vm1708_vm7, %v1699_v1, %v1239_v32 }
 0x1e8   : > { %1346 = vrot.lane.b32.xlu1 %v13302_v48, %s7703_s22 }
 0x1e9   : > { %v1207_v26 = vpop.permute.xlu0 %1206 }
 0x1ea   : > { %v1333_v36 = vpop.permute.xlu1 %1332  ;;  %v1716_v16 = vsel %vm1708_vm7, %v1683_v13, %v1207_v26  ;;  %v13309_v26 = vld [vmem:[#allocation28_spill] sm:$0xff]  ;;  %v1686_v13 = vsel %vm1675_vm6, %v8780_v41, %v8997_v50 }
 0x1eb   : > { %1314 = vrot.lane.b32.xlu0 %v13266_v43, %s7703_s22  ;;  %v804_v43 = vrot.slane %v13302_v48, 2  ;;  %v1764_v44 = vsel %vm1741_vm8, %v1731_v9, %v1333_v36  ;;  %v7454_v48 = vpack.i.bf16 %v13269_v3, %v13257_v57 }
 0x1ec   : > { %1440 = vrot.lane.b32.xlu1 %v800_v47, %s7704_s10 }
 0x1ed   : > { %v1301_v24 = vpop.permute.xlu0 %1300  ;;  %v805_v11 = vsel %vm715_vm2, %v803_v42, %v804_v43  ;;  %v807_v54 = vsel %vm715_vm2, %v804_v43, %v806_v31 }
 0x1ee   : > { %v1335_v12 = vpop.permute.xlu1 %1334  ;;  %v1748_v40 = vsel %vm1741_vm8, %v1715_v60, %v1301_v24  ;;  %v13310_v24 = vld [vmem:[#allocation33_spill] sm:$0xff] }
 0x1ef   : > { %1408 = vrot.lane.b32.xlu0 %v13305_v39, %s7704_s10  ;;  %v1765_v8 = vsel %vm1741_vm8, %v1732_v53, %v1335_v12 }
 0x1f0   : > { %1410 = vrot.lane.b32.xlu1 %v13306_v63, %s7704_s10  ;;  %v13313_v63 = vld [vmem:[#allocation65_spill] sm:$0xff] }
 0x1f1   : > { %v1303_v23 = vpop.permute.xlu0 %1302 }
 0x1f2   : > { %v1429_v61 = vpop.permute.xlu1 %1428  ;;  %v1749_v32 = vsel %vm1741_vm8, %v1716_v16, %v1303_v23 }
 0x1f3   : > { %1156 = vrot.lane.b32.xlu0 %v800_v47, %s7701_s16  ;;  %v1797_v6 = vsel %vm1774_vm10, %v1764_v44, %v1429_v61  ;;  %v13314_v61 = vld [vmem:[#allocation64_spill] sm:$0xff] }
 0x1f4   : > { %1504 = vrot.lane.b32.xlu1 %v13307_v20, %s7705_s21 }
 0x1f5   : > { %v1397_v45 = vpop.permute.xlu0 %1396 }
 0x1f6   : > { %v1399_v7 = vpop.permute.xlu1 %1398  ;;  %v1781_v19 = vsel %vm1774_vm10, %v1748_v40, %v1397_v45 }
 0x1f7   : > { %1442 = vrot.lane.b32.xlu0 %v802_v46, %s7704_s10  ;;  %v1782_v57 = vsel %vm1774_vm10, %v1749_v32, %v1399_v7 }
 0x1f8   : > { %1158 = vrot.lane.b32.xlu1 %v802_v46, %s7701_s16 }
 0x1f9   : > { %v9332_v58 = vpop.permute.xlu0 %1144 }
 0x1fa   : > { %v1493_v34 = vpop.permute.xlu1 %1492 }
 0x1fb   : > { %v1814_v35 = vsel %vm1807_vm9, %v1781_v19, %v1493_v34  ;;  %1536 = vrot.lane.b32.xlu0 %v805_v11, %s7705_s21 }
 0x1fc   : > { %1252 = vrot.lane.b32.xlu1 %v805_v11, %s7702_s17  ;;  %7128 = vmatprep.mubr.msk.f32.mxu0 %vm1849_vm11, %v1814_v35 }
 0x1fd   : > { %v1431_v22 = vpop.permute.xlu0 %1430 }
 0x1fe   : > { %v9343_v37 = vpop.permute.xlu1 %1146  ;;  %v1798_v38 = vsel %vm1774_vm10, %v1765_v8, %v1431_v22 }
 0x1ff   : > { %1220 = vrot.lane.b32.xlu0 %v13307_v20, %s7702_s17  ;;  %v1701_v35 = vsel %vm1675_vm6, %v8879_v10, %v9343_v37 }
 0x200   : > { %1538 = vrot.lane.b32.xlu1 %v807_v54, %s7705_s21 }
 0x201   : > { %v1525_v14 = vpop.permute.xlu0 %1524 }
 0x202   : > { %v1830_v18 = vsel %vm1807_vm9, %v1797_v6, %v1525_v14  ;;  %v1241_v59 = vpop.permute.xlu1 %1240 }
 0x203   : > { %1506 = vrot.lane.b32.xlu0 %v13308_v33, %s7705_s21  ;;  %7152 = vmatprep.mubr.msk.f32.mxu1 %vm1849_vm11, %v1830_v18 }
 0x204   : > { %1254 = vrot.lane.b32.xlu1 %v807_v54, %s7702_s17  ;;  %v1685_v54 = vsel %vm1675_vm6, %v8743_v5, %v8983_v30 }
 0x205   : > { %v1209_v56 = vpop.permute.xlu0 %1208 }
 0x206   : > { %v1527_v52 = vpop.permute.xlu1 %1526 }
 0x207   : > { %v1831_v51 = vsel %vm1807_vm9, %v1798_v38, %v1527_v52  ;;  %1222 = vrot.lane.b32.xlu0 %v13308_v33, %s7702_s17 }
 0x208   : > { %7455 = vrot.lane.b32.xlu1 %v7454_v48, %s7703_s22  ;;  %7153 = vmatmul.mubr.msk.f32.gmra.mxu1 %vm1849_vm11, %v1831_v51 }
 0x209   : > { %v1495_v3 = vpop.permute.xlu0 %1494 }
 0x20a   : > { %v1815_v62 = vsel %vm1807_vm9, %v1782_v57, %v1495_v3  ;;  %v1243_v27 = vpop.permute.xlu1 %1242 }
 0x20b   : > { %1316 = vrot.lane.b32.xlu0 %v13281_v29, %s7703_s22  ;;  %7129 = vmatmul.mubr.msk.f32.gmra.mxu0 %vm1849_vm11, %v1815_v62  ;;  %v13312_v29 = vld [vmem:[#allocation34_spill] sm:$0xff]  ;;  %v1734_v22 = vsel %vm1708_vm7, %v1701_v35, %v1243_v27  ;;  %v13315_v62 = vld [vmem:[#allocation85_spill] sm:$0xff] }
 0x20c   : > { %1412 = vrot.lane.b32.xlu1 %v13309_v26, %s7704_s10 }
 0x20d   : > { %v1211_v47 = vpop.permute.xlu0 %1210 }
 0x20e   : > { %v1337_v36 = vpop.permute.xlu1 %1336  ;;  %v1718_v44 = vsel %vm1708_vm7, %v1685_v54, %v1211_v47  ;;  %v13319_v54 = vld [vmem:[#allocation32_spill] sm:$0xff] }
 0x20f   : > { %1318 = vrot.lane.b32.xlu0 %v13285_v2, %s7703_s22  ;;  %v1684_v2 = vsel %vm1675_vm6, %v8760_v21, %v8989_v55  ;;  %v1700_v21 = vsel %vm1675_vm6, %v8896_v4, %v9332_v58 }
 0x210   : > { %1414 = vrot.lane.b32.xlu1 %v13310_v24, %s7704_s10  ;;  %v1717_v43 = vsel %vm1708_vm7, %v1684_v2, %v1209_v56  ;;  %v1733_v60 = vsel %vm1708_vm7, %v1700_v21, %v1241_v59 }
 0x211   : > { %v1305_v25 = vpop.permute.xlu0 %1304  ;;  %v1766_v11 = vsel %vm1741_vm8, %v1733_v60, %v1337_v36 }
 0x212   : > { %v1339_v17 = vpop.permute.xlu1 %1338  ;;  %v1750_v42 = vsel %vm1741_vm8, %v1717_v43, %v1305_v25 }
 0x213   : > { %7460 = vrot.lane.b32.xlu0 %v13311_v0, %s7704_s10  ;;  %v1767_v4 = vsel %vm1741_vm8, %v1734_v22, %v1339_v17  ;;  %v13316_v17 = vld [vmem:[#allocation35_spill] sm:$0xff] }
 0x214   : > { %7465 = vrot.lane.b32.xlu1 %v13312_v29, %s7705_s21 }
 0x215   : > { %v1307_v12 = vpop.permute.xlu0 %1306 }
 0x216   : > { %v1433_v39 = vpop.permute.xlu1 %1432  ;;  %v1751_v10 = vsel %vm1741_vm8, %v1718_v44, %v1307_v12 }
 0x217   : > { %1508 = vrot.lane.b32.xlu0 %v13313_v63, %s7705_s21  ;;  %v1799_v40 = vsel %vm1774_vm10, %v1766_v11, %v1433_v39  ;;  %v13317_v63 = vld [vmem:[#allocation42_spill] sm:$0xff] }
 0x219   : > { %v1401_v49 = vpop.permute.xlu0 %1400 }
 0x21a   : > { %v1403_v23 = vpop.permute.xlu1 %1402  ;;  %v1783_v46 = vsel %vm1774_vm10, %v1750_v42, %v1401_v49  ;;  %v13318_v49 = vld [vmem:[#allocation38_spill] sm:$0xff] }
 0x21b   : > { %1510 = vrot.lane.b32.xlu0 %v13314_v61, %s7705_s21  ;;  %v1784_v37 = vsel %vm1774_vm10, %v1751_v10, %v1403_v23  ;;  %v1687_v23 = vsel %vm1675_vm6, %v13318_v49, %v13317_v63 }
 0x21d   : > { %v1149_v20 = vpop.permute.xlu0 %1148 }
 0x21e   : > { %v1497_v45 = vpop.permute.xlu1 %1496  ;;  %v1702_v27 = vsel %vm1675_vm6, %v13315_v62, %v1149_v20 }
 0x21f   : > { %v1816_v7 = vsel %vm1807_vm9, %v1783_v46, %v1497_v45 }
 0x220   : > { %7131 = vmatprep.mubr.msk.f32.mxu0 %vm1849_vm11, %v1816_v7 }
 0x221   : > { %v1435_v28 = vpop.permute.xlu0 %1434 }
 0x222   : > { %v1151_v55 = vpop.permute.xlu1 %1150  ;;  %v1800_v15 = vsel %vm1774_vm10, %v1767_v4, %v1435_v28 }
 0x223   : > { %v1703_v0 = vsel %vm1675_vm6, %v13316_v17, %v1151_v55 }
 0x225   : > { %v1529_v31 = vpop.permute.xlu0 %1528 }
 0x226   : > { %v1832_v19 = vsel %vm1807_vm9, %v1799_v40, %v1529_v31  ;;  %v1245_v34 = vpop.permute.xlu1 %1244 }
 0x227   : > { %7155 = vmatprep.mubr.msk.f32.mxu1 %vm1849_vm11, %v1832_v19  ;;  %v1735_v47 = vsel %vm1708_vm7, %v1702_v27, %v1245_v34 }
 0x229   : > { %v1213_v58 = vpop.permute.xlu0 %1212 }
 0x22a   : > { %v1531_v9 = vpop.permute.xlu1 %1530  ;;  %v1719_v38 = vsel %vm1708_vm7, %v1686_v13, %v1213_v58 }
 0x22b   : > { %v1833_v6 = vsel %vm1807_vm9, %v1800_v15, %v1531_v9  ;;  %v13320_v15 = vld [vmem:[#allocation111_spill] sm:$0xff] }
 0x22c   : > { %7156 = vmatmul.mubr.msk.f32.gmra.mxu1 %vm1849_vm11, %v1833_v6  ;;  %v1688_v9 = vsel %vm1675_vm6, %v13320_v15, %v13319_v54 }
 0x22d   : > { %v1499_v14 = vpop.permute.xlu0 %1498 }
 0x22e   : > { %v1817_v18 = vsel %vm1807_vm9, %v1784_v37, %v1499_v14  ;;  %v1247_v59 = vpop.permute.xlu1 %1246 }
 0x22f   : > { %7132 = vmatmul.mubr.msk.f32.gmra.mxu0 %vm1849_vm11, %v1817_v18  ;;  %v1736_v29 = vsel %vm1708_vm7, %v1703_v0, %v1247_v59 }
 0x231   : > { %v1215_v5 = vpop.permute.xlu0 %1214 }
 0x232   : > { %v1341_v30 = vpop.permute.xlu1 %1340  ;;  %v1720_v43 = vsel %vm1708_vm7, %v1687_v23, %v1215_v5  ;;  %v13321_v5 = vld [vmem:[#allocation53_spill] sm:$0xff] }
 0x233   : > { %v1768_v41 = vsel %vm1741_vm8, %v1735_v47, %v1341_v30 }
 0x235   : > { %v1309_v1 = vpop.permute.xlu0 %1308 }
 0x236   : > { %v1343_v33 = vpop.permute.xlu1 %1342  ;;  %v1752_v52 = vsel %vm1741_vm8, %v1719_v38, %v1309_v1  ;;  %v13322_v38 = vld [vmem:[#allocation83_spill] sm:$0xff] }
 0x237   : > { %v1769_v12 = vsel %vm1741_vm8, %v1736_v29, %v1343_v33 }
 0x239   : > { %v1311_v53 = vpop.permute.xlu0 %1310 }
 0x23a   : > { %v1437_v48 = vpop.permute.xlu1 %1436  ;;  %v1753_v20 = vsel %vm1741_vm8, %v1720_v43, %v1311_v53 }
 0x23b   : > { %v1801_v50 = vsel %vm1774_vm10, %v1768_v41, %v1437_v48 }
 0x23d   : > { %v1405_v8 = vpop.permute.xlu0 %1404 }
 0x23e   : > { %v1407_v56 = vpop.permute.xlu1 %1406  ;;  %v1785_v51 = vsel %vm1774_vm10, %v1752_v52, %v1405_v8 }
 0x23f   : > { %v1786_v46 = vsel %vm1774_vm10, %v1753_v20, %v1407_v56  ;;  %v13325_v20 = vld [vmem:[#allocation36_spill] sm:$0xff] }
 0x241   : > { %v1153_v16 = vpop.permute.xlu0 %1152 }
 0x242   : > { %v1501_v32 = vpop.permute.xlu1 %1500  ;;  %v1704_v30 = vsel %vm1675_vm6, %v13321_v5, %v1153_v16 }
 0x243   : > { %v1818_v57 = vsel %vm1807_vm9, %v1785_v51, %v1501_v32 }
 0x244   : > { %7134 = vmatprep.mubr.msk.f32.mxu0 %vm1849_vm11, %v1818_v57  ;;  %v13323_v57 = vld [vmem:[#allocation84_spill] sm:$0xff] }
 0x245   : > { %v1439_v3 = vpop.permute.xlu0 %1438 }
 0x246   : > { %v1155_v26 = vpop.permute.xlu1 %1154  ;;  %v1802_v2 = vsel %vm1774_vm10, %v1769_v12, %v1439_v3  ;;  %v13324_v3 = vld [vmem:[#allocation110_spill] sm:$0xff] }
 0x247   : > { %v1705_v52 = vsel %vm1675_vm6, %v13322_v38, %v1155_v26  ;;  %v1689_v62 = vsel %vm1675_vm6, %v13324_v3, %v13323_v57 }
 0x249   : > { %v1533_v36 = vpop.permute.xlu0 %1532 }
 0x24a   : > { %v1834_v24 = vsel %vm1807_vm9, %v1801_v50, %v1533_v36  ;;  %v1249_v25 = vpop.permute.xlu1 %1248 }
 0x24b   : > { %7158 = vmatprep.mubr.msk.f32.mxu1 %vm1849_vm11, %v1834_v24  ;;  %v1737_v33 = vsel %vm1708_vm7, %v1704_v30, %v1249_v25 }
 0x24d   : > { %v1217_v39 = vpop.permute.xlu0 %1216 }
 0x24e   : > { %v1535_v61 = vpop.permute.xlu1 %1534  ;;  %v1721_v44 = vsel %vm1708_vm7, %v1688_v9, %v1217_v39 }
 0x24f   : > { %v1835_v42 = vsel %vm1807_vm9, %v1802_v2, %v1535_v61 }
 0x250   : > { %7159 = vmatmul.mubr.msk.f32.gmra.mxu1 %vm1849_vm11, %v1835_v42 }
 0x251   : > { %v1503_v45 = vpop.permute.xlu0 %1502 }
 0x252   : > { %v1819_v7 = vsel %vm1807_vm9, %v1786_v46, %v1503_v45  ;;  %v1251_v28 = vpop.permute.xlu1 %1250  ;;  %v13326_v46 = vld [vmem:[#allocation113_spill] sm:$0xff] }
 0x253   : > { %7135 = vmatmul.mubr.msk.f32.gmra.mxu0 %vm1849_vm11, %v1819_v7  ;;  %v1738_v51 = vsel %vm1708_vm7, %v1705_v52, %v1251_v28  ;;  %v1690_v45 = vsel %vm1675_vm6, %v13326_v46, %v13325_v20  ;;  %v13327_v7 = vld [vmem:[#allocation31_spill] sm:$0xff] }
 0x255   : > { %v1219_v21 = vpop.permute.xlu0 %1218 }
 0x256   : > { %v1345_v55 = vpop.permute.xlu1 %1344  ;;  %v1722_v41 = vsel %vm1708_vm7, %v1689_v62, %v1219_v21  ;;  %v13328_v21 = vld [vmem:[#allocation87_spill] sm:$0xff]  ;;  %v6810_v62 = vld [vmem:[%s12826_s8] ss:$0 sm:$0xff] }
 0x257   : > { %v1770_v53 = vsel %vm1741_vm8, %v1737_v33, %v1345_v55  ;;  %2210 = vst.msk [vmem:[#allocation3] sm:$0xff] %vm1576_vm3, %v6810_v62  ;;  %2211 = vst.msk [vmem:[#allocation3 + $0x8] sm:$0xff] %vm1576_vm3, %v6810_v62 }
 0x258   : > { %2212 = vst.msk [vmem:[#allocation3 + $0x10] sm:$0xff] %vm1576_vm3, %v6810_v62  ;;  %2213 = vst.msk [vmem:[#allocation3 + $0x18] sm:$0xff] %vm1576_vm3, %v6810_v62 }
 0x259   : > { %v1313_v60 = vpop.permute.xlu0 %1312  ;;  %2214 = vst.msk [vmem:[#allocation3 + $0x20] sm:$0xff] %vm1576_vm3, %v6810_v62  ;;  %2215 = vst.msk [vmem:[#allocation3 + $0x28] sm:$0xff] %vm1576_vm3, %v6810_v62 }
 0x25a   : > { %v1347_v11 = vpop.permute.xlu1 %1346  ;;  %v1754_v6 = vsel %vm1741_vm8, %v1721_v44, %v1313_v60  ;;  %v13329_v44 = vld [vmem:[#allocation89_spill] sm:$0xff]  ;;  %2216 = vst.msk [vmem:[#allocation3 + $0x30] sm:$0xff] %vm1576_vm3, %v6810_v62  ;;  %2217 = vst.msk [vmem:[#allocation3 + $0x38] sm:$0xff] %vm1576_vm3, %v6810_v62 }
 0x25b   : > { %v1771_v16 = vsel %vm1741_vm8, %v1738_v51, %v1347_v11  ;;  %2218 = vst.msk [vmem:[#allocation3 + $0x40] sm:$0xff] %vm1576_vm3, %v6810_v62  ;;  %2219 = vst.msk [vmem:[#allocation3 + $0x48] sm:$0xff] %vm1576_vm3, %v6810_v62 }
 0x25c   : > { %v7145_v40 = vpop.f32.mrf.mxu1  ;;  %2220 = vst.msk [vmem:[#allocation3 + $0x50] sm:$0xff] %vm1576_vm3, %v6810_v62  ;;  %2221 = vst.msk [vmem:[#allocation3 + $0x58] sm:$0xff] %vm1576_vm3, %v6810_v62 }
 0x25d   : > { %2188 = vst.msk [vmem:[#allocation2 + $0x88] sm:$0xff] %vm1576_vm3, %v7145_v40  ;;  %v1315_v31 = vpop.permute.xlu0 %1314  ;;  %2222 = vst.msk [vmem:[#allocation3 + $0x60] sm:$0xff] %vm1576_vm3, %v6810_v62 }
 0x25e   : > { %v1441_v19 = vpop.permute.xlu1 %1440  ;;  %v2092_v34 = vpop.f32.mrf.mxu1  ;;  %v1755_v26 = vsel %vm1741_vm8, %v1722_v41, %v1315_v31  ;;  %2223 = vst.msk [vmem:[#allocation3 + $0x68] sm:$0xff] %vm1576_vm3, %v6810_v62  ;;  %2224 = vst.msk [vmem:[#allocation3 + $0x70] sm:$0xff] %vm1576_vm3, %v6810_v62 }
 0x25f   : > { %v7121_v35 = vpop.f32.mrf.mxu0  ;;  %2187 = vst.msk [vmem:[#allocation2 + $0x80] sm:$0xff] %vm1576_vm3, %v2092_v34  ;;  %v1803_v48 = vsel %vm1774_vm10, %v1770_v53, %v1441_v19  ;;  %2225 = vst.msk [vmem:[#allocation3 + $0x78] sm:$0xff] %vm1576_vm3, %v6810_v62 }
 0x260   : > { %2172 = vst.msk [vmem:[#allocation2 + $0x8] sm:$0xff] %vm1576_vm3, %v7121_v35  ;;  %2226 = vst.msk [vmem:[#allocation3 + $0x80] sm:$0xff] %vm1576_vm3, %v6810_v62 }
 0x261   : > { %v2012_v22 = vpop.f32.mrf.mxu0  ;;  %v1409_v4 = vpop.permute.xlu0 %1408  ;;  %2227 = vst.msk [vmem:[#allocation3 + $0x88] sm:$0xff] %vm1576_vm3, %v6810_v62  ;;  %2228 = vst.msk [vmem:[#allocation3 + $0x90] sm:$0xff] %vm1576_vm3, %v6810_v62 }
 0x262   : > { %2171 = vst.msk [vmem:[#allocation2] sm:$0xff] %vm1576_vm3, %v2012_v22  ;;  %v1411_v58 = vpop.permute.xlu1 %1410  ;;  %v1787_v37 = vsel %vm1774_vm10, %v1754_v6, %v1409_v4  ;;  %v13330_v6 = vld [vmem:[#allocation112_spill] sm:$0xff]  ;;  %2229 = vst.msk [vmem:[#allocation3 + $0x98] sm:$0xff] %vm1576_vm3, %v6810_v62 }
 0x263   : > { %v1788_v36 = vsel %vm1774_vm10, %v1755_v26, %v1411_v58  ;;  %2230 = vst.msk [vmem:[#allocation3 + $0xa0] sm:$0xff] %vm1576_vm3, %v6810_v62  ;;  %2231 = vst.msk [vmem:[#allocation3 + $0xa8] sm:$0xff] %vm1576_vm3, %v6810_v62 }
 0x264   : > { %2232 = vst.msk [vmem:[#allocation3 + $0xb0] sm:$0xff] %vm1576_vm3, %v6810_v62  ;;  %2233 = vst.msk [vmem:[#allocation3 + $0xb8] sm:$0xff] %vm1576_vm3, %v6810_v62 }
 0x265   : > { %v1157_v10 = vpop.permute.xlu0 %1156  ;;  %2234 = vst.msk [vmem:[#allocation3 + $0xc0] sm:$0xff] %vm1576_vm3, %v6810_v62  ;;  %2235 = vst.msk [vmem:[#allocation3 + $0xc8] sm:$0xff] %vm1576_vm3, %v6810_v62 }
 0x266   : > { %v1505_v14 = vpop.permute.xlu1 %1504  ;;  %v1706_v28 = vsel %vm1675_vm6, %v13327_v7, %v1157_v10  ;;  %v1691_v10 = vsel %vm1675_vm6, %v13330_v6, %v13329_v44  ;;  %2236 = vst.msk [vmem:[#allocation3 + $0xd0] sm:$0xff] %vm1576_vm3, %v6810_v62  ;;  %2237 = vst.msk [vmem:[#allocation3 + $0xd8] sm:$0xff] %vm1576_vm3, %v6810_v62 }
 0x267   : > { %v1820_v18 = vsel %vm1807_vm9, %v1787_v37, %v1505_v14  ;;  %2238 = vst.msk [vmem:[#allocation3 + $0xe0] sm:$0xff] %vm1576_vm3, %v6810_v62  ;;  %2239 = vst.msk [vmem:[#allocation3 + $0xe8] sm:$0xff] %vm1576_vm3, %v6810_v62 }
 0x268   : > { %7137 = vmatprep.mubr.msk.f32.mxu0 %vm1849_vm11, %v1820_v18  ;;  %2240 = vst.msk [vmem:[#allocation3 + $0xf0] sm:$0xff] %vm1576_vm3, %v6810_v62  ;;  %2241 = vst.msk [vmem:[#allocation3 + $0xf8] sm:$0xff] %vm1576_vm3, %v6810_v62 }
 0x269   : > { %v1443_v59 = vpop.permute.xlu0 %1442 }
 0x26a   : > { %v1159_v1 = vpop.permute.xlu1 %1158  ;;  %v1804_v27 = vsel %vm1774_vm10, %v1771_v16, %v1443_v59 }
 0x26b   : > { %v1707_v55 = vsel %vm1675_vm6, %v13328_v21, %v1159_v1 }
 0x26d   : > { %v1537_v8 = vpop.permute.xlu0 %1536 }
 0x26e   : > { %v1836_v56 = vsel %vm1807_vm9, %v1803_v48, %v1537_v8  ;;  %v1253_v13 = vpop.permute.xlu1 %1252 }
 0x26f   : > { %7161 = vmatprep.mubr.msk.f32.mxu1 %vm1849_vm11, %v1836_v56  ;;  %v1739_v60 = vsel %vm1708_vm7, %v1706_v28, %v1253_v13 }
 0x271   : > { %v1221_v32 = vpop.permute.xlu0 %1220 }
 0x272   : > { %v1539_v47 = vpop.permute.xlu1 %1538  ;;  %v1723_v11 = vsel %vm1708_vm7, %v1690_v45, %v1221_v32 }
 0x273   : > { %v1837_v50 = vsel %vm1807_vm9, %v1804_v27, %v1539_v47 }
 0x274   : > { %7162 = vmatmul.mubr.msk.f32.gmra.mxu1 %vm1849_vm11, %v1837_v50 }
 0x275   : > { %v1507_v24 = vpop.permute.xlu0 %1506 }
 0x276   : > { %v1821_v25 = vsel %vm1807_vm9, %v1788_v36, %v1507_v24  ;;  %v1255_v17 = vpop.permute.xlu1 %1254 }
 0x277   : > { %7138 = vmatmul.mubr.msk.f32.gmra.mxu0 %vm1849_vm11, %v1821_v25  ;;  %v1740_v19 = vsel %vm1708_vm7, %v1707_v55, %v1255_v17 }
 0x279   : > { %v1223_v0 = vpop.permute.xlu0 %1222 }
 0x27a   : > { %v7456_v29 = vpop.permute.xlu1 %7455  ;;  %v1724_v18 = vsel %vm1708_vm7, %v1691_v10, %v1223_v0 }
 0x27b   : > { %v7458_v61 = vunpack.i.h.bf16 %v7456_v29  ;;  %v7457_v43 = vunpack.i.l.bf16 %v7456_v29 }
 0x27d   : > { %v1317_v12 = vpop.permute.xlu0 %1316  ;;  %v1772_v58 = vsel %vm1741_vm8, %v1739_v60, %v7457_v43  ;;  %v1773_v54 = vsel %vm1741_vm8, %v1740_v19, %v7458_v61 }
 0x27e   : > { %v1413_v39 = vpop.permute.xlu1 %1412  ;;  %v1756_v34 = vsel %vm1741_vm8, %v1723_v11, %v1317_v12 }
 0x27f   : > { %v1789_v59 = vsel %vm1774_vm10, %v1756_v34, %v1413_v39 }
 0x280   : > { %v7148_v63 = vpop.f32.mrf.mxu1 }
 0x281   : > { %2190 = vst.msk [vmem:[#allocation2 + $0x98] sm:$0xff] %vm1576_vm3, %v7148_v63  ;;  %v1319_v49 = vpop.permute.xlu0 %1318 }
 0x282   : > { %v1415_v23 = vpop.permute.xlu1 %1414  ;;  %v2102_v2 = vpop.f32.mrf.mxu1  ;;  %v1757_v33 = vsel %vm1741_vm8, %v1724_v18, %v1319_v49 }
 0x283   : > { %v7124_v42 = vpop.f32.mrf.mxu0  ;;  %2189 = vst.msk [vmem:[#allocation2 + $0x90] sm:$0xff] %vm1576_vm3, %v2102_v2  ;;  %v1790_v48 = vsel %vm1774_vm10, %v1757_v33, %v1415_v23 }
 0x284   : > { %2174 = vst.msk [vmem:[#allocation2 + $0x18] sm:$0xff] %vm1576_vm3, %v7124_v42 }
 0x285   : > { %v2022_v40 = vpop.f32.mrf.mxu0  ;;  %v7461_v31 = vpop.permute.xlu0 %7460 }
 0x286   : > { %2173 = vst.msk [vmem:[#allocation2 + $0x10] sm:$0xff] %vm1576_vm3, %v2022_v40  ;;  %v7463_v35 = vunpack.i.h.bf16 %v7461_v31  ;;  %v7462_v22 = vunpack.i.l.bf16 %v7461_v31  ;;  %v7466_v4 = vpop.permute.xlu1 %7465 }
 0x287   : > { %v7468_v15 = vunpack.i.h.bf16 %v7466_v4  ;;  %v7467_v9 = vunpack.i.l.bf16 %v7466_v4 }
 0x288   : > { %v1805_v37 = vsel %vm1774_vm10, %v1772_v58, %v7462_v22  ;;  %v1806_v14 = vsel %vm1774_vm10, %v1773_v54, %v7463_v35 }
 0x289   : > { %v1509_v5 = vpop.permute.xlu0 %1508  ;;  %v1838_v30 = vsel %vm1807_vm9, %v1805_v37, %v7467_v9  ;;  %v1839_v1 = vsel %vm1807_vm9, %v1806_v14, %v7468_v15 }
 0x28a   : > { %v1822_v53 = vsel %vm1807_vm9, %v1789_v59, %v1509_v5  ;;  %7164 = vmatprep.mubr.msk.f32.mxu1 %vm1849_vm11, %v1838_v30 }
 0x28b   : > { %7140 = vmatprep.mubr.msk.f32.mxu0 %vm1849_vm11, %v1822_v53  ;;  %7165 = vmatmul.mubr.msk.f32.gmra.mxu1 %vm1849_vm11, %v1839_v1 }
 0x28d   : > { %v1511_v8 = vpop.permute.xlu0 %1510 }
 0x28e   : > { %v1823_v56 = vsel %vm1807_vm9, %v1790_v48, %v1511_v8 }
 0x28f   : > { %7141 = vmatmul.mubr.msk.f32.gmra.mxu0 %vm1849_vm11, %v1823_v56 }
 0x2a4   : > { %v7151_v13 = vpop.f32.mrf.mxu1 }
 0x2a5   : > { %2192 = vst.msk [vmem:[#allocation2 + $0xa8] sm:$0xff] %vm1576_vm3, %v7151_v13 }
 0x2a6   : > { %v2112_v38 = vpop.f32.mrf.mxu1 }
 0x2a7   : > { %v7127_v52 = vpop.f32.mrf.mxu0  ;;  %2191 = vst.msk [vmem:[#allocation2 + $0xa0] sm:$0xff] %vm1576_vm3, %v2112_v38 }
 0x2a8   : > { %2176 = vst.msk [vmem:[#allocation2 + $0x28] sm:$0xff] %vm1576_vm3, %v7127_v52 }
 0x2a9   : > { %v2032_v51 = vpop.f32.mrf.mxu0 }
 0x2aa   : > { %2175 = vst.msk [vmem:[#allocation2 + $0x20] sm:$0xff] %vm1576_vm3, %v2032_v51 }
 0x2c8   : > { %v7154_v16 = vpop.f32.mrf.mxu1 }
 0x2c9   : > { %2194 = vst.msk [vmem:[#allocation2 + $0xb8] sm:$0xff] %vm1576_vm3, %v7154_v16 }
 0x2ca   : > { %v2122_v32 = vpop.f32.mrf.mxu1 }
 0x2cb   : > { %v7130_v57 = vpop.f32.mrf.mxu0  ;;  %2193 = vst.msk [vmem:[#allocation2 + $0xb0] sm:$0xff] %vm1576_vm3, %v2122_v32 }
 0x2cc   : > { %2178 = vst.msk [vmem:[#allocation2 + $0x38] sm:$0xff] %vm1576_vm3, %v7130_v57 }
 0x2cd   : > { %v2042_v3 = vpop.f32.mrf.mxu0 }
 0x2ce   : > { %2177 = vst.msk [vmem:[#allocation2 + $0x30] sm:$0xff] %vm1576_vm3, %v2042_v3 }
 0x2ec   : > { %v7157_v27 = vpop.f32.mrf.mxu1 }
 0x2ed   : > { %2196 = vst.msk [vmem:[#allocation2 + $0xc8] sm:$0xff] %vm1576_vm3, %v7157_v27 }
 0x2ee   : > { %v2132_v47 = vpop.f32.mrf.mxu1 }
 0x2ef   : > { %v7133_v41 = vpop.f32.mrf.mxu0  ;;  %2195 = vst.msk [vmem:[#allocation2 + $0xc0] sm:$0xff] %vm1576_vm3, %v2132_v47 }
 0x2f0   : > { %2180 = vst.msk [vmem:[#allocation2 + $0x48] sm:$0xff] %vm1576_vm3, %v7133_v41 }
 0x2f1   : > { %v2052_v50 = vpop.f32.mrf.mxu0 }
 0x2f2   : > { %2179 = vst.msk [vmem:[#allocation2 + $0x40] sm:$0xff] %vm1576_vm3, %v2052_v50 }
 0x310   : > { %v7160_v26 = vpop.f32.mrf.mxu1 }
 0x311   : > { %2198 = vst.msk [vmem:[#allocation2 + $0xd8] sm:$0xff] %vm1576_vm3, %v7160_v26 }
 0x312   : > { %v2142_v36 = vpop.f32.mrf.mxu1 }
 0x313   : > { %v7136_v24 = vpop.f32.mrf.mxu0  ;;  %2197 = vst.msk [vmem:[#allocation2 + $0xd0] sm:$0xff] %vm1576_vm3, %v2142_v36 }
 0x314   : > { %2182 = vst.msk [vmem:[#allocation2 + $0x58] sm:$0xff] %vm1576_vm3, %v7136_v24 }
 0x315   : > { %v2062_v25 = vpop.f32.mrf.mxu0 }
 0x316   : > { %2181 = vst.msk [vmem:[#allocation2 + $0x50] sm:$0xff] %vm1576_vm3, %v2062_v25 }
 0x334   : > { %v7163_v17 = vpop.f32.mrf.mxu1 }
 0x335   : > { %2200 = vst.msk [vmem:[#allocation2 + $0xe8] sm:$0xff] %vm1576_vm3, %v7163_v17 }
 0x336   : > { %v2152_v0 = vpop.f32.mrf.mxu1 }
 0x337   : > { %v7139_v29 = vpop.f32.mrf.mxu0  ;;  %2199 = vst.msk [vmem:[#allocation2 + $0xe0] sm:$0xff] %vm1576_vm3, %v2152_v0 }
 0x338   : > { %2184 = vst.msk [vmem:[#allocation2 + $0x68] sm:$0xff] %vm1576_vm3, %v7139_v29 }
 0x339   : > { %v2072_v12 = vpop.f32.mrf.mxu0 }
 0x33a   : > { %2183 = vst.msk [vmem:[#allocation2 + $0x60] sm:$0xff] %vm1576_vm3, %v2072_v12 }
 0x34b   : > { %v7166_v39 = vpop.f32.mrf.mxu1 }
 0x34c   : > { %2202 = vst.msk [vmem:[#allocation2 + $0xf8] sm:$0xff] %vm1576_vm3, %v7166_v39 }
 0x34d   : > { %v2162_v63 = vpop.f32.mrf.mxu1 }
 0x34e   : > { %2201 = vst.msk [vmem:[#allocation2 + $0xf0] sm:$0xff] %vm1576_vm3, %v2162_v63 }
 0x34f   : > { %v7142_v49 = vpop.f32.mrf.mxu0 }
 0x350   : > { %2186 = vst.msk [vmem:[#allocation2 + $0x78] sm:$0xff] %vm1576_vm3, %v7142_v49 }
 0x351   : > { %v2082_v23 = vpop.f32.mrf.mxu0 }
 0x352   : > { %2185 = vst.msk [vmem:[#allocation2 + $0x70] sm:$0xff] %vm1576_vm3, %v2082_v23 }
 0x353 PF: > { %v2242_v2 = vld [vmem:[%s7817_s13] sm:$0xff]  ;;  %v2243_v61 = vld [vmem:[%s7817_s13 + $0x8] sm:$0xff]  ;;  %vm2307_vm12 = vcmask 1040384   ;;  %v7706_v20 = vmov 0.0   ;;  %v2244_v45 = vld [vmem:[%s7817_s13 + $0x10] sm:$0xff]  ;;  %vm2473_vm13 = vcmask 1046528  }
 0x354   : > { %v2310_v43 = vrot.slane %v2242_v2, 7  ;;  %v2311_v42 = vrot.slane %v2243_v61, 7  ;;  %v9585_v46 = vrot.slane %v7706_v20, 7  ;;  %v2245_v7 = vld [vmem:[%s7817_s13 + $0x18] sm:$0xff]  ;;  %v2246_v28 = vld [vmem:[%s7817_s13 + $0x20] sm:$0xff]  ;;  %v2313_v21 = vrot.slane %v2244_v45, 7 }
 0x355   : > { %v2314_v55 = vrot.slane %v2245_v7, 7  ;;  %v2316_v60 = vrot.slane %v2246_v28, 7  ;;  %v2247_v58 = vld [vmem:[%s7817_s13 + $0x28] sm:$0xff]  ;;  %v2248_v14 = vld [vmem:[%s7817_s13 + $0x30] sm:$0xff]  ;;  %s7707_s22 = smov 8   ;;  %v2249_v1 = vld [vmem:[%s7817_s13 + $0x38] sm:$0xff] }
 0x356   : > { %13331 = vst [vmem:[#allocation114_spill] sm:$0xff] %v9585_v46  ;;  %v9591_v11 = vsel %vm2307_vm12, %v2310_v43, %v2311_v42  ;;  %v9594_v40 = vsel %vm2307_vm12, %v2311_v42, 0.0  ;;  %v9598_v31 = vsel %vm2307_vm12, 0.0, %v9585_v46  ;;  %v9602_v19 = vsel %vm2307_vm12, %v9585_v46, 0.0  ;;  %v2250_v8 = vld [vmem:[%s7817_s13 + $0x40] sm:$0xff]  ;;  %v2251_v56 = vld [vmem:[%s7817_s13 + $0x48] sm:$0xff] }
 0x357   : > { %13332 = vst [vmem:[#allocation115_spill] sm:$0xff] %v9598_v31  ;;  %v2480_v34 = vrot.slane %v9591_v11, 1  ;;  %v2482_v35 = vrot.slane %v9594_v40, 1  ;;  %v2474_v22 = vrot.slane %v9598_v31, 1  ;;  %v2475_v4 = vrot.slane %v9585_v46, 1  ;;  %v2252_v41 = vld [vmem:[%s7817_s13 + $0x50] sm:$0xff] }
 0x358   : > { %v2477_v54 = vrot.slane %v9602_v19, 1  ;;  %v9611_v15 = vsel %vm2307_vm12, %v2313_v21, %v2314_v55  ;;  %v9614_v9 = vsel %vm2307_vm12, 0.0, %v2313_v21  ;;  %v9627_v59 = vsel %vm2307_vm12, 0.0, %v2310_v43  ;;  %v2253_v25 = vld [vmem:[%s7817_s13 + $0x58] sm:$0xff]  ;;  %v2254_v39 = vld [vmem:[%s7817_s13 + $0x60] sm:$0xff]  ;;  %v2255_v2 = vld [vmem:[%s7817_s13 + $0x68] sm:$0xff] }
 0x359   : > { %v9617_v44 = vsel %vm2473_vm13, %v2480_v34, %v2482_v35  ;;  %v2476_v6 = vsel %vm2473_vm13, %v2474_v22, %v2475_v4  ;;  %v2484_v10 = vrot.slane %v9614_v9, 1  ;;  %v2485_v37 = vrot.slane %v9611_v15, 1  ;;  %s7708_s25 = smov 16   ;;  %s7709_s26 = smov 24  }
 0x35a   : > { %2653 = vrot.lane.b32.xlu1 %v9617_v44, %s7707_s22  ;;  %v2478_v18 = vsel %vm2473_vm13, %v2475_v4, %v2477_v54  ;;  %v2317_v5 = vrot.slane %v2247_v58, 7  ;;  %v9630_v30 = vsel %vm2307_vm12, 0.0, %v2316_v60  ;;  %v2479_v48 = vrot.slane %v9627_v59, 1  ;;  %s7710_s20 = smov 32   ;;  %s7711_s17 = smov 40  }
 0x35b   : > { %v9633_v33 = vpack.i.bf16 %v2478_v18, %v2476_v6  ;;  %v9636_v53 = vsel %vm2473_vm13, %v2484_v10, %v2485_v37  ;;  %v2489_v38 = vrot.slane %v9630_v30, 1  ;;  %v9646_v52 = vsel %vm2307_vm12, %v2314_v55, 0.0  ;;  %v2256_v55 = vld [vmem:[%s7817_s13 + $0x70] sm:$0xff]  ;;  %v2258_v18 = vld [vmem:[%s7817_s13 + $0x80] sm:$0xff]  ;;  %s7712_s14 = smov 48   ;;  %s7713_s19 = smov 56  }
 0x35c   : > { %v9642_v13 = vsel %vm2307_vm12, %v2316_v60, %v2317_v5  ;;  %v2319_v51 = vrot.slane %v2248_v14, 7  ;;  %v9651_v16 = vsel %vm2473_vm13, %v2479_v48, %v2480_v34  ;;  %v2320_v57 = vrot.slane %v2249_v1, 7  ;;  %v2257_v60 = vld [vmem:[%s7817_s13 + $0x78] sm:$0xff]  ;;  %s7714_s21 = smov 64   ;;  %p6941_p8 = scmp.ne.s32.totalorder %s7679_s30, 4 }
 0x35d   : > { %13333 = vst [vmem:[#allocation116_spill] sm:$0xff] %v9633_v33  ;;  %7470 = vrot.lane.b32.xlu0 %v9633_v33, %s7707_s22  ;;  %v2490_v32 = vrot.slane %v9642_v13, 1  ;;  %v2487_v3 = vrot.slane %v9646_v52, 1  ;;  %v2322_v27 = vrot.slane %v2250_v8, 7  ;;  %v2323_v47 = vrot.slane %v2251_v56, 7 }
 0x35e   : > { %2655 = vrot.lane.b32.xlu1 %v9636_v53, %s7707_s22  ;;  %v9658_v62 = vsel %vm2307_vm12, 0.0, %v2319_v51  ;;  %v9665_v26 = vsel %vm2307_vm12, %v2319_v51, %v2320_v57  ;;  %v9669_v24 = vsel %vm2307_vm12, %v2317_v5, 0.0  ;;  %v2325_v12 = vrot.slane %v2252_v41, 7  ;;  %v2259_v5 = vld [vmem:[%s7817_s13 + $0x88] sm:$0xff]  ;;  %v2261_v41 = vld [vmem:[%s7817_s13 + $0x98] sm:$0xff] }
 0x35f   : > { %v9662_v50 = vsel %vm2473_vm13, %v2489_v38, %v2490_v32  ;;  %v2494_v36 = vrot.slane %v9658_v62, 1  ;;  %v2495_v17 = vrot.slane %v9665_v26, 1  ;;  %v9674_v0 = vsel %vm2307_vm12, %v2322_v27, %v2323_v47 }
 0x360   : > { %13334 = vst [vmem:[#allocation117_spill] sm:$0xff] %v9674_v0  ;;  %v9677_v29 = vsel %vm2307_vm12, 0.0, %v2322_v27  ;;  %v9685_v63 = vsel %vm2473_vm13, %v2485_v37, %v2487_v3  ;;  %v2492_v49 = vrot.slane %v9669_v24, 1  ;;  %v2326_v23 = vrot.slane %v2253_v25, 7 }
 0x361   : > { %13335 = vst [vmem:[#allocation118_spill] sm:$0xff] %v9677_v29  ;;  %2651 = vrot.lane.b32.xlu0 %v9651_v16, %s7707_s22  ;;  %v9690_v61 = vsel %vm2473_vm13, %v2494_v36, %v2495_v17  ;;  %v2499_v43 = vrot.slane %v9677_v29, 1  ;;  %v2500_v42 = vrot.slane %v9674_v0, 1  ;;  %v9695_v20 = vsel %vm2307_vm12, %v2320_v57, 0.0 }
 0x362   : > { %2659 = vrot.lane.b32.xlu1 %v9662_v50, %s7707_s22  ;;  %13336 = vst [vmem:[#allocation119_spill] sm:$0xff] %v9690_v61  ;;  %v9698_v45 = vsel %vm2307_vm12, %v2325_v12, %v2326_v23  ;;  %v9701_v7 = vsel %vm2307_vm12, 0.0, %v2325_v12  ;;  %v2328_v28 = vrot.slane %v2254_v39, 7  ;;  %v2329_v21 = vrot.slane %v2255_v2, 7 }
 0x363   : > { %13337 = vst [vmem:[#allocation120_spill] sm:$0xff] %v9698_v45  ;;  %13338 = vst [vmem:[#allocation121_spill] sm:$0xff] %v9701_v7  ;;  %v9710_v34 = vsel %vm2473_vm13, %v2490_v32, %v2492_v49  ;;  %v2497_v35 = vrot.slane %v9695_v20, 1  ;;  %v9714_v22 = vsel %vm2473_vm13, %v2499_v43, %v2500_v42  ;;  %v2504_v4 = vrot.slane %v9701_v7, 1 }
 0x364   : > { %13339 = vst [vmem:[#allocation122_spill] sm:$0xff] %v9710_v34  ;;  %13340 = vst [vmem:[#allocation123_spill] sm:$0xff] %v9714_v22  ;;  %v2505_v58 = vrot.slane %v9698_v45, 1  ;;  %v9719_v54 = vsel %vm2307_vm12, %v2323_v47, 0.0  ;;  %v9722_v6 = vsel %vm2307_vm12, %v2328_v28, %v2329_v21  ;;  %v9725_v10 = vsel %vm2307_vm12, 0.0, %v2328_v28  ;;  %v2260_v47 = vld [vmem:[%s7817_s13 + $0x90] sm:$0xff] }
 0x365   : > { %2657 = vrot.lane.b32.xlu0 %v9685_v63, %s7707_s22  ;;  %13341 = vst [vmem:[#allocation124_spill] sm:$0xff] %v9722_v6  ;;  %13342 = vst [vmem:[#allocation125_spill] sm:$0xff] %v9725_v10  ;;  %v2331_v37 = vrot.slane %v2256_v55, 7  ;;  %v2332_v14 = vrot.slane %v2257_v60, 7  ;;  %v9734_v1 = vsel %vm2473_vm13, %v2495_v17, %v2497_v35  ;;  %v2502_v48 = vrot.slane %v9719_v54, 1  ;;  %v2262_v28 = vld [vmem:[%s7817_s13 + $0xa0] sm:$0xff] }
 0x366   : > { %2663 = vrot.lane.b32.xlu1 %v9690_v61, %s7707_s22  ;;  %13343 = vst [vmem:[#allocation126_spill] sm:$0xff] %v9734_v1  ;;  %v9738_v8 = vsel %vm2473_vm13, %v2504_v4, %v2505_v58  ;;  %v2509_v56 = vrot.slane %v9725_v10, 1  ;;  %v2510_v38 = vrot.slane %v9722_v6, 1  ;;  %v9743_v51 = vsel %vm2307_vm12, %v2326_v23, 0.0  ;;  %v2263_v55 = vld [vmem:[%s7817_s13 + $0xa8] sm:$0xff] }
 0x367   : > { %13344 = vst [vmem:[#allocation127_spill] sm:$0xff] %v9738_v8  ;;  %v9746_v32 = vsel %vm2307_vm12, %v2331_v37, %v2332_v14  ;;  %v9749_v57 = vsel %vm2307_vm12, 0.0, %v2331_v37  ;;  %v2334_v3 = vrot.slane %v2258_v18, 7  ;;  %v2335_v27 = vrot.slane %v2259_v5, 7 }
 0x368   : > { %v9758_v36 = vsel %vm2473_vm13, %v2500_v42, %v2502_v48  ;;  %v2507_v25 = vrot.slane %v9743_v51, 1  ;;  %v9762_v17 = vsel %vm2473_vm13, %v2509_v56, %v2510_v38  ;;  %v2514_v12 = vrot.slane %v9749_v57, 1 }
 0x369   : > { %2661 = vrot.lane.b32.xlu0 %v9710_v34, %s7707_s22  ;;  %13345 = vst [vmem:[#allocation128_spill] sm:$0xff] %v9758_v36  ;;  %13346 = vst [vmem:[#allocation129_spill] sm:$0xff] %v9762_v17  ;;  %v2515_v39 = vrot.slane %v9746_v32, 1  ;;  %v9767_v49 = vsel %vm2307_vm12, %v2329_v21, 0.0  ;;  %v9770_v23 = vsel %vm2307_vm12, %v2334_v3, %v2335_v27  ;;  %v9773_v2 = vsel %vm2307_vm12, 0.0, %v2334_v3  ;;  %v2264_v3 = vld [vmem:[%s7817_s13 + $0xb0] sm:$0xff] }
 0x36a   : > { %2667 = vrot.lane.b32.xlu1 %v9714_v22, %s7707_s22  ;;  %v2337_v43 = vrot.slane %v2260_v47, 7  ;;  %v2338_v42 = vrot.slane %v2261_v41, 7  ;;  %v9782_v21 = vsel %vm2473_vm13, %v2505_v58, %v2507_v25  ;;  %v2512_v60 = vrot.slane %v9767_v49, 1  ;;  %v2265_v47 = vld [vmem:[%s7817_s13 + $0xb8] sm:$0xff] }
 0x36b   : > { %13347 = vst [vmem:[#allocation130_spill] sm:$0xff] %v9782_v21  ;;  %v9786_v35 = vsel %vm2307_vm12, %v2332_v14, 0.0  ;;  %v9789_v4 = vsel %vm2473_vm13, %v2514_v12, %v2515_v39  ;;  %v2519_v37 = vrot.slane %v9773_v2, 1  ;;  %v2520_v18 = vrot.slane %v9770_v23, 1 }
 0x36c   : > { %13348 = vst [vmem:[#allocation131_spill] sm:$0xff] %v9789_v4  ;;  %v2340_v5 = vrot.slane %v2262_v28, 7  ;;  %v9794_v48 = vsel %vm2307_vm12, %v2337_v43, %v2338_v42  ;;  %v9797_v56 = vsel %vm2307_vm12, 0.0, %v2337_v43  ;;  %v2341_v58 = vrot.slane %v2263_v55, 7 }
 0x36d   : > { %2665 = vrot.lane.b32.xlu0 %v9734_v1, %s7707_s22  ;;  %v2517_v14 = vrot.slane %v9786_v35, 1  ;;  %v9807_v41 = vsel %vm2473_vm13, %v2510_v38, %v2512_v60  ;;  %v9810_v25 = vsel %vm2307_vm12, %v2335_v27, 0.0  ;;  %v9813_v12 = vsel %vm2473_vm13, %v2519_v37, %v2520_v18  ;;  %v2266_v60 = vld [vmem:[%s7817_s13 + $0xc0] sm:$0xff]  ;;  %v2267_v37 = vld [vmem:[%s7817_s13 + $0xc8] sm:$0xff] }
 0x36e   : > { %2671 = vrot.lane.b32.xlu1 %v9738_v8, %s7707_s22  ;;  %13349 = vst [vmem:[#allocation132_spill] sm:$0xff] %v9807_v41  ;;  %13350 = vst [vmem:[#allocation133_spill] sm:$0xff] %v9813_v12  ;;  %v2524_v43 = vrot.slane %v9797_v56, 1  ;;  %v2525_v28 = vrot.slane %v9794_v48, 1  ;;  %v9818_v55 = vsel %vm2307_vm12, 0.0, %v2340_v5  ;;  %v9821_v33 = vsel %vm2307_vm12, %v2340_v5, %v2341_v58 }
 0x36f   : > { %v2558_v38 = vrot.slane %v9602_v19, 2  ;;  %v9827_v27 = vsel %vm2473_vm13, %v2515_v39, %v2517_v14  ;;  %v2522_v5 = vrot.slane %v9810_v25, 1  ;;  %vm2554_vm14 = vcmask 1045504  }
 0x370   : > { %13351 = vst [vmem:[#allocation134_spill] sm:$0xff] %v9827_v27  ;;  %v9839_v19 = vsel %vm2473_vm13, %v2524_v43, %v2525_v28  ;;  %v2530_v39 = vrot.slane %v9821_v33, 1  ;;  %v2555_v14 = vrot.slane %v9598_v31, 2  ;;  %v2346_v8 = vrot.slane %v2266_v60, 7  ;;  %v2269_v43 = vld [vmem:[%s7817_s13 + $0xd8] sm:$0xff] }
 0x371   : > { %2669 = vrot.lane.b32.xlu0 %v9758_v36, %s7707_s22  ;;  %13352 = vst [vmem:[#allocation135_spill] sm:$0xff] %v9839_v19  ;;  %v2347_v36 = vrot.slane %v2267_v37, 7  ;;  %v9870_v1 = vsel %vm2307_vm12, %v2341_v58, 0.0  ;;  %vm3448_vm15 = vcmask 130048   ;;  %vm3415_vm0 = vcmask 64512  }
 0x372   : > { %2675 = vrot.lane.b32.xlu1 %v9762_v17, %s7707_s22  ;;  %v2344_v17 = vrot.slane %v2265_v47, 7  ;;  %v9836_v47 = vsel %vm2307_vm12, %v2338_v42, 0.0  ;;  %v2268_v42 = vld [vmem:[%s7817_s13 + $0xd0] sm:$0xff]  ;;  %v2532_v58 = vrot.slane %v9870_v1, 1  ;;  %vm3481_vm1 = vcmask 195584  }
 0x373   : > { %vm3514_vm2 = vcmask 261120   ;;  %vm3547_vm3 = vcmask 326656   ;;  %vm3580_vm4 = vcmask 392192   ;;  %vm3613_vm5 = vcmask 457728  }
 0x374   : > { %vm3646_vm6 = vcmask 523264   ;;  %vm3720_vm7 = vcmask 588800  }
 0x375   : > { %2673 = vrot.lane.b32.xlu0 %v9782_v21, %s7707_s22 }
 0x376   : > { %2679 = vrot.lane.b32.xlu1 %v9789_v4, %s7707_s22  ;;  %v2343_v4 = vrot.slane %v2264_v3, 7  ;;  %v2529_v3 = vrot.slane %v9818_v55, 1 }
 0x378   : > { %v9845_v21 = vsel %vm2307_vm12, %v2343_v4, %v2344_v17  ;;  %v9865_v37 = vsel %vm2473_vm13, %v2529_v3, %v2530_v39 }
 0x379   : > { %2677 = vrot.lane.b32.xlu0 %v9807_v41, %s7707_s22  ;;  %v2556_v41 = vrot.slane %v9585_v46, 2  ;;  %13353 = vst [vmem:[#allocation136_spill] sm:$0xff] %v9845_v21  ;;  %v9859_v46 = vsel %vm2473_vm13, %v2520_v18, %v2522_v5  ;;  %13356 = vst [vmem:[#allocation139_spill] sm:$0xff] %v9865_v37  ;;  %v9876_v18 = vsel %vm2307_vm12, 0.0, %v2346_v8  ;;  %v2350_v5 = vrot.slane %v2269_v43, 7 }
 0x37a   : > { %2683 = vrot.lane.b32.xlu1 %v9813_v12, %s7707_s22  ;;  %v9848_v12 = vsel %vm2307_vm12, 0.0, %v2343_v4  ;;  %13354 = vst [vmem:[#allocation137_spill] sm:$0xff] %v9859_v46  ;;  %v2527_v4 = vrot.slane %v9836_v47, 1  ;;  %13358 = vst [vmem:[#allocation141_spill] sm:$0xff] %v9876_v18  ;;  %v9894_v43 = vsel %vm2307_vm12, %v2344_v17, 0.0 }
 0x37b   : > { %v2557_v22 = vsel %vm2554_vm14, %v2555_v14, %v2556_v41  ;;  %v2559_v31 = vsel %vm2554_vm14, %v2556_v41, %v2558_v38  ;;  %v2535_v14 = vrot.slane %v9845_v21, 1  ;;  %v9873_v41 = vsel %vm2307_vm12, %v2346_v8, %v2347_v36 }
 0x37c   : > { %v9862_v60 = vpack.i.bf16 %v2559_v31, %v2557_v22  ;;  %13357 = vst [vmem:[#allocation140_spill] sm:$0xff] %v9873_v41  ;;  %v2349_v38 = vrot.slane %v2268_v42, 7  ;;  %v2270_v31 = vld [vmem:[%s7817_s13 + $0xe0] sm:$0xff]  ;;  %v2271_v22 = vld [vmem:[%s7817_s13 + $0xe8] sm:$0xff]  ;;  %v9885_v3 = vsel %vm2473_vm13, %v2525_v28, %v2527_v4  ;;  %v2539_v8 = vrot.slane %v9876_v18, 1 }
 0x37d   : > { %2681 = vrot.lane.b32.xlu0 %v9827_v27, %s7707_s22  ;;  %v2534_v27 = vrot.slane %v9848_v12, 1  ;;  %13359 = vst [vmem:[#allocation142_spill] sm:$0xff] %v9885_v3  ;;  %v2540_v42 = vrot.slane %v9873_v41, 1  ;;  %v2352_v28 = vrot.slane %v2270_v31, 7  ;;  %v2353_v4 = vrot.slane %v2271_v22, 7 }
 0x37e   : > { %2687 = vrot.lane.b32.xlu1 %v9839_v19, %s7707_s22  ;;  %13355 = vst [vmem:[#allocation138_spill] sm:$0xff] %v9862_v60  ;;  %v2537_v17 = vrot.slane %v9894_v43, 1  ;;  %v9916_v31 = vsel %vm2307_vm12, %v2347_v36, 0.0 }
 0x37f   : > { %v9889_v19 = vsel %vm2473_vm13, %v2534_v27, %v2535_v14  ;;  %v9907_v27 = vsel %vm2473_vm13, %v2530_v39, %v2532_v58  ;;  %v9911_v61 = vsel %vm2473_vm13, %v2539_v8, %v2540_v42  ;;  %v9919_v22 = vsel %vm2307_vm12, %v2352_v28, %v2353_v4 }
 0x380   : > { %13360 = vst [vmem:[#allocation143_spill] sm:$0xff] %v9889_v19  ;;  %13363 = vst [vmem:[#allocation146_spill] sm:$0xff] %v9907_v27  ;;  %v9929_v39 = vsel %vm2473_vm13, %v2535_v14, %v2537_v17  ;;  %v2542_v58 = vrot.slane %v9916_v31, 1 }
 0x381   : > { %2685 = vrot.lane.b32.xlu0 %v9859_v46, %s7707_s22  ;;  %v9897_v46 = vsel %vm2307_vm12, %v2349_v38, %v2350_v5  ;;  %13364 = vst [vmem:[#allocation147_spill] sm:$0xff] %v9911_v61  ;;  %13365 = vst [vmem:[#allocation148_spill] sm:$0xff] %v9919_v22 }
 0x382   : > { %2691 = vrot.lane.b32.xlu1 %v9865_v37, %s7707_s22  ;;  %13361 = vst [vmem:[#allocation144_spill] sm:$0xff] %v9897_v46  ;;  %v9900_v37 = vsel %vm2307_vm12, 0.0, %v2349_v38  ;;  %v2545_v38 = vrot.slane %v9897_v46, 1  ;;  %13367 = vst [vmem:[#allocation150_spill] sm:$0xff] %v9929_v39  ;;  %v9945_v14 = vsel %vm2473_vm13, %v2540_v42, %v2542_v58  ;;  %v2561_v58 = vrot.slane %v9591_v11, 2 }
 0x383   : > { %13362 = vst [vmem:[#allocation145_spill] sm:$0xff] %v9900_v37  ;;  %v2544_v34 = vrot.slane %v9900_v37, 1  ;;  %13369 = vst [vmem:[#allocation152_spill] sm:$0xff] %v9945_v14 }
 0x385   : > { %2689 = vrot.lane.b32.xlu0 %v9885_v3, %s7707_s22  ;;  %v9933_v36 = vsel %vm2473_vm13, %v2544_v34, %v2545_v38  ;;  %v2550_v3 = vrot.slane %v9919_v22, 1 }
 0x386   : > { %2695 = vrot.lane.b32.xlu1 %v9889_v19, %s7707_s22  ;;  %v9922_v19 = vsel %vm2307_vm12, 0.0, %v2352_v28  ;;  %13368 = vst [vmem:[#allocation151_spill] sm:$0xff] %v9933_v36  ;;  %v9938_v28 = vsel %vm2307_vm12, %v2350_v5, 0.0 }
 0x387   : > { %13366 = vst [vmem:[#allocation149_spill] sm:$0xff] %v9922_v19  ;;  %v2549_v8 = vrot.slane %v9922_v19, 1  ;;  %v2547_v17 = vrot.slane %v9938_v28, 1 }
 0x389   : > { %2693 = vrot.lane.b32.xlu0 %v9907_v27, %s7707_s22  ;;  %v9949_v34 = vsel %vm2473_vm13, %v2549_v8, %v2550_v3  ;;  %v9959_v5 = vsel %vm2473_vm13, %v2545_v38, %v2547_v17  ;;  %v2560_v8 = vrot.slane %v9627_v59, 2  ;;  %v2566_v17 = vrot.slane %v9611_v15, 2 }
 0x38a   : > { %2699 = vrot.lane.b32.xlu1 %v9911_v61, %s7707_s22  ;;  %13370 = vst [vmem:[#allocation153_spill] sm:$0xff] %v9949_v34  ;;  %v9952_v61 = vsel %vm2307_vm12, %v2353_v4, 0.0  ;;  %13371 = vst [vmem:[#allocation154_spill] sm:$0xff] %v9959_v5  ;;  %v2598_v27 = vrot.slane %v9786_v35, 2 }
 0x38b   : > { %v2552_v42 = vrot.slane %v9952_v61, 1 }
 0x38d   : > { %2697 = vrot.lane.b32.xlu0 %v9929_v39, %s7707_s22  ;;  %v9969_v4 = vsel %vm2473_vm13, %v2550_v3, %v2552_v42  ;;  %v2565_v3 = vrot.slane %v9614_v9, 2  ;;  %v2593_v39 = vrot.slane %v9767_v49, 2 }
 0x38e   : > { %2703 = vrot.lane.b32.xlu1 %v9933_v36, %s7707_s22  ;;  %v2563_v36 = vrot.slane %v9594_v40, 2  ;;  %13372 = vst [vmem:[#allocation155_spill] sm:$0xff] %v9969_v4  ;;  %v9982_v40 = vsel %vm2554_vm14, %v2560_v8, %v2561_v58 }
 0x390   : > { %v9973_v38 = vsel %vm2554_vm14, %v2561_v58, %v2563_v36  ;;  %v2571_v36 = vrot.slane %v9642_v13, 2  ;;  %v2570_v58 = vrot.slane %v9630_v30, 2 }
 0x391   : > { %2701 = vrot.lane.b32.xlu0 %v9945_v14, %s7707_s22  ;;  %v2588_v14 = vrot.slane %v9743_v51, 2 }
 0x392   : > { %2707 = vrot.lane.b32.xlu1 %v9949_v34, %s7707_s22  ;;  %v2568_v34 = vrot.slane %v9646_v52, 2  ;;  %v9995_v52 = vsel %vm2554_vm14, %v2565_v3, %v2566_v17 }
 0x394   : > { %v9986_v42 = vsel %vm2554_vm14, %v2566_v17, %v2568_v34  ;;  %v2576_v34 = vrot.slane %v9665_v26, 2  ;;  %v2575_v17 = vrot.slane %v9658_v62, 2 }
 0x395   : > { %2705 = vrot.lane.b32.xlu0 %v9959_v5, %s7707_s22  ;;  %v2583_v5 = vrot.slane %v9719_v54, 2 }
 0x396   : > { %7475 = vrot.lane.b32.xlu1 %v9862_v60, %s7708_s25  ;;  %v2573_v60 = vrot.slane %v9669_v24, 2  ;;  %v10008_v24 = vsel %vm2554_vm14, %v2570_v58, %v2571_v36 }
 0x398   : > { %v9999_v8 = vsel %vm2554_vm14, %v2571_v36, %v2573_v60  ;;  %v2581_v60 = vrot.slane %v9674_v0, 2  ;;  %v2580_v36 = vrot.slane %v9677_v29, 2 }
 0x399   : > { %2709 = vrot.lane.b32.xlu0 %v9969_v4, %s7707_s22  ;;  %v2578_v4 = vrot.slane %v9695_v20, 2  ;;  %v10021_v20 = vsel %vm2554_vm14, %v2575_v17, %v2576_v34 }
 0x39a   : > { %2749 = vrot.lane.b32.xlu1 %v9973_v38, %s7708_s25  ;;  %v10025_v58 = vsel %vm2554_vm14, %v2581_v60, %v2583_v5  ;;  %v10034_v54 = vsel %vm2554_vm14, %v2580_v36, %v2581_v60  ;;  %v2591_v5 = vrot.slane %v9722_v6, 2  ;;  %v2590_v60 = vrot.slane %v9725_v10, 2 }
 0x39b   : > { %v10012_v3 = vsel %vm2554_vm14, %v2576_v34, %v2578_v4  ;;  %v2586_v4 = vrot.slane %v9698_v45, 2  ;;  %v2585_v34 = vrot.slane %v9701_v7, 2 }
 0x39c   : > { %v10051_v36 = vsel %vm2554_vm14, %v2591_v5, %v2593_v39  ;;  %v10060_v49 = vsel %vm2554_vm14, %v2590_v60, %v2591_v5  ;;  %v2601_v39 = vrot.slane %v9770_v23, 2  ;;  %v2600_v5 = vrot.slane %v9773_v2, 2 }
 0x39d   : > { %2747 = vrot.lane.b32.xlu0 %v9982_v40, %s7708_s25  ;;  %v10038_v17 = vsel %vm2554_vm14, %v2586_v4, %v2588_v14  ;;  %v10047_v51 = vsel %vm2554_vm14, %v2585_v34, %v2586_v4  ;;  %13374 = vst [vmem:[#allocation157_spill] sm:$0xff] %v10051_v36  ;;  %v2596_v14 = vrot.slane %v9746_v32, 2  ;;  %v2595_v4 = vrot.slane %v9749_v57, 2 }
 0x39e   : > { %2753 = vrot.lane.b32.xlu1 %v9986_v42, %s7708_s25  ;;  %13373 = vst [vmem:[#allocation156_spill] sm:$0xff] %v10038_v17 }
 0x39f   : > { %v10064_v34 = vsel %vm2554_vm14, %v2596_v14, %v2598_v27  ;;  %v10073_v35 = vsel %vm2554_vm14, %v2595_v4, %v2596_v14  ;;  %v2606_v27 = vrot.slane %v9794_v48, 2  ;;  %v2605_v14 = vrot.slane %v9797_v56, 2 }
 0x3a0   : > { %13375 = vst [vmem:[#allocation158_spill] sm:$0xff] %v10064_v34 }
 0x3a1   : > { %2751 = vrot.lane.b32.xlu0 %v9995_v52, %s7708_s25 }
 0x3a2   : > { %2757 = vrot.lane.b32.xlu1 %v9999_v8, %s7708_s25 }
 0x3a5   : > { %2755 = vrot.lane.b32.xlu0 %v10008_v24, %s7708_s25 }
 0x3a6   : > { %2761 = vrot.lane.b32.xlu1 %v10012_v3, %s7708_s25 }
 0x3a9   : > { %2759 = vrot.lane.b32.xlu0 %v10021_v20, %s7708_s25 }
 0x3aa   : > { %2765 = vrot.lane.b32.xlu1 %v10025_v58, %s7708_s25 }
 0x3ad   : > { %2763 = vrot.lane.b32.xlu0 %v10034_v54, %s7708_s25 }
 0x3ae   : > { %2769 = vrot.lane.b32.xlu1 %v10038_v17, %s7708_s25  ;;  %v2603_v17 = vrot.slane %v9810_v25, 2  ;;  %v10086_v25 = vsel %vm2554_vm14, %v2600_v5, %v2601_v39 }
 0x3b0   : > { %v10077_v60 = vsel %vm2554_vm14, %v2601_v39, %v2603_v17  ;;  %v2611_v17 = vrot.slane %v9821_v33, 2  ;;  %v2610_v39 = vrot.slane %v9818_v55, 2 }
 0x3b1   : > { %2767 = vrot.lane.b32.xlu0 %v10047_v51, %s7708_s25  ;;  %13376 = vst [vmem:[#allocation159_spill] sm:$0xff] %v10077_v60 }
 0x3b2   : > { %2773 = vrot.lane.b32.xlu1 %v10051_v36, %s7708_s25  ;;  %v2608_v36 = vrot.slane %v9836_v47, 2  ;;  %v10099_v47 = vsel %vm2554_vm14, %v2605_v14, %v2606_v27 }
 0x3b4   : > { %v10090_v4 = vsel %vm2554_vm14, %v2606_v27, %v2608_v36  ;;  %v2616_v36 = vrot.slane %v9845_v21, 2  ;;  %v2615_v27 = vrot.slane %v9848_v12, 2 }
 0x3b5   : > { %2771 = vrot.lane.b32.xlu0 %v10060_v49, %s7708_s25  ;;  %13377 = vst [vmem:[#allocation160_spill] sm:$0xff] %v10090_v4 }
 0x3b6   : > { %2777 = vrot.lane.b32.xlu1 %v10064_v34, %s7708_s25  ;;  %v2613_v34 = vrot.slane %v9870_v1, 2  ;;  %v10112_v1 = vsel %vm2554_vm14, %v2610_v39, %v2611_v17 }
 0x3b8   : > { %v10103_v5 = vsel %vm2554_vm14, %v2611_v17, %v2613_v34  ;;  %v2621_v34 = vrot.slane %v9873_v41, 2  ;;  %v2620_v17 = vrot.slane %v9876_v18, 2  ;;  %v2628_v41 = vrot.slane %v9938_v28, 2 }
 0x3b9   : > { %2775 = vrot.lane.b32.xlu0 %v10073_v35, %s7708_s25 }
 0x3ba   : > { %2781 = vrot.lane.b32.xlu1 %v10077_v60, %s7708_s25  ;;  %v2618_v60 = vrot.slane %v9894_v43, 2  ;;  %v10125_v43 = vsel %vm2554_vm14, %v2615_v27, %v2616_v36 }
 0x3bb   : > { %13379 = vst [vmem:[#allocation162_spill] sm:$0xff] %v10125_v43 }
 0x3bc   : > { %v10116_v14 = vsel %vm2554_vm14, %v2616_v36, %v2618_v60  ;;  %v2626_v60 = vrot.slane %v9897_v46, 2  ;;  %v2625_v36 = vrot.slane %v9900_v37, 2  ;;  %v2633_v46 = vrot.slane %v9952_v61, 2 }
 0x3bd   : > { %2779 = vrot.lane.b32.xlu0 %v10086_v25, %s7708_s25  ;;  %13378 = vst [vmem:[#allocation161_spill] sm:$0xff] %v10116_v14 }
 0x3be   : > { %2785 = vrot.lane.b32.xlu1 %v10090_v4, %s7708_s25  ;;  %v2623_v4 = vrot.slane %v9916_v31, 2  ;;  %v10138_v31 = vsel %vm2554_vm14, %v2620_v17, %v2621_v34  ;;  %v10142_v27 = vsel %vm2554_vm14, %v2626_v60, %v2628_v41  ;;  %v10153_v28 = vsel %vm2554_vm14, %v2625_v36, %v2626_v60 }
 0x3bf   : > { %13381 = vst [vmem:[#allocation164_spill] sm:$0xff] %v10138_v31  ;;  %13382 = vst [vmem:[#allocation165_spill] sm:$0xff] %v10142_v27 }
 0x3c0   : > { %v10129_v39 = vsel %vm2554_vm14, %v2621_v34, %v2623_v4  ;;  %v2631_v4 = vrot.slane %v9919_v22, 2  ;;  %13383 = vst [vmem:[#allocation166_spill] sm:$0xff] %v10153_v28  ;;  %v2630_v34 = vrot.slane %v9922_v19, 2 }
 0x3c1   : > { %2783 = vrot.lane.b32.xlu0 %v10099_v47, %s7708_s25  ;;  %13380 = vst [vmem:[#allocation163_spill] sm:$0xff] %v10129_v39 }
 0x3c2   : > { %2789 = vrot.lane.b32.xlu1 %v10103_v5, %s7708_s25  ;;  %v10159_v41 = vsel %vm2554_vm14, %v2631_v4, %v2633_v46  ;;  %v10168_v61 = vsel %vm2554_vm14, %v2630_v34, %v2631_v4 }
 0x3c3   : > { %13384 = vst [vmem:[#allocation167_spill] sm:$0xff] %v10159_v41  ;;  %13385 = vst [vmem:[#allocation168_spill] sm:$0xff] %v10168_v61 }
 0x3c5   : > { %2787 = vrot.lane.b32.xlu0 %v10112_v1, %s7708_s25 }
 0x3c6   : > { %2793 = vrot.lane.b32.xlu1 %v10116_v14, %s7708_s25 }
 0x3c9   : > { %2791 = vrot.lane.b32.xlu0 %v10125_v43, %s7708_s25 }
 0x3ca   : > { %2797 = vrot.lane.b32.xlu1 %v10129_v39, %s7708_s25 }
 0x3cc   : > { %v10146_v14 = vpop.permute.xlu1 %2653 }
 0x3cd   : > { %2795 = vrot.lane.b32.xlu0 %v10138_v31, %s7708_s25 }
 0x3ce   : > { %2801 = vrot.lane.b32.xlu1 %v10142_v27, %s7708_s25 }
 0x3cf   : > { %v10156_v17 = vpop.permute.xlu0 %7470 }
 0x3d0   : > { %v10161_v22 = vpop.permute.xlu1 %2655 }
 0x3d1   : > { %2799 = vrot.lane.b32.xlu0 %v10153_v28, %s7708_s25 }
 0x3d2   : > { %2805 = vrot.lane.b32.xlu1 %v10159_v41, %s7708_s25 }
 0x3d3   : > { %v10170_v60 = vpop.permute.xlu0 %2651 }
 0x3d4   : > { %v10172_v36 = vpop.permute.xlu1 %2659 }
 0x3d5   : > { %2803 = vrot.lane.b32.xlu0 %v10168_v61, %s7708_s25 }
 0x3d6   : > { %2841 = vrot.lane.b32.xlu1 %v9591_v11, %s7709_s26 }
 0x3d7   : > { %v10178_v46 = vpop.permute.xlu0 %2657 }
 0x3d8   : > { %v10180_v19 = vpop.permute.xlu1 %2663 }
 0x3d9   : > { %2839 = vrot.lane.b32.xlu0 %v9627_v59, %s7709_s26 }
 0x3da   : > { %2845 = vrot.lane.b32.xlu1 %v9611_v15, %s7709_s26 }
 0x3db   : > { %v10186_v4 = vpop.permute.xlu0 %2661 }
 0x3dc   : > { %v10188_v34 = vpop.permute.xlu1 %2667 }
 0x3dd   : > { %13386 = vst [vmem:[#allocation169_spill] sm:$0xff] %v10188_v34  ;;  %2843 = vrot.lane.b32.xlu0 %v9614_v9, %s7709_s26 }
 0x3de   : > { %2849 = vrot.lane.b32.xlu1 %v9642_v13, %s7709_s26 }
 0x3df   : > { %v10194_v41 = vpop.permute.xlu0 %2665 }
 0x3e0   : > { %v10196_v61 = vpop.permute.xlu1 %2671 }
 0x3e1   : > { %13387 = vst [vmem:[#allocation170_spill] sm:$0xff] %v10196_v61  ;;  %2847 = vrot.lane.b32.xlu0 %v9630_v30, %s7709_s26 }
 0x3e2   : > { %2853 = vrot.lane.b32.xlu1 %v9665_v26, %s7709_s26 }
 0x3e3   : > { %v10202_v27 = vpop.permute.xlu0 %2669 }
 0x3e4   : > { %13388 = vst [vmem:[#allocation171_spill] sm:$0xff] %v10202_v27  ;;  %v10204_v28 = vpop.permute.xlu1 %2675  ;;  %v3716_v27 = vld [vmem:[%s12821_s3 + $0x28] sm:$0xff] }
 0x3e5   : > { %13389 = vst [vmem:[#allocation172_spill] sm:$0xff] %v10204_v28  ;;  %2851 = vrot.lane.b32.xlu0 %v9658_v62, %s7709_s26 }
 0x3e6   : > { %2857 = vrot.lane.b32.xlu1 %v9674_v0, %s7709_s26 }
 0x3e7   : > { %v10210_v37 = vpop.permute.xlu0 %2673 }
 0x3e8   : > { %13390 = vst [vmem:[#allocation173_spill] sm:$0xff] %v10210_v37  ;;  %v10212_v39 = vpop.permute.xlu1 %2679 }
 0x3e9   : > { %13391 = vst [vmem:[#allocation174_spill] sm:$0xff] %v10212_v39  ;;  %2855 = vrot.lane.b32.xlu0 %v9677_v29, %s7709_s26 }
 0x3ea   : > { %2861 = vrot.lane.b32.xlu1 %v9698_v45, %s7709_s26 }
 0x3eb   : > { %v10218_v61 = vpop.permute.xlu0 %2677 }
 0x3ec   : > { %13392 = vst [vmem:[#allocation175_spill] sm:$0xff] %v10218_v61  ;;  %v10220_v31 = vpop.permute.xlu1 %2683 }
 0x3ed   : > { %13393 = vst [vmem:[#allocation176_spill] sm:$0xff] %v10220_v31  ;;  %2859 = vrot.lane.b32.xlu0 %v9701_v7, %s7709_s26 }
 0x3ee   : > { %2865 = vrot.lane.b32.xlu1 %v9722_v6, %s7709_s26 }
 0x3ef   : > { %v10226_v28 = vpop.permute.xlu0 %2681 }
 0x3f0   : > { %13394 = vst [vmem:[#allocation177_spill] sm:$0xff] %v10226_v28  ;;  %v10228_v37 = vpop.permute.xlu1 %2687 }
 0x3f1   : > { %13395 = vst [vmem:[#allocation178_spill] sm:$0xff] %v10228_v37  ;;  %2863 = vrot.lane.b32.xlu0 %v9725_v10, %s7709_s26 }
 0x3f2   : > { %2869 = vrot.lane.b32.xlu1 %v9746_v32, %s7709_s26 }
 0x3f3   : > { %v10234_v39 = vpop.permute.xlu0 %2685 }
 0x3f4   : > { %13396 = vst [vmem:[#allocation179_spill] sm:$0xff] %v10234_v39  ;;  %v10236_v61 = vpop.permute.xlu1 %2691 }
 0x3f5   : > { %13397 = vst [vmem:[#allocation180_spill] sm:$0xff] %v10236_v61  ;;  %2867 = vrot.lane.b32.xlu0 %v9749_v57, %s7709_s26 }
 0x3f6   : > { %2873 = vrot.lane.b32.xlu1 %v9770_v23, %s7709_s26 }
 0x3f7   : > { %v10242_v31 = vpop.permute.xlu0 %2689 }
 0x3f8   : > { %13398 = vst [vmem:[#allocation181_spill] sm:$0xff] %v10242_v31  ;;  %v10244_v28 = vpop.permute.xlu1 %2695 }
 0x3f9   : > { %13399 = vst [vmem:[#allocation182_spill] sm:$0xff] %v10244_v28  ;;  %2871 = vrot.lane.b32.xlu0 %v9773_v2, %s7709_s26  ;;  %v3719_v28 = vld [vmem:[%s12821_s3 + $0x40] sm:$0xff] }
 0x3fa   : > { %2877 = vrot.lane.b32.xlu1 %v9794_v48, %s7709_s26  ;;  %7167 = vmatprep.subr.mxu0 %v3719_v28 }
 0x3fb   : > { %v10250_v37 = vpop.permute.xlu0 %2693  ;;  %7168 = vmatpush3.msra.mxu0 %v3719_v28  ;;  %7367 = vmatprep.subr.mxu1 %v3719_v28 }
 0x3fc   : > { %13400 = vst [vmem:[#allocation183_spill] sm:$0xff] %v10250_v37  ;;  %v10252_v39 = vpop.permute.xlu1 %2699  ;;  %7376 = vmatpush3.msra.mxu1 %v3719_v28  ;;  %v3715_v28 = vld [vmem:[%s12821_s3 + $0x20] sm:$0xff] }
 0x3fd   : > { %13401 = vst [vmem:[#allocation184_spill] sm:$0xff] %v10252_v39  ;;  %2875 = vrot.lane.b32.xlu0 %v9797_v56, %s7709_s26  ;;  %v3718_v39 = vld [vmem:[%s12821_s3 + $0x38] sm:$0xff] }
 0x3fe   : > { %2881 = vrot.lane.b32.xlu1 %v9821_v33, %s7709_s26  ;;  %7169 = vmatprep.subr.mxu0 %v3718_v39 }
 0x3ff   : > { %v10258_v61 = vpop.permute.xlu0 %2697  ;;  %7170 = vmatpush3.msra.mxu0 %v3718_v39  ;;  %7368 = vmatprep.subr.mxu1 %v3718_v39 }
 0x400   : > { %13402 = vst [vmem:[#allocation185_spill] sm:$0xff] %v10258_v61  ;;  %v10260_v31 = vpop.permute.xlu1 %2703  ;;  %v3717_v61 = vld [vmem:[%s12821_s3 + $0x30] sm:$0xff]  ;;  %7377 = vmatpush3.msra.mxu1 %v3718_v39 }
 0x401   : > { %13403 = vst [vmem:[#allocation186_spill] sm:$0xff] %v10260_v31  ;;  %2879 = vrot.lane.b32.xlu0 %v9818_v55, %s7709_s26  ;;  %7171 = vmatprep.subr.mxu0 %v3717_v61  ;;  %v3713_v39 = vld [vmem:[%s12821_s3 + $0x10] sm:$0xff] }
 0x402   : > { %2885 = vrot.lane.b32.xlu1 %v9845_v21, %s7709_s26  ;;  %7172 = vmatpush3.msra.mxu0 %v3717_v61 }
 0x403   : > { %v10272_v37 = vpop.permute.xlu0 %2701  ;;  %7173 = vmatprep.subr.mxu0 %v3716_v27  ;;  %7369 = vmatprep.subr.mxu1 %v3717_v61 }
 0x404   : > { %13404 = vst [vmem:[#allocation187_spill] sm:$0xff] %v10272_v37  ;;  %v10274_v31 = vpop.permute.xlu1 %2707  ;;  %7174 = vmatpush3.msra.mxu0 %v3716_v27  ;;  %7378 = vmatpush3.msra.mxu1 %v3717_v61  ;;  %v3711_v61 = vld [vmem:[%s12821_s3] sm:$0xff] }
 0x405   : > { %13405 = vst [vmem:[#allocation188_spill] sm:$0xff] %v10274_v31  ;;  %2883 = vrot.lane.b32.xlu0 %v9848_v12, %s7709_s26  ;;  %7175 = vmatprep.subr.mxu0 %v3715_v28 }
 0x406   : > { %2935 = vrot.lane.b32.xlu1 %v9651_v16, %s7710_s20  ;;  %v3714_v16 = vld [vmem:[%s12821_s3 + $0x18] sm:$0xff]  ;;  %7176 = vmatpush3.msra.mxu0 %v3715_v28 }
 0x407   : > { %v10286_v31 = vpop.permute.xlu0 %2705  ;;  %7177 = vmatprep.subr.mxu0 %v3714_v16  ;;  %7370 = vmatprep.subr.mxu1 %v3716_v27 }
 0x408   : > { %13406 = vst [vmem:[#allocation189_spill] sm:$0xff] %v10286_v31  ;;  %v10288_v37 = vpop.permute.xlu1 %7475  ;;  %7178 = vmatpush3.msra.mxu0 %v3714_v16  ;;  %7379 = vmatpush3.msra.mxu1 %v3716_v27 }
 0x409   : > { %2887 = vrot.lane.b32.xlu0 %v9876_v18, %s7709_s26  ;;  %7179 = vmatprep.subr.mxu0 %v3713_v39 }
 0x40a   : > { %3031 = vrot.lane.b32.xlu1 %v9982_v40, %s7711_s17  ;;  %v3712_v40 = vld [vmem:[%s12821_s3 + $0x8] sm:$0xff]  ;;  %7180 = vmatpush3.msra.mxu0 %v3713_v39 }
 0x40b   : > { %v10300_v31 = vpop.permute.xlu0 %2709  ;;  %7181 = vmatprep.subr.mxu0 %v3712_v40  ;;  %7371 = vmatprep.subr.mxu1 %v3715_v28 }
 0x40c   : > { %13407 = vst [vmem:[#allocation190_spill] sm:$0xff] %v10300_v31  ;;  %v10302_v34 = vpop.permute.xlu1 %2749  ;;  %7182 = vmatpush3.msra.mxu0 %v3712_v40  ;;  %7380 = vmatpush3.msra.mxu1 %v3715_v28 }
 0x40d   : > { %2937 = vrot.lane.b32.xlu0 %v9617_v44, %s7710_s20  ;;  %7183 = vmatprep.subr.mxu0 %v3711_v61 }
 0x40e   : > { %3127 = vrot.lane.b32.xlu1 %v9614_v9, %s7712_s14  ;;  %7184 = vmatpush3.msra.mxu0 %v3711_v61 }
 0x40f   : > { %v10314_v31 = vpop.permute.xlu0 %2747  ;;  %7372 = vmatprep.subr.mxu1 %v3714_v16 }
 0x410   : > { %v10319_v18 = vpop.permute.xlu1 %2753  ;;  %7381 = vmatpush3.msra.mxu1 %v3714_v16 }
 0x411   : > { %3033 = vrot.lane.b32.xlu0 %v9973_v38, %s7711_s17  ;;  %7373 = vmatprep.subr.mxu1 %v3713_v39 }
 0x412   : > { %3223 = vrot.lane.b32.xlu1 %v9636_v53, %s7713_s19  ;;  %7382 = vmatpush3.msra.mxu1 %v3713_v39 }
 0x413   : > { %v10325_v44 = vpop.permute.xlu0 %2751  ;;  %7374 = vmatprep.subr.mxu1 %v3712_v40 }
 0x414   : > { %v10327_v43 = vpop.permute.xlu1 %2757  ;;  %7383 = vmatpush3.msra.mxu1 %v3712_v40 }
 0x415   : > { %3129 = vrot.lane.b32.xlu0 %v9611_v15, %s7712_s14  ;;  %7375 = vmatprep.subr.mxu1 %v3711_v61 }
 0x416   : > { %3225 = vrot.lane.b32.xlu1 %v9685_v63, %s7713_s19  ;;  %7384 = vmatpush3.msra.mxu1 %v3711_v61 }
 0x417   : > { %v10333_v38 = vpop.permute.xlu0 %2755 }
 0x418   : > { %v10335_v27 = vpop.permute.xlu1 %2761 }
 0x419   : > { %13408 = vst [vmem:[#allocation191_spill] sm:$0xff] %v10335_v27  ;;  %2939 = vrot.lane.b32.xlu0 %v9636_v53, %s7710_s20  ;;  %v13461_v27 = vld [vmem:[#allocation115_spill] sm:$0xff] }
 0x41a   : > { %2941 = vrot.lane.b32.xlu1 %v9685_v63, %s7710_s20 }
 0x41b   : > { %v10341_v28 = vpop.permute.xlu0 %2759 }
 0x41c   : > { %13409 = vst [vmem:[#allocation192_spill] sm:$0xff] %v10341_v28  ;;  %v10343_v21 = vpop.permute.xlu1 %2765 }
 0x41d   : > { %13410 = vst [vmem:[#allocation193_spill] sm:$0xff] %v10343_v21  ;;  %3319 = vrot.lane.b32.xlu0 %v9995_v52, %s7714_s21 }
 0x41e   : > { %3321 = vrot.lane.b32.xlu1 %v9986_v42, %s7714_s21 }
 0x41f   : > { %v10349_v16 = vpop.permute.xlu0 %2763 }
 0x420   : > { %13411 = vst [vmem:[#allocation194_spill] sm:$0xff] %v10349_v16  ;;  %v10351_v53 = vpop.permute.xlu1 %2769  ;;  %v13442_v16 = vld [vmem:[#allocation127_spill] sm:$0xff] }
 0x421   : > { %13412 = vst [vmem:[#allocation195_spill] sm:$0xff] %v10351_v53  ;;  %3035 = vrot.lane.b32.xlu0 %v9995_v52, %s7711_s17  ;;  %v13417_v52 = vld [vmem:[#allocation122_spill] sm:$0xff] }
 0x422   : > { %3131 = vrot.lane.b32.xlu1 %v9630_v30, %s7712_s14 }
 0x423   : > { %v10357_v63 = vpop.permute.xlu0 %2767 }
 0x424   : > { %13413 = vst [vmem:[#allocation196_spill] sm:$0xff] %v10357_v63  ;;  %v10359_v39 = vpop.permute.xlu1 %2773 }
 0x425   : > { %13414 = vst [vmem:[#allocation197_spill] sm:$0xff] %v10359_v39  ;;  %3037 = vrot.lane.b32.xlu0 %v9986_v42, %s7711_s17 }
 0x426   : > { %3227 = vrot.lane.b32.xlu1 %v9662_v50, %s7713_s19 }
 0x427   : > { %v10365_v40 = vpop.permute.xlu0 %2771 }
 0x428   : > { %13415 = vst [vmem:[#allocation198_spill] sm:$0xff] %v10365_v40  ;;  %v10367_v61 = vpop.permute.xlu1 %2777 }
 0x429   : > { %13416 = vst [vmem:[#allocation199_spill] sm:$0xff] %v10367_v61  ;;  %3133 = vrot.lane.b32.xlu0 %v9642_v13, %s7712_s14 }
 0x42a   : > { %3229 = vrot.lane.b32.xlu1 %v13417_v52, %s7713_s19 }
 0x42b   : > { %v10373_v53 = vpop.permute.xlu0 %2775 }
 0x42c   : > { %13418 = vst [vmem:[#allocation122_spill] sm:$0xff] %v10373_v53  ;;  %v10375_v63 = vpop.permute.xlu1 %2781 }
 0x42d   : > { %13419 = vst [vmem:[#allocation200_spill] sm:$0xff] %v10375_v63  ;;  %2943 = vrot.lane.b32.xlu0 %v9662_v50, %s7710_s20 }
 0x42e   : > { %2945 = vrot.lane.b32.xlu1 %v13417_v52, %s7710_s20 }
 0x42f   : > { %v10381_v42 = vpop.permute.xlu0 %2779 }
 0x430   : > { %13420 = vst [vmem:[#allocation201_spill] sm:$0xff] %v10381_v42  ;;  %v10383_v39 = vpop.permute.xlu1 %2785 }
 0x431   : > { %13421 = vst [vmem:[#allocation202_spill] sm:$0xff] %v10383_v39  ;;  %3323 = vrot.lane.b32.xlu0 %v10008_v24, %s7714_s21  ;;  %v13426_v39 = vld [vmem:[#allocation119_spill] sm:$0xff] }
 0x432   : > { %3325 = vrot.lane.b32.xlu1 %v9999_v8, %s7714_s21 }
 0x433   : > { %v10389_v61 = vpop.permute.xlu0 %2783 }
 0x434   : > { %13422 = vst [vmem:[#allocation203_spill] sm:$0xff] %v10389_v61  ;;  %v10391_v53 = vpop.permute.xlu1 %2789 }
 0x435   : > { %13423 = vst [vmem:[#allocation204_spill] sm:$0xff] %v10391_v53  ;;  %3039 = vrot.lane.b32.xlu0 %v10008_v24, %s7711_s17  ;;  %v13429_v24 = vld [vmem:[#allocation126_spill] sm:$0xff] }
 0x436   : > { %3135 = vrot.lane.b32.xlu1 %v9658_v62, %s7712_s14 }
 0x437   : > { %v10397_v50 = vpop.permute.xlu0 %2787 }
 0x438   : > { %13424 = vst [vmem:[#allocation205_spill] sm:$0xff] %v10397_v50  ;;  %v10399_v52 = vpop.permute.xlu1 %2793 }
 0x439   : > { %13425 = vst [vmem:[#allocation206_spill] sm:$0xff] %v10399_v52  ;;  %3041 = vrot.lane.b32.xlu0 %v9999_v8, %s7711_s17 }
 0x43a   : > { %3231 = vrot.lane.b32.xlu1 %v13426_v39, %s7713_s19 }
 0x43b   : > { %v10405_v63 = vpop.permute.xlu0 %2791 }
 0x43c   : > { %13427 = vst [vmem:[#allocation119_spill] sm:$0xff] %v10405_v63  ;;  %v10407_v61 = vpop.permute.xlu1 %2797 }
 0x43d   : > { %13428 = vst [vmem:[#allocation207_spill] sm:$0xff] %v10407_v61  ;;  %3137 = vrot.lane.b32.xlu0 %v9665_v26, %s7712_s14 }
 0x43e   : > { %3233 = vrot.lane.b32.xlu1 %v13429_v24, %s7713_s19 }
 0x43f   : > { %v10413_v53 = vpop.permute.xlu0 %2795 }
 0x440   : > { %13430 = vst [vmem:[#allocation126_spill] sm:$0xff] %v10413_v53  ;;  %v10415_v50 = vpop.permute.xlu1 %2801 }
 0x441   : > { %13431 = vst [vmem:[#allocation208_spill] sm:$0xff] %v10415_v50  ;;  %2947 = vrot.lane.b32.xlu0 %v13426_v39, %s7710_s20 }
 0x442   : > { %2949 = vrot.lane.b32.xlu1 %v13429_v24, %s7710_s20 }
 0x443   : > { %v10421_v8 = vpop.permute.xlu0 %2799 }
 0x444   : > { %13432 = vst [vmem:[#allocation209_spill] sm:$0xff] %v10421_v8  ;;  %v10423_v52 = vpop.permute.xlu1 %2805 }
 0x445   : > { %13433 = vst [vmem:[#allocation210_spill] sm:$0xff] %v10423_v52  ;;  %3327 = vrot.lane.b32.xlu0 %v10021_v20, %s7714_s21  ;;  %v13435_v52 = vld [vmem:[#allocation123_spill] sm:$0xff] }
 0x446   : > { %3329 = vrot.lane.b32.xlu1 %v10012_v3, %s7714_s21 }
 0x447   : > { %v10429_v61 = vpop.permute.xlu0 %2803 }
 0x448   : > { %13434 = vst [vmem:[#allocation211_spill] sm:$0xff] %v10429_v61  ;;  %v10431_v53 = vpop.permute.xlu1 %2841 }
 0x449   : > { %3043 = vrot.lane.b32.xlu0 %v10021_v20, %s7711_s17  ;;  %v13436_v20 = vld [vmem:[#allocation128_spill] sm:$0xff] }
 0x44a   : > { %3139 = vrot.lane.b32.xlu1 %v9677_v29, %s7712_s14 }
 0x44b   : > { %v10437_v39 = vpop.permute.xlu0 %2839 }
 0x44c   : > { %v10439_v24 = vpop.permute.xlu1 %2845 }
 0x44d   : > { %3045 = vrot.lane.b32.xlu0 %v10012_v3, %s7711_s17 }
 0x44e   : > { %3235 = vrot.lane.b32.xlu1 %v13435_v52, %s7713_s19 }
 0x44f   : > { %v10445_v50 = vpop.permute.xlu0 %2843 }
 0x450   : > { %v10447_v61 = vpop.permute.xlu1 %2849 }
 0x451   : > { %3141 = vrot.lane.b32.xlu0 %v9674_v0, %s7712_s14 }
 0x452   : > { %3237 = vrot.lane.b32.xlu1 %v13436_v20, %s7713_s19 }
 0x453   : > { %v10453_v8 = vpop.permute.xlu0 %2847 }
 0x454   : > { %v10455_v63 = vpop.permute.xlu1 %2853 }
 0x455   : > { %2951 = vrot.lane.b32.xlu0 %v13435_v52, %s7710_s20 }
 0x456   : > { %2953 = vrot.lane.b32.xlu1 %v13436_v20, %s7710_s20 }
 0x457   : > { %v10461_v3 = vpop.permute.xlu0 %2851 }
 0x458   : > { %v10463_v42 = vpop.permute.xlu1 %2857 }
 0x459   : > { %13437 = vst [vmem:[#allocation123_spill] sm:$0xff] %v10463_v42  ;;  %3331 = vrot.lane.b32.xlu0 %v10034_v54, %s7714_s21 }
 0x45a   : > { %3333 = vrot.lane.b32.xlu1 %v10025_v58, %s7714_s21 }
 0x45b   : > { %v10469_v40 = vpop.permute.xlu0 %2855 }
 0x45c   : > { %13438 = vst [vmem:[#allocation128_spill] sm:$0xff] %v10469_v40  ;;  %v10471_v21 = vpop.permute.xlu1 %2861 }
 0x45d   : > { %13439 = vst [vmem:[#allocation212_spill] sm:$0xff] %v10471_v21  ;;  %3047 = vrot.lane.b32.xlu0 %v10034_v54, %s7711_s17  ;;  %v13445_v54 = vld [vmem:[#allocation130_spill] sm:$0xff] }
 0x45e   : > { %3143 = vrot.lane.b32.xlu1 %v9701_v7, %s7712_s14 }
 0x45f   : > { %v10477_v52 = vpop.permute.xlu0 %2859 }
 0x460   : > { %13440 = vst [vmem:[#allocation213_spill] sm:$0xff] %v10477_v52  ;;  %v10479_v20 = vpop.permute.xlu1 %2865  ;;  %v13460_v52 = vld [vmem:[#allocation114_spill] sm:$0xff] }
 0x461   : > { %13441 = vst [vmem:[#allocation214_spill] sm:$0xff] %v10479_v20  ;;  %3049 = vrot.lane.b32.xlu0 %v10025_v58, %s7711_s17 }
 0x462   : > { %3239 = vrot.lane.b32.xlu1 %v13442_v16, %s7713_s19 }
 0x463   : > { %v10485_v0 = vpop.permute.xlu0 %2863 }
 0x464   : > { %13443 = vst [vmem:[#allocation127_spill] sm:$0xff] %v10485_v0  ;;  %v10487_v29 = vpop.permute.xlu1 %2869 }
 0x465   : > { %13444 = vst [vmem:[#allocation215_spill] sm:$0xff] %v10487_v29  ;;  %3145 = vrot.lane.b32.xlu0 %v9698_v45, %s7712_s14  ;;  %v13450_v29 = vld [vmem:[#allocation156_spill] sm:$0xff]  ;;  %v7478_v45 = vunpack.i.h.bf16 %v10288_v37 }
 0x466   : > { %3241 = vrot.lane.b32.xlu1 %v13445_v54, %s7713_s19 }
 0x467   : > { %v10493_v7 = vpop.permute.xlu0 %2867 }
 0x468   : > { %13446 = vst [vmem:[#allocation130_spill] sm:$0xff] %v10493_v7  ;;  %v10495_v21 = vpop.permute.xlu1 %2873 }
 0x469   : > { %13447 = vst [vmem:[#allocation216_spill] sm:$0xff] %v10495_v21  ;;  %2955 = vrot.lane.b32.xlu0 %v13442_v16, %s7710_s20 }
 0x46a   : > { %2957 = vrot.lane.b32.xlu1 %v13445_v54, %s7710_s20 }
 0x46b   : > { %v10501_v58 = vpop.permute.xlu0 %2871 }
 0x46c   : > { %13448 = vst [vmem:[#allocation217_spill] sm:$0xff] %v10501_v58  ;;  %v10503_v20 = vpop.permute.xlu1 %2877 }
 0x46d   : > { %13449 = vst [vmem:[#allocation218_spill] sm:$0xff] %v10503_v20  ;;  %3335 = vrot.lane.b32.xlu0 %v10047_v51, %s7714_s21  ;;  %v13455_v20 = vld [vmem:[#allocation129_spill] sm:$0xff] }
 0x46e   : > { %3337 = vrot.lane.b32.xlu1 %v13450_v29, %s7714_s21 }
 0x46f   : > { %v10509_v0 = vpop.permute.xlu0 %2875 }
 0x470   : > { %13451 = vst [vmem:[#allocation156_spill] sm:$0xff] %v10509_v0  ;;  %v10511_v7 = vpop.permute.xlu1 %2881 }
 0x471   : > { %13452 = vst [vmem:[#allocation219_spill] sm:$0xff] %v10511_v7  ;;  %3051 = vrot.lane.b32.xlu0 %v10047_v51, %s7711_s17  ;;  %v13457_v51 = vld [vmem:[#allocation132_spill] sm:$0xff] }
 0x472   : > { %3147 = vrot.lane.b32.xlu1 %v9725_v10, %s7712_s14 }
 0x473   : > { %v10517_v16 = vpop.permute.xlu0 %2879 }
 0x474   : > { %13453 = vst [vmem:[#allocation220_spill] sm:$0xff] %v10517_v16  ;;  %v10519_v54 = vpop.permute.xlu1 %2885 }
 0x475   : > { %13454 = vst [vmem:[#allocation221_spill] sm:$0xff] %v10519_v54  ;;  %3053 = vrot.lane.b32.xlu0 %v13450_v29, %s7711_s17 }
 0x476   : > { %3243 = vrot.lane.b32.xlu1 %v13455_v20, %s7713_s19 }
 0x477   : > { %v10525_v21 = vpop.permute.xlu0 %2883 }
 0x478   : > { %13456 = vst [vmem:[#allocation129_spill] sm:$0xff] %v10525_v21  ;;  %v2936_v0 = vpop.permute.xlu1 %2935  ;;  %v13459_v21 = vld [vmem:[#allocation157_spill] sm:$0xff] }
 0x479   : > { %3149 = vrot.lane.b32.xlu0 %v9722_v6, %s7712_s14  ;;  %v7473_v6 = vunpack.i.h.bf16 %v10156_v17 }
 0x47a   : > { %3245 = vrot.lane.b32.xlu1 %v13457_v51, %s7713_s19 }
 0x47b   : > { %v10531_v7 = vpop.permute.xlu0 %2887  ;;  %v3417_v42 = vsel %vm3415_vm0, %v13460_v52, %v7473_v6  ;;  %v13462_v6 = vld [vmem:[#allocation131_spill] sm:$0xff] }
 0x47c   : > { %13458 = vst [vmem:[#allocation132_spill] sm:$0xff] %v10531_v7  ;;  %v3032_v16 = vpop.permute.xlu1 %3031  ;;  %v7472_v7 = vunpack.i.l.bf16 %v10156_v17  ;;  %v10552_v17 = vsel %vm3448_vm15, %v3417_v42, %v7478_v45 }
 0x47d   : > { %2959 = vrot.lane.b32.xlu0 %v13455_v20, %s7710_s20  ;;  %v7477_v20 = vunpack.i.l.bf16 %v10288_v37  ;;  %v3483_v37 = vsel %vm3481_vm1, %v10552_v17, %v10431_v53 }
 0x47e   : > { %2961 = vrot.lane.b32.xlu1 %v13457_v51, %s7710_s20  ;;  %v3416_v28 = vsel %vm3415_vm0, %v13461_v27, %v7472_v7 }
 0x47f   : > { %v2938_v29 = vpop.permute.xlu0 %2937 }
 0x480   : > { %v3128_v54 = vpop.permute.xlu1 %3127  ;;  %v3516_v7 = vsel %vm3514_vm2, %v3483_v37, %v2938_v29  ;;  %v13463_v29 = vld [vmem:[#allocation134_spill] sm:$0xff] }
 0x481   : > { %3339 = vrot.lane.b32.xlu0 %v10060_v49, %s7714_s21 }
 0x482   : > { %3341 = vrot.lane.b32.xlu1 %v13459_v21, %s7714_s21 }
 0x483   : > { %v3034_v58 = vpop.permute.xlu0 %3033 }
 0x484   : > { %v3224_v10 = vpop.permute.xlu1 %3223  ;;  %v3549_v52 = vsel %vm3547_vm3, %v3516_v7, %v3034_v58 }
 0x485   : > { %3055 = vrot.lane.b32.xlu0 %v10060_v49, %s7711_s17  ;;  %v10562_v49 = vsel %vm3448_vm15, %v3416_v28, %v7477_v20 }
 0x486   : > { %3151 = vrot.lane.b32.xlu1 %v9749_v57, %s7712_s14  ;;  %v3482_v45 = vsel %vm3481_vm1, %v10562_v49, %v10437_v39 }
 0x487   : > { %v3130_v51 = vpop.permute.xlu0 %3129 }
 0x488   : > { %v3226_v40 = vpop.permute.xlu1 %3225  ;;  %v3582_v20 = vsel %vm3580_vm4, %v3549_v52, %v3130_v51 }
 0x489   : > { %3057 = vrot.lane.b32.xlu0 %v13459_v21, %s7711_s17  ;;  %v3515_v21 = vsel %vm3514_vm2, %v3482_v45, %v2936_v0  ;;  %v3615_v58 = vsel %vm3613_vm5, %v3582_v20, %v3226_v40  ;;  %v13464_v40 = vld [vmem:[#allocation158_spill] sm:$0xff] }
 0x48a   : > { %3247 = vrot.lane.b32.xlu1 %v13462_v6, %s7713_s19  ;;  %v3548_v28 = vsel %vm3547_vm3, %v3515_v21, %v3032_v16 }
 0x48b   : > { %v2940_v42 = vpop.permute.xlu0 %2939  ;;  %v3581_v39 = vsel %vm3580_vm4, %v3548_v28, %v3128_v54  ;;  %v3419_v28 = vsel %vm3415_vm0, %v9591_v11, %v10146_v14  ;;  %v13465_v11 = vld [vmem:[#allocation133_spill] sm:$0xff] }
 0x48c   : > { %v2942_v53 = vpop.permute.xlu1 %2941  ;;  %v3614_v0 = vsel %vm3613_vm5, %v3581_v39, %v3224_v10 }
 0x48d   : > { %3153 = vrot.lane.b32.xlu0 %v9746_v32, %s7712_s14 }
 0x48e   : > { %3249 = vrot.lane.b32.xlu1 %v13463_v29, %s7713_s19 }
 0x48f   : > { %v3320_v37 = vpop.permute.xlu0 %3319 }
 0x490   : > { %v3322_v45 = vpop.permute.xlu1 %3321  ;;  %v3647_v16 = vsel %vm3646_vm6, %v3614_v0, %v3320_v37 }
 0x491   : > { %v3648_v52 = vsel %vm3646_vm6, %v3615_v58, %v3322_v45  ;;  %2963 = vrot.lane.b32.xlu0 %v13462_v6, %s7710_s20  ;;  %7185 = vmatprep.mubr.msk.f32.mxu0 %vm3720_vm7, %v3647_v16  ;;  %v3418_v6 = vsel %vm3415_vm0, %v9627_v59, %v10170_v60 }
 0x492   : > { %2965 = vrot.lane.b32.xlu1 %v13463_v29, %s7710_s20  ;;  %7186 = vmatmul.mubr.msk.f32.vlgmr.msra.gmra.mxu0 %vm3720_vm7, %v3648_v52  ;;  %v3451_v20 = vsel %vm3448_vm15, %v3418_v6, %v10314_v31  ;;  %v3452_v29 = vsel %vm3448_vm15, %v3419_v28, %v10302_v34 }
 0x493   : > { %v3036_v54 = vpop.permute.xlu0 %3035  ;;  %v3485_v59 = vsel %vm3481_vm1, %v3452_v29, %v10439_v24 }
 0x494   : > { %v3132_v10 = vpop.permute.xlu1 %3131  ;;  %v3518_v14 = vsel %vm3514_vm2, %v3485_v59, %v2942_v53 }
 0x495   : > { %3343 = vrot.lane.b32.xlu0 %v10073_v35, %s7714_s21 }
 0x496   : > { %3345 = vrot.lane.b32.xlu1 %v13464_v40, %s7714_s21 }
 0x497   : > { %v3038_v51 = vpop.permute.xlu0 %3037 }
 0x498   : > { %v3228_v7 = vpop.permute.xlu1 %3227  ;;  %v3551_v34 = vsel %vm3547_vm3, %v3518_v14, %v3038_v51  ;;  %v13467_v51 = vld [vmem:[#allocation159_spill] sm:$0xff] }
 0x499   : > { %3059 = vrot.lane.b32.xlu0 %v10073_v35, %s7711_s17  ;;  %v3484_v35 = vsel %vm3481_vm1, %v3451_v20, %v10445_v50  ;;  %v3421_v20 = vsel %vm3415_vm0, %v9611_v15, %v10178_v46  ;;  %v13468_v15 = vld [vmem:[#allocation135_spill] sm:$0xff] }
 0x49a   : > { %3155 = vrot.lane.b32.xlu1 %v9773_v2, %s7712_s14  ;;  %v3517_v60 = vsel %vm3514_vm2, %v3484_v35, %v2940_v42  ;;  %v13466_v42 = vld [vmem:[#allocation137_spill] sm:$0xff]  ;;  %v3454_v35 = vsel %vm3448_vm15, %v3421_v20, %v10319_v18 }
 0x49b   : > { %v3134_v21 = vpop.permute.xlu0 %3133  ;;  %v3550_v31 = vsel %vm3547_vm3, %v3517_v60, %v3036_v54 }
 0x49c   : > { %v3230_v39 = vpop.permute.xlu1 %3229  ;;  %v3584_v50 = vsel %vm3580_vm4, %v3551_v34, %v3134_v21  ;;  %v3583_v24 = vsel %vm3580_vm4, %v3550_v31, %v3132_v10  ;;  %v3420_v21 = vsel %vm3415_vm0, %v9614_v9, %v10161_v22  ;;  %v3487_v9 = vsel %vm3481_vm1, %v3454_v35, %v10447_v61 }
 0x49d   : > { %3061 = vrot.lane.b32.xlu0 %v13464_v40, %s7711_s17  ;;  %v3616_v58 = vsel %vm3613_vm5, %v3583_v24, %v3228_v7  ;;  %v3617_v53 = vsel %vm3613_vm5, %v3584_v50, %v3230_v39  ;;  %v3453_v39 = vsel %vm3448_vm15, %v3420_v21, %v10325_v44  ;;  %v13472_v21 = vld [vmem:[#allocation146_spill] sm:$0xff] }
 0x49e   : > { %3251 = vrot.lane.b32.xlu1 %v13465_v11, %s7713_s19 }
 0x49f   : > { %v2944_v0 = vpop.permute.xlu0 %2943 }
 0x4a0   : > { %v2946_v37 = vpop.permute.xlu1 %2945 }
 0x4a1   : > { %3157 = vrot.lane.b32.xlu0 %v9770_v23, %s7712_s14  ;;  %v3520_v46 = vsel %vm3514_vm2, %v3487_v9, %v2946_v37 }
 0x4a2   : > { %3253 = vrot.lane.b32.xlu1 %v13466_v42, %s7713_s19 }
 0x4a3   : > { %v3324_v45 = vpop.permute.xlu0 %3323 }
 0x4a4   : > { %v3649_v16 = vsel %vm3646_vm6, %v3616_v58, %v3324_v45  ;;  %v3326_v52 = vpop.permute.xlu1 %3325  ;;  %v13470_v58 = vld [vmem:[#allocation160_spill] sm:$0xff] }
 0x4a5   : > { %v3650_v54 = vsel %vm3646_vm6, %v3617_v53, %v3326_v52  ;;  %2967 = vrot.lane.b32.xlu0 %v13465_v11, %s7710_s20  ;;  %7188 = vmatprep.mubr.msk.f32.mxu0 %vm3720_vm7, %v3649_v16  ;;  %v13469_v11 = vld [vmem:[#allocation142_spill] sm:$0xff]  ;;  %v3422_v16 = vsel %vm3415_vm0, %v9630_v30, %v10172_v36 }
 0x4a6   : > { %2969 = vrot.lane.b32.xlu1 %v13466_v42, %s7710_s20  ;;  %7189 = vmatmul.mubr.msk.f32.gmra.mxu0 %vm3720_vm7, %v3650_v54  ;;  %v3423_v54 = vsel %vm3415_vm0, %v9642_v13, %v10186_v4  ;;  %v13471_v13 = vld [vmem:[#allocation139_spill] sm:$0xff] }
 0x4a7   : > { %v3040_v10 = vpop.permute.xlu0 %3039 }
 0x4a8   : > { %v3136_v40 = vpop.permute.xlu1 %3135 }
 0x4a9   : > { %3347 = vrot.lane.b32.xlu0 %v10086_v25, %s7714_s21 }
 0x4aa   : > { %3349 = vrot.lane.b32.xlu1 %v13467_v51, %s7714_s21 }
 0x4ab   : > { %v3042_v7 = vpop.permute.xlu0 %3041 }
 0x4ac   : > { %v3232_v6 = vpop.permute.xlu1 %3231  ;;  %v3553_v18 = vsel %vm3547_vm3, %v3520_v46, %v3042_v7 }
 0x4ad   : > { %3063 = vrot.lane.b32.xlu0 %v10086_v25, %s7711_s17  ;;  %v3486_v25 = vsel %vm3481_vm1, %v3453_v39, %v10453_v8 }
 0x4ae   : > { %3159 = vrot.lane.b32.xlu1 %v9797_v56, %s7712_s14  ;;  %v3519_v22 = vsel %vm3514_vm2, %v3486_v25, %v2944_v0 }
 0x4af   : > { %v3138_v28 = vpop.permute.xlu0 %3137  ;;  %v3552_v44 = vsel %vm3547_vm3, %v3519_v22, %v3040_v10  ;;  %v3455_v10 = vsel %vm3448_vm15, %v3422_v16, %v10333_v38 }
 0x4b0   : > { %v3234_v29 = vpop.permute.xlu1 %3233  ;;  %v3586_v8 = vsel %vm3580_vm4, %v3553_v18, %v3138_v28  ;;  %v3585_v61 = vsel %vm3580_vm4, %v3552_v44, %v3136_v40  ;;  %v3424_v44 = vsel %vm3415_vm0, %v9658_v62, %v10180_v19  ;;  %v3425_v18 = vsel %vm3415_vm0, %v9665_v26, %v10194_v41  ;;  %v13477_v26 = vld [vmem:[#allocation143_spill] sm:$0xff] }
 0x4b1   : > { %3065 = vrot.lane.b32.xlu0 %v13467_v51, %s7711_s17  ;;  %v3618_v14 = vsel %vm3613_vm5, %v3585_v61, %v3232_v6  ;;  %v3619_v0 = vsel %vm3613_vm5, %v3586_v8, %v3234_v29  ;;  %v3456_v51 = vsel %vm3448_vm15, %v3423_v54, %v10327_v43 }
 0x4b2   : > { %3255 = vrot.lane.b32.xlu1 %v13468_v15, %s7713_s19  ;;  %v3489_v30 = vsel %vm3481_vm1, %v3456_v51, %v10455_v63 }
 0x4b3   : > { %v2948_v59 = vpop.permute.xlu0 %2947 }
 0x4b4   : > { %v2950_v60 = vpop.permute.xlu1 %2949 }
 0x4b5   : > { %3161 = vrot.lane.b32.xlu0 %v9794_v48, %s7712_s14  ;;  %v3522_v4 = vsel %vm3514_vm2, %v3489_v30, %v2950_v60  ;;  %v13473_v60 = vld [vmem:[#allocation192_spill] sm:$0xff]  ;;  %v13480_v30 = vld [vmem:[#allocation162_spill] sm:$0xff] }
 0x4b6   : > { %3257 = vrot.lane.b32.xlu1 %v13469_v11, %s7713_s19  ;;  %v3457_v8 = vsel %vm3448_vm15, %v3424_v44, %v13473_v60 }
 0x4b7   : > { %v3328_v31 = vpop.permute.xlu0 %3327 }
 0x4b8   : > { %v3651_v34 = vsel %vm3646_vm6, %v3618_v14, %v3328_v31  ;;  %v3330_v37 = vpop.permute.xlu1 %3329 }
 0x4b9   : > { %v3652_v50 = vsel %vm3646_vm6, %v3619_v0, %v3330_v37  ;;  %2971 = vrot.lane.b32.xlu0 %v13468_v15, %s7710_s20  ;;  %7191 = vmatprep.mubr.msk.f32.mxu0 %vm3720_vm7, %v3651_v34  ;;  %v13476_v0 = vld [vmem:[#allocation123_spill] sm:$0xff] }
 0x4ba   : > { %2973 = vrot.lane.b32.xlu1 %v13469_v11, %s7710_s20  ;;  %7192 = vmatmul.mubr.msk.f32.gmra.mxu0 %vm3720_vm7, %v3652_v50  ;;  %v13474_v11 = vld [vmem:[#allocation191_spill] sm:$0xff] }
 0x4bb   : > { %v3044_v24 = vpop.permute.xlu0 %3043  ;;  %v3458_v14 = vsel %vm3448_vm15, %v3425_v18, %v13474_v11 }
 0x4bc   : > { %v3140_v42 = vpop.permute.xlu1 %3139  ;;  %v3491_v62 = vsel %vm3481_vm1, %v3458_v14, %v13476_v0 }
 0x4bd   : > { %3351 = vrot.lane.b32.xlu0 %v10099_v47, %s7714_s21 }
 0x4be   : > { %3353 = vrot.lane.b32.xlu1 %v13470_v58, %s7714_s21 }
 0x4bf   : > { %v3046_v45 = vpop.permute.xlu0 %3045 }
 0x4c0   : > { %v3236_v53 = vpop.permute.xlu1 %3235  ;;  %v3555_v43 = vsel %vm3547_vm3, %v3522_v4, %v3046_v45  ;;  %v13479_v45 = vld [vmem:[#allocation150_spill] sm:$0xff] }
 0x4c1   : > { %3067 = vrot.lane.b32.xlu0 %v10099_v47, %s7711_s17  ;;  %v3488_v47 = vsel %vm3481_vm1, %v3455_v10, %v10461_v3 }
 0x4c2   : > { %3163 = vrot.lane.b32.xlu1 %v9818_v55, %s7712_s14  ;;  %v3521_v36 = vsel %vm3514_vm2, %v3488_v47, %v2948_v59 }
 0x4c3   : > { %v3142_v52 = vpop.permute.xlu0 %3141  ;;  %v3554_v38 = vsel %vm3547_vm3, %v3521_v36, %v3044_v24  ;;  %v13481_v36 = vld [vmem:[#allocation161_spill] sm:$0xff] }
 0x4c4   : > { %v3238_v40 = vpop.permute.xlu1 %3237  ;;  %v3588_v3 = vsel %vm3580_vm4, %v3555_v43, %v3142_v52  ;;  %v3587_v63 = vsel %vm3580_vm4, %v3554_v38, %v3140_v42  ;;  %v13482_v38 = vld [vmem:[#allocation141_spill] sm:$0xff]  ;;  %v13484_v43 = vld [vmem:[#allocation118_spill] sm:$0xff] }
 0x4c5   : > { %3069 = vrot.lane.b32.xlu0 %v13470_v58, %s7711_s17  ;;  %v3620_v28 = vsel %vm3613_vm5, %v3587_v63, %v3236_v53  ;;  %v3621_v39 = vsel %vm3613_vm5, %v3588_v3, %v3238_v40  ;;  %v13485_v63 = vld [vmem:[#allocation171_spill] sm:$0xff] }
 0x4c6   : > { %3259 = vrot.lane.b32.xlu1 %v13471_v13, %s7713_s19 }
 0x4c7   : > { %v2952_v7 = vpop.permute.xlu0 %2951 }
 0x4c8   : > { %v2954_v6 = vpop.permute.xlu1 %2953 }
 0x4c9   : > { %3165 = vrot.lane.b32.xlu0 %v9821_v33, %s7712_s14  ;;  %v3524_v41 = vsel %vm3514_vm2, %v3491_v62, %v2954_v6 }
 0x4ca   : > { %3261 = vrot.lane.b32.xlu1 %v13472_v21, %s7713_s19 }
 0x4cb   : > { %v3332_v20 = vpop.permute.xlu0 %3331 }
 0x4cc   : > { %v3653_v29 = vsel %vm3646_vm6, %v3620_v28, %v3332_v20  ;;  %v3334_v35 = vpop.permute.xlu1 %3333  ;;  %v13487_v20 = vld [vmem:[#allocation194_spill] sm:$0xff] }
 0x4cd   : > { %v3654_v25 = vsel %vm3646_vm6, %v3621_v39, %v3334_v35  ;;  %2975 = vrot.lane.b32.xlu0 %v13471_v13, %s7710_s20  ;;  %7194 = vmatprep.mubr.msk.f32.mxu0 %vm3720_vm7, %v3653_v29  ;;  %v13488_v35 = vld [vmem:[#allocation193_spill] sm:$0xff] }
 0x4ce   : > { %2977 = vrot.lane.b32.xlu1 %v13472_v21, %s7710_s20  ;;  %7195 = vmatmul.mubr.msk.f32.gmra.mxu0 %vm3720_vm7, %v3654_v25  ;;  %v13486_v21 = vld [vmem:[#allocation117_spill] sm:$0xff] }
 0x4cf   : > { %v3048_v9 = vpop.permute.xlu0 %3047  ;;  %v3427_v28 = vsel %vm3415_vm0, %v13486_v21, %v13485_v63 }
 0x4d0   : > { %v3144_v22 = vpop.permute.xlu1 %3143  ;;  %v3460_v25 = vsel %vm3448_vm15, %v3427_v28, %v13488_v35  ;;  %v13504_v28 = vld [vmem:[#allocation145_spill] sm:$0xff] }
 0x4d1   : > { %3355 = vrot.lane.b32.xlu0 %v10112_v1, %s7714_s21 }
 0x4d2   : > { %3357 = vrot.lane.b32.xlu1 %v10103_v5, %s7714_s21 }
 0x4d3   : > { %v3050_v15 = vpop.permute.xlu0 %3049 }
 0x4d4   : > { %v3240_v46 = vpop.permute.xlu1 %3239  ;;  %v3557_v50 = vsel %vm3547_vm3, %v3524_v41, %v3050_v15  ;;  %v13490_v15 = vld [vmem:[#allocation212_spill] sm:$0xff] }
 0x4d5   : > { %3071 = vrot.lane.b32.xlu0 %v10112_v1, %s7711_s17  ;;  %v13475_v1 = vld [vmem:[#allocation128_spill] sm:$0xff] }
 0x4d6   : > { %3167 = vrot.lane.b32.xlu1 %v9848_v12, %s7712_s14  ;;  %v3490_v31 = vsel %vm3481_vm1, %v3457_v8, %v13475_v1  ;;  %v13492_v1 = vld [vmem:[#allocation140_spill] sm:$0xff] }
 0x4d7   : > { %v3146_v59 = vpop.permute.xlu0 %3145  ;;  %v3523_v19 = vsel %vm3514_vm2, %v3490_v31, %v2952_v7  ;;  %v13483_v7 = vld [vmem:[#allocation169_spill] sm:$0xff] }
 0x4d8   : > { %v3242_v61 = vpop.permute.xlu1 %3241  ;;  %v3556_v34 = vsel %vm3547_vm3, %v3523_v19, %v3048_v9  ;;  %v3590_v42 = vsel %vm3580_vm4, %v3557_v50, %v3146_v59  ;;  %v3426_v6 = vsel %vm3415_vm0, %v13484_v43, %v13483_v7  ;;  %v13489_v9 = vld [vmem:[#allocation213_spill] sm:$0xff]  ;;  %v13491_v59 = vld [vmem:[#allocation147_spill] sm:$0xff] }
 0x4d9   : > { %3073 = vrot.lane.b32.xlu0 %v10103_v5, %s7711_s17  ;;  %v13478_v5 = vld [vmem:[#allocation136_spill] sm:$0xff]  ;;  %v3589_v58 = vsel %vm3580_vm4, %v3556_v34, %v3144_v22  ;;  %v3623_v52 = vsel %vm3613_vm5, %v3590_v42, %v3242_v61  ;;  %v3459_v39 = vsel %vm3448_vm15, %v3426_v6, %v13487_v20  ;;  %v13502_v43 = vld [vmem:[#allocation127_spill] sm:$0xff] }
 0x4da   : > { %3263 = vrot.lane.b32.xlu1 %v13477_v26, %s7713_s19  ;;  %v3622_v53 = vsel %vm3613_vm5, %v3589_v58, %v3240_v46  ;;  %v3492_v22 = vsel %vm3481_vm1, %v3459_v39, %v13489_v9  ;;  %v3493_v46 = vsel %vm3481_vm1, %v3460_v25, %v13490_v15  ;;  %v13494_v42 = vld [vmem:[#allocation152_spill] sm:$0xff]  ;;  %v13505_v15 = vld [vmem:[#allocation151_spill] sm:$0xff] }
 0x4db   : > { %v2956_v37 = vpop.permute.xlu0 %2955 }
 0x4dc   : > { %v2958_v24 = vpop.permute.xlu1 %2957  ;;  %v3525_v44 = vsel %vm3514_vm2, %v3492_v22, %v2956_v37  ;;  %v13493_v37 = vld [vmem:[#allocation164_spill] sm:$0xff] }
 0x4dd   : > { %3169 = vrot.lane.b32.xlu0 %v13478_v5, %s7712_s14  ;;  %v3526_v18 = vsel %vm3514_vm2, %v3493_v46, %v2958_v24 }
 0x4de   : > { %3265 = vrot.lane.b32.xlu1 %v13479_v45, %s7713_s19 }
 0x4df   : > { %v3336_v16 = vpop.permute.xlu0 %3335 }
 0x4e0   : > { %v3655_v54 = vsel %vm3646_vm6, %v3622_v53, %v3336_v16  ;;  %v3338_v10 = vpop.permute.xlu1 %3337  ;;  %v13495_v53 = vld [vmem:[#allocation163_spill] sm:$0xff]  ;;  %v13496_v16 = vld [vmem:[#allocation170_spill] sm:$0xff] }
 0x4e1   : > { %v3656_v40 = vsel %vm3646_vm6, %v3623_v52, %v3338_v10  ;;  %2979 = vrot.lane.b32.xlu0 %v13477_v26, %s7710_s20  ;;  %7197 = vmatprep.mubr.msk.f32.mxu0 %vm3720_vm7, %v3655_v54  ;;  %v13497_v52 = vld [vmem:[#allocation121_spill] sm:$0xff] }
 0x4e2   : > { %2981 = vrot.lane.b32.xlu1 %v13479_v45, %s7710_s20  ;;  %7198 = vmatmul.mubr.msk.f32.gmra.mxu0 %vm3720_vm7, %v3656_v40  ;;  %v3428_v54 = vsel %vm3415_vm0, %v13497_v52, %v13496_v16  ;;  %v13498_v40 = vld [vmem:[#allocation173_spill] sm:$0xff] }
 0x4e3   : > { %v3052_v51 = vpop.permute.xlu0 %3051  ;;  %v13514_v16 = vld [vmem:[#allocation197_spill] sm:$0xff] }
 0x4e4   : > { %v3148_v47 = vpop.permute.xlu1 %3147  ;;  %v3558_v60 = vsel %vm3547_vm3, %v3525_v44, %v3052_v51  ;;  %v13499_v51 = vld [vmem:[#allocation120_spill] sm:$0xff] }
 0x4e5   : > { %3359 = vrot.lane.b32.xlu0 %v13480_v30, %s7714_s21  ;;  %v3591_v31 = vsel %vm3580_vm4, %v3558_v60, %v3148_v47  ;;  %v3429_v47 = vsel %vm3415_vm0, %v13499_v51, %v13498_v40  ;;  %v13516_v40 = vld [vmem:[#allocation215_spill] sm:$0xff] }
 0x4e6   : > { %3361 = vrot.lane.b32.xlu1 %v13481_v36, %s7714_s21 }
 0x4e7   : > { %v3054_v13 = vpop.permute.xlu0 %3053 }
 0x4e8   : > { %v3244_v4 = vpop.permute.xlu1 %3243  ;;  %v3559_v61 = vsel %vm3547_vm3, %v3526_v18, %v3054_v13 }
 0x4e9   : > { %3075 = vrot.lane.b32.xlu0 %v13480_v30, %s7711_s17  ;;  %v3624_v0 = vsel %vm3613_vm5, %v3591_v31, %v3244_v4  ;;  %v13500_v30 = vld [vmem:[#allocation196_spill] sm:$0xff]  ;;  %v13501_v4 = vld [vmem:[#allocation195_spill] sm:$0xff]  ;;  %v13507_v31 = vld [vmem:[#allocation166_spill] sm:$0xff] }
 0x4ea   : > { %3171 = vrot.lane.b32.xlu1 %v13482_v38, %s7712_s14  ;;  %v3462_v7 = vsel %vm3448_vm15, %v3429_v47, %v13501_v4 }
 0x4eb   : > { %v3150_v3 = vpop.permute.xlu0 %3149 }
 0x4ec   : > { %v3246_v29 = vpop.permute.xlu1 %3245  ;;  %v3592_v14 = vsel %vm3580_vm4, %v3559_v61, %v3150_v3  ;;  %v13503_v3 = vld [vmem:[#allocation214_spill] sm:$0xff]  ;;  %v13506_v61 = vld [vmem:[#allocation144_spill] sm:$0xff] }
 0x4ed   : > { %3077 = vrot.lane.b32.xlu0 %v13481_v36, %s7711_s17  ;;  %v3625_v19 = vsel %vm3613_vm5, %v3592_v14, %v3246_v29  ;;  %v3461_v36 = vsel %vm3448_vm15, %v3428_v54, %v13500_v30  ;;  %v3495_v63 = vsel %vm3481_vm1, %v3462_v7, %v13503_v3  ;;  %v13515_v54 = vld [vmem:[#allocation130_spill] sm:$0xff]  ;;  %v13517_v30 = vld [vmem:[#allocation165_spill] sm:$0xff] }
 0x4ee   : > { %3267 = vrot.lane.b32.xlu1 %v13491_v59, %s7713_s19  ;;  %v3494_v6 = vsel %vm3481_vm1, %v3461_v36, %v13502_v43 }
 0x4ef   : > { %v2960_v8 = vpop.permute.xlu0 %2959 }
 0x4f0   : > { %v2962_v11 = vpop.permute.xlu1 %2961  ;;  %v3527_v21 = vsel %vm3514_vm2, %v3494_v6, %v2960_v8 }
 0x4f1   : > { %3173 = vrot.lane.b32.xlu0 %v13492_v1, %s7712_s14  ;;  %v3528_v20 = vsel %vm3514_vm2, %v3495_v63, %v2962_v11  ;;  %v13518_v63 = vld [vmem:[#allocation149_spill] sm:$0xff] }
 0x4f2   : > { %2983 = vrot.lane.b32.xlu1 %v13491_v59, %s7710_s20 }
 0x4f3   : > { %v3340_v62 = vpop.permute.xlu0 %3339 }
 0x4f4   : > { %v3657_v26 = vsel %vm3646_vm6, %v3624_v0, %v3340_v62  ;;  %v3342_v41 = vpop.permute.xlu1 %3341 }
 0x4f5   : > { %v3658_v34 = vsel %vm3646_vm6, %v3625_v19, %v3342_v41  ;;  %2889 = vrot.lane.b32.xlu0 %v13492_v1, %s7709_s26  ;;  %7200 = vmatprep.mubr.msk.f32.mxu0 %vm3720_vm7, %v3657_v26  ;;  %v13508_v19 = vld [vmem:[#allocation154_spill] sm:$0xff]  ;;  %v13509_v26 = vld [vmem:[#allocation172_spill] sm:$0xff]  ;;  %v13510_v41 = vld [vmem:[#allocation125_spill] sm:$0xff] }
 0x4f6   : > { %3363 = vrot.lane.b32.xlu1 %v13493_v37, %s7714_s21  ;;  %7201 = vmatmul.mubr.msk.f32.gmra.mxu0 %vm3720_vm7, %v3658_v34  ;;  %v3430_v34 = vsel %vm3415_vm0, %v13510_v41, %v13509_v26 }
 0x4f7   : > { %v3056_v50 = vpop.permute.xlu0 %3055 }
 0x4f8   : > { %v3152_v24 = vpop.permute.xlu1 %3151  ;;  %v3560_v39 = vsel %vm3547_vm3, %v3527_v21, %v3056_v50  ;;  %v13511_v50 = vld [vmem:[#allocation175_spill] sm:$0xff] }
 0x4f9   : > { %3269 = vrot.lane.b32.xlu0 %v13494_v42, %s7713_s19  ;;  %v3593_v22 = vsel %vm3580_vm4, %v3560_v39, %v3152_v24  ;;  %v13512_v24 = vld [vmem:[#allocation124_spill] sm:$0xff] }
 0x4fa   : > { %3079 = vrot.lane.b32.xlu1 %v13493_v37, %s7711_s17 }
 0x4fb   : > { %v3058_v58 = vpop.permute.xlu0 %3057 }
 0x4fc   : > { %v3248_v45 = vpop.permute.xlu1 %3247  ;;  %v3561_v35 = vsel %vm3547_vm3, %v3528_v20, %v3058_v58  ;;  %v13513_v58 = vld [vmem:[#allocation198_spill] sm:$0xff] }
 0x4fd   : > { %2985 = vrot.lane.b32.xlu0 %v13494_v42, %s7710_s20  ;;  %v3626_v46 = vsel %vm3613_vm5, %v3593_v22, %v3248_v45  ;;  %v3431_v42 = vsel %vm3415_vm0, %v13512_v24, %v13511_v50  ;;  %v3463_v45 = vsel %vm3448_vm15, %v3430_v34, %v13513_v58  ;;  %v13525_v50 = vld [vmem:[#allocation199_spill] sm:$0xff] }
 0x4fe   : > { %3081 = vrot.lane.b32.xlu1 %v13495_v53, %s7711_s17  ;;  %v3464_v52 = vsel %vm3448_vm15, %v3431_v42, %v13514_v16  ;;  %v13526_v42 = vld [vmem:[#allocation217_spill] sm:$0xff] }
 0x4ff   : > { %v3154_v10 = vpop.permute.xlu0 %3153  ;;  %v3497_v51 = vsel %vm3481_vm1, %v3464_v52, %v13516_v40 }
 0x500   : > { %v3250_v13 = vpop.permute.xlu1 %3249  ;;  %v3594_v9 = vsel %vm3580_vm4, %v3561_v35, %v3154_v10  ;;  %v3496_v10 = vsel %vm3481_vm1, %v3463_v45, %v13515_v54  ;;  %v13527_v45 = vld [vmem:[#allocation155_spill] sm:$0xff] }
 0x501   : > { %3365 = vrot.lane.b32.xlu0 %v13495_v53, %s7714_s21  ;;  %v3627_v59 = vsel %vm3613_vm5, %v3594_v9, %v3250_v13  ;;  %v13519_v9 = vld [vmem:[#allocation153_spill] sm:$0xff] }
 0x502   : > { %2891 = vrot.lane.b32.xlu1 %v13504_v28, %s7709_s26 }
 0x503   : > { %v2964_v29 = vpop.permute.xlu0 %2963 }
 0x504   : > { %v2966_v25 = vpop.permute.xlu1 %2965  ;;  %v3529_v47 = vsel %vm3514_vm2, %v3496_v10, %v2964_v29 }
 0x505   : > { %3175 = vrot.lane.b32.xlu0 %v13504_v28, %s7712_s14  ;;  %v3530_v36 = vsel %vm3514_vm2, %v3497_v51, %v2966_v25 }
 0x506   : > { %3271 = vrot.lane.b32.xlu1 %v13505_v15, %s7713_s19 }
 0x507   : > { %v3344_v44 = vpop.permute.xlu0 %3343 }
 0x508   : > { %v3659_v18 = vsel %vm3646_vm6, %v3626_v46, %v3344_v44  ;;  %v3346_v60 = vpop.permute.xlu1 %3345  ;;  %v13520_v46 = vld [vmem:[#allocation148_spill] sm:$0xff] }
 0x509   : > { %v3660_v8 = vsel %vm3646_vm6, %v3627_v59, %v3346_v60  ;;  %3177 = vrot.lane.b32.xlu0 %v13506_v61, %s7712_s14  ;;  %7203 = vmatprep.mubr.msk.f32.mxu0 %vm3720_vm7, %v3659_v18  ;;  %v2272_v18 = vld [vmem:[%s7817_s13 + $0xf0] sm:$0xff]  ;;  %v2273_v60 = vld [vmem:[%s7817_s13 + $0xf8] sm:$0xff] }
 0x50a   : > { %2987 = vrot.lane.b32.xlu1 %v13505_v15, %s7710_s20  ;;  %7204 = vmatmul.mubr.msk.f32.gmra.mxu0 %vm3720_vm7, %v3660_v8  ;;  %v13521_v8 = vld [vmem:[#allocation168_spill] sm:$0xff]  ;;  %v2355_v34 = vrot.slane %v2272_v18, 7 }
 0x50b   : > { %v3060_v11 = vpop.permute.xlu0 %3059 }
 0x50c   : > { %v3156_v14 = vpop.permute.xlu1 %3155  ;;  %v3562_v13 = vsel %vm3547_vm3, %v3529_v47, %v3060_v11  ;;  %v13522_v11 = vld [vmem:[#allocation174_spill] sm:$0xff]  ;;  %v2423_v47 = vsel %vm2307_vm12, 0.0, %v2355_v34 }
 0x50d   : > { %2893 = vrot.lane.b32.xlu0 %v13506_v61, %s7709_s26  ;;  %v3595_v3 = vsel %vm3580_vm4, %v3562_v13, %v3156_v14  ;;  %v3432_v14 = vsel %vm3415_vm0, %v9749_v57, %v13522_v11  ;;  %v13528_v57 = vld [vmem:[#allocation216_spill] sm:$0xff]  ;;  %v13529_v13 = vld [vmem:[#allocation167_spill] sm:$0xff] }
 0x50e   : > { %3367 = vrot.lane.b32.xlu1 %v13507_v31, %s7714_s21 }
 0x50f   : > { %v3062_v0 = vpop.permute.xlu0 %3061 }
 0x510   : > { %v3252_v62 = vpop.permute.xlu1 %3251  ;;  %v3563_v7 = vsel %vm3547_vm3, %v3530_v36, %v3062_v0  ;;  %v13523_v0 = vld [vmem:[#allocation177_spill] sm:$0xff] }
 0x511   : > { %3273 = vrot.lane.b32.xlu0 %v13508_v19, %s7713_s19  ;;  %v3628_v21 = vsel %vm3613_vm5, %v3595_v3, %v3252_v62  ;;  %v3433_v62 = vsel %vm3415_vm0, %v9746_v32, %v13523_v0 }
 0x512   : > { %3083 = vrot.lane.b32.xlu1 %v13507_v31, %s7711_s17  ;;  %v3466_v24 = vsel %vm3448_vm15, %v3433_v62, %v13525_v50  ;;  %v13532_v62 = vld [vmem:[#allocation201_spill] sm:$0xff] }
 0x513   : > { %v3158_v37 = vpop.permute.xlu0 %3157 }
 0x514   : > { %v3254_v53 = vpop.permute.xlu1 %3253  ;;  %v3596_v6 = vsel %vm3580_vm4, %v3563_v7, %v3158_v37  ;;  %v2356_v37 = vrot.slane %v2273_v60, 7  ;;  %v13530_v60 = vld [vmem:[#allocation176_spill] sm:$0xff] }
 0x515   : > { %2989 = vrot.lane.b32.xlu0 %v13508_v19, %s7710_s20  ;;  %v3629_v39 = vsel %vm3613_vm5, %v3596_v6, %v3254_v53  ;;  %v13524_v19 = vld [vmem:[#allocation122_spill] sm:$0xff]  ;;  %v3499_v53 = vsel %vm3481_vm1, %v3466_v24, %v13528_v57 }
 0x516   : > { %3085 = vrot.lane.b32.xlu1 %v13517_v30, %s7711_s17  ;;  %v3465_v26 = vsel %vm3448_vm15, %v3432_v14, %v13524_v19  ;;  %v2357_v51 = vsel %vm2307_vm12, %v2355_v34, %v2356_v37 }
 0x517   : > { %v2968_v4 = vpop.permute.xlu0 %2967  ;;  %v3498_v58 = vsel %vm3481_vm1, %v3465_v26, %v13526_v42  ;;  %v2638_v6 = vrot.slane %v2357_v51, 1 }
 0x518   : > { %v2970_v43 = vpop.permute.xlu1 %2969  ;;  %v3531_v32 = vsel %vm3514_vm2, %v3498_v58, %v2968_v4 }
 0x519   : > { %3369 = vrot.lane.b32.xlu0 %v13517_v30, %s7714_s21  ;;  %v3532_v16 = vsel %vm3514_vm2, %v3499_v53, %v2970_v43  ;;  %v2637_v43 = vrot.slane %v2423_v47, 1 }
 0x51a   : > { %2895 = vrot.lane.b32.xlu1 %v13518_v63, %s7709_s26 }
 0x51b   : > { %v3348_v20 = vpop.permute.xlu0 %3347 }
 0x51c   : > { %v3661_v29 = vsel %vm3646_vm6, %v3628_v21, %v3348_v20  ;;  %v3350_v35 = vpop.permute.xlu1 %3349 }
 0x51d   : > { %v3662_v25 = vsel %vm3646_vm6, %v3629_v39, %v3350_v35  ;;  %3179 = vrot.lane.b32.xlu0 %v13518_v63, %s7712_s14  ;;  %7206 = vmatprep.mubr.msk.f32.mxu0 %vm3720_vm7, %v3661_v29  ;;  %v2639_v35 = vsel %vm2473_vm13, %v2637_v43, %v2638_v6  ;;  %v13536_v43 = vld [vmem:[#allocation114_spill] sm:$0xff] }
 0x51e   : > { %3275 = vrot.lane.b32.xlu1 %v13519_v9, %s7713_s19  ;;  %7207 = vmatmul.mubr.msk.f32.gmra.mxu0 %vm3720_vm7, %v3662_v25 }
 0x51f   : > { %v3064_v22 = vpop.permute.xlu0 %3063 }
 0x520   : > { %v3160_v15 = vpop.permute.xlu1 %3159  ;;  %v3564_v52 = vsel %vm3547_vm3, %v3531_v32, %v3064_v22 }
 0x521   : > { %3181 = vrot.lane.b32.xlu0 %v13520_v46, %s7712_s14  ;;  %v3597_v36 = vsel %vm3580_vm4, %v3564_v52, %v3160_v15  ;;  %v2643_v15 = vrot.slane %v2357_v51, 2 }
 0x522   : > { %2991 = vrot.lane.b32.xlu1 %v13519_v9, %s7710_s20  ;;  %v2642_v9 = vrot.slane %v2423_v47, 2 }
 0x523   : > { %v3066_v44 = vpop.permute.xlu0 %3065 }
 0x524   : > { %v3256_v59 = vpop.permute.xlu1 %3255  ;;  %v3565_v10 = vsel %vm3547_vm3, %v3532_v16, %v3066_v44  ;;  %v2440_v44 = vsel %vm2307_vm12, %v2356_v37, 0.0  ;;  %v2644_v14 = vsel %vm2554_vm14, %v2642_v9, %v2643_v15  ;;  %v13534_v37 = vld [vmem:[#allocation156_spill] sm:$0xff] }
 0x525   : > { %2897 = vrot.lane.b32.xlu0 %v13520_v46, %s7709_s26  ;;  %v3630_v4 = vsel %vm3613_vm5, %v3597_v36, %v3256_v59  ;;  %v2640_v18 = vrot.slane %v2440_v44, 1  ;;  %v2645_v53 = vrot.slane %v2440_v44, 2  ;;  %v3680_v44 = vld [vmem:[#allocation2 + $0x8] sm:$0xff] }
 0x526   : > { %3371 = vrot.lane.b32.xlu1 %v13521_v8, %s7714_s21 }
 0x527   : > { %v3162_v31 = vpop.permute.xlu0 %3161 }
 0x528   : > { %v3258_v41 = vpop.permute.xlu1 %3257  ;;  %v3598_v30 = vsel %vm3580_vm4, %v3565_v10, %v3162_v31  ;;  %v13531_v31 = vld [vmem:[#allocation179_spill] sm:$0xff] }
 0x529   : > { %3277 = vrot.lane.b32.xlu0 %v13527_v45, %s7713_s19  ;;  %v3631_v3 = vsel %vm3613_vm5, %v3598_v30, %v3258_v41  ;;  %v3435_v0 = vsel %vm3415_vm0, %v9770_v23, %v13531_v31  ;;  %v13533_v41 = vld [vmem:[#allocation200_spill] sm:$0xff]  ;;  %v2641_v23 = vsel %vm2473_vm13, %v2638_v6, %v2640_v18  ;;  %v7479_v6 = vpack.i.bf16 %v13536_v43, %v13461_v27 }
 0x52a   : > { %3087 = vrot.lane.b32.xlu1 %v13521_v8, %s7711_s17  ;;  %v3434_v8 = vsel %vm3415_vm0, %v9773_v2, %v13530_v60  ;;  %v3468_v34 = vsel %vm3448_vm15, %v3435_v0, %v13533_v41  ;;  %v13535_v2 = vld [vmem:[#allocation218_spill] sm:$0xff]  ;;  %v13542_v60 = vld [vmem:[#allocation220_spill] sm:$0xff] }
 0x52b   : > { %v2972_v54 = vpop.permute.xlu0 %2971  ;;  %v3467_v19 = vsel %vm3448_vm15, %v3434_v8, %v13532_v62  ;;  %v3501_v24 = vsel %vm3481_vm1, %v3468_v34, %v13535_v2  ;;  %v11027_v0 = vld [vmem:[%s12822_s4] ss:$0 sm:$0xff] }
 0x52c   : > { %v2974_v40 = vpop.permute.xlu1 %2973  ;;  %v3500_v50 = vsel %vm3481_vm1, %v3467_v19, %v13534_v37  ;;  %v3679_v62 = vld [vmem:[#allocation2] sm:$0xff] }
 0x52d   : > { %2993 = vrot.lane.b32.xlu0 %v13527_v45, %s7710_s20  ;;  %v3533_v42 = vsel %vm3514_vm2, %v3500_v50, %v2972_v54  ;;  %v3534_v58 = vsel %vm3514_vm2, %v3501_v24, %v2974_v40  ;;  %v2646_v40 = vsel %vm2554_vm14, %v2643_v15, %v2645_v53 }
 0x52e   : > { %3089 = vrot.lane.b32.xlu1 %v13529_v13, %s7711_s17 }
 0x52f   : > { %v3352_v7 = vpop.permute.xlu0 %3351 }
 0x530   : > { %v3354_v21 = vpop.permute.xlu1 %3353  ;;  %v3663_v20 = vsel %vm3646_vm6, %v3630_v4, %v3352_v7 }
 0x531   : > { %v3664_v39 = vsel %vm3646_vm6, %v3631_v3, %v3354_v21  ;;  %3373 = vrot.lane.b32.xlu0 %v13529_v13, %s7714_s21  ;;  %7209 = vmatprep.mubr.msk.f32.mxu1 %vm3720_vm7, %v3663_v20  ;;  %v13537_v3 = vld [vmem:[#allocation116_spill] sm:$0xff] }
 0x532   : > { %2899 = vrot.lane.b32.xlu1 %v2423_v47, %s7709_s26  ;;  %7210 = vmatmul.mubr.msk.f32.vlgmr.msra.gmra.mxu1 %vm3720_vm7, %v3664_v39  ;;  %v13538_v39 = vld [vmem:[#allocation178_spill] sm:$0xff] }
 0x533   : > { %v3068_v29 = vpop.permute.xlu0 %3067 }
 0x534   : > { %v3164_v25 = vpop.permute.xlu1 %3163  ;;  %v3566_v45 = vsel %vm3547_vm3, %v3533_v42, %v3068_v29  ;;  %v3436_v29 = vsel %vm3415_vm0, %v9797_v56, %v13538_v39  ;;  %v13544_v56 = vld [vmem:[#allocation219_spill] sm:$0xff] }
 0x535   : > { %3183 = vrot.lane.b32.xlu0 %v2423_v47, %s7712_s14  ;;  %v3599_v10 = vsel %vm3580_vm4, %v3566_v45, %v3164_v25  ;;  %v13539_v25 = vld [vmem:[#allocation181_spill] sm:$0xff] }
 0x536   : > { %3279 = vrot.lane.b32.xlu1 %v2639_v35, %s7713_s19  ;;  %v3437_v9 = vsel %vm3415_vm0, %v9794_v48, %v13539_v25 }
 0x537   : > { %v3070_v22 = vpop.permute.xlu0 %3069 }
 0x538   : > { %v3260_v59 = vpop.permute.xlu1 %3259  ;;  %v3567_v32 = vsel %vm3547_vm3, %v3534_v58, %v3070_v22  ;;  %v13540_v22 = vld [vmem:[#allocation203_spill] sm:$0xff] }
 0x539   : > { %3185 = vrot.lane.b32.xlu0 %v2357_v51, %s7712_s14  ;;  %v3632_v54 = vsel %vm3613_vm5, %v3599_v10, %v3260_v59  ;;  %v3469_v15 = vsel %vm3448_vm15, %v3436_v29, %v13540_v22  ;;  %v13541_v59 = vld [vmem:[#allocation202_spill] sm:$0xff] }
 0x53a   : > { %2995 = vrot.lane.b32.xlu1 %v2639_v35, %s7710_s20  ;;  %v3470_v18 = vsel %vm3448_vm15, %v3437_v9, %v13541_v59  ;;  %v3502_v8 = vsel %vm3481_vm1, %v3469_v15, %v13542_v60  ;;  %v13547_v9 = vld [vmem:[#allocation129_spill] sm:$0xff] }
 0x53b   : > { %v3166_v11 = vpop.permute.xlu0 %3165 }
 0x53c   : > { %v3262_v26 = vpop.permute.xlu1 %3261  ;;  %v3600_v52 = vsel %vm3580_vm4, %v3567_v32, %v3166_v11  ;;  %v13543_v11 = vld [vmem:[#allocation138_spill] sm:$0xff] }
 0x53d   : > { %2901 = vrot.lane.b32.xlu0 %v2357_v51, %s7709_s26  ;;  %v3633_v47 = vsel %vm3613_vm5, %v3600_v52, %v3262_v26 }
 0x53e   : > { %3375 = vrot.lane.b32.xlu1 %v2644_v14, %s7714_s21 }
 0x53f   : > { %v2976_v57 = vpop.permute.xlu0 %2975 }
 0x540   : > { %v2978_v16 = vpop.permute.xlu1 %2977  ;;  %v3535_v31 = vsel %vm3514_vm2, %v3502_v8, %v2976_v57 }
 0x541   : > { %3281 = vrot.lane.b32.xlu0 %v2641_v23, %s7713_s19 }
 0x542   : > { %3091 = vrot.lane.b32.xlu1 %v2644_v14, %s7711_s17  ;;  %v3503_v14 = vsel %vm3481_vm1, %v3470_v18, %v13544_v56 }
 0x543   : > { %v3356_v51 = vpop.permute.xlu0 %3355  ;;  %v3536_v19 = vsel %vm3514_vm2, %v3503_v14, %v2978_v16 }
 0x544   : > { %v3665_v30 = vsel %vm3646_vm6, %v3632_v54, %v3356_v51  ;;  %v3358_v36 = vpop.permute.xlu1 %3357 }
 0x545   : > { %v3666_v13 = vsel %vm3646_vm6, %v3633_v47, %v3358_v36  ;;  %2997 = vrot.lane.b32.xlu0 %v2641_v23, %s7710_s20  ;;  %7212 = vmatprep.mubr.msk.f32.mxu1 %vm3720_vm7, %v3665_v30 }
 0x546   : > { %3093 = vrot.lane.b32.xlu1 %v2646_v40, %s7711_s17  ;;  %7213 = vmatmul.mubr.msk.f32.gmra.mxu1 %vm3720_vm7, %v3666_v13 }
 0x547   : > { %v3072_v4 = vpop.permute.xlu0 %3071 }
 0x548   : > { %v3168_v7 = vpop.permute.xlu1 %3167  ;;  %v3568_v26 = vsel %vm3547_vm3, %v3535_v31, %v3072_v4  ;;  %v3681_v31 = vld [vmem:[#allocation2 + $0x10] sm:$0xff] }
 0x549   : > { %3377 = vrot.lane.b32.xlu0 %v2646_v40, %s7714_s21  ;;  %v3601_v58 = vsel %vm3580_vm4, %v3568_v26, %v3168_v7 }
 0x54a   : > { %7485 = vrot.lane.b32.xlu1 %v13537_v3, %s7713_s19  ;;  %v13545_v3 = vld [vmem:[#allocation180_spill] sm:$0xff] }
 0x54b   : > { %v3074_v21 = vpop.permute.xlu0 %3073 }
 0x54c   : > { %v3264_v20 = vpop.permute.xlu1 %3263  ;;  %v3569_v37 = vsel %vm3547_vm3, %v3536_v19, %v3074_v21  ;;  %v3438_v21 = vsel %vm3415_vm0, %v9818_v55, %v13545_v3 }
 0x54d   : > { %7480 = vrot.lane.b32.xlu0 %v7479_v6, %s7712_s14  ;;  %v3634_v45 = vsel %vm3613_vm5, %v3601_v58, %v3264_v20 }
 0x54f   : > { %v3170_v35 = vpop.permute.xlu0 %3169 }
 0x550   : > { %v3266_v27 = vpop.permute.xlu1 %3265  ;;  %v3602_v24 = vsel %vm3580_vm4, %v3569_v37, %v3170_v35  ;;  %v13546_v35 = vld [vmem:[#allocation205_spill] sm:$0xff] }
 0x551   : > { %7490 = vrot.lane.b32.xlu0 %v13543_v11, %s7714_s21  ;;  %v3635_v16 = vsel %vm3613_vm5, %v3602_v24, %v3266_v27  ;;  %v3471_v25 = vsel %vm3448_vm15, %v3438_v21, %v13546_v35  ;;  %v3682_v11 = vld [vmem:[#allocation2 + $0x18] sm:$0xff] }
 0x552   : > { %v7187_v48 = vpop.f32.mrf.mxu0  ;;  %v3504_v22 = vsel %vm3481_vm1, %v3471_v25, %v13547_v9 }
 0x553   : > { %v4043_v41 = vadd.f32 %v7187_v48, %v3680_v44  ;;  %v2980_v34 = vpop.permute.xlu0 %2979 }
 0x554   : > { %v11032_v50 = vpop.permute.xlu1 %2981  ;;  %v3883_v2 = vpop.f32.mrf.mxu0  ;;  %v3537_v27 = vsel %vm3514_vm2, %v3504_v22, %v2980_v34 }
 0x555   : > { %v4082_v42 = vadd.f32 %v11027_v0, %v4043_v41  ;;  %v4042_v23 = vadd.f32 %v3883_v2, %v3679_v62 }
 0x557   : > { %v4114_v57 = vmul.f32 0.1, %v4082_v42  ;;  %v4081_v53 = vadd.f32 %v11027_v0, %v4042_v23  ;;  %v3360_v32 = vpop.permute.xlu0 %3359 }
 0x558   : > { %v3667_v52 = vsel %vm3646_vm6, %v3634_v45, %v3360_v32  ;;  %v3362_v10 = vpop.permute.xlu1 %3361  ;;  %v13548_v32 = vld [vmem:[#allocation183_spill] sm:$0xff] }
 0x559   : > { %v4146_v54 = vmax.f32 %v4082_v42, %v4114_v57  ;;  %v4113_v51 = vmul.f32 0.1, %v4081_v53  ;;  %v3668_v40 = vsel %vm3646_vm6, %v3635_v16, %v3362_v10  ;;  %7215 = vmatprep.mubr.msk.f32.mxu1 %vm3720_vm7, %v3667_v52  ;;  %v3439_v16 = vsel %vm3415_vm0, %v9821_v33, %v13548_v32  ;;  %v5520_v32 = vld [vmem:[%s12823_s5 + $0x10] sm:$0xff] }
 0x55a   : > { %7216 = vmatmul.mubr.msk.f32.gmra.mxu1 %vm3720_vm7, %v3668_v40 }
 0x55b   : > { %v4145_v47 = vmax.f32 %v4081_v53, %v4113_v51  ;;  %v3076_v30 = vpop.permute.xlu0 %3075  ;;  %v4210_v13 = vrot.slane %v4146_v54, 7  ;;  %v5526_v54 = vld [vmem:[%s12823_s5 + $0x40] sm:$0xff]  ;;  %v13549_v51 = vld [vmem:[#allocation204_spill] sm:$0xff] }
 0x55c   : > { %v3172_v36 = vpop.permute.xlu1 %3171  ;;  %v3570_v60 = vsel %vm3547_vm3, %v3537_v27, %v3076_v30  ;;  %v3472_v40 = vsel %vm3448_vm15, %v3439_v16, %v13549_v51  ;;  %7233 = vmatprep.subr.mxu1 %v5526_v54  ;;  %v13550_v30 = vld [vmem:[#allocation221_spill] sm:$0xff] }
 0x55d   : > { %v4209_v4 = vrot.slane %v4145_v47, 7  ;;  %v4320_v15 = vsel %vm2307_vm12, %v4210_v13, 0.0  ;;  %v3603_v48 = vsel %vm3580_vm4, %v3570_v60, %v3172_v36  ;;  %v3505_v36 = vsel %vm3481_vm1, %v3472_v40, %v13550_v30  ;;  %7234 = vmatpush3.msra.mxu1 %v5526_v54 }
 0x55e   : > { %v4369_v56 = vrot.slane %v4320_v15, 1  ;;  %v4444_v10 = vrot.slane %v4320_v15, 2  ;;  %v3538_v33 = vsel %vm3514_vm2, %v3505_v36, %v11032_v50  ;;  %v5524_v50 = vld [vmem:[%s12823_s5 + $0x30] sm:$0xff] }
 0x55f   : > { %v3078_v7 = vpop.permute.xlu0 %3077  ;;  %v11045_v43 = vsel %vm2307_vm12, 0.0, %v4209_v4  ;;  %v11048_v6 = vsel %vm2307_vm12, %v4209_v4, %v4210_v13 }
 0x560   : > { %v3268_v20 = vpop.permute.xlu1 %3267  ;;  %4708 = vrot.lane.b32.xlu1 %v11045_v43, %s7709_s26  ;;  %v4366_v39 = vrot.slane %v11045_v43, 1  ;;  %v4367_v29 = vrot.slane %v11048_v6, 1  ;;  %4710 = vrot.lane.b32.xlu0 %v11048_v6, %s7709_s26  ;;  %v4441_v44 = vrot.slane %v11045_v43, 2  ;;  %v4442_v59 = vrot.slane %v11048_v6, 2 }
 0x561   : > { %v3636_v34 = vsel %vm3613_vm5, %v3603_v48, %v3268_v20  ;;  %v5525_v20 = vld [vmem:[%s12823_s5 + $0x38] sm:$0xff]  ;;  %v13552_v48 = vld [vmem:[#allocation119_spill] sm:$0xff] }
 0x562   : > { %v4368_v55 = vsel %vm2473_vm13, %v4366_v39, %v4367_v29  ;;  %v4370_v26 = vsel %vm2473_vm13, %v4367_v29, %v4369_v56  ;;  %v4443_v41 = vsel %vm2554_vm14, %v4441_v44, %v4442_v59  ;;  %v4445_v3 = vsel %vm2554_vm14, %v4442_v59, %v4444_v10  ;;  %7235 = vmatprep.subr.mxu1 %v5525_v20  ;;  %v5523_v44 = vld [vmem:[%s12823_s5 + $0x28] sm:$0xff]  ;;  %v13551_v56 = vld [vmem:[#allocation182_spill] sm:$0xff] }
 0x563   : > { %v3174_v18 = vpop.permute.xlu0 %3173  ;;  %v3571_v39 = vsel %vm3547_vm3, %v3538_v33, %v3078_v7  ;;  %7236 = vmatpush3.msra.mxu1 %v5525_v20  ;;  %v5518_v33 = vld [vmem:[%s12823_s5] sm:$0xff]  ;;  %v13554_v20 = vld [vmem:[#allocation185_spill] sm:$0xff] }
 0x564   : > { %v11069_v8 = vpop.permute.xlu1 %2983  ;;  %4804 = vrot.lane.b32.xlu1 %v4368_v55, %s7710_s20  ;;  %4528 = vrot.lane.b32.xlu0 %v4368_v55, %s7707_s22  ;;  %v3604_v35 = vsel %vm3580_vm4, %v3571_v39, %v3174_v18  ;;  %v3441_v39 = vsel %vm3415_vm0, %v13478_v5, %v13554_v20 }
 0x565   : > { %7237 = vmatprep.subr.mxu1 %v5524_v50 }
 0x566   : > { %v7190_v14 = vpop.f32.mrf.mxu0  ;;  %7238 = vmatpush3.msra.mxu1 %v5524_v50  ;;  %v13555_v50 = vld [vmem:[#allocation206_spill] sm:$0xff] }
 0x567   : > { %v4045_v62 = vadd.f32 %v7190_v14, %v3682_v11  ;;  %v11074_v19 = vpop.permute.xlu0 %2889  ;;  %7239 = vmatprep.subr.mxu1 %v5523_v44  ;;  %v5522_v11 = vld [vmem:[%s12823_s5 + $0x20] sm:$0xff]  ;;  %v3440_v14 = vsel %vm3415_vm0, %v9848_v12, %v13551_v56  ;;  %v5521_v12 = vld [vmem:[%s12823_s5 + $0x18] sm:$0xff] }
 0x568   : > { %v3364_v37 = vpop.permute.xlu1 %3363  ;;  %4806 = vrot.lane.b32.xlu1 %v4370_v26, %s7710_s20  ;;  %v3893_v2 = vpop.f32.mrf.mxu0  ;;  %4900 = vrot.lane.b32.xlu0 %v4443_v41, %s7711_s17 }
 0x569   : > { %v4084_v24 = vadd.f32 %v11027_v0, %v4045_v62  ;;  %v3669_v42 = vsel %vm3646_vm6, %v3636_v34, %v3364_v37  ;;  %v4044_v23 = vadd.f32 %v3893_v2, %v3681_v31  ;;  %v3473_v62 = vsel %vm3448_vm15, %v3440_v14, %v13552_v48  ;;  %7240 = vmatpush3.msra.mxu1 %v5523_v44 }
 0x56a   : > { %7218 = vmatprep.mubr.msk.f32.mxu1 %vm3720_vm7, %v3669_v42  ;;  %7241 = vmatprep.subr.mxu1 %v5522_v11 }
 0x56b   : > { %v4116_v58 = vmul.f32 0.1, %v4084_v24  ;;  %v4083_v45 = vadd.f32 %v11027_v0, %v4044_v23  ;;  %v3270_v57 = vpop.permute.xlu0 %3269  ;;  %7242 = vmatpush3.msra.mxu1 %v5522_v11 }
 0x56c   : > { %v3080_v53 = vpop.permute.xlu1 %3079  ;;  %4530 = vrot.lane.b32.xlu1 %v4370_v26, %s7707_s22  ;;  %4618 = vrot.lane.b32.xlu0 %v4443_v41, %s7708_s25  ;;  %v3637_v9 = vsel %vm3613_vm5, %v3604_v35, %v3270_v57  ;;  %v13553_v26 = vld [vmem:[#allocation132_spill] sm:$0xff] }
 0x56d   : > { %v4115_v52 = vmul.f32 0.1, %v4083_v45  ;;  %v4148_v47 = vmax.f32 %v4084_v24, %v4116_v58  ;;  %v3506_v41 = vsel %vm3481_vm1, %v3473_v62, %v13553_v26  ;;  %7243 = vmatprep.subr.mxu1 %v5521_v12 }
 0x56e   : > { %v3539_v2 = vsel %vm3514_vm2, %v3506_v41, %v11069_v8  ;;  %7244 = vmatpush3.msra.mxu1 %v5521_v12  ;;  %v13556_v12 = vld [vmem:[#allocation184_spill] sm:$0xff] }
 0x56f   : > { %v4147_v13 = vmax.f32 %v4083_v45, %v4115_v52  ;;  %v11097_v4 = vpop.permute.xlu0 %2985  ;;  %v4213_v25 = vrot.slane %v4148_v47, 7  ;;  %v3572_v23 = vsel %vm3547_vm3, %v3539_v2, %v3080_v53  ;;  %v3683_v45 = vld [vmem:[#allocation2 + $0x20] sm:$0xff]  ;;  %v3684_v53 = vld [vmem:[#allocation2 + $0x28] sm:$0xff]  ;;  %7245 = vmatprep.subr.mxu1 %v5520_v32  ;;  %v3442_v2 = vsel %vm3415_vm0, %v13482_v38, %v13556_v12 }
 0x570   : > { %v11102_v21 = vpop.permute.xlu1 %3081  ;;  %4902 = vrot.lane.b32.xlu1 %v4445_v3, %s7711_s17  ;;  %v5519_v47 = vld [vmem:[%s12823_s5 + $0x8] sm:$0xff]  ;;  %7246 = vmatpush3.msra.mxu1 %v5520_v32 }
 0x571   : > { %v4212_v29 = vrot.slane %v4147_v13, 7  ;;  %v11147_v34 = vsel %vm2307_vm12, %v4213_v25, 0.0  ;;  %7247 = vmatprep.subr.mxu1 %v5519_v47 }
 0x572   : > { %v4374_v16 = vrot.slane %v11147_v34, 1  ;;  %7248 = vmatpush3.msra.mxu1 %v5519_v47 }
 0x573   : > { %v3366_v22 = vpop.permute.xlu0 %3365  ;;  %v11115_v15 = vsel %vm2307_vm12, 0.0, %v4212_v29  ;;  %v11124_v27 = vsel %vm2307_vm12, %v4212_v29, %v4213_v25  ;;  %7249 = vmatprep.subr.mxu1 %v5518_v33 }
 0x574   : > { %v3670_v55 = vsel %vm3646_vm6, %v3637_v9, %v3366_v22  ;;  %v11118_v7 = vpop.permute.xlu1 %2891  ;;  %4620 = vrot.lane.b32.xlu1 %v4445_v3, %s7708_s25  ;;  %4996 = vrot.lane.b32.xlu0 %v11115_v15, %s7712_s14  ;;  %v4371_v18 = vrot.slane %v11115_v15, 1  ;;  %v4372_v60 = vrot.slane %v11124_v27, 1  ;;  %v4446_v51 = vrot.slane %v11115_v15, 2 }
 0x575   : > { %7219 = vmatmul.mubr.msk.f32.gmra.mxu1 %vm3720_vm7, %v3670_v55  ;;  %v4447_v40 = vrot.slane %v11124_v27, 2  ;;  %v3474_v9 = vsel %vm3448_vm15, %v3441_v39, %v13555_v50 }
 0x576   : > { %v4373_v42 = vsel %vm2473_vm13, %v4371_v18, %v4372_v60  ;;  %v4375_v54 = vsel %vm2473_vm13, %v4372_v60, %v4374_v16  ;;  %v3507_v55 = vsel %vm3481_vm1, %v3474_v9, %v11074_v19  ;;  %7250 = vmatpush3.msra.mxu1 %v5518_v33  ;;  %v4449_v19 = vrot.slane %v11147_v34, 2 }
 0x577   : > { %v3176_v59 = vpop.permute.xlu0 %3175  ;;  %v4448_v25 = vsel %vm2554_vm14, %v4446_v51, %v4447_v40  ;;  %v3540_v5 = vsel %vm3514_vm2, %v3507_v55, %v11097_v4 }
 0x578   : > { %v3272_v31 = vpop.permute.xlu1 %3271  ;;  %4998 = vrot.lane.b32.xlu1 %v11124_v27, %s7712_s14  ;;  %4712 = vrot.lane.b32.xlu0 %v11115_v15, %s7709_s26  ;;  %v3605_v8 = vsel %vm3580_vm4, %v3572_v23, %v3176_v59  ;;  %v3573_v11 = vsel %vm3547_vm3, %v3540_v5, %v11102_v21  ;;  %v4450_v62 = vsel %vm2554_vm14, %v4447_v40, %v4449_v19  ;;  %v3686_v5 = vld [vmem:[#allocation2 + $0x38] sm:$0xff] }
 0x579   : > { %v3638_v30 = vsel %vm3613_vm5, %v3605_v8, %v3272_v31 }
 0x57a   : > { %v7193_v37 = vpop.f32.mrf.mxu0 }
 0x57b   : > { %v3178_v24 = vpop.permute.xlu0 %3177  ;;  %v4047_v3 = vadd.f32 %v7193_v37, %v3684_v53 }
 0x57c   : > { %v11156_v58 = vpop.permute.xlu1 %2987  ;;  %4714 = vrot.lane.b32.xlu1 %v11124_v27, %s7709_s26  ;;  %v3903_v57 = vpop.f32.mrf.mxu0  ;;  %5086 = vrot.lane.b32.xlu0 %v4373_v42, %s7713_s19  ;;  %v3606_v14 = vsel %vm3580_vm4, %v3573_v11, %v3178_v24 }
 0x57d   : > { %v4046_v52 = vadd.f32 %v3903_v57, %v3683_v45  ;;  %v4086_v44 = vadd.f32 %v11027_v0, %v4047_v3  ;;  %v13558_v3 = vld [vmem:[#allocation187_spill] sm:$0xff] }
 0x57e   : > { %v3443_v33 = vsel %vm3415_vm0, %v13492_v1, %v13558_v3 }
 0x57f   : > { %v11166_v10 = vpop.permute.xlu0 %2893  ;;  %v4085_v29 = vadd.f32 %v11027_v0, %v4046_v52  ;;  %v4118_v56 = vmul.f32 0.1, %v4086_v44 }
 0x580   : > { %v3368_v36 = vpop.permute.xlu1 %3367  ;;  %5088 = vrot.lane.b32.xlu1 %v4375_v54, %s7713_s19  ;;  %4808 = vrot.lane.b32.xlu0 %v4373_v42, %s7710_s20 }
 0x581   : > { %v3671_v13 = vsel %vm3646_vm6, %v3638_v30, %v3368_v36  ;;  %v4117_v59 = vmul.f32 0.1, %v4085_v29  ;;  %v4150_v21 = vmax.f32 %v4086_v44, %v4118_v56 }
 0x582   : > { %7221 = vmatprep.mubr.msk.f32.mxu1 %vm3720_vm7, %v3671_v13 }
 0x583   : > { %v3274_v35 = vpop.permute.xlu0 %3273  ;;  %v4149_v4 = vmax.f32 %v4085_v29, %v4117_v59  ;;  %v4216_v57 = vrot.slane %v4150_v21, 7  ;;  %v13559_v29 = vld [vmem:[#allocation207_spill] sm:$0xff] }
 0x584   : > { %v3084_v22 = vpop.permute.xlu1 %3083  ;;  %4532 = vrot.lane.b32.xlu1 %v4373_v42, %s7707_s22  ;;  %5176 = vrot.lane.b32.xlu0 %v4448_v25, %s7714_s21  ;;  %v3639_v31 = vsel %vm3613_vm5, %v3606_v14, %v3274_v35  ;;  %v13557_v42 = vld [vmem:[#allocation126_spill] sm:$0xff]  ;;  %v3476_v35 = vsel %vm3448_vm15, %v3443_v33, %v13559_v29 }
 0x585   : > { %v4215_v34 = vrot.slane %v4149_v4, 7  ;;  %v3475_v23 = vsel %vm3448_vm15, %v3442_v2, %v13557_v42  ;;  %v4322_v13 = vsel %vm2307_vm12, %v4216_v57, 0.0  ;;  %v13560_v2 = vld [vmem:[#allocation186_spill] sm:$0xff] }
 0x586   : > { %v3508_v45 = vsel %vm3481_vm1, %v3475_v23, %v11118_v7  ;;  %v4379_v55 = vrot.slane %v4322_v13, 1  ;;  %v13561_v23 = vld [vmem:[#allocation209_spill] sm:$0xff] }
 0x587   : > { %v2990_v18 = vpop.permute.xlu0 %2989  ;;  %v3541_v32 = vsel %vm3514_vm2, %v3508_v45, %v11156_v58  ;;  %v11224_v16 = vsel %vm2307_vm12, 0.0, %v4215_v34  ;;  %v11231_v52 = vsel %vm2307_vm12, %v4215_v34, %v4216_v57  ;;  %v4454_v57 = vrot.slane %v4322_v13, 2 }
 0x588   : > { %v11196_v60 = vpop.permute.xlu1 %3085  ;;  %4904 = vrot.lane.b32.xlu1 %v4448_v25, %s7711_s17  ;;  %4810 = vrot.lane.b32.xlu0 %v4375_v54, %s7710_s20  ;;  %v3574_v38 = vsel %vm3547_vm3, %v3541_v32, %v3084_v22  ;;  %v4376_v58 = vrot.slane %v11224_v16, 1  ;;  %v4377_v51 = vrot.slane %v11231_v52, 1  ;;  %v3509_v22 = vsel %vm3481_vm1, %v3476_v35, %v11166_v10 }
 0x589   : > { %v3542_v1 = vsel %vm3514_vm2, %v3509_v22, %v2990_v18  ;;  %v4451_v19 = vrot.slane %v11224_v16, 2  ;;  %v4452_v56 = vrot.slane %v11231_v52, 2 }
 0x58a   : > { %v4378_v39 = vsel %vm2473_vm13, %v4376_v58, %v4377_v51  ;;  %v4380_v11 = vsel %vm2473_vm13, %v4377_v51, %v4379_v55  ;;  %v3575_v10 = vsel %vm3547_vm3, %v3542_v1, %v11196_v60 }
 0x58b   : > { %v3370_v48 = vpop.permute.xlu0 %3369  ;;  %v4455_v51 = vsel %vm2554_vm14, %v4452_v56, %v4454_v57 }
 0x58c   : > { %v3672_v26 = vsel %vm3646_vm6, %v3639_v31, %v3370_v48  ;;  %v11207_v41 = vpop.permute.xlu1 %2895  ;;  %4534 = vrot.lane.b32.xlu1 %v4375_v54, %s7707_s22  ;;  %5178 = vrot.lane.b32.xlu0 %v4450_v62, %s7714_s21 }
 0x58d   : > { %7222 = vmatmul.mubr.msk.f32.gmra.mxu1 %vm3720_vm7, %v3672_v26  ;;  %v4453_v26 = vsel %vm2554_vm14, %v4451_v19, %v4452_v56 }
 0x58e   : > { %v7196_v40 = vpop.f32.mrf.mxu0 }
 0x58f   : > { %v3180_v37 = vpop.permute.xlu0 %3179  ;;  %v4049_v4 = vadd.f32 %v7196_v40, %v3686_v5 }
 0x590   : > { %v3276_v24 = vpop.permute.xlu1 %3275  ;;  %4906 = vrot.lane.b32.xlu1 %v4450_v62, %s7711_s17  ;;  %4622 = vrot.lane.b32.xlu0 %v4448_v25, %s7708_s25  ;;  %v3607_v7 = vsel %vm3580_vm4, %v3574_v38, %v3180_v37  ;;  %v3685_v25 = vld [vmem:[#allocation2 + $0x30] sm:$0xff]  ;;  %v3913_v50 = vpop.f32.mrf.mxu0 }
 0x591   : > { %v3640_v47 = vsel %vm3613_vm5, %v3607_v7, %v3276_v24  ;;  %v4048_v44 = vadd.f32 %v3913_v50, %v3685_v25  ;;  %v4088_v60 = vadd.f32 %v11027_v0, %v4049_v4  ;;  %v3444_v24 = vsel %vm3415_vm0, %v13504_v28, %v13560_v2  ;;  %v13563_v25 = vld [vmem:[#allocation208_spill] sm:$0xff] }
 0x592   : > { %v3477_v45 = vsel %vm3448_vm15, %v3444_v24, %v13561_v23  ;;  %v13567_v24 = vld [vmem:[#allocation211_spill] sm:$0xff] }
 0x593   : > { %v3182_v8 = vpop.permute.xlu0 %3181  ;;  %v4087_v31 = vadd.f32 %v11027_v0, %v4048_v44  ;;  %v3510_v32 = vsel %vm3481_vm1, %v3477_v45, %v11207_v41 }
 0x594   : > { %v2992_v53 = vpop.permute.xlu1 %2991  ;;  %4624 = vrot.lane.b32.xlu1 %v4450_v62, %s7708_s25  ;;  %5000 = vrot.lane.b32.xlu0 %v11224_v16, %s7712_s14  ;;  %v3608_v18 = vsel %vm3580_vm4, %v3575_v10, %v3182_v8  ;;  %v4120_v8 = vmul.f32 0.1, %v4088_v60 }
 0x595   : > { %v4119_v37 = vmul.f32 0.1, %v4087_v31  ;;  %v3543_v7 = vsel %vm3514_vm2, %v3510_v32, %v2992_v53 }
 0x597   : > { %v11234_v54 = vpop.permute.xlu0 %2897  ;;  %v4151_v38 = vmax.f32 %v4087_v31, %v4119_v37 }
 0x598   : > { %v3372_v30 = vpop.permute.xlu1 %3371  ;;  %5002 = vrot.lane.b32.xlu1 %v11231_v52, %s7712_s14  ;;  %4716 = vrot.lane.b32.xlu0 %v11224_v16, %s7709_s26 }
 0x599   : > { %v3673_v36 = vsel %vm3646_vm6, %v3640_v47, %v3372_v30  ;;  %v4152_v30 = vmax.f32 %v4088_v60, %v4120_v8 }
 0x59a   : > { %7224 = vmatprep.mubr.msk.f32.mxu1 %vm3720_vm7, %v3673_v36  ;;  %v4218_v36 = vrot.slane %v4151_v38, 7 }
 0x59b   : > { %v3278_v20 = vpop.permute.xlu0 %3277  ;;  %v4219_v33 = vrot.slane %v4152_v30, 7 }
 0x59c   : > { %v3088_v9 = vpop.permute.xlu1 %3087  ;;  %4718 = vrot.lane.b32.xlu1 %v11231_v52, %s7709_s26  ;;  %5090 = vrot.lane.b32.xlu0 %v4378_v39, %s7713_s19  ;;  %v3641_v48 = vsel %vm3613_vm5, %v3608_v18, %v3278_v20  ;;  %v13562_v20 = vld [vmem:[#allocation189_spill] sm:$0xff]  ;;  %v11300_v35 = vsel %vm2307_vm12, 0.0, %v4218_v36 }
 0x59d   : > { %v3576_v28 = vsel %vm3547_vm3, %v3543_v7, %v3088_v9  ;;  %v11308_v22 = vsel %vm2307_vm12, %v4218_v36, %v4219_v33  ;;  %v4381_v5 = vrot.slane %v11300_v35, 1  ;;  %v4323_v56 = vsel %vm2307_vm12, %v4219_v33, 0.0  ;;  %v3688_v7 = vld [vmem:[#allocation2 + $0x48] sm:$0xff] }
 0x59e   : > { %v4382_v44 = vrot.slane %v11308_v22, 1  ;;  %v4384_v2 = vrot.slane %v4323_v56, 1  ;;  %v4456_v8 = vrot.slane %v11300_v35, 2  ;;  %v4457_v38 = vrot.slane %v11308_v22, 2 }
 0x59f   : > { %v2994_v59 = vpop.permute.xlu0 %2993 }
 0x5a0   : > { %v3090_v14 = vpop.permute.xlu1 %3089  ;;  %5092 = vrot.lane.b32.xlu1 %v4380_v11, %s7713_s19  ;;  %4812 = vrot.lane.b32.xlu0 %v4378_v39, %s7710_s20  ;;  %v4458_v33 = vsel %vm2554_vm14, %v4456_v8, %v4457_v38 }
 0x5a2   : > { %v7199_v19 = vpop.f32.mrf.mxu0 }
 0x5a3   : > { %v3374_v62 = vpop.permute.xlu0 %3373 }
 0x5a4   : > { %v3674_v21 = vsel %vm3646_vm6, %v3641_v48, %v3374_v62  ;;  %v11270_v34 = vpop.permute.xlu1 %2899  ;;  %4536 = vrot.lane.b32.xlu1 %v4378_v39, %s7707_s22  ;;  %5180 = vrot.lane.b32.xlu0 %v4453_v26, %s7714_s21  ;;  %v3445_v39 = vsel %vm3415_vm0, %v13506_v61, %v13562_v20  ;;  %v4383_v48 = vsel %vm2473_vm13, %v4381_v5, %v4382_v44  ;;  %v13565_v62 = vld [vmem:[#allocation210_spill] sm:$0xff]  ;;  %v3923_v37 = vpop.f32.mrf.mxu0  ;;  %v4459_v5 = vrot.slane %v4323_v56, 2 }
 0x5a5   : > { %7225 = vmatmul.mubr.msk.f32.gmra.mxu1 %vm3720_vm7, %v3674_v21  ;;  %v3478_v50 = vsel %vm3448_vm15, %v3445_v39, %v13563_v25  ;;  %v13566_v21 = vld [vmem:[#allocation188_spill] sm:$0xff] }
 0x5a6   : > { %v3511_v55 = vsel %vm3481_vm1, %v3478_v50, %v11234_v54  ;;  %v3446_v60 = vsel %vm3415_vm0, %v13518_v63, %v13566_v21  ;;  %v4385_v63 = vsel %vm2473_vm13, %v4382_v44, %v4384_v2  ;;  %v3689_v2 = vld [vmem:[#allocation2 + $0x50] sm:$0xff] }
 0x5a7   : > { %v3184_v12 = vpop.permute.xlu0 %3183  ;;  %v3544_v61 = vsel %vm3514_vm2, %v3511_v55, %v2994_v59  ;;  %v13564_v59 = vld [vmem:[#allocation190_spill] sm:$0xff] }
 0x5a8   : > { %v3280_v42 = vpop.permute.xlu1 %3279  ;;  %4908 = vrot.lane.b32.xlu1 %v4453_v26, %s7711_s17  ;;  %4814 = vrot.lane.b32.xlu0 %v4380_v11, %s7710_s20  ;;  %v3609_v47 = vsel %vm3580_vm4, %v3576_v28, %v3184_v12  ;;  %v3447_v4 = vsel %vm3415_vm0, %v13520_v46, %v13564_v59  ;;  %v3687_v46 = vld [vmem:[#allocation2 + $0x40] sm:$0xff] }
 0x5a9   : > { %v3642_v41 = vsel %vm3613_vm5, %v3609_v47, %v3280_v42  ;;  %v3479_v42 = vsel %vm3448_vm15, %v3446_v60, %v13567_v24 }
 0x5aa   : > { %v3512_v57 = vsel %vm3481_vm1, %v3479_v42, %v11270_v34 }
 0x5ab   : > { %v3186_v58 = vpop.permute.xlu0 %3185 }
 0x5ac   : > { %v2996_v40 = vpop.permute.xlu1 %2995  ;;  %4538 = vrot.lane.b32.xlu1 %v4380_v11, %s7707_s22  ;;  %5182 = vrot.lane.b32.xlu0 %v4455_v51, %s7714_s21  ;;  %v3577_v11 = vsel %vm3547_vm3, %v3544_v61, %v3090_v14 }
 0x5ad   : > { %v3610_v54 = vsel %vm3580_vm4, %v3577_v11, %v3186_v58  ;;  %v4050_v58 = vadd.f32 %v3923_v37, %v3687_v46 }
 0x5af   : > { %v2902_v13 = vpop.permute.xlu0 %2901  ;;  %v4089_v20 = vadd.f32 %v11027_v0, %v4050_v58 }
 0x5b0   : > { %v3376_v3 = vpop.permute.xlu1 %3375  ;;  %4910 = vrot.lane.b32.xlu1 %v4455_v51, %s7711_s17  ;;  %4626 = vrot.lane.b32.xlu0 %v4453_v26, %s7708_s25  ;;  %v3480_v26 = vsel %vm3448_vm15, %v3447_v4, %v13565_v62 }
 0x5b1   : > { %v3675_v53 = vsel %vm3646_vm6, %v3642_v41, %v3376_v3  ;;  %v3513_v12 = vsel %vm3481_vm1, %v3480_v26, %v2902_v13  ;;  %v4051_v3 = vadd.f32 %v7199_v19, %v3688_v7  ;;  %v4460_v19 = vsel %vm2554_vm14, %v4457_v38, %v4459_v5 }
 0x5b2   : > { %7227 = vmatprep.mubr.msk.f32.mxu1 %vm3720_vm7, %v3675_v53 }
 0x5b3   : > { %v3282_v29 = vpop.permute.xlu0 %3281  ;;  %v4090_v61 = vadd.f32 %v11027_v0, %v4051_v3 }
 0x5b4   : > { %v3092_v9 = vpop.permute.xlu1 %3091  ;;  %4628 = vrot.lane.b32.xlu1 %v4455_v51, %s7708_s25  ;;  %5004 = vrot.lane.b32.xlu0 %v11300_v35, %s7712_s14  ;;  %v3643_v18 = vsel %vm3613_vm5, %v3610_v54, %v3282_v29  ;;  %v3545_v51 = vsel %vm3514_vm2, %v3512_v57, %v2996_v40 }
 0x5b5   : > { %v3578_v34 = vsel %vm3547_vm3, %v3545_v51, %v3092_v9  ;;  %v4122_v44 = vmul.f32 0.1, %v4090_v61 }
 0x5b6   : > { %v7202_v21 = vpop.f32.mrf.mxu0 }
 0x5b7   : > { %v2998_v1 = vpop.permute.xlu0 %2997  ;;  %v4154_v54 = vmax.f32 %v4090_v61, %v4122_v44 }
 0x5b8   : > { %5006 = vrot.lane.b32.xlu1 %v11308_v22, %s7712_s14  ;;  %4720 = vrot.lane.b32.xlu0 %v11300_v35, %s7709_s26  ;;  %v3094_v10 = vpop.permute.xlu1 %3093  ;;  %v3546_v23 = vsel %vm3514_vm2, %v3513_v12, %v2998_v1  ;;  %v4121_v1 = vmul.f32 0.1, %v4089_v20  ;;  %v3933_v24 = vpop.f32.mrf.mxu0 }
 0x5b9   : > { %v3579_v30 = vsel %vm3547_vm3, %v3546_v23, %v3094_v10  ;;  %v4052_v8 = vadd.f32 %v3933_v24, %v3689_v2 }
 0x5ba   : > { %v4153_v11 = vmax.f32 %v4089_v20, %v4121_v1 }
 0x5bb   : > { %v3378_v31 = vpop.permute.xlu0 %3377 }
 0x5bc   : > { %v3676_v14 = vsel %vm3646_vm6, %v3643_v18, %v3378_v31  ;;  %4722 = vrot.lane.b32.xlu1 %v11308_v22, %s7709_s26  ;;  %5094 = vrot.lane.b32.xlu0 %v4383_v48, %s7713_s19  ;;  %v11341_v45 = vpop.permute.xlu1 %7485  ;;  %v4221_v10 = vrot.slane %v4153_v11, 7  ;;  %v4222_v18 = vrot.slane %v4154_v54, 7 }
 0x5bd   : > { %7228 = vmatmul.mubr.msk.f32.gmra.mxu1 %vm3720_vm7, %v3676_v14  ;;  %v13070_v36 = vunpack.i.h.bf16 %v11341_v45  ;;  %v13073_v13 = vunpack.i.l.bf16 %v11341_v45 }
 0x5be   : > { %v11399_v56 = vsel %vm2307_vm12, 0.0, %v4221_v10  ;;  %v11404_v31 = vsel %vm2307_vm12, %v4221_v10, %v4222_v18  ;;  %v4324_v60 = vsel %vm2307_vm12, %v4222_v18, 0.0 }
 0x5bf   : > { %v11345_v32 = vpop.permute.xlu0 %7480  ;;  %v4386_v26 = vrot.slane %v11399_v56, 1  ;;  %v4387_v14 = vrot.slane %v11404_v31, 1  ;;  %v4389_v42 = vrot.slane %v4324_v60, 1  ;;  %v4461_v38 = vrot.slane %v11399_v56, 2 }
 0x5c0   : > { %v13071_v28 = vunpack.i.h.bf16 %v11345_v32  ;;  %v13074_v47 = vunpack.i.l.bf16 %v11345_v32  ;;  %5096 = vrot.lane.b32.xlu1 %v4385_v63, %s7713_s19  ;;  %4816 = vrot.lane.b32.xlu0 %v4383_v48, %s7710_s20  ;;  %v4462_v7 = vrot.slane %v11404_v31, 2 }
 0x5c1   : > { %v4388_v12 = vsel %vm2473_vm13, %v4386_v26, %v4387_v14  ;;  %v4390_v57 = vsel %vm2473_vm13, %v4387_v14, %v4389_v42 }
 0x5c2   : > { %v3611_v40 = vsel %vm3580_vm4, %v3578_v34, %v13074_v47  ;;  %v3612_v41 = vsel %vm3580_vm4, %v3579_v30, %v13071_v28  ;;  %v4091_v30 = vadd.f32 %v11027_v0, %v4052_v8 }
 0x5c3   : > { %v11365_v53 = vpop.permute.xlu0 %7490  ;;  %v3644_v25 = vsel %vm3613_vm5, %v3611_v40, %v13073_v13  ;;  %v3645_v50 = vsel %vm3613_vm5, %v3612_v41, %v13070_v36  ;;  %v4463_v40 = vsel %vm2554_vm14, %v4461_v38, %v4462_v7 }
 0x5c4   : > { %v13069_v39 = vunpack.i.h.bf16 %v11365_v53  ;;  %v13072_v29 = vunpack.i.l.bf16 %v11365_v53  ;;  %4540 = vrot.lane.b32.xlu1 %v4383_v48, %s7707_s22  ;;  %5184 = vrot.lane.b32.xlu0 %v4458_v33, %s7714_s21  ;;  %v4123_v20 = vmul.f32 0.1, %v4091_v30 }
 0x5c6   : > { %v3677_v9 = vsel %vm3646_vm6, %v3644_v25, %v13072_v29  ;;  %v3678_v55 = vsel %vm3646_vm6, %v3645_v50, %v13069_v39  ;;  %v4155_v61 = vmax.f32 %v4091_v30, %v4123_v20 }
 0x5c7   : > { %7230 = vmatprep.mubr.msk.f32.mxu1 %vm3720_vm7, %v3677_v9  ;;  %v4464_v9 = vrot.slane %v4324_v60, 2 }
 0x5c8   : > { %7231 = vmatmul.mubr.msk.f32.gmra.mxu1 %vm3720_vm7, %v3678_v55  ;;  %4912 = vrot.lane.b32.xlu1 %v4458_v33, %s7711_s17 }
 0x5c9   : > { %4818 = vrot.lane.b32.xlu0 %v4385_v63, %s7710_s20  ;;  %v4465_v1 = vsel %vm2554_vm14, %v4462_v7, %v4464_v9 }
 0x5cc   : > { %4542 = vrot.lane.b32.xlu1 %v4385_v63, %s7707_s22  ;;  %v3690_v63 = vld [vmem:[#allocation2 + $0x58] sm:$0xff] }
 0x5cd   : > { %5186 = vrot.lane.b32.xlu0 %v4460_v19, %s7714_s21  ;;  %v4053_v34 = vadd.f32 %v7202_v21, %v3690_v63 }
 0x5d0   : > { %4914 = vrot.lane.b32.xlu1 %v4460_v19, %s7711_s17 }
 0x5d1   : > { %4630 = vrot.lane.b32.xlu0 %v4458_v33, %s7708_s25  ;;  %v4092_v33 = vadd.f32 %v11027_v0, %v4053_v34 }
 0x5d2   : > { %v4709_v59 = vpop.permute.xlu1 %4708  ;;  %v11395_v4 = vpop.permute.xlu0 %4710 }
 0x5d3   : > { %v4124_v55 = vmul.f32 0.1, %v4092_v33  ;;  %v5326_v18 = vsel %vm3481_vm1, %v10562_v49, %v4709_v59  ;;  %v5327_v38 = vsel %vm3481_vm1, %v10552_v17, %v11395_v4 }
 0x5d4   : > { %4632 = vrot.lane.b32.xlu1 %v4460_v19, %s7708_s25  ;;  %v4224_v19 = vrot.slane %v4155_v61, 7  ;;  %v3692_v61 = vld [vmem:[#allocation2 + $0x68] sm:$0xff] }
 0x5d5   : > { %5008 = vrot.lane.b32.xlu0 %v11399_v56, %s7712_s14  ;;  %v4156_v11 = vmax.f32 %v4092_v33, %v4124_v55 }
 0x5d6   : > { %v4805_v48 = vpop.permute.xlu1 %4804  ;;  %v11406_v62 = vpop.permute.xlu0 %4528  ;;  %v11455_v21 = vsel %vm2307_vm12, 0.0, %v4224_v19 }
 0x5d7   : > { %v4225_v10 = vrot.slane %v4156_v11, 7  ;;  %v5358_v14 = vsel %vm3514_vm2, %v5326_v18, %v4805_v48 }
 0x5d8   : > { %5010 = vrot.lane.b32.xlu1 %v11404_v31, %s7712_s14 }
 0x5d9   : > { %4724 = vrot.lane.b32.xlu0 %v11399_v56, %s7709_s26  ;;  %v4325_v63 = vsel %vm2307_vm12, %v4225_v10, 0.0 }
 0x5da   : > { %v11415_v46 = vpop.permute.xlu1 %4806  ;;  %v4901_v37 = vpop.permute.xlu0 %4900  ;;  %v4394_v20 = vrot.slane %v4325_v63, 1 }
 0x5db   : > { %v5390_v60 = vsel %vm3547_vm3, %v5358_v14, %v4901_v37  ;;  %v4391_v37 = vrot.slane %v11455_v21, 1  ;;  %v5359_v34 = vsel %vm3514_vm2, %v5327_v38, %v11415_v46 }
 0x5dc   : > { %4726 = vrot.lane.b32.xlu1 %v11404_v31, %s7709_s26 }
 0x5dd   : > { %5098 = vrot.lane.b32.xlu0 %v4388_v12, %s7713_s19 }
 0x5de   : > { %v11421_v23 = vpop.permute.xlu1 %4530  ;;  %v11428_v58 = vpop.permute.xlu0 %4618 }
 0x5e0   : > { %5100 = vrot.lane.b32.xlu1 %v4390_v57, %s7713_s19 }
 0x5e1   : > { %4820 = vrot.lane.b32.xlu0 %v4388_v12, %s7710_s20 }
 0x5e2   : > { %v4903_v51 = vpop.permute.xlu1 %4902 }
 0x5e3   : > { %v5391_v33 = vsel %vm3547_vm3, %v5359_v34, %v4903_v51  ;;  %v4466_v51 = vrot.slane %v11455_v21, 2 }
 0x5e4   : > { %4544 = vrot.lane.b32.xlu1 %v4388_v12, %s7707_s22  ;;  %v11461_v12 = vsel %vm2307_vm12, %v4224_v19, %v4225_v10 }
 0x5e5   : > { %5188 = vrot.lane.b32.xlu0 %v4463_v40, %s7714_s21  ;;  %v4392_v42 = vrot.slane %v11461_v12, 1  ;;  %v4467_v11 = vrot.slane %v11461_v12, 2 }
 0x5e6   : > { %v11434_v41 = vpop.permute.xlu1 %4620  ;;  %v4997_v3 = vpop.permute.xlu0 %4996 }
 0x5e7   : > { %v5422_v2 = vsel %vm3580_vm4, %v5390_v60, %v4997_v3  ;;  %v4393_v30 = vsel %vm2473_vm13, %v4391_v37, %v4392_v42  ;;  %v4395_v46 = vsel %vm2473_vm13, %v4392_v42, %v4394_v20  ;;  %v4468_v18 = vsel %vm2554_vm14, %v4466_v51, %v4467_v11 }
 0x5e8   : > { %4916 = vrot.lane.b32.xlu1 %v4463_v40, %s7711_s17  ;;  %v5267_v51 = vsel %vm3415_vm0, %v11048_v6, %v11421_v23 }
 0x5e9   : > { %4822 = vrot.lane.b32.xlu0 %v4390_v57, %s7710_s20 }
 0x5ea   : > { %v4999_v25 = vpop.permute.xlu1 %4998  ;;  %v11439_v50 = vpop.permute.xlu0 %4712 }
 0x5eb   : > { %v5423_v9 = vsel %vm3580_vm4, %v5391_v33, %v4999_v25 }
 0x5ec   : > { %4546 = vrot.lane.b32.xlu1 %v4390_v57, %s7707_s22  ;;  %v7205_v57 = vpop.f32.mrf.mxu0 }
 0x5ed   : > { %5190 = vrot.lane.b32.xlu0 %v4465_v1, %s7714_s21  ;;  %v4055_v19 = vadd.f32 %v7205_v57, %v3692_v61 }
 0x5ee   : > { %v11444_v5 = vpop.permute.xlu1 %4714  ;;  %v5087_v44 = vpop.permute.xlu0 %5086 }
 0x5ef   : > { %v5454_v59 = vsel %vm3613_vm5, %v5422_v2, %v5087_v44  ;;  %v3943_v3 = vpop.f32.mrf.mxu0  ;;  %v4094_v60 = vadd.f32 %v11027_v0, %v4055_v19 }
 0x5f0   : > { %4918 = vrot.lane.b32.xlu1 %v4465_v1, %s7711_s17 }
 0x5f1   : > { %4634 = vrot.lane.b32.xlu0 %v4463_v40, %s7708_s25  ;;  %v3691_v40 = vld [vmem:[#allocation2 + $0x60] sm:$0xff]  ;;  %v4126_v37 = vmul.f32 0.1, %v4094_v60 }
 0x5f2   : > { %v5089_v54 = vpop.permute.xlu1 %5088  ;;  %v11450_v26 = vpop.permute.xlu0 %4808 }
 0x5f3   : > { %v5455_v4 = vsel %vm3613_vm5, %v5423_v9, %v5089_v54 }
 0x5f4   : > { %4636 = vrot.lane.b32.xlu1 %v4465_v1, %s7708_s25  ;;  %v4054_v1 = vadd.f32 %v3943_v3, %v3691_v40 }
 0x5f5   : > { %5012 = vrot.lane.b32.xlu0 %v11455_v21, %s7712_s14 }
 0x5f6   : > { %v11464_v49 = vpop.permute.xlu1 %4532  ;;  %v5177_v48 = vpop.permute.xlu0 %5176  ;;  %v4093_v10 = vadd.f32 %v11027_v0, %v4054_v1  ;;  %v4158_v0 = vmax.f32 %v4094_v60, %v4126_v37 }
 0x5f7   : > { %v5486_v24 = vsel %vm3646_vm6, %v5454_v59, %v5177_v48 }
 0x5f8   : > { %5014 = vrot.lane.b32.xlu1 %v11461_v12, %s7712_s14  ;;  %7251 = vmatprep.mubr.msk.f32.mxu1 %vm3720_vm7, %v5486_v24  ;;  %v4125_v59 = vmul.f32 0.1, %v4093_v10  ;;  %v4469_v24 = vrot.slane %v4325_v63, 2  ;;  %v5266_v63 = vsel %vm3415_vm0, %v11045_v43, %v11406_v62  ;;  %v4228_v20 = vrot.slane %v4158_v0, 7 }
 0x5f9   : > { %4728 = vrot.lane.b32.xlu0 %v11455_v21, %s7709_s26  ;;  %v5296_v3 = vsel %vm3448_vm15, %v5266_v63, %v11428_v58 }
 0x5fa   : > { %v4905_v8 = vpop.permute.xlu1 %4904  ;;  %v11479_v7 = vpop.permute.xlu0 %4810  ;;  %v4157_v57 = vmax.f32 %v4093_v10, %v4125_v59  ;;  %v4470_v38 = vsel %vm2554_vm14, %v4467_v11, %v4469_v24  ;;  %v5328_v9 = vsel %vm3481_vm1, %v5296_v3, %v11439_v50  ;;  %v4326_v19 = vsel %vm2307_vm12, %v4228_v20, 0.0  ;;  %v3693_v59 = vld [vmem:[#allocation2 + $0x70] sm:$0xff] }
 0x5fb   : > { %v7208_v11 = vpop.f32.mrf.mxu0  ;;  %v5297_v10 = vsel %vm3448_vm15, %v5267_v51, %v11434_v41  ;;  %v4399_v41 = vrot.slane %v4326_v19, 1 }
 0x5fc   : > { %4730 = vrot.lane.b32.xlu1 %v11461_v12, %s7709_s26  ;;  %v4227_v40 = vrot.slane %v4157_v57, 7  ;;  %v5329_v60 = vsel %vm3481_vm1, %v5297_v10, %v11444_v5 }
 0x5fd   : > { %5102 = vrot.lane.b32.xlu0 %v4393_v30, %s7713_s19  ;;  %v5361_v6 = vsel %vm3514_vm2, %v5329_v60, %v11479_v7  ;;  %v3953_v24 = vpop.f32.mrf.mxu0 }
 0x5fe   : > { %v11489_v17 = vpop.permute.xlu1 %4534  ;;  %v5179_v55 = vpop.permute.xlu0 %5178  ;;  %v11538_v62 = vsel %vm2307_vm12, %v4227_v40, %v4228_v20 }
 0x5ff   : > { %v5487_v44 = vsel %vm3646_vm6, %v5455_v4, %v5179_v55  ;;  %v5360_v55 = vsel %vm3514_vm2, %v5328_v9, %v11450_v26  ;;  %v4472_v3 = vrot.slane %v11538_v62, 2  ;;  %v11587_v9 = vld [vmem:[%s12822_s4] ss:$0 sm:$0xff] }
 0x600   : > { %5104 = vrot.lane.b32.xlu1 %v4395_v46, %s7713_s19  ;;  %7252 = vmatmul.mubr.msk.f32.vlgmr.msra.gmra.mxu1 %vm3720_vm7, %v5487_v44  ;;  %v5392_v43 = vsel %vm3547_vm3, %v5360_v55, %v4905_v8  ;;  %v4397_v44 = vrot.slane %v11538_v62, 1 }
 0x601   : > { %4824 = vrot.lane.b32.xlu0 %v4393_v30, %s7710_s20 }
 0x602   : > { %v4907_v25 = vpop.permute.xlu1 %4906  ;;  %v11499_v54 = vpop.permute.xlu0 %4622  ;;  %v4400_v7 = vsel %vm2473_vm13, %v4397_v44, %v4399_v41 }
 0x603   : > { %v5393_v37 = vsel %vm3547_vm3, %v5361_v6, %v4907_v25 }
 0x604   : > { %4548 = vrot.lane.b32.xlu1 %v4393_v30, %s7707_s22 }
 0x605   : > { %5192 = vrot.lane.b32.xlu0 %v4468_v18, %s7714_s21 }
 0x606   : > { %v11505_v14 = vpop.permute.xlu1 %4624  ;;  %v5001_v2 = vpop.permute.xlu0 %5000 }
 0x607   : > { %v5424_v58 = vsel %vm3580_vm4, %v5392_v43, %v5001_v2 }
 0x608   : > { %4920 = vrot.lane.b32.xlu1 %v4468_v18, %s7711_s17 }
 0x609   : > { %4826 = vrot.lane.b32.xlu0 %v4395_v46, %s7710_s20 }
 0x60a   : > { %v5003_v48 = vpop.permute.xlu1 %5002  ;;  %v11510_v42 = vpop.permute.xlu0 %4716 }
 0x60b   : > { %v5425_v57 = vsel %vm3580_vm4, %v5393_v37, %v5003_v48 }
 0x60c   : > { %4550 = vrot.lane.b32.xlu1 %v4395_v46, %s7707_s22  ;;  %v11532_v46 = vsel %vm2307_vm12, 0.0, %v4227_v40  ;;  %v4056_v40 = vadd.f32 %v3953_v24, %v3693_v59 }
 0x60d   : > { %5194 = vrot.lane.b32.xlu0 %v4470_v38, %s7714_s21  ;;  %v4396_v8 = vrot.slane %v11532_v46, 1  ;;  %v4471_v25 = vrot.slane %v11532_v46, 2 }
 0x60e   : > { %v11515_v34 = vpop.permute.xlu1 %4718  ;;  %v5091_v30 = vpop.permute.xlu0 %5090  ;;  %v4095_v55 = vadd.f32 %v11587_v9, %v4056_v40 }
 0x60f   : > { %v5456_v61 = vsel %vm3613_vm5, %v5424_v58, %v5091_v30  ;;  %v4398_v23 = vsel %vm2473_vm13, %v4396_v8, %v4397_v44  ;;  %v3694_v30 = vld [vmem:[#allocation2 + $0x78] sm:$0xff]  ;;  %v4473_v43 = vsel %vm2554_vm14, %v4471_v25, %v4472_v3  ;;  %v4474_v44 = vrot.slane %v4326_v19, 2 }
 0x610   : > { %4922 = vrot.lane.b32.xlu1 %v4470_v38, %s7711_s17  ;;  %v5268_v19 = vsel %vm3415_vm0, %v11115_v15, %v11464_v49 }
 0x611   : > { %4638 = vrot.lane.b32.xlu0 %v4468_v18, %s7708_s25  ;;  %v4475_v60 = vsel %vm2554_vm14, %v4472_v3, %v4474_v44  ;;  %v5298_v37 = vsel %vm3448_vm15, %v5268_v19, %v11499_v54  ;;  %v7211_v3 = vpop.f32.mrf.mxu1 }
 0x612   : > { %v5093_v33 = vpop.permute.xlu1 %5092  ;;  %v11526_v4 = vpop.permute.xlu0 %4812 }
 0x614   : > { %4640 = vrot.lane.b32.xlu1 %v4470_v38, %s7708_s25  ;;  %v5457_v38 = vsel %vm3613_vm5, %v5425_v57, %v5093_v33  ;;  %v4057_v33 = vadd.f32 %v7208_v11, %v3694_v30 }
 0x615   : > { %5016 = vrot.lane.b32.xlu0 %v11532_v46, %s7712_s14 }
 0x616   : > { %v11541_v50 = vpop.permute.xlu1 %4536  ;;  %v5181_v26 = vpop.permute.xlu0 %5180 }
 0x617   : > { %v5488_v1 = vsel %vm3646_vm6, %v5456_v61, %v5181_v26  ;;  %v4096_v61 = vadd.f32 %v11587_v9, %v4057_v33  ;;  %v5269_v33 = vsel %vm3415_vm0, %v11124_v27, %v11489_v17  ;;  %v3695_v17 = vld [vmem:[#allocation2 + $0x80] sm:$0xff] }
 0x618   : > { %5018 = vrot.lane.b32.xlu1 %v11538_v62, %s7712_s14  ;;  %7254 = vmatprep.mubr.msk.f32.mxu1 %vm3720_vm7, %v5488_v1  ;;  %v4127_v1 = vmul.f32 0.1, %v4095_v55 }
 0x619   : > { %4732 = vrot.lane.b32.xlu0 %v11532_v46, %s7709_s26  ;;  %v4128_v51 = vmul.f32 0.1, %v4096_v61 }
 0x61a   : > { %v4909_v18 = vpop.permute.xlu1 %4908  ;;  %v11560_v2 = vpop.permute.xlu0 %4814  ;;  %v4159_v10 = vmax.f32 %v4095_v55, %v4127_v1 }
 0x61c   : > { %4734 = vrot.lane.b32.xlu1 %v11538_v62, %s7709_s26  ;;  %v4230_v24 = vrot.slane %v4159_v10, 7 }
 0x61d   : > { %5106 = vrot.lane.b32.xlu0 %v4398_v23, %s7713_s19 }
 0x61e   : > { %v11570_v5 = vpop.permute.xlu1 %4538  ;;  %v5183_v0 = vpop.permute.xlu0 %5182  ;;  %v11620_v30 = vsel %vm2307_vm12, 0.0, %v4230_v24 }
 0x61f   : > { %v5489_v63 = vsel %vm3646_vm6, %v5457_v38, %v5183_v0  ;;  %v5330_v38 = vsel %vm3481_vm1, %v5298_v37, %v11510_v42 }
 0x620   : > { %5108 = vrot.lane.b32.xlu1 %v4400_v7, %s7713_s19  ;;  %7255 = vmatmul.mubr.msk.f32.gmra.mxu1 %vm3720_vm7, %v5489_v63 }
 0x621   : > { %4828 = vrot.lane.b32.xlu0 %v4398_v23, %s7710_s20 }
 0x622   : > { %v11580_v48 = vpop.permute.xlu1 %4910  ;;  %v11582_v20 = vpop.permute.xlu0 %4626 }
 0x624   : > { %4552 = vrot.lane.b32.xlu1 %v4398_v23, %s7707_s22  ;;  %v4160_v23 = vmax.f32 %v4096_v61, %v4128_v51  ;;  %v3963_v51 = vpop.f32.mrf.mxu1 }
 0x625   : > { %5196 = vrot.lane.b32.xlu0 %v4473_v43, %s7714_s21  ;;  %v4058_v19 = vadd.f32 %v3963_v51, %v3695_v17 }
 0x626   : > { %v11593_v58 = vpop.permute.xlu1 %4628  ;;  %v5005_v26 = vpop.permute.xlu0 %5004  ;;  %v4231_v57 = vrot.slane %v4160_v23, 7 }
 0x628   : > { %4924 = vrot.lane.b32.xlu1 %v4473_v43, %s7711_s17  ;;  %v11626_v49 = vsel %vm2307_vm12, %v4230_v24, %v4231_v57  ;;  %v4327_v55 = vsel %vm2307_vm12, %v4231_v57, 0.0  ;;  %v3696_v24 = vld [vmem:[#allocation2 + $0x88] sm:$0xff] }
 0x629   : > { %4830 = vrot.lane.b32.xlu0 %v4400_v7, %s7710_s20  ;;  %v4402_v25 = vrot.slane %v11626_v49, 1  ;;  %v4477_v57 = vrot.slane %v11626_v49, 2 }
 0x62a   : > { %v5007_v8 = vpop.permute.xlu1 %5006  ;;  %v11598_v11 = vpop.permute.xlu0 %4720 }
 0x62c   : > { %4554 = vrot.lane.b32.xlu1 %v4400_v7, %s7707_s22  ;;  %v5362_v7 = vsel %vm3514_vm2, %v5330_v38, %v11526_v4  ;;  %v4059_v38 = vadd.f32 %v7211_v3, %v3696_v24 }
 0x62d   : > { %5198 = vrot.lane.b32.xlu0 %v4475_v60, %s7714_s21  ;;  %v5394_v15 = vsel %vm3547_vm3, %v5362_v7, %v4909_v18  ;;  %v4401_v18 = vrot.slane %v11620_v30, 1  ;;  %v4097_v7 = vadd.f32 %v11587_v9, %v4058_v19 }
 0x62e   : > { %v11603_v6 = vpop.permute.xlu1 %4722  ;;  %v5095_v59 = vpop.permute.xlu0 %5094  ;;  %v5426_v54 = vsel %vm3580_vm4, %v5394_v15, %v5005_v26 }
 0x62f   : > { %v5458_v40 = vsel %vm3613_vm5, %v5426_v54, %v5095_v59  ;;  %v4403_v27 = vsel %vm2473_vm13, %v4401_v18, %v4402_v25 }
 0x630   : > { %4926 = vrot.lane.b32.xlu1 %v4475_v60, %s7711_s17 }
 0x631   : > { %4642 = vrot.lane.b32.xlu0 %v4473_v43, %s7708_s25  ;;  %v5299_v43 = vsel %vm3448_vm15, %v5269_v33, %v11505_v14  ;;  %v4404_v14 = vrot.slane %v4327_v55, 1 }
 0x632   : > { %v5097_v41 = vpop.permute.xlu1 %5096  ;;  %v11614_v0 = vpop.permute.xlu0 %4816  ;;  %v5331_v26 = vsel %vm3481_vm1, %v5299_v43, %v11515_v34 }
 0x633   : > { %v5363_v44 = vsel %vm3514_vm2, %v5331_v26, %v11560_v2  ;;  %v4405_v59 = vsel %vm2473_vm13, %v4402_v25, %v4404_v14  ;;  %v4479_v25 = vrot.slane %v4327_v55, 2  ;;  %v5270_v55 = vsel %vm3415_vm0, %v11224_v16, %v11541_v50 }
 0x634   : > { %4644 = vrot.lane.b32.xlu1 %v4475_v60, %s7708_s25  ;;  %v5395_v10 = vsel %vm3547_vm3, %v5363_v44, %v11580_v48  ;;  %v4476_v48 = vrot.slane %v11620_v30, 2 }
 0x635   : > { %5020 = vrot.lane.b32.xlu0 %v11620_v30, %s7712_s14  ;;  %v5427_v34 = vsel %vm3580_vm4, %v5395_v10, %v5007_v8  ;;  %v4480_v26 = vsel %vm2554_vm14, %v4477_v57, %v4479_v25  ;;  %v5300_v10 = vsel %vm3448_vm15, %v5270_v55, %v11582_v20  ;;  %v3697_v25 = vld [vmem:[#allocation2 + $0x90] sm:$0xff] }
 0x636   : > { %v11629_v42 = vpop.permute.xlu1 %4540  ;;  %v5185_v4 = vpop.permute.xlu0 %5184  ;;  %v5459_v23 = vsel %vm3613_vm5, %v5427_v34, %v5097_v41  ;;  %v4478_v15 = vsel %vm2554_vm14, %v4476_v48, %v4477_v57 }
 0x637   : > { %v5490_v63 = vsel %vm3646_vm6, %v5458_v40, %v5185_v4  ;;  %v4098_v40 = vadd.f32 %v11587_v9, %v4059_v38  ;;  %v7214_v57 = vpop.f32.mrf.mxu1  ;;  %v5271_v38 = vsel %vm3415_vm0, %v11231_v52, %v11570_v5 }
 0x638   : > { %5022 = vrot.lane.b32.xlu1 %v11626_v49, %s7712_s14  ;;  %7257 = vmatprep.mubr.msk.f32.mxu1 %vm3720_vm7, %v5490_v63  ;;  %v4129_v63 = vmul.f32 0.1, %v4097_v7 }
 0x639   : > { %4736 = vrot.lane.b32.xlu0 %v11620_v30, %s7709_s26  ;;  %v4130_v3 = vmul.f32 0.1, %v4098_v40 }
 0x63a   : > { %v4913_v61 = vpop.permute.xlu1 %4912  ;;  %v4161_v43 = vmax.f32 %v4097_v7, %v4129_v63 }
 0x63b   : > { %v11648_v1 = vpop.permute.xlu0 %4818 }
 0x63c   : > { %4738 = vrot.lane.b32.xlu1 %v11626_v49, %s7709_s26  ;;  %v4233_v51 = vrot.slane %v4161_v43, 7 }
 0x63d   : > { %5110 = vrot.lane.b32.xlu0 %v4403_v27, %s7713_s19 }
 0x63e   : > { %v11659_v60 = vpop.permute.xlu1 %4542  ;;  %v11702_v24 = vsel %vm2307_vm12, 0.0, %v4233_v51 }
 0x63f   : > { %v5187_v2 = vpop.permute.xlu0 %5186 }
 0x640   : > { %v5491_v37 = vsel %vm3646_vm6, %v5459_v23, %v5187_v2  ;;  %5112 = vrot.lane.b32.xlu1 %v4405_v59, %s7713_s19  ;;  %v5332_v23 = vsel %vm3481_vm1, %v5300_v10, %v11598_v11 }
 0x641   : > { %4832 = vrot.lane.b32.xlu0 %v4403_v27, %s7710_s20  ;;  %7258 = vmatmul.mubr.msk.f32.gmra.mxu1 %vm3720_vm7, %v5491_v37 }
 0x642   : > { %v4915_v8 = vpop.permute.xlu1 %4914 }
 0x643   : > { %v11669_v41 = vpop.permute.xlu0 %4630 }
 0x644   : > { %4556 = vrot.lane.b32.xlu1 %v4403_v27, %s7707_s22  ;;  %v4162_v27 = vmax.f32 %v4098_v40, %v4130_v3  ;;  %v3973_v3 = vpop.f32.mrf.mxu1 }
 0x645   : > { %5200 = vrot.lane.b32.xlu0 %v4478_v15, %s7714_s21  ;;  %v4060_v55 = vadd.f32 %v3973_v3, %v3697_v25 }
 0x646   : > { %v11675_v54 = vpop.permute.xlu1 %4632  ;;  %v4234_v34 = vrot.slane %v4162_v27, 7 }
 0x647   : > { %v5009_v4 = vpop.permute.xlu0 %5008 }
 0x648   : > { %4928 = vrot.lane.b32.xlu1 %v4478_v15, %s7711_s17  ;;  %v11708_v50 = vsel %vm2307_vm12, %v4233_v51, %v4234_v34  ;;  %v4328_v7 = vsel %vm2307_vm12, %v4234_v34, 0.0  ;;  %v3698_v51 = vld [vmem:[#allocation2 + $0x98] sm:$0xff] }
 0x649   : > { %4834 = vrot.lane.b32.xlu0 %v4405_v59, %s7710_s20  ;;  %v4407_v48 = vrot.slane %v11708_v50, 1  ;;  %v4482_v34 = vrot.slane %v11708_v50, 2 }
 0x64a   : > { %v5011_v18 = vpop.permute.xlu1 %5010 }
 0x64b   : > { %v11680_v33 = vpop.permute.xlu0 %4724 }
 0x64c   : > { %4558 = vrot.lane.b32.xlu1 %v4405_v59, %s7707_s22  ;;  %v5364_v59 = vsel %vm3514_vm2, %v5332_v23, %v11614_v0 }
 0x64d   : > { %5202 = vrot.lane.b32.xlu0 %v4480_v26, %s7714_s21  ;;  %v5396_v16 = vsel %vm3547_vm3, %v5364_v59, %v4913_v61  ;;  %v4406_v61 = vrot.slane %v11702_v24, 1  ;;  %v4099_v59 = vadd.f32 %v11587_v9, %v4060_v55 }
 0x64e   : > { %v11685_v44 = vpop.permute.xlu1 %4726  ;;  %v5428_v20 = vsel %vm3580_vm4, %v5396_v16, %v5009_v4 }
 0x64f   : > { %v5099_v17 = vpop.permute.xlu0 %5098  ;;  %v4408_v5 = vsel %vm2473_vm13, %v4406_v61, %v4407_v48  ;;  %v6111_v61 = vld [vmem:[%s7807_s28] sm:$0xff] }
 0x650   : > { %4930 = vrot.lane.b32.xlu1 %v4480_v26, %s7711_s17  ;;  %v5460_v19 = vsel %vm3613_vm5, %v5428_v20, %v5099_v17  ;;  %v11759_v20 = vpop.f32.mrf.mxu1  ;;  %7299 = vmatprep.subr.mxu0 %v6111_v61 }
 0x651   : > { %4646 = vrot.lane.b32.xlu0 %v4478_v15, %s7708_s25  ;;  %v5301_v15 = vsel %vm3448_vm15, %v5271_v38, %v11593_v58  ;;  %v4409_v58 = vrot.slane %v4328_v7, 1  ;;  %7300 = vmatpush3.msra.mxu0 %v6111_v61 }
 0x652   : > { %v5101_v14 = vpop.permute.xlu1 %5100  ;;  %v5333_v4 = vsel %vm3481_vm1, %v5301_v15, %v11603_v6  ;;  %v4484_v15 = vrot.slane %v4328_v7, 2  ;;  %v5272_v7 = vsel %vm3415_vm0, %v11300_v35, %v11629_v42 }
 0x653   : > { %v11696_v2 = vpop.permute.xlu0 %4820  ;;  %v5365_v52 = vsel %vm3514_vm2, %v5333_v4, %v11648_v1  ;;  %v4410_v1 = vsel %vm2473_vm13, %v4407_v48, %v4409_v58  ;;  %v4131_v48 = vmul.f32 0.1, %v4099_v59 }
 0x654   : > { %4648 = vrot.lane.b32.xlu1 %v4480_v26, %s7708_s25  ;;  %v5397_v43 = vsel %vm3547_vm3, %v5365_v52, %v4915_v8  ;;  %v4481_v8 = vrot.slane %v11702_v24, 2  ;;  %v4485_v3 = vsel %vm2554_vm14, %v4482_v34, %v4484_v15 }
 0x655   : > { %5024 = vrot.lane.b32.xlu0 %v11702_v24, %s7712_s14  ;;  %v5429_v26 = vsel %vm3580_vm4, %v5397_v43, %v5011_v18  ;;  %v4163_v25 = vmax.f32 %v4099_v59, %v4131_v48 }
 0x656   : > { %v11711_v11 = vpop.permute.xlu1 %4544  ;;  %v5461_v27 = vsel %vm3613_vm5, %v5429_v26, %v5101_v14  ;;  %v4061_v14 = vadd.f32 %v7214_v57, %v3698_v51  ;;  %v4483_v16 = vsel %vm2554_vm14, %v4481_v8, %v4482_v34  ;;  %v11767_v57 = vpop.f32.mrf.mxu1 }
 0x657   : > { %v5189_v0 = vpop.permute.xlu0 %5188 }
 0x658   : > { %v5492_v37 = vsel %vm3646_vm6, %v5460_v19, %v5189_v0  ;;  %5026 = vrot.lane.b32.xlu1 %v11708_v50, %s7712_s14  ;;  %v4100_v0 = vadd.f32 %v11587_v9, %v4061_v14  ;;  %v11770_v52 = vpop.f32.mrf.mxu1 }
 0x659   : > { %4740 = vrot.lane.b32.xlu0 %v11702_v24, %s7709_s26  ;;  %7260 = vmatprep.mubr.msk.f32.mxu1 %vm3720_vm7, %v5492_v37 }
 0x65a   : > { %v11728_v40 = vpop.permute.xlu1 %4916  ;;  %v4132_v4 = vmul.f32 0.1, %v4100_v0  ;;  %v11779_v26 = vpop.f32.mrf.mxu1 }
 0x65b   : > { %v11732_v63 = vpop.permute.xlu0 %4822 }
 0x65c   : > { %4742 = vrot.lane.b32.xlu1 %v11708_v50, %s7709_s26  ;;  %v4164_v58 = vmax.f32 %v4100_v0, %v4132_v4  ;;  %v11785_v51 = vpop.f32.mrf.mxu1 }
 0x65d   : > { %5114 = vrot.lane.b32.xlu0 %v4408_v5, %s7713_s19 }
 0x65e   : > { %v11742_v6 = vpop.permute.xlu1 %4546  ;;  %v11800_v42 = vpop.f32.mrf.mxu1 }
 0x65f   : > { %v5191_v17 = vpop.permute.xlu0 %5190 }
 0x660   : > { %v5493_v10 = vsel %vm3646_vm6, %v5461_v27, %v5191_v17  ;;  %5116 = vrot.lane.b32.xlu1 %v4410_v1, %s7713_s19  ;;  %v4236_v17 = vrot.slane %v4163_v25, 7 }
 0x661   : > { %4836 = vrot.lane.b32.xlu0 %v4408_v5, %s7710_s20  ;;  %7261 = vmatmul.mubr.msk.f32.gmra.mxu1 %vm3720_vm7, %v5493_v10  ;;  %v4237_v10 = vrot.slane %v4164_v58, 7 }
 0x662   : > { %v11752_v18 = vpop.permute.xlu1 %4918  ;;  %v11798_v35 = vsel %vm2307_vm12, 0.0, %v4236_v17 }
 0x663   : > { %v11754_v23 = vpop.permute.xlu0 %4634  ;;  %v11827_v4 = vsel %vm2307_vm12, %v4237_v10, 0.0 }
 0x664   : > { %4560 = vrot.lane.b32.xlu1 %v4408_v5, %s7707_s22 }
 0x665   : > { %5204 = vrot.lane.b32.xlu0 %v4483_v16, %s7714_s21 }
 0x666   : > { %v11762_v19 = vpop.permute.xlu1 %4636 }
 0x667   : > { %v5013_v37 = vpop.permute.xlu0 %5012 }
 0x668   : > { %4932 = vrot.lane.b32.xlu1 %v4483_v16, %s7711_s17 }
 0x669   : > { %4838 = vrot.lane.b32.xlu0 %v4410_v1, %s7710_s20 }
 0x66a   : > { %v5015_v38 = vpop.permute.xlu1 %5014 }
 0x66b   : > { %v11772_v5 = vpop.permute.xlu0 %4728 }
 0x66c   : > { %4562 = vrot.lane.b32.xlu1 %v4410_v1, %s7707_s22  ;;  %v5302_v1 = vsel %vm3448_vm15, %v5272_v7, %v11669_v41 }
 0x66d   : > { %5206 = vrot.lane.b32.xlu0 %v4485_v3, %s7714_s21  ;;  %v5334_v8 = vsel %vm3481_vm1, %v5302_v1, %v11680_v33  ;;  %v11807_v33 = vsel %vm2307_vm12, %v4236_v17, %v4237_v10  ;;  %v3699_v1 = vld [vmem:[#allocation2 + $0xa0] sm:$0xff] }
 0x66e   : > { %v11777_v43 = vpop.permute.xlu1 %4730  ;;  %v5366_v14 = vsel %vm3514_vm2, %v5334_v8, %v11696_v2  ;;  %v11812_v2 = vpop.f32.mrf.mxu1  ;;  %v4412_v15 = vrot.slane %v11807_v33, 1  ;;  %v4414_v8 = vrot.slane %v11827_v4, 1 }
 0x66f   : > { %v5103_v27 = vpop.permute.xlu0 %5102  ;;  %v5398_v41 = vsel %vm3547_vm3, %v5366_v14, %v11728_v40  ;;  %v4411_v40 = vrot.slane %v11798_v35, 1 }
 0x670   : > { %4934 = vrot.lane.b32.xlu1 %v4485_v3, %s7711_s17  ;;  %v5430_v59 = vsel %vm3580_vm4, %v5398_v41, %v5013_v37  ;;  %v5273_v37 = vsel %vm3415_vm0, %v11308_v22, %v11659_v60  ;;  %v3708_v22 = vld [vmem:[#allocation2 + $0xe8] sm:$0xff] }
 0x671   : > { %4650 = vrot.lane.b32.xlu0 %v4483_v16, %s7708_s25  ;;  %v5462_v0 = vsel %vm3613_vm5, %v5430_v59, %v5103_v27  ;;  %v5303_v25 = vsel %vm3448_vm15, %v5273_v37, %v11675_v54  ;;  %v11835_v27 = vpop.f32.mrf.mxu1  ;;  %v4413_v7 = vsel %vm2473_vm13, %v4411_v40, %v4412_v15  ;;  %v4415_v40 = vsel %vm2473_vm13, %v4412_v15, %v4414_v8 }
 0x672   : > { %v5105_v55 = vpop.permute.xlu1 %5104  ;;  %v5335_v58 = vsel %vm3481_vm1, %v5303_v25, %v11685_v44  ;;  %v3707_v44 = vld [vmem:[#allocation2 + $0xe0] sm:$0xff]  ;;  %v4487_v37 = vrot.slane %v11807_v33, 2  ;;  %v4062_v25 = vadd.f32 %v11767_v57, %v3699_v1 }
 0x673   : > { %v11792_v34 = vpop.permute.xlu0 %4824  ;;  %v5367_v60 = vsel %vm3514_vm2, %v5335_v58, %v11732_v63  ;;  %v3700_v63 = vld [vmem:[#allocation2 + $0xa8] sm:$0xff] }
 0x674   : > { %4652 = vrot.lane.b32.xlu1 %v4485_v3, %s7708_s25  ;;  %v5399_v54 = vsel %vm3547_vm3, %v5367_v60, %v11752_v18  ;;  %v4486_v18 = vrot.slane %v11798_v35, 2  ;;  %v4101_v57 = vadd.f32 %v11587_v9, %v4062_v25 }
 0x675   : > { %5028 = vrot.lane.b32.xlu0 %v11798_v35, %s7712_s14  ;;  %v5431_v14 = vsel %vm3580_vm4, %v5399_v54, %v5015_v38 }
 0x676   : > { %v11810_v16 = vpop.permute.xlu1 %4548  ;;  %v4488_v8 = vsel %vm2554_vm14, %v4486_v18, %v4487_v37 }
 0x677   : > { %v5193_v61 = vpop.permute.xlu0 %5192 }
 0x678   : > { %v5494_v48 = vsel %vm3646_vm6, %v5462_v0, %v5193_v61  ;;  %5030 = vrot.lane.b32.xlu1 %v11807_v33, %s7712_s14  ;;  %v5463_v0 = vsel %vm3613_vm5, %v5431_v14, %v5105_v55  ;;  %v4063_v55 = vadd.f32 %v11759_v20, %v3700_v63  ;;  %v3710_v63 = vld [vmem:[#allocation2 + $0xf8] sm:$0xff] }
 0x679   : > { %4744 = vrot.lane.b32.xlu0 %v11798_v35, %s7709_s26  ;;  %7263 = vmatprep.mubr.msk.f32.mxu1 %vm3720_vm7, %v5494_v48 }
 0x67a   : > { %v11831_v3 = vpop.permute.xlu1 %4920  ;;  %v4102_v14 = vadd.f32 %v11587_v9, %v4063_v55 }
 0x67b   : > { %v11837_v17 = vpop.permute.xlu0 %4826 }
 0x67c   : > { %4746 = vrot.lane.b32.xlu1 %v11807_v33, %s7709_s26  ;;  %v4134_v18 = vmul.f32 0.1, %v4102_v14 }
 0x67d   : > { %v7229_v10 = vpop.f32.mrf.mxu1  ;;  %5118 = vrot.lane.b32.xlu0 %v4413_v7, %s7713_s19 }
 0x67e   : > { %v4071_v41 = vadd.f32 %v7229_v10, %v3708_v22  ;;  %v11849_v59 = vpop.permute.xlu1 %4550 }
 0x67f   : > { %v4023_v61 = vpop.f32.mrf.mxu1  ;;  %v5195_v48 = vpop.permute.xlu0 %5194 }
 0x680   : > { %v4110_v58 = vadd.f32 %v11587_v9, %v4071_v41  ;;  %v4070_v60 = vadd.f32 %v4023_v61, %v3707_v44  ;;  %v5495_v38 = vsel %vm3646_vm6, %v5463_v0, %v5195_v48  ;;  %5120 = vrot.lane.b32.xlu1 %v4415_v40, %s7713_s19  ;;  %v4133_v61 = vmul.f32 0.1, %v4101_v57 }
 0x681   : > { %4840 = vrot.lane.b32.xlu0 %v4413_v7, %s7710_s20  ;;  %7264 = vmatmul.mubr.msk.f32.gmra.mxu1 %vm3720_vm7, %v5495_v38 }
 0x682   : > { %v4142_v15 = vmul.f32 0.1, %v4110_v58  ;;  %v4109_v22 = vadd.f32 %v11587_v9, %v4070_v60  ;;  %v11863_v54 = vpop.permute.xlu1 %4922  ;;  %v4165_v39 = vmax.f32 %v4101_v57, %v4133_v61  ;;  %v5274_v57 = vsel %vm3415_vm0, %v11399_v56, %v11711_v11 }
 0x683   : > { %v11865_v10 = vpop.permute.xlu0 %4638 }
 0x684   : > { %v4174_v1 = vmax.f32 %v4110_v58, %v4142_v15  ;;  %v4141_v44 = vmul.f32 0.1, %v4109_v22  ;;  %4564 = vrot.lane.b32.xlu1 %v4413_v7, %s7707_s22  ;;  %v3709_v7 = vld [vmem:[#allocation2 + $0xf0] sm:$0xff]  ;;  %v4489_v15 = vrot.slane %v11827_v4, 2  ;;  %v4166_v4 = vmax.f32 %v4102_v14, %v4134_v18 }
 0x685   : > { %5208 = vrot.lane.b32.xlu0 %v4488_v8, %s7714_s21 }
 0x686   : > { %v4173_v20 = vmax.f32 %v4109_v22, %v4141_v44  ;;  %v11872_v41 = vpop.permute.xlu1 %4640  ;;  %v11874_v48 = vrot.slane %v4174_v1, 7  ;;  %v4240_v14 = vrot.slane %v4166_v4, 7 }
 0x687   : > { %v5017_v0 = vpop.permute.xlu0 %5016 }
 0x688   : > { %v11876_v60 = vrot.slane %v4173_v20, 7  ;;  %v7232_v25 = vpop.f32.mrf.mxu1  ;;  %4936 = vrot.lane.b32.xlu1 %v4488_v8, %s7711_s17 }
 0x689   : > { %v4073_v58 = vadd.f32 %v7232_v25, %v3710_v63  ;;  %4842 = vrot.lane.b32.xlu0 %v4415_v40, %s7710_s20  ;;  %v4490_v63 = vsel %vm2554_vm14, %v4487_v37, %v4489_v15 }
 0x68a   : > { %v4033_v38 = vpop.f32.mrf.mxu1  ;;  %v11880_v55 = vpop.permute.xlu1 %5018  ;;  %v11886_v22 = vsel %vm2307_vm12, %v11876_v60, %v11874_v48 }
 0x68b   : > { %v4112_v1 = vadd.f32 %v11587_v9, %v4073_v58  ;;  %v4072_v44 = vadd.f32 %v4033_v38, %v3709_v7  ;;  %v11889_v20 = vpop.permute.xlu0 %4732  ;;  %v4239_v58 = vrot.slane %v4165_v39, 7 }
 0x68c   : > { %4566 = vrot.lane.b32.xlu1 %v4415_v40, %s7707_s22  ;;  %v5304_v40 = vsel %vm3448_vm15, %v5274_v57, %v11754_v23 }
 0x68d   : > { %v4144_v25 = vmul.f32 0.1, %v4112_v1  ;;  %v4111_v36 = vadd.f32 %v11587_v9, %v4072_v44  ;;  %5210 = vrot.lane.b32.xlu0 %v4490_v63, %s7714_s21  ;;  %v5336_v7 = vsel %vm3481_vm1, %v5304_v40, %v11772_v5 }
 0x68e   : > { %v11895_v28 = vpop.permute.xlu1 %4734  ;;  %v5368_v39 = vsel %vm3514_vm2, %v5336_v7, %v11792_v34 }
 0x68f   : > { %v4176_v29 = vmax.f32 %v4112_v1, %v4144_v25  ;;  %v4143_v13 = vmul.f32 0.1, %v4111_v36  ;;  %v5107_v47 = vpop.permute.xlu0 %5106  ;;  %v5400_v23 = vsel %vm3547_vm3, %v5368_v39, %v11831_v3 }
 0x690   : > { %4938 = vrot.lane.b32.xlu1 %v4490_v63, %s7711_s17 }
 0x691   : > { %v4255_v37 = vrot.slane %v4176_v29, 7  ;;  %v4175_v61 = vmax.f32 %v4111_v36, %v4143_v13  ;;  %4654 = vrot.lane.b32.xlu0 %v4488_v8, %s7708_s25  ;;  %v11915_v36 = vsel %vm2307_vm12, 0.0, %v4239_v58  ;;  %v11918_v13 = vsel %vm2307_vm12, %v4239_v58, %v4240_v14 }
 0x692   : > { %v5109_v18 = vpop.permute.xlu1 %5108  ;;  %v5432_v29 = vsel %vm3580_vm4, %v5400_v23, %v5017_v0  ;;  %v4416_v4 = vrot.slane %v11915_v36, 1  ;;  %v4417_v58 = vrot.slane %v11918_v13, 1 }
 0x693   : > { %v4335_v38 = vsel %vm2307_vm12, %v4255_v37, 0.0  ;;  %v4254_v56 = vrot.slane %v4175_v61, 7  ;;  %v11909_v11 = vpop.permute.xlu0 %4828 }
 0x694   : > { %4656 = vrot.lane.b32.xlu1 %v4490_v63, %s7708_s25  ;;  %v4521_v3 = vrot.slane %v4335_v38, 1  ;;  %v5464_v63 = vsel %vm3613_vm5, %v5432_v29, %v5107_v47  ;;  %v4526_v57 = vrot.slane %v4335_v38, 2  ;;  %v5275_v47 = vsel %vm3415_vm0, %v11404_v31, %v11742_v6 }
 0x695   : > { %5032 = vrot.lane.b32.xlu0 %v11915_v36, %s7712_s14  ;;  %v11924_v5 = vsel %vm2307_vm12, 0.0, %v4254_v56  ;;  %v11927_v34 = vsel %vm2307_vm12, %v4254_v56, %v4255_v37  ;;  %v4330_v38 = vsel %vm2307_vm12, %v4240_v14, 0.0  ;;  %v5305_v56 = vsel %vm3448_vm15, %v5275_v47, %v11762_v19 }
 0x696   : > { %v11929_v8 = vpop.permute.xlu1 %4552  ;;  %v4518_v15 = vrot.slane %v11924_v5, 1  ;;  %v4523_v1 = vrot.slane %v11924_v5, 2  ;;  %v4519_v44 = vrot.slane %v11927_v34, 1  ;;  %v4524_v0 = vrot.slane %v11927_v34, 2 }
 0x697   : > { %v5197_v25 = vpop.permute.xlu0 %5196  ;;  %v5337_v29 = vsel %vm3481_vm1, %v5305_v56, %v11777_v43  ;;  %v4418_v6 = vsel %vm2473_vm13, %v4416_v4, %v4417_v58  ;;  %v4419_v19 = vrot.slane %v4330_v38, 1 }
 0x698   : > { %v5496_v40 = vsel %vm3646_vm6, %v5464_v63, %v5197_v25  ;;  %5034 = vrot.lane.b32.xlu1 %v11918_v13, %s7712_s14  ;;  %v11942_v37 = vsel %vm2473_vm13, %v4518_v15, %v4519_v44  ;;  %v11945_v61 = vsel %vm2473_vm13, %v4519_v44, %v4521_v3  ;;  %v11948_v7 = vsel %vm2554_vm14, %v4523_v1, %v4524_v0  ;;  %v3701_v15 = vld [vmem:[#allocation2 + $0xb0] sm:$0xff]  ;;  %v3702_v63 = vld [vmem:[#allocation2 + $0xb8] sm:$0xff] }
 0x699   : > { %4748 = vrot.lane.b32.xlu0 %v11915_v36, %s7709_s26  ;;  %7266 = vmatprep.mubr.msk.f32.mxu1 %vm3720_vm7, %v5496_v40  ;;  %v11957_v39 = vsel %vm2554_vm14, %v4524_v0, %v4526_v57  ;;  %v5369_v31 = vsel %vm3514_vm2, %v5337_v29, %v11837_v17  ;;  %v4420_v0 = vsel %vm2473_vm13, %v4417_v58, %v4419_v19  ;;  %v4492_v57 = vrot.slane %v11918_v13, 2 }
 0x69a   : > { %v4925_v23 = vpop.permute.xlu1 %4924  ;;  %v5401_v14 = vsel %vm3547_vm3, %v5369_v31, %v11863_v54  ;;  %v4064_v25 = vadd.f32 %v11779_v26, %v3701_v15  ;;  %v4491_v54 = vrot.slane %v11915_v36, 2  ;;  %v4494_v15 = vrot.slane %v4330_v38, 2 }
 0x69b   : > { %v11964_v3 = vpop.permute.xlu0 %4830  ;;  %v5433_v43 = vsel %vm3580_vm4, %v5401_v14, %v11880_v55  ;;  %v5276_v38 = vsel %vm3415_vm0, %v11455_v21, %v11810_v16 }
 0x69c   : > { %4750 = vrot.lane.b32.xlu1 %v11918_v13, %s7709_s26  ;;  %v5465_v44 = vsel %vm3613_vm5, %v5433_v43, %v5109_v18  ;;  %v4065_v18 = vadd.f32 %v11770_v52, %v3702_v63  ;;  %v4103_v58 = vadd.f32 %v11587_v9, %v4064_v25  ;;  %v4493_v26 = vsel %vm2554_vm14, %v4491_v54, %v4492_v57 }
 0x69d   : > { %5122 = vrot.lane.b32.xlu0 %v4418_v6, %s7713_s19  ;;  %v4495_v43 = vsel %vm2554_vm14, %v4492_v57, %v4494_v15 }
 0x69e   : > { %v11976_v1 = vpop.permute.xlu1 %4554  ;;  %v4104_v56 = vadd.f32 %v11587_v9, %v4065_v18  ;;  %v4135_v31 = vmul.f32 0.1, %v4103_v58 }
 0x69f   : > { %v5199_v17 = vpop.permute.xlu0 %5198 }
 0x6a0   : > { %v5497_v4 = vsel %vm3646_vm6, %v5465_v44, %v5199_v17  ;;  %5124 = vrot.lane.b32.xlu1 %v4420_v0, %s7713_s19  ;;  %v4136_v14 = vmul.f32 0.1, %v4104_v56 }
 0x6a1   : > { %4844 = vrot.lane.b32.xlu0 %v4418_v6, %s7710_s20  ;;  %7267 = vmatmul.mubr.msk.f32.gmra.mxu1 %vm3720_vm7, %v5497_v4 }
 0x6a2   : > { %v4927_v55 = vpop.permute.xlu1 %4926  ;;  %v4168_v17 = vmax.f32 %v4104_v56, %v4136_v14  ;;  %v5277_v14 = vsel %vm3415_vm0, %v11461_v12, %v11849_v59 }
 0x6a3   : > { %v11988_v40 = vpop.permute.xlu0 %4642 }
 0x6a4   : > { %4568 = vrot.lane.b32.xlu1 %v4418_v6, %s7707_s22  ;;  %v4167_v6 = vmax.f32 %v4103_v58, %v4135_v31  ;;  %v4243_v54 = vrot.slane %v4168_v17, 7 }
 0x6a5   : > { %5212 = vrot.lane.b32.xlu0 %v4493_v26, %s7714_s21 }
 0x6a6   : > { %v11994_v47 = vpop.permute.xlu1 %4644  ;;  %v4242_v25 = vrot.slane %v4167_v6, 7  ;;  %v5307_v6 = vsel %vm3448_vm15, %v5277_v14, %v11872_v41 }
 0x6a7   : > { %v5021_v29 = vpop.permute.xlu0 %5020  ;;  %v5339_v17 = vsel %vm3481_vm1, %v5307_v6, %v11895_v28 }
 0x6a8   : > { %4940 = vrot.lane.b32.xlu1 %v4493_v26, %s7711_s17  ;;  %v12021_v56 = vsel %vm2307_vm12, 0.0, %v4242_v25  ;;  %v12027_v16 = vsel %vm2307_vm12, %v4242_v25, %v4243_v54  ;;  %v5371_v12 = vsel %vm3514_vm2, %v5339_v17, %v11964_v3  ;;  %v3703_v25 = vld [vmem:[#allocation2 + $0xc0] sm:$0xff] }
 0x6a9   : > { %4846 = vrot.lane.b32.xlu0 %v4420_v0, %s7710_s20  ;;  %v4422_v15 = vrot.slane %v12027_v16, 1 }
 0x6aa   : > { %v5023_v52 = vpop.permute.xlu1 %5022 }
 0x6ab   : > { %v11999_v19 = vpop.permute.xlu0 %4736 }
 0x6ac   : > { %4570 = vrot.lane.b32.xlu1 %v4420_v0, %s7707_s22  ;;  %v5306_v0 = vsel %vm3448_vm15, %v5276_v38, %v11865_v10  ;;  %v5403_v38 = vsel %vm3547_vm3, %v5371_v12, %v4927_v55  ;;  %v4066_v55 = vadd.f32 %v11800_v42, %v3703_v25 }
 0x6ad   : > { %5214 = vrot.lane.b32.xlu0 %v4495_v43, %s7714_s21  ;;  %v5338_v57 = vsel %vm3481_vm1, %v5306_v0, %v11889_v20  ;;  %v5435_v0 = vsel %vm3580_vm4, %v5403_v38, %v5023_v52  ;;  %v4496_v52 = vrot.slane %v12021_v56, 2 }
 0x6ae   : > { %v12004_v44 = vpop.permute.xlu1 %4738  ;;  %v5370_v58 = vsel %vm3514_vm2, %v5338_v57, %v11909_v11  ;;  %v4105_v14 = vadd.f32 %v11587_v9, %v4066_v55 }
 0x6af   : > { %v5111_v63 = vpop.permute.xlu0 %5110  ;;  %v5402_v21 = vsel %vm3547_vm3, %v5370_v58, %v4925_v23  ;;  %v4421_v23 = vrot.slane %v12021_v56, 1  ;;  %v12068_v58 = vld [vmem:[%s12824_s6] ss:$0 sm:$0xff] }
 0x6b0   : > { %4942 = vrot.lane.b32.xlu1 %v4495_v43, %s7711_s17  ;;  %v5434_v10 = vsel %vm3580_vm4, %v5402_v21, %v5021_v29  ;;  %v4331_v29 = vsel %vm2307_vm12, %v4243_v54, 0.0  ;;  %v3704_v21 = vld [vmem:[#allocation2 + $0xc8] sm:$0xff] }
 0x6b1   : > { %4658 = vrot.lane.b32.xlu0 %v4493_v26, %s7708_s25  ;;  %v5466_v26 = vsel %vm3613_vm5, %v5434_v10, %v5111_v63  ;;  %v4423_v59 = vsel %vm2473_vm13, %v4421_v23, %v4422_v15  ;;  %v4424_v41 = vrot.slane %v4331_v29, 1  ;;  %v4067_v23 = vadd.f32 %v11785_v51, %v3704_v21 }
 0x6b2   : > { %v5113_v4 = vpop.permute.xlu1 %5112 }
 0x6b3   : > { %v12015_v18 = vpop.permute.xlu0 %4832  ;;  %v5467_v28 = vsel %vm3613_vm5, %v5435_v0, %v5113_v4  ;;  %v4425_v3 = vsel %vm2473_vm13, %v4422_v15, %v4424_v41  ;;  %v4106_v51 = vadd.f32 %v11587_v9, %v4067_v23  ;;  %v4137_v0 = vmul.f32 0.1, %v4105_v14 }
 0x6b4   : > { %4660 = vrot.lane.b32.xlu1 %v4495_v43, %s7708_s25 }
 0x6b5   : > { %5036 = vrot.lane.b32.xlu0 %v12021_v56, %s7712_s14  ;;  %v4169_v55 = vmax.f32 %v4105_v14, %v4137_v0 }
 0x6b6   : > { %v12030_v20 = vpop.permute.xlu1 %4556 }
 0x6b7   : > { %v5201_v11 = vpop.permute.xlu0 %5200 }
 0x6b8   : > { %v5498_v31 = vsel %vm3646_vm6, %v5466_v26, %v5201_v11  ;;  %5038 = vrot.lane.b32.xlu1 %v12027_v16, %s7712_s14  ;;  %v4497_v26 = vrot.slane %v12027_v16, 2 }
 0x6b9   : > { %4752 = vrot.lane.b32.xlu0 %v12021_v56, %s7709_s26  ;;  %7269 = vmatprep.mubr.msk.f32.mxu1 %vm3720_vm7, %v5498_v31 }
 0x6ba   : > { %v12047_v43 = vpop.permute.xlu1 %4928  ;;  %v4498_v12 = vsel %vm2554_vm14, %v4496_v52, %v4497_v26 }
 0x6bb   : > { %v12051_v63 = vpop.permute.xlu0 %4834 }
 0x6bc   : > { %4754 = vrot.lane.b32.xlu1 %v12027_v16, %s7709_s26 }
 0x6bd   : > { %5126 = vrot.lane.b32.xlu0 %v4423_v59, %s7713_s19 }
 0x6be   : > { %v12061_v54 = vpop.permute.xlu1 %4558 }
 0x6bf   : > { %v5203_v57 = vpop.permute.xlu0 %5202 }
 0x6c0   : > { %v5499_v10 = vsel %vm3646_vm6, %v5467_v28, %v5203_v57  ;;  %5128 = vrot.lane.b32.xlu1 %v4425_v3, %s7713_s19  ;;  %v7253_v4 = vpop.f32.mrf.mxu1  ;;  %v4499_v57 = vrot.slane %v4331_v29, 2  ;;  %v5278_v29 = vsel %vm3415_vm0, %v11532_v46, %v11929_v8 }
 0x6c1   : > { %4848 = vrot.lane.b32.xlu0 %v4423_v59, %s7710_s20  ;;  %7270 = vmatmul.mubr.msk.f32.gmra.mxu1 %vm3720_vm7, %v5499_v10  ;;  %v5702_v11 = vadd.f32 %v7253_v4, %v12068_v58 }
 0x6c2   : > { %v12078_v31 = vpop.permute.xlu1 %4930  ;;  %v5696_v15 = vpop.f32.mrf.mxu1  ;;  %v4500_v10 = vsel %vm2554_vm14, %v4497_v26, %v4499_v57 }
 0x6c3   : > { %v12081_v42 = vpop.permute.xlu0 %4646  ;;  %v6878_v6 = vmul.f32 -1.442695, %v5702_v11  ;;  %v5697_v17 = vadd.f32 %v12068_v58, %v5696_v15  ;;  %v4245_v11 = vrot.slane %v4169_v55, 7 }
 0x6c4   : > { %4572 = vrot.lane.b32.xlu1 %v4423_v59, %s7707_s22  ;;  %v4138_v59 = vmul.f32 0.1, %v4106_v51 }
 0x6c5   : > { %5216 = vrot.lane.b32.xlu0 %v4498_v12, %s7714_s21  ;;  %7494 = vpow2.f32 %v6878_v6  ;;  %v6877_v25 = vmul.f32 -1.442695, %v5697_v17  ;;  %v12115_v46 = vsel %vm2307_vm12, 0.0, %v4245_v11 }
 0x6c6   : > { %v12088_v38 = vpop.permute.xlu1 %4648  ;;  %v4170_v52 = vmax.f32 %v4106_v51, %v4138_v59 }
 0x6c7   : > { %v5025_v41 = vpop.permute.xlu0 %5024  ;;  %7496 = vpow2.f32 %v6877_v25 }
 0x6c8   : > { %4944 = vrot.lane.b32.xlu1 %v4498_v12, %s7711_s17  ;;  %v4246_v15 = vrot.slane %v4170_v52, 7 }
 0x6c9   : > { %4850 = vrot.lane.b32.xlu0 %v4425_v3, %s7710_s20 }
 0x6ca   : > { %v5027_v28 = vpop.permute.xlu1 %5026 }
 0x6cb   : > { %v12093_v21 = vpop.permute.xlu0 %4740 }
 0x6cc   : > { %4574 = vrot.lane.b32.xlu1 %v4425_v3, %s7707_s22  ;;  %v5308_v3 = vsel %vm3448_vm15, %v5278_v29, %v11988_v40 }
 0x6cd   : > { %5218 = vrot.lane.b32.xlu0 %v4500_v10, %s7714_s21  ;;  %v5340_v14 = vsel %vm3481_vm1, %v5308_v3, %v11999_v19  ;;  %v12122_v19 = vsel %vm2307_vm12, %v4245_v11, %v4246_v15  ;;  %v3705_v3 = vld [vmem:[#allocation2 + $0xd0] sm:$0xff] }
 0x6ce   : > { %v12098_v9 = vpop.permute.xlu1 %4742  ;;  %v5372_v17 = vsel %vm3514_vm2, %v5340_v14, %v12015_v18  ;;  %v4427_v55 = vrot.slane %v12122_v19, 1 }
 0x6cf   : > { %v5115_v4 = vpop.permute.xlu0 %5114  ;;  %v5404_v40 = vsel %vm3547_vm3, %v5372_v17, %v12047_v43  ;;  %v4426_v43 = vrot.slane %v12115_v46, 1 }
 0x6d0   : > { %4946 = vrot.lane.b32.xlu1 %v4500_v10, %s7711_s17  ;;  %v5436_v51 = vsel %vm3580_vm4, %v5404_v40, %v5025_v41  ;;  %v5279_v41 = vsel %vm3415_vm0, %v11538_v62, %v11976_v1 }
 0x6d1   : > { %4662 = vrot.lane.b32.xlu0 %v4498_v12, %s7708_s25  ;;  %v5468_v0 = vsel %vm3613_vm5, %v5436_v51, %v5115_v4  ;;  %v5309_v52 = vsel %vm3448_vm15, %v5279_v41, %v11994_v47  ;;  %v4428_v1 = vsel %vm2473_vm13, %v4426_v43, %v4427_v55  ;;  %v7623_v43 = vld [vmem:[%s12822_s4] ss:$0 sm:$0xff] }
 0x6d2   : > { %v5117_v23 = vpop.permute.xlu1 %5116  ;;  %v7495_v26 = vpop.eup %7494  ;;  %v5341_v11 = vsel %vm3481_vm1, %v5309_v52, %v12004_v44 }
 0x6d3   : > { %v12109_v6 = vpop.permute.xlu0 %4836  ;;  %v5952_v25 = vadd.f32 1.0, %v7495_v26  ;;  %v5373_v62 = vsel %vm3514_vm2, %v5341_v11, %v12051_v63 }
 0x6d4   : > { %4664 = vrot.lane.b32.xlu1 %v4500_v10, %s7708_s25  ;;  %v7497_v8 = vpop.eup %7496  ;;  %v12140_v10 = vsel %vm2307_vm12, %v4246_v15, 0.0  ;;  %v5405_v26 = vsel %vm3547_vm3, %v5373_v62, %v12078_v31  ;;  %v4501_v31 = vrot.slane %v12115_v46, 2 }
 0x6d5   : > { %5040 = vrot.lane.b32.xlu0 %v12115_v46, %s7712_s14  ;;  %v5951_v12 = vadd.f32 1.0, %v7497_v8  ;;  %7498 = vrcp.f32 %v5952_v25  ;;  %v4429_v47 = vrot.slane %v12140_v10, 1  ;;  %v5437_v44 = vsel %vm3580_vm4, %v5405_v26, %v5027_v28  ;;  %v3706_v25 = vld [vmem:[#allocation2 + $0xd8] sm:$0xff]  ;;  %v7624_v26 = vld [vmem:[%s7817_s13] sm:$0xff] }
 0x6d6   : > { %v12125_v18 = vpop.permute.xlu1 %4560  ;;  %v5469_v14 = vsel %vm3613_vm5, %v5437_v44, %v5117_v23  ;;  %v4068_v8 = vadd.f32 %v11835_v27, %v3705_v3  ;;  %v4069_v27 = vadd.f32 %v11812_v2, %v3706_v25 }
 0x6d7   : > { %v5205_v57 = vpop.permute.xlu0 %5204  ;;  %7500 = vrcp.f32 %v5951_v12  ;;  %v4430_v17 = vsel %vm2473_vm13, %v4427_v55, %v4429_v47  ;;  %v4502_v12 = vrot.slane %v12122_v19, 2 }
 0x6d8   : > { %v5500_v59 = vsel %vm3646_vm6, %v5468_v0, %v5205_v57  ;;  %5042 = vrot.lane.b32.xlu1 %v12122_v19, %s7712_s14  ;;  %v4107_v55 = vadd.f32 %v7623_v43, %v4068_v8  ;;  %v4108_v44 = vadd.f32 %v7623_v43, %v4069_v27 }
 0x6d9   : > { %4756 = vrot.lane.b32.xlu0 %v12115_v46, %s7709_s26  ;;  %7272 = vmatprep.mubr.msk.f32.mxu1 %vm3720_vm7, %v5500_v59  ;;  %v4503_v11 = vsel %vm2554_vm14, %v4501_v31, %v4502_v12 }
 0x6da   : > { %v12144_v4 = vpop.permute.xlu1 %4932  ;;  %v4139_v8 = vmul.f32 0.1, %v4107_v55  ;;  %v4140_v31 = vmul.f32 0.1, %v4108_v44 }
 0x6db   : > { %v12148_v29 = vpop.permute.xlu0 %4838 }
 0x6dc   : > { %4758 = vrot.lane.b32.xlu1 %v12122_v19, %s7709_s26 }
 0x6dd   : > { %5130 = vrot.lane.b32.xlu0 %v4428_v1, %s7713_s19 }
 0x6de   : > { %v12160_v15 = vpop.permute.xlu1 %4562 }
 0x6df   : > { %v5207_v63 = vpop.permute.xlu0 %5206 }
 0x6e0   : > { %v5501_v40 = vsel %vm3646_vm6, %v5469_v14, %v5207_v63  ;;  %5132 = vrot.lane.b32.xlu1 %v4430_v17, %s7713_s19  ;;  %v7256_v28 = vpop.f32.mrf.mxu1  ;;  %v7625_v63 = vld [vmem:[%s7817_s13 + $0x8] sm:$0xff] }
 0x6e1   : > { %4852 = vrot.lane.b32.xlu0 %v4428_v1, %s7710_s20  ;;  %7273 = vmatmul.mubr.msk.f32.gmra.mxu1 %vm3720_vm7, %v5501_v40  ;;  %v5712_v23 = vadd.f32 %v7256_v28, %v12068_v58  ;;  %v4504_v40 = vrot.slane %v12140_v10, 2  ;;  %v5280_v10 = vsel %vm3415_vm0, %v11620_v30, %v12030_v20 }
 0x6e2   : > { %v12172_v51 = vpop.permute.xlu1 %4934  ;;  %v5706_v57 = vpop.f32.mrf.mxu1 }
 0x6e3   : > { %v12175_v0 = vpop.permute.xlu0 %4650  ;;  %v7499_v59 = vpop.eup %7498  ;;  %v6880_v41 = vmul.f32 -1.442695, %v5712_v23  ;;  %v5707_v52 = vadd.f32 %v12068_v58, %v5706_v57  ;;  %v4171_v23 = vmax.f32 %v4107_v55, %v4139_v8  ;;  %v4505_v27 = vsel %vm2554_vm14, %v4502_v12, %v4504_v40 }
 0x6e4   : > { %4576 = vrot.lane.b32.xlu1 %v4428_v1, %s7707_s22  ;;  %v7501_v62 = vpop.eup %7500  ;;  %v6048_v25 = vmul.f32 %v7625_v63, %v7499_v59  ;;  %v4172_v59 = vmax.f32 %v4108_v44, %v4140_v31 }
 0x6e5   : > { %5220 = vrot.lane.b32.xlu0 %v4503_v11, %s7714_s21  ;;  %7502 = vpow2.f32 %v6880_v41  ;;  %v6879_v2 = vmul.f32 -1.442695, %v5707_v52  ;;  %v6047_v47 = vmul.f32 %v7624_v26, %v7501_v62  ;;  %v4248_v41 = vrot.slane %v4171_v23, 7 }
 0x6e6   : > { %v12184_v3 = vpop.permute.xlu1 %4652  ;;  %v4249_v52 = vrot.slane %v4172_v59, 7 }
 0x6e7   : > { %v5029_v14 = vpop.permute.xlu0 %5028  ;;  %7504 = vpow2.f32 %v6879_v2  ;;  %7301 = vmatprep.mubr.msk.f32.mxu0 %vm3415_vm0, %v6047_v47  ;;  %v12215_v30 = vsel %vm2307_vm12, 0.0, %v4248_v41 }
 0x6e8   : > { %4948 = vrot.lane.b32.xlu1 %v4503_v11, %s7711_s17  ;;  %7302 = vmatmul.mubr.msk.f32.vlgmr.msra.gmra.mxu0 %vm3415_vm0, %v6048_v25  ;;  %v4333_v31 = vsel %vm2307_vm12, %v4249_v52, 0.0 }
 0x6e9   : > { %4854 = vrot.lane.b32.xlu0 %v4430_v17, %s7710_s20 }
 0x6ea   : > { %v5031_v1 = vpop.permute.xlu1 %5030 }
 0x6eb   : > { %v12193_v28 = vpop.permute.xlu0 %4744 }
 0x6ec   : > { %4578 = vrot.lane.b32.xlu1 %v4430_v17, %s7707_s22  ;;  %v5310_v17 = vsel %vm3448_vm15, %v5280_v10, %v12081_v42 }
 0x6ed   : > { %5222 = vrot.lane.b32.xlu0 %v4505_v27, %s7714_s21  ;;  %v5342_v62 = vsel %vm3481_vm1, %v5310_v17, %v12093_v21  ;;  %v12222_v21 = vsel %vm2307_vm12, %v4248_v41, %v4249_v52 }
 0x6ee   : > { %v12198_v57 = vpop.permute.xlu1 %4746  ;;  %v5374_v26 = vsel %vm3514_vm2, %v5342_v62, %v12109_v6  ;;  %v4432_v40 = vrot.slane %v12222_v21, 1  ;;  %v4506_v62 = vrot.slane %v12215_v30, 2 }
 0x6ef   : > { %v5119_v43 = vpop.permute.xlu0 %5118  ;;  %v5406_v42 = vsel %vm3547_vm3, %v5374_v26, %v12144_v4  ;;  %v4431_v4 = vrot.slane %v12215_v30, 1 }
 0x6f0   : > { %4950 = vrot.lane.b32.xlu1 %v4505_v27, %s7711_s17  ;;  %v5438_v44 = vsel %vm3580_vm4, %v5406_v42, %v5029_v14  ;;  %v5281_v14 = vsel %vm3415_vm0, %v11626_v49, %v12061_v54 }
 0x6f1   : > { %4666 = vrot.lane.b32.xlu0 %v4503_v11, %s7708_s25  ;;  %v5470_v63 = vsel %vm3613_vm5, %v5438_v44, %v5119_v43  ;;  %v5311_v23 = vsel %vm3448_vm15, %v5281_v14, %v12088_v38  ;;  %v4433_v54 = vsel %vm2473_vm13, %v4431_v4, %v4432_v40  ;;  %v4434_v38 = vrot.slane %v4333_v31, 1 }
 0x6f2   : > { %v5121_v55 = vpop.permute.xlu1 %5120  ;;  %v7503_v12 = vpop.eup %7502  ;;  %v5343_v59 = vsel %vm3481_vm1, %v5311_v23, %v12098_v9 }
 0x6f3   : > { %v12209_v2 = vpop.permute.xlu0 %4840  ;;  %v5954_v47 = vadd.f32 1.0, %v7503_v12  ;;  %v5375_v49 = vsel %vm3514_vm2, %v5343_v59, %v12148_v29  ;;  %v4435_v29 = vsel %vm2473_vm13, %v4432_v40, %v4434_v38  ;;  %v7626_v40 = vld [vmem:[%s7817_s13 + $0x10] sm:$0xff]  ;;  %v7627_v59 = vld [vmem:[%s7817_s13 + $0x18] sm:$0xff] }
 0x6f4   : > { %4668 = vrot.lane.b32.xlu1 %v4505_v27, %s7708_s25  ;;  %v7505_v20 = vpop.eup %7504  ;;  %v5407_v41 = vsel %vm3547_vm3, %v5375_v49, %v12172_v51  ;;  %v4507_v51 = vrot.slane %v12222_v21, 2 }
 0x6f5   : > { %5044 = vrot.lane.b32.xlu0 %v12215_v30, %s7712_s14  ;;  %v5953_v11 = vadd.f32 1.0, %v7505_v20  ;;  %7506 = vrcp.f32 %v5954_v47  ;;  %v5439_v10 = vsel %vm3580_vm4, %v5407_v41, %v5031_v1  ;;  %v4509_v41 = vrot.slane %v4333_v31, 2 }
 0x6f6   : > { %v12225_v6 = vpop.permute.xlu1 %4564  ;;  %v5471_v9 = vsel %vm3613_vm5, %v5439_v10, %v5121_v55 }
 0x6f7   : > { %v5209_v25 = vpop.permute.xlu0 %5208  ;;  %7508 = vrcp.f32 %v5953_v11  ;;  %v4510_v10 = vsel %vm2554_vm14, %v4507_v51, %v4509_v41 }
 0x6f8   : > { %v5502_v8 = vsel %vm3646_vm6, %v5470_v63, %v5209_v25  ;;  %5046 = vrot.lane.b32.xlu1 %v12222_v21, %s7712_s14  ;;  %v4508_v63 = vsel %vm2554_vm14, %v4506_v62, %v4507_v51 }
 0x6f9   : > { %4760 = vrot.lane.b32.xlu0 %v12215_v30, %s7709_s26  ;;  %7275 = vmatprep.mubr.msk.f32.mxu1 %vm3720_vm7, %v5502_v8 }
 0x6fa   : > { %v12242_v27 = vpop.permute.xlu1 %4936 }
 0x6fb   : > { %v12246_v43 = vpop.permute.xlu0 %4842 }
 0x6fc   : > { %4762 = vrot.lane.b32.xlu1 %v12222_v21, %s7709_s26 }
 0x6fd   : > { %5134 = vrot.lane.b32.xlu0 %v4433_v54, %s7713_s19 }
 0x6fe   : > { %v12257_v17 = vpop.permute.xlu1 %4566 }
 0x6ff   : > { %v5211_v12 = vpop.permute.xlu0 %5210 }
 0x700   : > { %v5503_v52 = vsel %vm3646_vm6, %v5471_v9, %v5211_v12  ;;  %5136 = vrot.lane.b32.xlu1 %v4435_v29, %s7713_s19 }
 0x701   : > { %4856 = vrot.lane.b32.xlu0 %v4433_v54, %s7710_s20  ;;  %v7259_v26 = vpop.f32.mrf.mxu1  ;;  %7276 = vmatmul.mubr.msk.f32.gmra.mxu1 %vm3720_vm7, %v5503_v52  ;;  %v5282_v52 = vsel %vm3415_vm0, %v11702_v24, %v12125_v18  ;;  %v12307_v24 = vsel %vm2307_vm12, 0.0, %v11876_v60 }
 0x702   : > { %v5722_v1 = vadd.f32 %v7259_v26, %v12068_v58  ;;  %v12268_v55 = vpop.permute.xlu1 %4938  ;;  %v7507_v42 = vpop.eup %7506  ;;  %v5312_v31 = vsel %vm3448_vm15, %v5282_v52, %v12175_v0  ;;  %v4511_v52 = vrot.slane %v12307_v24, 2 }
 0x703   : > { %v12270_v47 = vpop.permute.xlu0 %4654  ;;  %v5716_v20 = vpop.f32.mrf.mxu1  ;;  %v6050_v49 = vmul.f32 %v7627_v59, %v7507_v42  ;;  %v5344_v51 = vsel %vm3481_vm1, %v5312_v31, %v12193_v28 }
 0x704   : > { %v6882_v11 = vmul.f32 -1.442695, %v5722_v1  ;;  %v5717_v44 = vadd.f32 %v12068_v58, %v5716_v20  ;;  %4580 = vrot.lane.b32.xlu1 %v4433_v54, %s7707_s22  ;;  %v7509_v25 = vpop.eup %7508  ;;  %v5376_v1 = vsel %vm3514_vm2, %v5344_v51, %v12209_v2 }
 0x705   : > { %5224 = vrot.lane.b32.xlu0 %v4508_v63, %s7714_s21  ;;  %v6049_v14 = vmul.f32 %v7626_v40, %v7509_v25  ;;  %v5408_v0 = vsel %vm3547_vm3, %v5376_v1, %v12242_v27  ;;  %v4436_v27 = vrot.slane %v12307_v24, 1  ;;  %v5283_v25 = vsel %vm3415_vm0, %v11708_v50, %v12160_v15 }
 0x706   : > { %7510 = vpow2.f32 %v6882_v11  ;;  %v6881_v8 = vmul.f32 -1.442695, %v5717_v44  ;;  %v12276_v4 = vpop.permute.xlu1 %4656  ;;  %v5313_v40 = vsel %vm3448_vm15, %v5283_v25, %v12184_v3 }
 0x707   : > { %v5033_v23 = vpop.permute.xlu0 %5032  ;;  %7304 = vmatprep.mubr.msk.f32.mxu0 %vm3415_vm0, %v6049_v14 }
 0x708   : > { %7512 = vpow2.f32 %v6881_v8  ;;  %4952 = vrot.lane.b32.xlu1 %v4508_v63, %s7711_s17  ;;  %7305 = vmatmul.mubr.msk.f32.gmra.mxu0 %vm3415_vm0, %v6050_v49  ;;  %v5440_v42 = vsel %vm3580_vm4, %v5408_v0, %v5033_v23  ;;  %v4334_v8 = vsel %vm2307_vm12, %v11874_v48, 0.0  ;;  %v5345_v23 = vsel %vm3481_vm1, %v5313_v40, %v12198_v57 }
 0x709   : > { %4858 = vrot.lane.b32.xlu0 %v4435_v29, %s7710_s20  ;;  %v5377_v50 = vsel %vm3514_vm2, %v5345_v23, %v12246_v43  ;;  %v4439_v3 = vrot.slane %v4334_v8, 1  ;;  %v4514_v23 = vrot.slane %v4334_v8, 2 }
 0x70a   : > { %v5035_v54 = vpop.permute.xlu1 %5034  ;;  %v5409_v48 = vsel %vm3547_vm3, %v5377_v50, %v12268_v55  ;;  %v4512_v55 = vrot.slane %v11886_v22, 2 }
 0x70b   : > { %v12284_v38 = vpop.permute.xlu0 %4748  ;;  %v5441_v49 = vsel %vm3580_vm4, %v5409_v48, %v5035_v54 }
 0x70c   : > { %4582 = vrot.lane.b32.xlu1 %v4435_v29, %s7707_s22  ;;  %v4513_v0 = vsel %vm2554_vm14, %v4511_v52, %v4512_v55 }
 0x70d   : > { %5226 = vrot.lane.b32.xlu0 %v4510_v10, %s7714_s21 }
 0x70e   : > { %v12289_v9 = vpop.permute.xlu1 %4750 }
 0x70f   : > { %v5123_v12 = vpop.permute.xlu0 %5122 }
 0x710   : > { %4954 = vrot.lane.b32.xlu1 %v4510_v10, %s7711_s17  ;;  %v5472_v2 = vsel %vm3613_vm5, %v5440_v42, %v5123_v12 }
 0x711   : > { %4670 = vrot.lane.b32.xlu0 %v4508_v63, %s7708_s25  ;;  %v4437_v63 = vrot.slane %v11886_v22, 1 }
 0x712   : > { %v5125_v62 = vpop.permute.xlu1 %5124 }
 0x713   : > { %v7511_v29 = vpop.eup %7510  ;;  %v12300_v26 = vpop.permute.xlu0 %4844  ;;  %v4438_v15 = vsel %vm2473_vm13, %v4436_v27, %v4437_v63  ;;  %v5473_v57 = vsel %vm3613_vm5, %v5441_v49, %v5125_v62  ;;  %v4440_v43 = vsel %vm2473_vm13, %v4437_v63, %v4439_v3  ;;  %v7629_v63 = vld [vmem:[%s7817_s13 + $0x28] sm:$0xff]  ;;  %v5284_v49 = vsel %vm3415_vm0, %v11798_v35, %v12225_v6 }
 0x714   : > { %v5956_v20 = vadd.f32 1.0, %v7511_v29  ;;  %4672 = vrot.lane.b32.xlu1 %v4510_v10, %s7708_s25  ;;  %v5314_v8 = vsel %vm3448_vm15, %v5284_v49, %v12270_v47 }
 0x715   : > { %v7513_v18 = vpop.eup %7512  ;;  %5048 = vrot.lane.b32.xlu0 %v12307_v24, %s7712_s14 }
 0x716   : > { %v5955_v28 = vadd.f32 1.0, %v7513_v18  ;;  %v12314_v11 = vpop.permute.xlu1 %4568  ;;  %7514 = vrcp.f32 %v5956_v20 }
 0x717   : > { %v5213_v44 = vpop.permute.xlu0 %5212 }
 0x718   : > { %7516 = vrcp.f32 %v5955_v28  ;;  %v5504_v60 = vsel %vm3646_vm6, %v5472_v2, %v5213_v44  ;;  %5050 = vrot.lane.b32.xlu1 %v11886_v22, %s7712_s14  ;;  %v7628_v44 = vld [vmem:[%s7817_s13 + $0x20] sm:$0xff] }
 0x719   : > { %4764 = vrot.lane.b32.xlu0 %v12307_v24, %s7709_s26  ;;  %7278 = vmatprep.mubr.msk.f32.mxu1 %vm3720_vm7, %v5504_v60 }
 0x71a   : > { %v12332_v14 = vpop.permute.xlu1 %4940 }
 0x71b   : > { %v12336_v59 = vpop.permute.xlu0 %4846 }
 0x71c   : > { %4766 = vrot.lane.b32.xlu1 %v11886_v22, %s7709_s26 }
 0x71d   : > { %5138 = vrot.lane.b32.xlu0 %v4438_v15, %s7713_s19 }
 0x71e   : > { %v12347_v41 = vpop.permute.xlu1 %4570 }
 0x71f   : > { %v5215_v10 = vpop.permute.xlu0 %5214 }
 0x720   : > { %v5505_v12 = vsel %vm3646_vm6, %v5473_v57, %v5215_v10  ;;  %5140 = vrot.lane.b32.xlu1 %v4440_v43, %s7713_s19 }
 0x721   : > { %4860 = vrot.lane.b32.xlu0 %v4438_v15, %s7710_s20  ;;  %v7262_v31 = vpop.f32.mrf.mxu1  ;;  %7279 = vmatmul.mubr.msk.f32.gmra.mxu1 %vm3720_vm7, %v5505_v12 }
 0x722   : > { %v5732_v54 = vadd.f32 %v7262_v31, %v12068_v58  ;;  %v12358_v62 = vpop.permute.xlu1 %4942 }
 0x723   : > { %v12360_v29 = vpop.permute.xlu0 %4658  ;;  %v5726_v51 = vpop.f32.mrf.mxu1 }
 0x724   : > { %v7515_v1 = vpop.eup %7514  ;;  %v6884_v20 = vmul.f32 -1.442695, %v5732_v54  ;;  %v5727_v18 = vadd.f32 %v12068_v58, %v5726_v51  ;;  %4584 = vrot.lane.b32.xlu1 %v4438_v15, %s7707_s22  ;;  %v4515_v15 = vsel %vm2554_vm14, %v4512_v55, %v4514_v23 }
 0x725   : > { %v7517_v28 = vpop.eup %7516  ;;  %5228 = vrot.lane.b32.xlu0 %v4513_v0, %s7714_s21  ;;  %v6052_v25 = vmul.f32 %v7629_v63, %v7515_v1 }
 0x726   : > { %7518 = vpow2.f32 %v6884_v20  ;;  %v6883_v42 = vmul.f32 -1.442695, %v5727_v18  ;;  %v12366_v2 = vpop.permute.xlu1 %4660  ;;  %v6051_v60 = vmul.f32 %v7628_v44, %v7517_v28 }
 0x727   : > { %v5037_v27 = vpop.permute.xlu0 %5036 }
 0x728   : > { %7520 = vpow2.f32 %v6883_v42  ;;  %7307 = vmatprep.mubr.msk.f32.mxu0 %vm3415_vm0, %v6051_v60  ;;  %4956 = vrot.lane.b32.xlu1 %v4513_v0, %s7711_s17 }
 0x729   : > { %4862 = vrot.lane.b32.xlu0 %v4440_v43, %s7710_s20  ;;  %7308 = vmatmul.mubr.msk.f32.gmra.mxu0 %vm3415_vm0, %v6052_v25 }
 0x72a   : > { %v5039_v40 = vpop.permute.xlu1 %5038 }
 0x72b   : > { %v12374_v50 = vpop.permute.xlu0 %4752 }
 0x72c   : > { %4586 = vrot.lane.b32.xlu1 %v4440_v43, %s7707_s22  ;;  %v5346_v43 = vsel %vm3481_vm1, %v5314_v8, %v12284_v38  ;;  %v7631_v8 = vld [vmem:[%s7817_s13 + $0x38] sm:$0xff] }
 0x72d   : > { %5230 = vrot.lane.b32.xlu0 %v4515_v15, %s7714_s21  ;;  %v5378_v52 = vsel %vm3514_vm2, %v5346_v43, %v12300_v26 }
 0x72e   : > { %v12379_v48 = vpop.permute.xlu1 %4754  ;;  %v5410_v35 = vsel %vm3547_vm3, %v5378_v52, %v12332_v14  ;;  %v5285_v14 = vsel %vm3415_vm0, %v11807_v33, %v12257_v17 }
 0x72f   : > { %v5127_v3 = vpop.permute.xlu0 %5126  ;;  %v5442_v47 = vsel %vm3580_vm4, %v5410_v35, %v5037_v27  ;;  %v5315_v1 = vsel %vm3448_vm15, %v5285_v14, %v12276_v4 }
 0x730   : > { %4958 = vrot.lane.b32.xlu1 %v4515_v15, %s7711_s17  ;;  %v5474_v38 = vsel %vm3613_vm5, %v5442_v47, %v5127_v3  ;;  %v5347_v18 = vsel %vm3481_vm1, %v5315_v1, %v12289_v9 }
 0x731   : > { %4674 = vrot.lane.b32.xlu0 %v4513_v0, %s7708_s25  ;;  %v5379_v28 = vsel %vm3514_vm2, %v5347_v18, %v12336_v59 }
 0x732   : > { %v5129_v57 = vpop.permute.xlu1 %5128  ;;  %v5411_v33 = vsel %vm3547_vm3, %v5379_v28, %v12358_v62 }
 0x733   : > { %v7519_v10 = vpop.eup %7518  ;;  %v12390_v12 = vpop.permute.xlu0 %4848 }
 0x734   : > { %v5958_v55 = vadd.f32 1.0, %v7519_v10  ;;  %4676 = vrot.lane.b32.xlu1 %v4515_v15, %s7708_s25  ;;  %v7630_v15 = vld [vmem:[%s7817_s13 + $0x30] sm:$0xff] }
 0x735   : > { %v7521_v31 = vpop.eup %7520  ;;  %5052 = vrot.lane.b32.xlu0 %v11924_v5, %s7712_s14 }
 0x736   : > { %v5957_v6 = vadd.f32 1.0, %v7521_v31  ;;  %v12400_v54 = vpop.permute.xlu1 %4572  ;;  %7522 = vrcp.f32 %v5958_v55  ;;  %v5286_v55 = vsel %vm3415_vm0, %v11915_v36, %v12314_v11 }
 0x737   : > { %v5217_v51 = vpop.permute.xlu0 %5216  ;;  %v5316_v31 = vsel %vm3448_vm15, %v5286_v55, %v12360_v29 }
 0x738   : > { %7524 = vrcp.f32 %v5957_v6  ;;  %v5506_v26 = vsel %vm3646_vm6, %v5474_v38, %v5217_v51  ;;  %5054 = vrot.lane.b32.xlu1 %v11927_v34, %s7712_s14 }
 0x739   : > { %7281 = vmatprep.mubr.msk.f32.mxu1 %vm3720_vm7, %v5506_v26  ;;  %4768 = vrot.lane.b32.xlu0 %v11924_v5, %s7709_s26  ;;  %v5443_v5 = vsel %vm3580_vm4, %v5411_v33, %v5039_v40 }
 0x73a   : > { %v4945_v20 = vpop.permute.xlu1 %4944  ;;  %v5475_v4 = vsel %vm3613_vm5, %v5443_v5, %v5129_v57 }
 0x73b   : > { %v12416_v0 = vpop.permute.xlu0 %4850 }
 0x73c   : > { %4770 = vrot.lane.b32.xlu1 %v11927_v34, %s7709_s26 }
 0x73d   : > { %5142 = vrot.lane.b32.xlu0 %v11942_v37, %s7713_s19 }
 0x73e   : > { %v12427_v17 = vpop.permute.xlu1 %4574 }
 0x73f   : > { %v5219_v9 = vpop.permute.xlu0 %5218 }
 0x740   : > { %v5507_v42 = vsel %vm3646_vm6, %v5475_v4, %v5219_v9  ;;  %5144 = vrot.lane.b32.xlu1 %v11945_v61, %s7713_s19 }
 0x741   : > { %v7265_v59 = vpop.f32.mrf.mxu1  ;;  %7282 = vmatmul.mubr.msk.f32.gmra.mxu1 %vm3720_vm7, %v5507_v42  ;;  %4864 = vrot.lane.b32.xlu0 %v11942_v37, %s7710_s20 }
 0x742   : > { %v5742_v34 = vadd.f32 %v7265_v59, %v12068_v58  ;;  %v4947_v62 = vpop.permute.xlu1 %4946 }
 0x743   : > { %v12437_v44 = vpop.permute.xlu0 %4662  ;;  %v5736_v60 = vpop.f32.mrf.mxu1 }
 0x744   : > { %v7523_v27 = vpop.eup %7522  ;;  %v6886_v63 = vmul.f32 -1.442695, %v5742_v34  ;;  %v5737_v25 = vadd.f32 %v12068_v58, %v5736_v60  ;;  %4866 = vrot.lane.b32.xlu1 %v11945_v61, %s7710_s20 }
 0x745   : > { %v7525_v40 = vpop.eup %7524  ;;  %5232 = vrot.lane.b32.xlu0 %v11948_v7, %s7714_s21  ;;  %v6054_v57 = vmul.f32 %v7631_v8, %v7523_v27  ;;  %v7633_v8 = vld [vmem:[%s7817_s13 + $0x48] sm:$0xff] }
 0x746   : > { %7526 = vpow2.f32 %v6886_v63  ;;  %v6885_v37 = vmul.f32 -1.442695, %v5737_v25  ;;  %v12444_v23 = vpop.permute.xlu1 %4664  ;;  %v6053_v3 = vmul.f32 %v7630_v15, %v7525_v40  ;;  %v7632_v15 = vld [vmem:[%s7817_s13 + $0x40] sm:$0xff] }
 0x747   : > { %v5041_v49 = vpop.permute.xlu0 %5040 }
 0x748   : > { %7528 = vpow2.f32 %v6885_v37  ;;  %7310 = vmatprep.mubr.msk.f32.mxu0 %vm3415_vm0, %v6053_v3  ;;  %5234 = vrot.lane.b32.xlu1 %v11957_v39, %s7714_s21 }
 0x749   : > { %7311 = vmatmul.mubr.msk.f32.gmra.mxu0 %vm3415_vm0, %v6054_v57  ;;  %4960 = vrot.lane.b32.xlu0 %v11948_v7, %s7711_s17  ;;  %v5348_v7 = vsel %vm3481_vm1, %v5316_v31, %v12374_v50 }
 0x74a   : > { %v5043_v61 = vpop.permute.xlu1 %5042  ;;  %v5380_v38 = vsel %vm3514_vm2, %v5348_v7, %v12390_v12  ;;  %v5287_v12 = vsel %vm3415_vm0, %v11918_v13, %v12347_v41 }
 0x74b   : > { %v12454_v10 = vpop.permute.xlu0 %4756  ;;  %v5412_v26 = vsel %vm3547_vm3, %v5380_v38, %v4945_v20  ;;  %v5317_v20 = vsel %vm3448_vm15, %v5287_v12, %v12366_v2 }
 0x74c   : > { %v5444_v1 = vsel %vm3580_vm4, %v5412_v26, %v5041_v49  ;;  %v5349_v28 = vsel %vm3481_vm1, %v5317_v20, %v12379_v48 }
 0x74d   : > { %4962 = vrot.lane.b32.xlu0 %v11957_v39, %s7711_s17  ;;  %v5381_v5 = vsel %vm3514_vm2, %v5349_v28, %v12416_v0 }
 0x74e   : > { %v12458_v43 = vpop.permute.xlu1 %4758  ;;  %v5413_v4 = vsel %vm3547_vm3, %v5381_v5, %v4947_v62 }
 0x74f   : > { %v5131_v52 = vpop.permute.xlu0 %5130  ;;  %v5445_v9 = vsel %vm3580_vm4, %v5413_v4, %v5043_v61 }
 0x750   : > { %v5476_v11 = vsel %vm3613_vm5, %v5444_v1, %v5131_v52 }
 0x752   : > { %v5133_v35 = vpop.permute.xlu1 %5132 }
 0x753   : > { %v7527_v6 = vpop.eup %7526  ;;  %v4853_v47 = vpop.permute.xlu0 %4852  ;;  %v5477_v13 = vsel %vm3613_vm5, %v5445_v9, %v5133_v35  ;;  %v5288_v35 = vsel %vm3415_vm0, %v12021_v56, %v12400_v54 }
 0x754   : > { %v5960_v39 = vadd.f32 1.0, %v7527_v6  ;;  %v5318_v6 = vsel %vm3448_vm15, %v5288_v35, %v12437_v44 }
 0x755   : > { %v7529_v51 = vpop.eup %7528 }
 0x756   : > { %v5959_v14 = vadd.f32 1.0, %v7529_v51  ;;  %v12471_v36 = vpop.permute.xlu1 %4576  ;;  %7530 = vrcp.f32 %v5960_v39  ;;  %v5350_v39 = vsel %vm3481_vm1, %v5318_v6, %v12454_v10  ;;  %v5289_v10 = vsel %vm3415_vm0, %v12027_v16, %v12427_v17 }
 0x757   : > { %v5221_v29 = vpop.permute.xlu0 %5220  ;;  %v5382_v26 = vsel %vm3514_vm2, %v5350_v39, %v4853_v47  ;;  %v5319_v47 = vsel %vm3448_vm15, %v5289_v10, %v12444_v23 }
 0x758   : > { %7532 = vrcp.f32 %v5959_v14  ;;  %v5508_v50 = vsel %vm3646_vm6, %v5476_v11, %v5221_v29 }
 0x759   : > { %7284 = vmatprep.mubr.msk.f32.mxu1 %vm3720_vm7, %v5508_v50 }
 0x75a   : > { %v4949_v18 = vpop.permute.xlu1 %4948 }
 0x75b   : > { %v4855_v33 = vpop.permute.xlu0 %4854  ;;  %v5414_v11 = vsel %vm3547_vm3, %v5382_v26, %v4949_v18  ;;  %v5351_v18 = vsel %vm3481_vm1, %v5319_v47, %v12458_v43 }
 0x75c   : > { %v5383_v5 = vsel %vm3514_vm2, %v5351_v18, %v4855_v33 }
 0x75e   : > { %v12487_v42 = vpop.permute.xlu1 %4578 }
 0x75f   : > { %v5223_v41 = vpop.permute.xlu0 %5222 }
 0x760   : > { %v5509_v2 = vsel %vm3646_vm6, %v5477_v13, %v5223_v41 }
 0x761   : > { %v7268_v59 = vpop.f32.mrf.mxu1  ;;  %7285 = vmatmul.mubr.msk.f32.gmra.mxu1 %vm3720_vm7, %v5509_v2 }
 0x762   : > { %v5752_v48 = vadd.f32 %v7268_v59, %v12068_v58  ;;  %v4951_v34 = vpop.permute.xlu1 %4950 }
 0x763   : > { %v12493_v0 = vpop.permute.xlu0 %4666  ;;  %v5746_v62 = vpop.f32.mrf.mxu1  ;;  %v5415_v4 = vsel %vm3547_vm3, %v5383_v5, %v4951_v34 }
 0x764   : > { %v7531_v60 = vpop.eup %7530  ;;  %v6888_v27 = vmul.f32 -1.442695, %v5752_v48  ;;  %v5747_v63 = vadd.f32 %v12068_v58, %v5746_v62 }
 0x765   : > { %v7533_v25 = vpop.eup %7532  ;;  %v6056_v57 = vmul.f32 %v7633_v8, %v7531_v60 }
 0x766   : > { %7534 = vpow2.f32 %v6888_v27  ;;  %v6887_v40 = vmul.f32 -1.442695, %v5747_v63  ;;  %v12496_v37 = vpop.permute.xlu1 %4668  ;;  %v6055_v3 = vmul.f32 %v7632_v15, %v7533_v25  ;;  %v7634_v25 = vld [vmem:[%s7817_s13 + $0x50] sm:$0xff] }
 0x767   : > { %v5045_v49 = vpop.permute.xlu0 %5044 }
 0x768   : > { %7536 = vpow2.f32 %v6887_v40  ;;  %7313 = vmatprep.mubr.msk.f32.mxu0 %vm3415_vm0, %v6055_v3  ;;  %v5446_v50 = vsel %vm3580_vm4, %v5414_v11, %v5045_v49  ;;  %v7635_v3 = vld [vmem:[%s7817_s13 + $0x58] sm:$0xff] }
 0x769   : > { %7314 = vmatmul.mubr.msk.f32.gmra.mxu0 %vm3415_vm0, %v6056_v57 }
 0x76a   : > { %v5047_v61 = vpop.permute.xlu1 %5046 }
 0x76b   : > { %v12502_v52 = vpop.permute.xlu0 %4760  ;;  %v5447_v9 = vsel %vm3580_vm4, %v5415_v4, %v5047_v61 }
 0x76e   : > { %v12504_v55 = vpop.permute.xlu1 %4762 }
 0x76f   : > { %v5135_v31 = vpop.permute.xlu0 %5134 }
 0x770   : > { %v5478_v56 = vsel %vm3613_vm5, %v5446_v50, %v5135_v31  ;;  %v5290_v31 = vsel %vm3415_vm0, %v12115_v46, %v12471_v36 }
 0x771   : > { %v5320_v35 = vsel %vm3448_vm15, %v5290_v31, %v12493_v0 }
 0x772   : > { %v5137_v7 = vpop.permute.xlu1 %5136 }
 0x773   : > { %v7535_v38 = vpop.eup %7534  ;;  %v4857_v51 = vpop.permute.xlu0 %4856  ;;  %v5479_v16 = vsel %vm3613_vm5, %v5447_v9, %v5137_v7 }
 0x774   : > { %v5962_v14 = vadd.f32 1.0, %v7535_v38  ;;  %v5352_v38 = vsel %vm3481_vm1, %v5320_v35, %v12502_v52 }
 0x775   : > { %v7537_v1 = vpop.eup %7536  ;;  %v5384_v26 = vsel %vm3514_vm2, %v5352_v38, %v4857_v51  ;;  %v5291_v51 = vsel %vm3415_vm0, %v12122_v19, %v12487_v42 }
 0x776   : > { %v5961_v29 = vadd.f32 1.0, %v7537_v1  ;;  %v12516_v12 = vpop.permute.xlu1 %4580  ;;  %7538 = vrcp.f32 %v5962_v14 }
 0x777   : > { %v5225_v54 = vpop.permute.xlu0 %5224  ;;  %v5292_v38 = vsel %vm3415_vm0, %v12215_v30, %v12516_v12 }
 0x778   : > { %7540 = vrcp.f32 %v5961_v29  ;;  %v5510_v44 = vsel %vm3646_vm6, %v5478_v56, %v5225_v54  ;;  %v5321_v56 = vsel %vm3448_vm15, %v5291_v51, %v12496_v37 }
 0x779   : > { %7287 = vmatprep.mubr.msk.f32.mxu1 %vm3720_vm7, %v5510_v44  ;;  %v5353_v44 = vsel %vm3481_vm1, %v5321_v56, %v12504_v55  ;;  %v12585_v55 = vld [vmem:[%s12824_s6] ss:$0 sm:$0xff] }
 0x77a   : > { %v4953_v20 = vpop.permute.xlu1 %4952 }
 0x77b   : > { %v4859_v28 = vpop.permute.xlu0 %4858  ;;  %v5416_v11 = vsel %vm3547_vm3, %v5384_v26, %v4953_v20 }
 0x77c   : > { %v5385_v47 = vsel %vm3514_vm2, %v5353_v44, %v4859_v28 }
 0x77e   : > { %v12531_v13 = vpop.permute.xlu1 %4582 }
 0x77f   : > { %v5227_v17 = vpop.permute.xlu0 %5226 }
 0x780   : > { %v5511_v41 = vsel %vm3646_vm6, %v5479_v16, %v5227_v17 }
 0x781   : > { %v7271_v23 = vpop.f32.mrf.mxu1  ;;  %7288 = vmatmul.mubr.msk.f32.gmra.mxu1 %vm3720_vm7, %v5511_v41 }
 0x782   : > { %v5762_v43 = vadd.f32 %v7271_v23, %v12068_v58  ;;  %v4955_v2 = vpop.permute.xlu1 %4954 }
 0x783   : > { %v12537_v33 = vpop.permute.xlu0 %4670  ;;  %v5756_v59 = vpop.f32.mrf.mxu1  ;;  %v5417_v20 = vsel %vm3547_vm3, %v5385_v47, %v4955_v2 }
 0x784   : > { %v7539_v48 = vpop.eup %7538  ;;  %v6890_v34 = vmul.f32 -1.442695, %v5762_v43  ;;  %v5757_v62 = vadd.f32 %v12068_v58, %v5756_v59  ;;  %v5322_v26 = vsel %vm3448_vm15, %v5292_v38, %v12537_v33  ;;  %v6081_v38 = vld [vmem:[#allocation3 + $0x10] sm:$0xff] }
 0x785   : > { %v7541_v60 = vpop.eup %7540  ;;  %v6058_v49 = vmul.f32 %v7635_v3, %v7539_v48  ;;  %v6079_v3 = vld [vmem:[#allocation3] sm:$0xff] }
 0x786   : > { %7542 = vpow2.f32 %v6890_v34  ;;  %v6889_v27 = vmul.f32 -1.442695, %v5757_v62  ;;  %v12540_v63 = vpop.permute.xlu1 %4672  ;;  %v6057_v40 = vmul.f32 %v7634_v25, %v7541_v60  ;;  %v7637_v34 = vld [vmem:[%s7817_s13 + $0x60] sm:$0xff]  ;;  %v7638_v25 = vld [vmem:[%s7817_s13 + $0x68] sm:$0xff] }
 0x787   : > { %v5049_v15 = vpop.permute.xlu0 %5048 }
 0x788   : > { %7544 = vpow2.f32 %v6889_v27  ;;  %7316 = vmatprep.mubr.msk.f32.mxu0 %vm3415_vm0, %v6057_v40  ;;  %v5448_v50 = vsel %vm3580_vm4, %v5416_v11, %v5049_v15  ;;  %v6080_v27 = vld [vmem:[#allocation3 + $0x8] sm:$0xff] }
 0x789   : > { %7317 = vmatmul.mubr.msk.f32.gmra.mxu0 %vm3415_vm0, %v6058_v49 }
 0x78a   : > { %v5051_v8 = vpop.permute.xlu1 %5050 }
 0x78b   : > { %v12546_v57 = vpop.permute.xlu0 %4764  ;;  %v5449_v18 = vsel %vm3580_vm4, %v5417_v20, %v5051_v8 }
 0x78c   : > { %v5354_v11 = vsel %vm3481_vm1, %v5322_v26, %v12546_v57 }
 0x78e   : > { %v12548_v61 = vpop.permute.xlu1 %4766 }
 0x78f   : > { %v5139_v58 = vpop.permute.xlu0 %5138 }
 0x790   : > { %v5480_v36 = vsel %vm3613_vm5, %v5448_v50, %v5139_v58  ;;  %v5293_v50 = vsel %vm3415_vm0, %v12222_v21, %v12531_v13 }
 0x791   : > { %v5323_v30 = vsel %vm3448_vm15, %v5293_v50, %v12540_v63 }
 0x792   : > { %v5141_v6 = vpop.permute.xlu1 %5140  ;;  %v5355_v33 = vsel %vm3481_vm1, %v5323_v30, %v12548_v61 }
 0x793   : > { %v7543_v7 = vpop.eup %7542  ;;  %v12557_v39 = vpop.permute.xlu0 %4860  ;;  %v5481_v19 = vsel %vm3613_vm5, %v5449_v18, %v5141_v6 }
 0x794   : > { %v5964_v14 = vadd.f32 1.0, %v7543_v7 }
 0x795   : > { %v7545_v1 = vpop.eup %7544 }
 0x796   : > { %v5963_v29 = vadd.f32 1.0, %v7545_v1  ;;  %v12562_v46 = vpop.permute.xlu1 %4584  ;;  %7546 = vrcp.f32 %v5964_v14 }
 0x797   : > { %v5229_v0 = vpop.permute.xlu0 %5228 }
 0x798   : > { %7548 = vrcp.f32 %v5963_v29  ;;  %v5512_v52 = vsel %vm3646_vm6, %v5480_v36, %v5229_v0  ;;  %v5386_v36 = vsel %vm3514_vm2, %v5354_v11, %v12557_v39  ;;  %v5294_v39 = vsel %vm3415_vm0, %v12307_v24, %v12562_v46 }
 0x799   : > { %7290 = vmatprep.mubr.msk.f32.mxu1 %vm3720_vm7, %v5512_v52 }
 0x79a   : > { %v4957_v54 = vpop.permute.xlu1 %4956 }
 0x79b   : > { %v4863_v10 = vpop.permute.xlu0 %4862  ;;  %v5418_v12 = vsel %vm3547_vm3, %v5386_v36, %v4957_v54 }
 0x79c   : > { %v5387_v44 = vsel %vm3514_vm2, %v5355_v33, %v4863_v10 }
 0x79e   : > { %v12577_v5 = vpop.permute.xlu1 %4586 }
 0x79f   : > { %v5231_v42 = vpop.permute.xlu0 %5230 }
 0x7a0   : > { %v5513_v4 = vsel %vm3646_vm6, %v5481_v19, %v5231_v42  ;;  %v5295_v42 = vsel %vm3415_vm0, %v11886_v22, %v12577_v5  ;;  %v13570_v22 = vunpack.i.l.bf16 %v11365_v53 }
 0x7a1   : > { %v7274_v37 = vpop.f32.mrf.mxu1  ;;  %7291 = vmatmul.mubr.msk.f32.gmra.mxu1 %vm3720_vm7, %v5513_v4 }
 0x7a2   : > { %v5772_v28 = vadd.f32 %v12585_v55, %v7274_v37  ;;  %v4959_v9 = vpop.permute.xlu1 %4958 }
 0x7a3   : > { %v4675_v16 = vpop.permute.xlu0 %4674  ;;  %v5766_v17 = vpop.f32.mrf.mxu1  ;;  %v5419_v63 = vsel %vm3547_vm3, %v5387_v44, %v4959_v9  ;;  %v7641_v44 = vld [vmem:[%s7817_s13 + $0x80] sm:$0xff] }
 0x7a4   : > { %v7547_v41 = vpop.eup %7546  ;;  %v6892_v23 = vmul.f32 -1.442695, %v5772_v28  ;;  %v5767_v43 = vadd.f32 %v12585_v55, %v5766_v17  ;;  %v5324_v61 = vsel %vm3448_vm15, %v5294_v39, %v4675_v16  ;;  %v13568_v28 = vunpack.i.l.bf16 %v11345_v32  ;;  %v7642_v39 = vld [vmem:[%s7817_s13 + $0x88] sm:$0xff] }
 0x7a5   : > { %v7549_v2 = vpop.eup %7548  ;;  %v6060_v40 = vmul.f32 %v7638_v25, %v7547_v41  ;;  %v13569_v17 = vunpack.i.l.bf16 %v11341_v45 }
 0x7a6   : > { %7550 = vpow2.f32 %v6892_v23  ;;  %v6891_v59 = vmul.f32 -1.442695, %v5767_v43  ;;  %v4677_v48 = vpop.permute.xlu1 %4676  ;;  %v6059_v62 = vmul.f32 %v7637_v34, %v7549_v2 }
 0x7a7   : > { %v5053_v60 = vpop.permute.xlu0 %5052  ;;  %v5325_v37 = vsel %vm3448_vm15, %v5295_v42, %v4677_v48 }
 0x7a8   : > { %7552 = vpow2.f32 %v6891_v59  ;;  %7319 = vmatprep.mubr.msk.f32.mxu0 %vm3415_vm0, %v6059_v62  ;;  %v7303_v15 = vpop.f32.mrf.mxu0  ;;  %v5450_v57 = vsel %vm3580_vm4, %v5418_v12, %v5053_v60  ;;  %v13571_v59 = vunpack.i.h.bf16 %v11345_v32  ;;  %v13572_v60 = vunpack.i.h.bf16 %v11341_v45  ;;  %v7640_v45 = vld [vmem:[%s7817_s13 + $0x78] sm:$0xff] }
 0x7a9   : > { %7320 = vmatmul.mubr.msk.f32.gmra.mxu0 %vm3415_vm0, %v6060_v40  ;;  %v6434_v49 = vadd.f32 %v7303_v15, %v6080_v27  ;;  %v13573_v40 = vunpack.i.h.bf16 %v11365_v53 }
 0x7aa   : > { %v5055_v8 = vpop.permute.xlu1 %5054  ;;  %v6274_v58 = vpop.f32.mrf.mxu0 }
 0x7ab   : > { %v4769_v31 = vpop.permute.xlu0 %4768  ;;  %6466 = vst.msk [vmem:[#allocation3 + $0x8] sm:$0xff] %vm3415_vm0, %v6434_v49  ;;  %v6433_v35 = vadd.f32 %v6274_v58, %v6079_v3  ;;  %v5451_v47 = vsel %vm3580_vm4, %v5419_v63, %v5055_v8 }
 0x7ac   : > { %v5356_v10 = vsel %vm3481_vm1, %v5324_v61, %v4769_v31  ;;  %v7639_v31 = vld [vmem:[%s7817_s13 + $0x70] sm:$0xff]  ;;  %v6083_v61 = vld [vmem:[#allocation3 + $0x20] sm:$0xff] }
 0x7ad   : > { %6465 = vst.msk [vmem:[#allocation3] sm:$0xff] %vm3415_vm0, %v6433_v35 }
 0x7ae   : > { %v4771_v6 = vpop.permute.xlu1 %4770 }
 0x7af   : > { %v5143_v7 = vpop.permute.xlu0 %5142  ;;  %v5357_v16 = vsel %vm3481_vm1, %v5325_v37, %v4771_v6  ;;  %v6082_v6 = vld [vmem:[#allocation3 + $0x18] sm:$0xff] }
 0x7b0   : > { %v5482_v21 = vsel %vm3613_vm5, %v5450_v57, %v5143_v7 }
 0x7b2   : > { %v5145_v14 = vpop.permute.xlu1 %5144 }
 0x7b3   : > { %v7551_v1 = vpop.eup %7550  ;;  %v4865_v29 = vpop.permute.xlu0 %4864  ;;  %v5483_v20 = vsel %vm3613_vm5, %v5451_v47, %v5145_v14 }
 0x7b4   : > { %v5966_v0 = vadd.f32 1.0, %v7551_v1  ;;  %v5388_v19 = vsel %vm3514_vm2, %v5356_v10, %v4865_v29 }
 0x7b5   : > { %v7553_v52 = vpop.eup %7552 }
 0x7b6   : > { %v5965_v51 = vadd.f32 1.0, %v7553_v52  ;;  %v4867_v56 = vpop.permute.xlu1 %4866  ;;  %7554 = vrcp.f32 %v5966_v0 }
 0x7b7   : > { %v5233_v13 = vpop.permute.xlu0 %5232  ;;  %v5389_v23 = vsel %vm3514_vm2, %v5357_v16, %v4867_v56 }
 0x7b8   : > { %7556 = vrcp.f32 %v5965_v51  ;;  %v5514_v54 = vsel %vm3646_vm6, %v5482_v21, %v5233_v13  ;;  %v6084_v13 = vld [vmem:[#allocation3 + $0x28] sm:$0xff] }
 0x7b9   : > { %7293 = vmatprep.mubr.msk.f32.mxu1 %vm3720_vm7, %v5514_v54 }
 0x7ba   : > { %v5235_v18 = vpop.permute.xlu1 %5234 }
 0x7bb   : > { %v5515_v24 = vsel %vm3646_vm6, %v5483_v20, %v5235_v18  ;;  %v4961_v46 = vpop.permute.xlu0 %4960 }
 0x7bc   : > { %v5420_v4 = vsel %vm3547_vm3, %v5388_v19, %v4961_v46  ;;  %7294 = vmatmul.mubr.msk.f32.gmra.mxu1 %vm3720_vm7, %v5515_v24 }
 0x7bd   : > { %v5452_v9 = vsel %vm3580_vm4, %v5420_v4, %v13568_v28 }
 0x7be   : > { %v5484_v41 = vsel %vm3613_vm5, %v5452_v9, %v13569_v17 }
 0x7bf   : > { %v4963_v43 = vpop.permute.xlu0 %4962  ;;  %v5516_v5 = vsel %vm3646_vm6, %v5484_v41, %v13570_v22  ;;  %v6086_v22 = vld [vmem:[#allocation3 + $0x38] sm:$0xff] }
 0x7c0   : > { %v5421_v2 = vsel %vm3547_vm3, %v5389_v23, %v4963_v43  ;;  %7296 = vmatprep.mubr.msk.f32.mxu1 %vm3720_vm7, %v5516_v5  ;;  %v7643_v23 = vld [vmem:[%s7817_s13 + $0x90] sm:$0xff]  ;;  %v7644_v5 = vld [vmem:[%s7817_s13 + $0x98] sm:$0xff] }
 0x7c1   : > { %v5453_v48 = vsel %vm3580_vm4, %v5421_v2, %v13571_v59  ;;  %v7277_v34 = vpop.f32.mrf.mxu1 }
 0x7c2   : > { %v5782_v62 = vadd.f32 %v12585_v55, %v7277_v34  ;;  %v5485_v27 = vsel %vm3613_vm5, %v5453_v48, %v13572_v60  ;;  %v6085_v48 = vld [vmem:[#allocation3 + $0x30] sm:$0xff] }
 0x7c3   : > { %v5776_v25 = vpop.f32.mrf.mxu1  ;;  %v5517_v15 = vsel %vm3646_vm6, %v5485_v27, %v13573_v40  ;;  %v7555_v3 = vpop.eup %7554 }
 0x7c4   : > { %v6894_v49 = vmul.f32 -1.442695, %v5782_v62  ;;  %v5777_v8 = vadd.f32 %v12585_v55, %v5776_v25  ;;  %7297 = vmatmul.mubr.msk.f32.gmra.mxu1 %vm3720_vm7, %v5517_v15  ;;  %v6062_v7 = vmul.f32 %v7640_v45, %v7555_v3  ;;  %v7645_v45 = vld [vmem:[%s7817_s13 + $0xa0] sm:$0xff] }
 0x7c5   : > { %v7557_v32 = vpop.eup %7556 }
 0x7c6   : > { %7558 = vpow2.f32 %v6894_v49  ;;  %v6893_v58 = vmul.f32 -1.442695, %v5777_v8  ;;  %v6061_v35 = vmul.f32 %v7639_v31, %v7557_v32 }
 0x7c8   : > { %7560 = vpow2.f32 %v6893_v58  ;;  %7322 = vmatprep.mubr.msk.f32.mxu0 %vm3415_vm0, %v6061_v35  ;;  %v7306_v53 = vpop.f32.mrf.mxu0 }
 0x7c9   : > { %7323 = vmatmul.mubr.msk.f32.gmra.mxu0 %vm3415_vm0, %v6062_v7  ;;  %v6436_v26 = vadd.f32 %v7306_v53, %v6082_v6  ;;  %v6088_v53 = vld [vmem:[#allocation3 + $0x48] sm:$0xff] }
 0x7ca   : > { %v6284_v14 = vpop.f32.mrf.mxu0 }
 0x7cb   : > { %6468 = vst.msk [vmem:[#allocation3 + $0x18] sm:$0xff] %vm3415_vm0, %v6436_v26  ;;  %v6435_v1 = vadd.f32 %v6284_v14, %v6081_v38  ;;  %v7646_v38 = vld [vmem:[%s7817_s13 + $0xa8] sm:$0xff] }
 0x7cd   : > { %6467 = vst.msk [vmem:[#allocation3 + $0x10] sm:$0xff] %vm3415_vm0, %v6435_v1  ;;  %v6087_v1 = vld [vmem:[#allocation3 + $0x40] sm:$0xff] }
 0x7d3   : > { %v7559_v11 = vpop.eup %7558 }
 0x7d4   : > { %v5968_v29 = vadd.f32 1.0, %v7559_v11 }
 0x7d5   : > { %v7561_v50 = vpop.eup %7560 }
 0x7d6   : > { %v5967_v36 = vadd.f32 1.0, %v7561_v50  ;;  %7562 = vrcp.f32 %v5968_v29 }
 0x7d8   : > { %7564 = vrcp.f32 %v5967_v36 }
 0x7e1   : > { %v7280_v0 = vpop.f32.mrf.mxu1 }
 0x7e2   : > { %v5792_v52 = vadd.f32 %v12585_v55, %v7280_v0 }
 0x7e3   : > { %v5786_v30 = vpop.f32.mrf.mxu1  ;;  %v7563_v12 = vpop.eup %7562 }
 0x7e4   : > { %v6896_v33 = vmul.f32 -1.442695, %v5792_v52  ;;  %v5787_v51 = vadd.f32 %v12585_v55, %v5786_v30  ;;  %v6064_v63 = vmul.f32 %v7642_v39, %v7563_v12  ;;  %v7647_v39 = vld [vmem:[%s7817_s13 + $0xb0] sm:$0xff] }
 0x7e5   : > { %v7565_v57 = vpop.eup %7564 }
 0x7e6   : > { %7566 = vpow2.f32 %v6896_v33  ;;  %v6895_v56 = vmul.f32 -1.442695, %v5787_v51  ;;  %v6063_v21 = vmul.f32 %v7641_v44, %v7565_v57 }
 0x7e8   : > { %7568 = vpow2.f32 %v6895_v56  ;;  %7325 = vmatprep.mubr.msk.f32.mxu0 %vm3415_vm0, %v6063_v21 }
 0x7e9   : > { %v7309_v54 = vpop.f32.mrf.mxu0  ;;  %7326 = vmatmul.mubr.msk.f32.gmra.mxu0 %vm3415_vm0, %v6064_v63 }
 0x7ea   : > { %v6438_v47 = vadd.f32 %v7309_v54, %v6084_v13  ;;  %v6090_v54 = vld [vmem:[#allocation3 + $0x58] sm:$0xff] }
 0x7eb   : > { %v6294_v10 = vpop.f32.mrf.mxu0 }
 0x7ec   : > { %6470 = vst.msk [vmem:[#allocation3 + $0x28] sm:$0xff] %vm3415_vm0, %v6438_v47  ;;  %v6437_v20 = vadd.f32 %v6294_v10, %v6083_v61  ;;  %v7648_v61 = vld [vmem:[%s7817_s13 + $0xb8] sm:$0xff] }
 0x7ee   : > { %6469 = vst.msk [vmem:[#allocation3 + $0x20] sm:$0xff] %vm3415_vm0, %v6437_v20  ;;  %v6089_v20 = vld [vmem:[#allocation3 + $0x50] sm:$0xff] }
 0x7f3   : > { %v7567_v18 = vpop.eup %7566 }
 0x7f4   : > { %v5970_v19 = vadd.f32 1.0, %v7567_v18 }
 0x7f5   : > { %v7569_v24 = vpop.eup %7568 }
 0x7f6   : > { %v5969_v46 = vadd.f32 1.0, %v7569_v24  ;;  %7570 = vrcp.f32 %v5970_v19 }
 0x7f8   : > { %7572 = vrcp.f32 %v5969_v46 }
 0x801   : > { %v7283_v42 = vpop.f32.mrf.mxu1 }
 0x802   : > { %v5802_v4 = vadd.f32 %v12585_v55, %v7283_v42 }
 0x803   : > { %v5796_v37 = vpop.f32.mrf.mxu1  ;;  %v7571_v28 = vpop.eup %7570 }
 0x804   : > { %v6898_v9 = vmul.f32 -1.442695, %v5802_v4  ;;  %v5797_v16 = vadd.f32 %v12585_v55, %v5796_v37  ;;  %v6066_v2 = vmul.f32 %v7644_v5, %v7571_v28  ;;  %v7649_v5 = vld [vmem:[%s7817_s13 + $0xc0] sm:$0xff] }
 0x805   : > { %v7573_v17 = vpop.eup %7572 }
 0x806   : > { %7574 = vpow2.f32 %v6898_v9  ;;  %v6897_v41 = vmul.f32 -1.442695, %v5797_v16  ;;  %v6065_v43 = vmul.f32 %v7643_v23, %v7573_v17 }
 0x808   : > { %7576 = vpow2.f32 %v6897_v41  ;;  %7328 = vmatprep.mubr.msk.f32.mxu0 %vm3415_vm0, %v6065_v43 }
 0x809   : > { %v7312_v59 = vpop.f32.mrf.mxu0  ;;  %7329 = vmatmul.mubr.msk.f32.gmra.mxu0 %vm3415_vm0, %v6066_v2 }
 0x80a   : > { %v6440_v34 = vadd.f32 %v7312_v59, %v6086_v22  ;;  %v6092_v59 = vld [vmem:[#allocation3 + $0x68] sm:$0xff] }
 0x80b   : > { %v6304_v62 = vpop.f32.mrf.mxu0 }
 0x80c   : > { %6472 = vst.msk [vmem:[#allocation3 + $0x38] sm:$0xff] %vm3415_vm0, %v6440_v34  ;;  %v6439_v60 = vadd.f32 %v6304_v62, %v6085_v48  ;;  %v7650_v48 = vld [vmem:[%s7817_s13 + $0xc8] sm:$0xff] }
 0x80e   : > { %6471 = vst.msk [vmem:[#allocation3 + $0x30] sm:$0xff] %vm3415_vm0, %v6439_v60  ;;  %v6091_v60 = vld [vmem:[#allocation3 + $0x60] sm:$0xff] }
 0x813   : > { %v7575_v27 = vpop.eup %7574 }
 0x814   : > { %v5972_v25 = vadd.f32 1.0, %v7575_v27 }
 0x815   : > { %v7577_v40 = vpop.eup %7576 }
 0x816   : > { %v5971_v15 = vadd.f32 1.0, %v7577_v40  ;;  %7578 = vrcp.f32 %v5972_v25 }
 0x818   : > { %7580 = vrcp.f32 %v5971_v15 }
 0x821   : > { %v7286_v3 = vpop.f32.mrf.mxu1 }
 0x822   : > { %v5812_v49 = vadd.f32 %v12585_v55, %v7286_v3 }
 0x823   : > { %v5806_v8 = vpop.f32.mrf.mxu1  ;;  %v7579_v32 = vpop.eup %7578 }
 0x824   : > { %v6900_v58 = vmul.f32 -1.442695, %v5812_v49  ;;  %v5807_v31 = vadd.f32 %v12585_v55, %v5806_v8  ;;  %v6068_v26 = vmul.f32 %v7646_v38, %v7579_v32 }
 0x825   : > { %v7581_v35 = vpop.eup %7580 }
 0x826   : > { %7582 = vpow2.f32 %v6900_v58  ;;  %v6899_v6 = vmul.f32 -1.442695, %v5807_v31  ;;  %v6067_v7 = vmul.f32 %v7645_v45, %v7581_v35 }
 0x828   : > { %7584 = vpow2.f32 %v6899_v6  ;;  %7331 = vmatprep.mubr.msk.f32.mxu0 %vm3415_vm0, %v6067_v7 }
 0x829   : > { %v7315_v14 = vpop.f32.mrf.mxu0  ;;  %7332 = vmatmul.mubr.msk.f32.gmra.mxu0 %vm3415_vm0, %v6068_v26 }
 0x82a   : > { %v6442_v11 = vadd.f32 %v7315_v14, %v6088_v53 }
 0x82b   : > { %v6314_v29 = vpop.f32.mrf.mxu0 }
 0x82c   : > { %6474 = vst.msk [vmem:[#allocation3 + $0x48] sm:$0xff] %vm3415_vm0, %v6442_v11  ;;  %v6441_v50 = vadd.f32 %v6314_v29, %v6087_v1  ;;  %v7651_v1 = vld [vmem:[%s7817_s13 + $0xd0] sm:$0xff] }
 0x82e   : > { %6473 = vst.msk [vmem:[#allocation3 + $0x40] sm:$0xff] %vm3415_vm0, %v6441_v50 }
 0x833   : > { %v7583_v36 = vpop.eup %7582 }
 0x834   : > { %v5974_v0 = vadd.f32 1.0, %v7583_v36  ;;  %v6094_v36 = vld [vmem:[#allocation3 + $0x78] sm:$0xff] }
 0x835   : > { %v7585_v52 = vpop.eup %7584 }
 0x836   : > { %v5973_v30 = vadd.f32 1.0, %v7585_v52  ;;  %7586 = vrcp.f32 %v5974_v0  ;;  %v7652_v0 = vld [vmem:[%s7817_s13 + $0xd8] sm:$0xff] }
 0x838   : > { %7588 = vrcp.f32 %v5973_v30 }
 0x841   : > { %v7289_v12 = vpop.f32.mrf.mxu1 }
 0x842   : > { %v5822_v33 = vadd.f32 %v12585_v55, %v7289_v12 }
 0x843   : > { %v5816_v51 = vpop.f32.mrf.mxu1  ;;  %v7587_v57 = vpop.eup %7586 }
 0x844   : > { %v6902_v56 = vmul.f32 -1.442695, %v5822_v33  ;;  %v5817_v44 = vadd.f32 %v12585_v55, %v5816_v51  ;;  %v6070_v47 = vmul.f32 %v7648_v61, %v7587_v57  ;;  %v6093_v33 = vld [vmem:[#allocation3 + $0x70] sm:$0xff] }
 0x845   : > { %v7589_v21 = vpop.eup %7588 }
 0x846   : > { %7590 = vpow2.f32 %v6902_v56  ;;  %v6901_v13 = vmul.f32 -1.442695, %v5817_v44  ;;  %v6069_v63 = vmul.f32 %v7647_v39, %v7589_v21 }
 0x848   : > { %7592 = vpow2.f32 %v6901_v13  ;;  %7334 = vmatprep.mubr.msk.f32.mxu0 %vm3415_vm0, %v6069_v63 }
 0x849   : > { %v7318_v10 = vpop.f32.mrf.mxu0  ;;  %7335 = vmatmul.mubr.msk.f32.gmra.mxu0 %vm3415_vm0, %v6070_v47 }
 0x84a   : > { %v6444_v18 = vadd.f32 %v7318_v10, %v6090_v54 }
 0x84b   : > { %v6324_v19 = vpop.f32.mrf.mxu0 }
 0x84c   : > { %6476 = vst.msk [vmem:[#allocation3 + $0x58] sm:$0xff] %vm3415_vm0, %v6444_v18  ;;  %v6443_v24 = vadd.f32 %v6324_v19, %v6089_v20  ;;  %v7653_v20 = vld [vmem:[%s7817_s13 + $0xe0] sm:$0xff]  ;;  %v7654_v19 = vld [vmem:[%s7817_s13 + $0xe8] sm:$0xff] }
 0x84e   : > { %6475 = vst.msk [vmem:[#allocation3 + $0x50] sm:$0xff] %vm3415_vm0, %v6443_v24 }
 0x853   : > { %v7591_v46 = vpop.eup %7590 }
 0x854   : > { %v5976_v42 = vadd.f32 1.0, %v7591_v46 }
 0x855   : > { %v7593_v4 = vpop.eup %7592 }
 0x856   : > { %v5975_v37 = vadd.f32 1.0, %v7593_v4  ;;  %7594 = vrcp.f32 %v5976_v42  ;;  %v6096_v42 = vld [vmem:[#allocation3 + $0x88] sm:$0xff] }
 0x858   : > { %7596 = vrcp.f32 %v5975_v37 }
 0x861   : > { %v7292_v28 = vpop.f32.mrf.mxu1 }
 0x862   : > { %v5832_v9 = vadd.f32 %v12585_v55, %v7292_v28  ;;  %v6095_v28 = vld [vmem:[#allocation3 + $0x80] sm:$0xff] }
 0x863   : > { %v5826_v16 = vpop.f32.mrf.mxu1  ;;  %v7595_v17 = vpop.eup %7594 }
 0x864   : > { %v6904_v41 = vmul.f32 -1.442695, %v5832_v9  ;;  %v5827_v23 = vadd.f32 %v12585_v55, %v5826_v16  ;;  %v6072_v34 = vmul.f32 %v7650_v48, %v7595_v17  ;;  %v7655_v9 = vld [vmem:[%s7817_s13 + $0xf0] sm:$0xff] }
 0x865   : > { %v7597_v43 = vpop.eup %7596 }
 0x866   : > { %7598 = vpow2.f32 %v6904_v41  ;;  %v6903_v22 = vmul.f32 -1.442695, %v5827_v23  ;;  %v6071_v2 = vmul.f32 %v7649_v5, %v7597_v43  ;;  %v7656_v41 = vld [vmem:[%s7817_s13 + $0xf8] sm:$0xff] }
 0x867   : > { %v6098_v5 = vld [vmem:[#allocation3 + $0x98] sm:$0xff] }
 0x868   : > { %7600 = vpow2.f32 %v6903_v22  ;;  %7337 = vmatprep.mubr.msk.f32.mxu0 %vm3415_vm0, %v6071_v2 }
 0x869   : > { %v7321_v62 = vpop.f32.mrf.mxu0  ;;  %7338 = vmatmul.mubr.msk.f32.gmra.mxu0 %vm3415_vm0, %v6072_v34 }
 0x86a   : > { %v6446_v27 = vadd.f32 %v7321_v62, %v6092_v59  ;;  %v6097_v59 = vld [vmem:[#allocation3 + $0x90] sm:$0xff] }
 0x86b   : > { %v6334_v25 = vpop.f32.mrf.mxu0 }
 0x86c   : > { %6478 = vst.msk [vmem:[#allocation3 + $0x68] sm:$0xff] %vm3415_vm0, %v6446_v27  ;;  %v6445_v40 = vadd.f32 %v6334_v25, %v6091_v60  ;;  %v6100_v60 = vld [vmem:[#allocation3 + $0xa8] sm:$0xff]  ;;  %v6099_v25 = vld [vmem:[#allocation3 + $0xa0] sm:$0xff] }
 0x86e   : > { %6477 = vst.msk [vmem:[#allocation3 + $0x60] sm:$0xff] %vm3415_vm0, %v6445_v40 }
 0x873   : > { %v7599_v15 = vpop.eup %7598 }
 0x874   : > { %v5978_v3 = vadd.f32 1.0, %v7599_v15 }
 0x875   : > { %v7601_v49 = vpop.eup %7600 }
 0x876   : > { %v5977_v8 = vadd.f32 1.0, %v7601_v49  ;;  %7602 = vrcp.f32 %v5978_v3  ;;  %v6102_v49 = vld [vmem:[#allocation3 + $0xb8] sm:$0xff] }
 0x878   : > { %7604 = vrcp.f32 %v5977_v8 }
 0x87c   : > { %v7295_v32 = vpop.f32.mrf.mxu1 }
 0x87d   : > { %v5842_v58 = vadd.f32 %v12585_v55, %v7295_v32  ;;  %v6101_v32 = vld [vmem:[#allocation3 + $0xb0] sm:$0xff] }
 0x87e   : > { %v5836_v31 = vpop.f32.mrf.mxu1 }
 0x87f   : > { %v6906_v35 = vmul.f32 -1.442695, %v5842_v58  ;;  %v5837_v6 = vadd.f32 %v12585_v55, %v5836_v31 }
 0x881   : > { %7606 = vpow2.f32 %v6906_v35  ;;  %v6905_v45 = vmul.f32 -1.442695, %v5837_v6  ;;  %v6104_v6 = vld [vmem:[#allocation3 + $0xc8] sm:$0xff] }
 0x883   : > { %7608 = vpow2.f32 %v6905_v45  ;;  %v7603_v7 = vpop.eup %7602 }
 0x884   : > { %v7298_v53 = vpop.f32.mrf.mxu1  ;;  %v6074_v52 = vmul.f32 %v7652_v0, %v7603_v7  ;;  %v6103_v7 = vld [vmem:[#allocation3 + $0xc0] sm:$0xff]  ;;  %v6108_v0 = vld [vmem:[#allocation3 + $0xe8] sm:$0xff] }
 0x885   : > { %v7605_v38 = vpop.eup %7604  ;;  %v5852_v26 = vadd.f32 %v12585_v55, %v7298_v53 }
 0x886   : > { %v5846_v14 = vpop.f32.mrf.mxu1  ;;  %v6073_v11 = vmul.f32 %v7651_v1, %v7605_v38 }
 0x887   : > { %v6908_v29 = vmul.f32 -1.442695, %v5852_v26  ;;  %v5847_v50 = vadd.f32 %v12585_v55, %v5846_v14  ;;  %v6106_v14 = vld [vmem:[#allocation3 + $0xd8] sm:$0xff] }
 0x888   : > { %7340 = vmatprep.mubr.msk.f32.mxu0 %vm3415_vm0, %v6073_v11  ;;  %v6105_v11 = vld [vmem:[#allocation3 + $0xd0] sm:$0xff] }
 0x889   : > { %7610 = vpow2.f32 %v6908_v29  ;;  %v6907_v30 = vmul.f32 -1.442695, %v5847_v50  ;;  %v7324_v12 = vpop.f32.mrf.mxu0  ;;  %7341 = vmatmul.mubr.msk.f32.gmra.mxu0 %vm3415_vm0, %v6074_v52 }
 0x88a   : > { %v6448_v51 = vadd.f32 %v7324_v12, %v6094_v36 }
 0x88b   : > { %7612 = vpow2.f32 %v6907_v30  ;;  %v6344_v57 = vpop.f32.mrf.mxu0  ;;  %v6107_v30 = vld [vmem:[#allocation3 + $0xe0] sm:$0xff] }
 0x88c   : > { %6480 = vst.msk [vmem:[#allocation3 + $0x78] sm:$0xff] %vm3415_vm0, %v6448_v51  ;;  %v6447_v56 = vadd.f32 %v6344_v57, %v6093_v33  ;;  %v6110_v57 = vld [vmem:[#allocation3 + $0xf8] sm:$0xff] }
 0x88e   : > { %v7607_v44 = vpop.eup %7606  ;;  %6479 = vst.msk [vmem:[#allocation3 + $0x70] sm:$0xff] %vm3415_vm0, %v6447_v56 }
 0x88f   : > { %v5980_v55 = vadd.f32 1.0, %v7607_v44  ;;  %v6109_v44 = vld [vmem:[#allocation3 + $0xf0] sm:$0xff] }
 0x890   : > { %v7609_v21 = vpop.eup %7608 }
 0x891   : > { %v5979_v13 = vadd.f32 1.0, %v7609_v21  ;;  %7614 = vrcp.f32 %v5980_v55 }
 0x893   : > { %7616 = vrcp.f32 %v5979_v13 }
 0x896   : > { %v7611_v39 = vpop.eup %7610 }
 0x897   : > { %v5982_v63 = vadd.f32 1.0, %v7611_v39 }
 0x898   : > { %v7613_v54 = vpop.eup %7612 }
 0x899   : > { %v5981_v61 = vadd.f32 1.0, %v7613_v54  ;;  %7618 = vrcp.f32 %v5982_v63 }
 0x89b   : > { %7620 = vrcp.f32 %v5981_v61 }
 0x89e   : > { %v7615_v47 = vpop.eup %7614 }
 0x89f   : > { %v6076_v24 = vmul.f32 %v7654_v19, %v7615_v47 }
 0x8a0   : > { %v7617_v10 = vpop.eup %7616 }
 0x8a1   : > { %v6075_v18 = vmul.f32 %v7653_v20, %v7617_v10 }
 0x8a3   : > { %7343 = vmatprep.mubr.msk.f32.mxu0 %vm3415_vm0, %v6075_v18 }
 0x8a4   : > { %7344 = vmatmul.mubr.msk.f32.gmra.mxu0 %vm3415_vm0, %v6076_v24 }
 0x8a6   : > { %v7619_v46 = vpop.eup %7618 }
 0x8a7   : > { %v6078_v23 = vmul.f32 %v7656_v41, %v7619_v46 }
 0x8a8   : > { %v7621_v4 = vpop.eup %7620 }
 0x8a9   : > { %v7327_v37 = vpop.f32.mrf.mxu0  ;;  %v6077_v16 = vmul.f32 %v7655_v9, %v7621_v4 }
 0x8aa   : > { %v6450_v17 = vadd.f32 %v7327_v37, %v6096_v42 }
 0x8ab   : > { %v6354_v43 = vpop.f32.mrf.mxu0  ;;  %7346 = vmatprep.mubr.msk.f32.mxu0 %vm3415_vm0, %v6077_v16 }
 0x8ac   : > { %6482 = vst.msk [vmem:[#allocation3 + $0x88] sm:$0xff] %vm3415_vm0, %v6450_v17  ;;  %v6449_v22 = vadd.f32 %v6354_v43, %v6095_v28  ;;  %7347 = vmatmul.mubr.msk.f32.gmra.mxu0 %vm3415_vm0, %v6078_v23 }
 0x8ae   : > { %6481 = vst.msk [vmem:[#allocation3 + $0x80] sm:$0xff] %vm3415_vm0, %v6449_v22 }
 0x8c9   : > { %v7330_v2 = vpop.f32.mrf.mxu0 }
 0x8ca   : > { %v6452_v48 = vadd.f32 %v7330_v2, %v6098_v5 }
 0x8cb   : > { %v6364_v34 = vpop.f32.mrf.mxu0 }
 0x8cc   : > { %6484 = vst.msk [vmem:[#allocation3 + $0x98] sm:$0xff] %vm3415_vm0, %v6452_v48  ;;  %v6451_v62 = vadd.f32 %v6364_v34, %v6097_v59 }
 0x8ce   : > { %6483 = vst.msk [vmem:[#allocation3 + $0x90] sm:$0xff] %vm3415_vm0, %v6451_v62 }
 0x8e9   : > { %v7333_v27 = vpop.f32.mrf.mxu0 }
 0x8ea   : > { %v6454_v40 = vadd.f32 %v7333_v27, %v6100_v60 }
 0x8eb   : > { %v6374_v15 = vpop.f32.mrf.mxu0 }
 0x8ec   : > { %6486 = vst.msk [vmem:[#allocation3 + $0xa8] sm:$0xff] %vm3415_vm0, %v6454_v40  ;;  %v6453_v3 = vadd.f32 %v6374_v15, %v6099_v25 }
 0x8ee   : > { %6485 = vst.msk [vmem:[#allocation3 + $0xa0] sm:$0xff] %vm3415_vm0, %v6453_v3 }
 0x909   : > { %v7336_v8 = vpop.f32.mrf.mxu0 }
 0x90a   : > { %v6456_v58 = vadd.f32 %v7336_v8, %v6102_v49 }
 0x90b   : > { %v6384_v31 = vpop.f32.mrf.mxu0 }
 0x90c   : > { %6488 = vst.msk [vmem:[#allocation3 + $0xb8] sm:$0xff] %vm3415_vm0, %v6456_v58  ;;  %v6455_v35 = vadd.f32 %v6384_v31, %v6101_v32 }
 0x90e   : > { %6487 = vst.msk [vmem:[#allocation3 + $0xb0] sm:$0xff] %vm3415_vm0, %v6455_v35 }
 0x929   : > { %v7339_v45 = vpop.f32.mrf.mxu0 }
 0x92a   : > { %v6458_v53 = vadd.f32 %v7339_v45, %v6104_v6 }
 0x92b   : > { %v6394_v38 = vpop.f32.mrf.mxu0 }
 0x92c   : > { %6490 = vst.msk [vmem:[#allocation3 + $0xc8] sm:$0xff] %vm3415_vm0, %v6458_v53  ;;  %v6457_v26 = vadd.f32 %v6394_v38, %v6103_v7 }
 0x92e   : > { %6489 = vst.msk [vmem:[#allocation3 + $0xc0] sm:$0xff] %vm3415_vm0, %v6457_v26 }
 0x949   : > { %v7342_v1 = vpop.f32.mrf.mxu0 }
 0x94a   : > { %v6460_v29 = vadd.f32 %v7342_v1, %v6106_v14 }
 0x94b   : > { %v6404_v50 = vpop.f32.mrf.mxu0 }
 0x94c   : > { %6492 = vst.msk [vmem:[#allocation3 + $0xd8] sm:$0xff] %vm3415_vm0, %v6460_v29  ;;  %v6459_v36 = vadd.f32 %v6404_v50, %v6105_v11 }
 0x94e   : > { %6491 = vst.msk [vmem:[#allocation3 + $0xd0] sm:$0xff] %vm3415_vm0, %v6459_v36 }
 0x964   : > { %v7345_v52 = vpop.f32.mrf.mxu0 }
 0x965   : > { %v6462_v12 = vadd.f32 %v7345_v52, %v6108_v0 }
 0x966   : > { %v6414_v33 = vpop.f32.mrf.mxu0 }
 0x967   : > { %6494 = vst.msk [vmem:[#allocation3 + $0xe8] sm:$0xff] %vm3415_vm0, %v6462_v12  ;;  %v6461_v51 = vadd.f32 %v6414_v33, %v6107_v30 }
 0x969   : > { %6493 = vst.msk [vmem:[#allocation3 + $0xe0] sm:$0xff] %vm3415_vm0, %v6461_v51 }
 0x96c   : > { %v7348_v56 = vpop.f32.mrf.mxu0 }
 0x96d   : > { %v6464_v55 = vadd.f32 %v7348_v56, %v6110_v57  ;;  %6500 = sbr.rel (%p6941_p8) target bundleno = 2445 (0x98d), region = 64 }
 0x96e   : > { %v6424_v21 = vpop.f32.mrf.mxu0 }
 0x96f   : > { %6496 = vst.msk [vmem:[#allocation3 + $0xf8] sm:$0xff] %vm3415_vm0, %v6464_v55  ;;  %v6463_v13 = vadd.f32 %v6424_v21, %v6109_v44 }
 0x971   : > { %6495 = vst.msk [vmem:[#allocation3 + $0xf0] sm:$0xff] %vm3415_vm0, %v6463_v13 }
 0x972   : > { %v6501_v39 = vld [vmem:[#allocation3] sm:$0xff]  ;;  %v6502_v63 = vld [vmem:[#allocation3 + $0x8] sm:$0xff]  ;;  %v6503_v54 = vld [vmem:[#allocation3 + $0x10] sm:$0xff] }
 0x973   : > { %v6533_v61 = vmul.f32 0.1, %v6501_v39  ;;  %v6534_v47 = vmul.f32 0.1, %v6502_v63  ;;  %v6535_v10 = vmul.f32 0.1, %v6503_v54 }
 0x974   : > { %v6504_v20 = vld [vmem:[#allocation3 + $0x18] sm:$0xff]  ;;  %v6505_v18 = vld [vmem:[#allocation3 + $0x20] sm:$0xff]  ;;  %v6506_v19 = vld [vmem:[#allocation3 + $0x28] sm:$0xff] }
 0x975   : > { %v6565_v24 = vmax.f32 %v6501_v39, %v6533_v61  ;;  %v6566_v46 = vmax.f32 %v6502_v63, %v6534_v47  ;;  %v6567_v42 = vmax.f32 %v6503_v54, %v6535_v10  ;;  %v6536_v4 = vmul.f32 0.1, %v6504_v20  ;;  %v6507_v37 = vld [vmem:[#allocation3 + $0x30] sm:$0xff]  ;;  %v6508_v28 = vld [vmem:[#allocation3 + $0x38] sm:$0xff]  ;;  %v6509_v9 = vld [vmem:[#allocation3 + $0x40] sm:$0xff] }
 0x976   : > { %v6537_v16 = vmul.f32 0.1, %v6505_v18  ;;  %v6538_v17 = vmul.f32 0.1, %v6506_v19  ;;  %v6539_v41 = vmul.f32 0.1, %v6507_v37 }
 0x977   : > { %6597 = vst.msk [vmem:[%s7812_s12] sm:$0xff] %vm3415_vm0, %v6565_v24  ;;  %6598 = vst.msk [vmem:[%s7812_s12 + $0x8] sm:$0xff] %vm3415_vm0, %v6566_v46  ;;  %v6568_v23 = vmax.f32 %v6504_v20, %v6536_v4  ;;  %v6540_v43 = vmul.f32 0.1, %v6508_v28  ;;  %v6541_v22 = vmul.f32 0.1, %v6509_v9 }
 0x978   : > { %6599 = vst.msk [vmem:[%s7812_s12 + $0x10] sm:$0xff] %vm3415_vm0, %v6567_v42  ;;  %v6510_v5 = vld [vmem:[#allocation3 + $0x48] sm:$0xff]  ;;  %v6511_v2 = vld [vmem:[#allocation3 + $0x50] sm:$0xff]  ;;  %v6569_v59 = vmax.f32 %v6505_v18, %v6537_v16  ;;  %v6570_v48 = vmax.f32 %v6506_v19, %v6538_v17  ;;  %v6571_v34 = vmax.f32 %v6507_v37, %v6539_v41  ;;  %v6512_v60 = vld [vmem:[#allocation3 + $0x58] sm:$0xff] }
 0x979   : > { %v6542_v62 = vmul.f32 0.1, %v6510_v5  ;;  %v6513_v27 = vld [vmem:[#allocation3 + $0x60] sm:$0xff]  ;;  %v6514_v25 = vld [vmem:[#allocation3 + $0x68] sm:$0xff]  ;;  %6600 = vst.msk [vmem:[%s7812_s12 + $0x18] sm:$0xff] %vm3415_vm0, %v6568_v23  ;;  %v6572_v40 = vmax.f32 %v6508_v28, %v6540_v43  ;;  %v6573_v15 = vmax.f32 %v6509_v9, %v6541_v22  ;;  %v6515_v8 = vld [vmem:[#allocation3 + $0x70] sm:$0xff] }
 0x97a   : > { %v6543_v3 = vmul.f32 0.1, %v6511_v2  ;;  %v6544_v49 = vmul.f32 0.1, %v6512_v60  ;;  %v6516_v32 = vld [vmem:[#allocation3 + $0x78] sm:$0xff]  ;;  %6601 = vst.msk [vmem:[%s7812_s12 + $0x20] sm:$0xff] %vm3415_vm0, %v6569_v59 }
 0x97b   : > { %6602 = vst.msk [vmem:[%s7812_s12 + $0x28] sm:$0xff] %vm3415_vm0, %v6570_v48  ;;  %6603 = vst.msk [vmem:[%s7812_s12 + $0x30] sm:$0xff] %vm3415_vm0, %v6571_v34  ;;  %v6574_v58 = vmax.f32 %v6510_v5, %v6542_v62  ;;  %v6545_v31 = vmul.f32 0.1, %v6513_v27  ;;  %v6546_v35 = vmul.f32 0.1, %v6514_v25 }
 0x97c   : > { %v6547_v6 = vmul.f32 0.1, %v6515_v8  ;;  %6604 = vst.msk [vmem:[%s7812_s12 + $0x38] sm:$0xff] %vm3415_vm0, %v6572_v40  ;;  %6605 = vst.msk [vmem:[%s7812_s12 + $0x40] sm:$0xff] %vm3415_vm0, %v6573_v15  ;;  %v6575_v45 = vmax.f32 %v6511_v2, %v6543_v3  ;;  %v6576_v7 = vmax.f32 %v6512_v60, %v6544_v49  ;;  %v6548_v53 = vmul.f32 0.1, %v6516_v32 }
 0x97d   : > { %v6517_v38 = vld [vmem:[#allocation3 + $0x80] sm:$0xff]  ;;  %v6518_v26 = vld [vmem:[#allocation3 + $0x88] sm:$0xff]  ;;  %v6519_v14 = vld [vmem:[#allocation3 + $0x90] sm:$0xff]  ;;  %6606 = vst.msk [vmem:[%s7812_s12 + $0x48] sm:$0xff] %vm3415_vm0, %v6574_v58  ;;  %v6577_v1 = vmax.f32 %v6513_v27, %v6545_v31  ;;  %v6578_v11 = vmax.f32 %v6514_v25, %v6546_v35 }
 0x97e   : > { %v6579_v29 = vmax.f32 %v6515_v8, %v6547_v6  ;;  %v6549_v50 = vmul.f32 0.1, %v6517_v38  ;;  %v6520_v36 = vld [vmem:[#allocation3 + $0x98] sm:$0xff]  ;;  %v6521_v0 = vld [vmem:[#allocation3 + $0xa0] sm:$0xff]  ;;  %v6522_v52 = vld [vmem:[#allocation3 + $0xa8] sm:$0xff]  ;;  %6607 = vst.msk [vmem:[%s7812_s12 + $0x50] sm:$0xff] %vm3415_vm0, %v6575_v45  ;;  %v6580_v30 = vmax.f32 %v6516_v32, %v6548_v53 }
 0x97f   : > { %6608 = vst.msk [vmem:[%s7812_s12 + $0x58] sm:$0xff] %vm3415_vm0, %v6576_v7  ;;  %v6550_v12 = vmul.f32 0.1, %v6518_v26  ;;  %v6551_v33 = vmul.f32 0.1, %v6519_v14  ;;  %6609 = vst.msk [vmem:[%s7812_s12 + $0x60] sm:$0xff] %vm3415_vm0, %v6577_v1 }
 0x980   : > { %v6552_v51 = vmul.f32 0.1, %v6520_v36  ;;  %6610 = vst.msk [vmem:[%s7812_s12 + $0x68] sm:$0xff] %vm3415_vm0, %v6578_v11  ;;  %6611 = vst.msk [vmem:[%s7812_s12 + $0x70] sm:$0xff] %vm3415_vm0, %v6579_v29  ;;  %v6581_v57 = vmax.f32 %v6517_v38, %v6549_v50  ;;  %v6553_v56 = vmul.f32 0.1, %v6521_v0 }
 0x981   : > { %v6554_v44 = vmul.f32 0.1, %v6522_v52  ;;  %v6523_v55 = vld [vmem:[#allocation3 + $0xb0] sm:$0xff]  ;;  %v6524_v21 = vld [vmem:[#allocation3 + $0xb8] sm:$0xff]  ;;  %6612 = vst.msk [vmem:[%s7812_s12 + $0x78] sm:$0xff] %vm3415_vm0, %v6580_v30  ;;  %v6582_v13 = vmax.f32 %v6518_v26, %v6550_v12  ;;  %v6583_v39 = vmax.f32 %v6519_v14, %v6551_v33  ;;  %v6525_v61 = vld [vmem:[#allocation3 + $0xc0] sm:$0xff] }
 0x982   : > { %v6584_v63 = vmax.f32 %v6520_v36, %v6552_v51  ;;  %v6555_v54 = vmul.f32 0.1, %v6523_v55  ;;  %v6526_v47 = vld [vmem:[#allocation3 + $0xc8] sm:$0xff]  ;;  %v6527_v10 = vld [vmem:[#allocation3 + $0xd0] sm:$0xff]  ;;  %6613 = vst.msk [vmem:[%s7812_s12 + $0x80] sm:$0xff] %vm3415_vm0, %v6581_v57  ;;  %v6585_v20 = vmax.f32 %v6521_v0, %v6553_v56  ;;  %v6528_v46 = vld [vmem:[#allocation3 + $0xd8] sm:$0xff] }
 0x983   : > { %v6586_v18 = vmax.f32 %v6522_v52, %v6554_v44  ;;  %v6556_v19 = vmul.f32 0.1, %v6524_v21  ;;  %v6557_v24 = vmul.f32 0.1, %v6525_v61  ;;  %v6529_v42 = vld [vmem:[#allocation3 + $0xe0] sm:$0xff]  ;;  %6614 = vst.msk [vmem:[%s7812_s12 + $0x88] sm:$0xff] %vm3415_vm0, %v6582_v13 }
 0x984   : > { %6615 = vst.msk [vmem:[%s7812_s12 + $0x90] sm:$0xff] %vm3415_vm0, %v6583_v39  ;;  %6616 = vst.msk [vmem:[%s7812_s12 + $0x98] sm:$0xff] %vm3415_vm0, %v6584_v63  ;;  %v6587_v4 = vmax.f32 %v6523_v55, %v6555_v54  ;;  %v6558_v37 = vmul.f32 0.1, %v6526_v47  ;;  %v6559_v28 = vmul.f32 0.1, %v6527_v10 }
 0x985   : > { %v6560_v9 = vmul.f32 0.1, %v6528_v46  ;;  %6617 = vst.msk [vmem:[%s7812_s12 + $0xa0] sm:$0xff] %vm3415_vm0, %v6585_v20  ;;  %6618 = vst.msk [vmem:[%s7812_s12 + $0xa8] sm:$0xff] %vm3415_vm0, %v6586_v18  ;;  %v6588_v16 = vmax.f32 %v6524_v21, %v6556_v19  ;;  %v6589_v17 = vmax.f32 %v6525_v61, %v6557_v24  ;;  %v6561_v41 = vmul.f32 0.1, %v6529_v42 }
 0x986   : > { %v6530_v23 = vld [vmem:[#allocation3 + $0xe8] sm:$0xff]  ;;  %v6531_v43 = vld [vmem:[#allocation3 + $0xf0] sm:$0xff]  ;;  %v6532_v22 = vld [vmem:[#allocation3 + $0xf8] sm:$0xff]  ;;  %6619 = vst.msk [vmem:[%s7812_s12 + $0xb0] sm:$0xff] %vm3415_vm0, %v6587_v4  ;;  %v6590_v5 = vmax.f32 %v6526_v47, %v6558_v37  ;;  %v6591_v2 = vmax.f32 %v6527_v10, %v6559_v28 }
 0x987   : > { %v6592_v59 = vmax.f32 %v6528_v46, %v6560_v9  ;;  %v6562_v48 = vmul.f32 0.1, %v6530_v23  ;;  %6620 = vst.msk [vmem:[%s7812_s12 + $0xb8] sm:$0xff] %vm3415_vm0, %v6588_v16  ;;  %6621 = vst.msk [vmem:[%s7812_s12 + $0xc0] sm:$0xff] %vm3415_vm0, %v6589_v17  ;;  %v6593_v34 = vmax.f32 %v6529_v42, %v6561_v41  ;;  %v6563_v62 = vmul.f32 0.1, %v6531_v43 }
 0x988   : > { %v6564_v60 = vmul.f32 0.1, %v6532_v22  ;;  %6622 = vst.msk [vmem:[%s7812_s12 + $0xc8] sm:$0xff] %vm3415_vm0, %v6590_v5  ;;  %6623 = vst.msk [vmem:[%s7812_s12 + $0xd0] sm:$0xff] %vm3415_vm0, %v6591_v2 }
 0x989   : > { %6624 = vst.msk [vmem:[%s7812_s12 + $0xd8] sm:$0xff] %vm3415_vm0, %v6592_v59  ;;  %v6594_v27 = vmax.f32 %v6530_v23, %v6562_v48  ;;  %6625 = vst.msk [vmem:[%s7812_s12 + $0xe0] sm:$0xff] %vm3415_vm0, %v6593_v34  ;;  %v6595_v25 = vmax.f32 %v6531_v43, %v6563_v62 }
 0x98a   : > { %v6596_v40 = vmax.f32 %v6532_v22, %v6564_v60 }
 0x98b   : > { %6626 = vst.msk [vmem:[%s7812_s12 + $0xe8] sm:$0xff] %vm3415_vm0, %v6594_v27  ;;  %6627 = vst.msk [vmem:[%s7812_s12 + $0xf0] sm:$0xff] %vm3415_vm0, %v6595_v25 }
 0x98c   : > { %6628 = vst.msk [vmem:[%s7812_s12 + $0xf8] sm:$0xff] %vm3415_vm0, %v6596_v40 }
 0x98d PF: > { %s13574_s30 = sld [smem:[#allocation6_spill]] }
 0x98e   : > { %s13576_s10 = sld [smem:[#allocation5_spill]] }
 0x98f   : > { %s13577_s11 = sld [smem:[#allocation7_spill]] }
 0x990   : > { %s13578_s12 = sld [smem:[#allocation8_spill]] }
 0x993   : > { %s19_s13 = sadd.s32 1, %s13574_s30   ;;  %s13575_s30 = sld [smem:[#allocation4_spill]] }
 0x994   : > { %p16_p9 = scmp.ge.s32.totalorder %s19_s13, 12  }
 0x996   :  { %18 = sbr.rel (!%p16_p9) target bundleno = 3 (0x3), region = 100 }

</bundles_post_ra>
